<compile_context>
chip_gen: v7x
topology: tpu7x:2x2x1
jax: 0.10.0
libtpu: 0.0.40
codegen_flags: <defaults>
</compile_context>

<pallas_src>
import functools
import numpy as np

import jax
import jax.numpy as jnp
from jax.experimental import pallas as pl
from jax.experimental.pallas import tpu as pltpu


# ---------------------------------------------------------------------------
# In-kernel building blocks (pure functions on VMEM-resident values)
# ---------------------------------------------------------------------------
def _layernorm(x, g, b, eps=1e-5):
    mu = jnp.mean(x, axis=-1, keepdims=True)
    var = jnp.mean(jnp.square(x - mu), axis=-1, keepdims=True)
    return (x - mu) * jax.lax.rsqrt(var + eps) * g + b


def _bdot(a, w):
    """f32 activation x bf16 weight matmul, f32 accumulation on the MXU."""
    return jnp.dot(a.astype(jnp.bfloat16), w, preferred_element_type=jnp.float32)


def _mha(q_in, k_in, v_in, wq, wk, wv, wo, bq, bk, bv, bo, mask, nhead):
    """Fused multi-head attention.

    q_in/k_in/v_in: (M, D) f32, rows in (batch, seq) order.
    wq/wk/wv/wo: (D, D) bf16 (attention scale pre-folded into wq/bq).
    mask: (M, M) additive block-diagonal batch mask (0 within batch, -1e30 across).
    """
    M, D = q_in.shape
    dh = D // nhead
    q = _bdot(q_in, wq) + bq
    k = _bdot(k_in, wk) + bk
    v = _bdot(v_in, wv) + bv
    ctx = []
    for h in range(nhead):
        qh = q[:, h * dh:(h + 1) * dh]
        kh = k[:, h * dh:(h + 1) * dh]
        vh = v[:, h * dh:(h + 1) * dh]
        s = jax.lax.dot_general(qh, kh, (((1,), (1,)), ((), ())),
                                preferred_element_type=jnp.float32) + mask   # (M, M)
        m = jnp.max(s, axis=-1, keepdims=True)
        p = jnp.exp(s - m)
        p = p * pl.reciprocal(jnp.sum(p, axis=-1, keepdims=True), approx=True)
        ctx.append(jnp.dot(p, vh, preferred_element_type=jnp.float32))       # (M, dh)
    ctx = jnp.concatenate(ctx, axis=-1)                                      # (M, D)
    return _bdot(ctx, wo) + bo


def _graph_branch(x, gk_flat, w_top, w_eff, bg, nq):
    """max_q LeakyReLU_0.2( (fk_q - fq) @ Wtop + fq @ Wbot + bg ).

    x: (M, D) fq features; gk_flat: (nq*M, D) gathered fk rows (neighbor q major).
    w_top = Wg[:D] (multiplies fk - fq); w_eff = Wg[D:] - Wg[:D] (pre-folded, multiplies fq).
    """
    M, _ = x.shape
    gkw = _bdot(gk_flat, w_top)                # one matmul for all 9 neighbors: (nq*M, D)
    base = _bdot(x, w_eff) + bg                # hoisted fq term: (M, D)
    acc = None
    for q in range(nq):
        y = gkw[q * M:(q + 1) * M, :] + base
        y = jnp.where(y >= 0.0, y, 0.2 * y)
        acc = y if acc is None else jnp.maximum(acc, y)
    return acc


# ---------------------------------------------------------------------------
# Fused whole-stack kernels (grid = (num_layers,), activation carried in o_ref)
# ---------------------------------------------------------------------------
# Encoder per-layer packs:
#   wsq (8, D, D)  bf16: [wq*scale, wk, wv, wo, wg_top, wg_eff, w2_attn, w2_graph]
#   vec (11, D)    f32 : [bq*scale, bk, bv, bo, bg, bp2, b_ffn2, ln1_g, ln1_b, ln2_g, ln2_b]
def _encoder_stack_kernel(x0_ref, kv_ref, pos_ref, oneh_ref, mask_ref,
                          wsq_ref, wff1_ref, wff2_ref, b1_ref, vec_ref, fnorm_ref,
                          o_ref, *, nhead, nq):
    l = pl.program_id(0)

    @pl.when(l == 0)
    def _():
        o_ref[...] = x0_ref[...]

    x = o_ref[...]
    kv = kv_ref[...]
    pos = pos_ref[...]
    mask = mask_ref[...]
    v = lambda i: vec_ref[i:i + 1, :]

    # self-attention: q from x+pos, k from kv+pos, v from kv
    attn = _mha(x + pos, kv + pos, kv,
                wsq_ref[0], wsq_ref[1], wsq_ref[2], wsq_ref[3],
                v(0), v(1), v(2), v(3), mask, nhead)
    # graph branch: fq = x, fk = static one-hot gather of kv (in-kernel)
    gk = jnp.dot(oneh_ref[...], kv, preferred_element_type=jnp.float32)
    g = _graph_branch(x, gk, wsq_ref[4], wsq_ref[5], v(4), nq)
    # projection2(cat[attn, g]) as split matmuls + residual + norm1
    y = _bdot(attn, wsq_ref[6]) + _bdot(g, wsq_ref[7]) + v(5)
    x = _layernorm(x + y, v(7), v(8))
    # FFN + residual + norm2
    hid = jnp.maximum(_bdot(x, wff1_ref[...]) + b1_ref[...], 0.0)
    y = _bdot(hid, wff2_ref[...]) + v(6)
    x = _layernorm(x + y, v(9), v(10))

    o_ref[...] = x

    @pl.when(l == pl.num_programs(0) - 1)
    def _():
        o_ref[...] = _layernorm(x, fnorm_ref[0:1, :], fnorm_ref[1:2, :])


# Decoder per-layer packs:
#   wsq (16, D, D) bf16: [0-3 self wq*s,wk,wv,wo | 4-7 cross wq*s,wk,wv,wo |
#                         8 wg_top_s, 9 wg_eff_s | 10 wg_top_c, 11 wg_eff_c |
#                         12 w2a_s, 13 w2g_s | 14 w2a_c, 15 w2g_c]
#   vec (19, D)    f32 : [0-3 self biases, 4 bg_s, 5 bp2_s, 6-9 cross biases, 10 bg_c,
#                         11 bp2_c, 12 b_ffn2, 13-18 ln1_g,ln1_b,ln2_g,ln2_b,ln3_g,ln3_b]
def _decoder_stack_kernel(x0_ref, mem_ref, pos_ref, oneh_ref, mask_ref,
                          wsq_ref, wff1_ref, wff2_ref, b1_ref, vec_ref, fnorm_ref,
                          o_ref, *, nhead, nq):
    l = pl.program_id(0)

    @pl.when(l == 0)
    def _():
        o_ref[...] = x0_ref[...]

    x = o_ref[...]
    mem = mem_ref[...]
    pos = pos_ref[...]
    mask = mask_ref[...]
    oneh = oneh_ref[...]
    v = lambda i: vec_ref[i:i + 1, :]

    # --- self-attention block (+ self graph branch) + norm1
    attn = _mha(x + pos, x + pos, x,
                wsq_ref[0], wsq_ref[1], wsq_ref[2], wsq_ref[3],
                v(0), v(1), v(2), v(3), mask, nhead)
    gk = jnp.dot(oneh, x, preferred_element_type=jnp.float32)
    g = _graph_branch(x, gk, wsq_ref[8], wsq_ref[9], v(4), nq)
    y = _bdot(attn, wsq_ref[12]) + _bdot(g, wsq_ref[13]) + v(5)
    x = _layernorm(x + y, v(13), v(14))

    # --- cross-attention block (q from updated x, k/v from memory) + norm2
    attn = _mha(x + pos, mem + pos, mem,
                wsq_ref[4], wsq_ref[5], wsq_ref[6], wsq_ref[7],
                v(6), v(7), v(8), v(9), mask, nhead)
    gk = jnp.dot(oneh, mem, preferred_element_type=jnp.float32)
    g = _graph_branch(x, gk, wsq_ref[10], wsq_ref[11], v(10), nq)
    y = _bdot(attn, wsq_ref[14]) + _bdot(g, wsq_ref[15]) + v(11)
    x = _layernorm(x + y, v(15), v(16))

    # --- FFN + norm3
    hid = jnp.maximum(_bdot(x, wff1_ref[...]) + b1_ref[...], 0.0)
    y = _bdot(hid, wff2_ref[...]) + v(12)
    x = _layernorm(x + y, v(17), v(18))

    o_ref[...] = x

    @pl.when(l == pl.num_programs(0) - 1)
    def _():
        o_ref[...] = _layernorm(x, fnorm_ref[0:1, :], fnorm_ref[1:2, :])


# ---------------------------------------------------------------------------
# pallas_call wrappers (grid over layers; weights indexed per-layer via BlockSpec)
# ---------------------------------------------------------------------------
def _fixed_spec(shape):
    nd = len(shape)
    return pl.BlockSpec(tuple(shape), lambda l, _nd=nd: (0,) * _nd)


def _layer_spec(shape):
    nd = len(shape)
    return pl.BlockSpec((None,) + tuple(shape), lambda l, _nd=nd: (l,) + (0,) * _nd)


def encoder_stack_pallas(x0, kv, pos, oneh, mask, p, *, nhead, nq):
    M, D = x0.shape
    L = p["wsq"].shape[0]
    FF = p["wff1"].shape[-1]
    kern = functools.partial(_encoder_stack_kernel, nhead=nhead, nq=nq)
    return pl.pallas_call(
        kern,
        out_shape=jax.ShapeDtypeStruct((M, D), jnp.float32),
        grid=(L,),
        in_specs=[
            _fixed_spec((M, D)), _fixed_spec((M, D)), _fixed_spec((M, D)),
            _fixed_spec(tuple(oneh.shape)), _fixed_spec((M, M)),
            _layer_spec((8, D, D)), _layer_spec((D, FF)), _layer_spec((FF, D)),
            _layer_spec((1, FF)), _layer_spec((11, D)),
            _fixed_spec((2, D)),
        ],
        out_specs=pl.BlockSpec((M, D), lambda l: (0, 0)),
        compiler_params=pltpu.CompilerParams(dimension_semantics=("arbitrary",)),
    )(x0, kv, pos, oneh, mask,
      p["wsq"], p["wff1"], p["wff2"], p["b1"], p["vec"], p["fnorm"])


def decoder_stack_pallas(x0, mem, pos, oneh, mask, p, *, nhead, nq):
    M, D = x0.shape
    L = p["wsq"].shape[0]
    FF = p["wff1"].shape[-1]
    kern = functools.partial(_decoder_stack_kernel, nhead=nhead, nq=nq)
    return pl.pallas_call(
        kern,
        out_shape=jax.ShapeDtypeStruct((M, D), jnp.float32),
        grid=(L,),
        in_specs=[
            _fixed_spec((M, D)), _fixed_spec((M, D)), _fixed_spec((M, D)),
            _fixed_spec(tuple(oneh.shape)), _fixed_spec((M, M)),
            _layer_spec((16, D, D)), _layer_spec((D, FF)), _layer_spec((FF, D)),
            _layer_spec((1, FF)), _layer_spec((19, D)),
            _fixed_spec((2, D)),
        ],
        out_specs=pl.BlockSpec((M, D), lambda l: (0, 0)),
        compiler_params=pltpu.CompilerParams(dimension_semantics=("arbitrary",)),
    )(x0, mem, pos, oneh, mask,
      p["wsq"], p["wff1"], p["wff2"], p["b1"], p["vec"], p["fnorm"])


# ---------------------------------------------------------------------------
# Static glue: neighbor index (compile-time constant) -> one-hot gather matrix
# ---------------------------------------------------------------------------
def get_index_np(b, n, w, h, num_query=9):
    """Exact replication of the reference get_index (incl. the uint8 cast)."""
    kernel = 3 if num_query == 9 else num_query
    padding = kernel // 2
    idx = np.zeros(b * n * num_query, dtype=np.int64)
    for tb in range(b):
        for i in range(h):
            for j in range(w):
                temp = tb * n + i * w + j
                for ii in range(kernel):
                    for jj in range(kernel):
                        ttemp = num_query * temp + ii * kernel + jj
                        bi = i - padding + ii
                        biasi = bi if bi >= 0 else 0
                        bj = j - padding + jj
                        biasj = bj if bj >= 0 else 0
                        biasi = biasi if bi < h else h - 1
                        biasj = biasj if bj < w else w - 1
                        idx[ttemp] = tb * n + biasi * w + biasj
    return idx.astype(np.uint8).astype(np.int64)


def build_graph_onehot(idx, nbatch, seq, nq):
    """One-hot matrix so that (onehot @ k2d)[q*M + (b*S+n)] == fk[b, q, n] of the reference.

    Replicates the reference exactly: gather from the flat (B*N*Q, D) Q-broadcast of k
    (flat row r holds k[r // (N*Q), (r % (N*Q)) // Q]) followed by the .view(B, Q, N, D)
    reinterpretation of the (b, n, q)-ordered gather results.
    """
    N = seq
    M = nbatch * seq
    v = np.asarray(idx, dtype=np.int64)
    src_row = (v // (N * nq)) * N + (v % (N * nq)) // nq      # source row in (B*N, D) k matrix
    src_row = src_row.reshape(nbatch, nq, N)                  # reference's view(B, Q, N)
    final = np.transpose(src_row, (1, 0, 2)).reshape(nq, M)   # target layout gk[q, b*S + n]
    onehot = np.zeros((nq * M, M), dtype=np.float32)
    onehot[np.arange(nq * M), final.reshape(-1)] = 1.0
    return onehot


def build_batch_mask(nbatch, seq):
    """Additive block-diagonal mask: 0 within a batch block, -1e30 across batches."""
    M = nbatch * seq
    b = np.arange(M) // seq
    return np.where(b[:, None] == b[None, :], 0.0, -1e30).astype(np.float32)


# ---------------------------------------------------------------------------
# TF forward (2 pallas_calls total)
# ---------------------------------------------------------------------------
@functools.partial(jax.jit, static_argnames=("nhead", "nbatch", "seq", "nq"))
def tf_forward(src, srcc, srcc2, pos, oneh, mask, enc_params, dec_params,
               *, nhead, nbatch, seq, nq):
    D = src.shape[-1]
    to2d = lambda t: jnp.transpose(t, (1, 0, 2)).reshape(nbatch * seq, D)
    src2d, srcc2d, srcc22d, pos2d = (to2d(t) for t in (src, srcc, srcc2, pos))

    # memory = encoder(srcc, src, pos): evolving state starts at srcc, k/v source is src
    memory = encoder_stack_pallas(srcc2d, src2d, pos2d, oneh, mask, enc_params,
                                  nhead=nhead, nq=nq)
    # output = decoder(srcc2, memory, pos)
    out = decoder_stack_pallas(srcc22d, memory, pos2d, oneh, mask, dec_params,
                               nhead=nhead, nq=nq)
    return jnp.transpose(out.reshape(nbatch, seq, D), (1, 0, 2))


# ---------------------------------------------------------------------------
# Deterministic parameter initialization (pre-packed for the fused stack kernels)
# ---------------------------------------------------------------------------
def _w(key, shape, scale=0.1):
    return scale * jax.random.normal(key, shape, dtype=jnp.float32)


def init_encoder_params(key, D, FF, H, L):
    scale = (D // H) ** -0.5
    ones = jnp.ones((D,), jnp.float32)
    zeros = jnp.zeros((D,), jnp.float32)
    wsq, wff1, wff2, b1, vec = [], [], [], [], []
    for i in range(L):
        ks = jax.random.split(jax.random.fold_in(key, i), 8)
        wq, wk, wv, wo = (_w(k, (D, D)) for k in ks[:4])
        wg = _w(ks[4], (2 * D, D))   # graph projection: rows[:D] -> (fk - fq), rows[D:] -> fq
        w2 = _w(ks[5], (2 * D, D))   # projection2: rows[:D] -> attn out, rows[D:] -> graph out
        wsq.append(jnp.stack([wq * scale, wk, wv, wo,
                              wg[:D], wg[D:] - wg[:D], w2[:D], w2[D:]]))
        wff1.append(_w(ks[6], (D, FF)))
        wff2.append(_w(ks[7], (FF, D)))
        b1.append(jnp.zeros((1, FF), jnp.float32))
        vec.append(jnp.stack([zeros] * 7 + [ones, zeros, ones, zeros]))
    return dict(
        wsq=jnp.stack(wsq).astype(jnp.bfloat16),
        wff1=jnp.stack(wff1).astype(jnp.bfloat16),
        wff2=jnp.stack(wff2).astype(jnp.bfloat16),
        b1=jnp.stack(b1),
        vec=jnp.stack(vec),
        fnorm=jnp.stack([ones, zeros]),
    )


def init_decoder_params(key, D, FF, H, L):
    scale = (D // H) ** -0.5
    ones = jnp.ones((D,), jnp.float32)
    zeros = jnp.zeros((D,), jnp.float32)
    wsq, wff1, wff2, b1, vec = [], [], [], [], []
    for i in range(L):
        ks = jax.random.split(jax.random.fold_in(key, i), 14)
        wq_s, wk_s, wv_s, wo_s = (_w(k, (D, D)) for k in ks[0:4])
        wq_c, wk_c, wv_c, wo_c = (_w(k, (D, D)) for k in ks[4:8])
        wg_s = _w(ks[8], (2 * D, D))
        wg_c = _w(ks[9], (2 * D, D))
        w2_s = _w(ks[10], (2 * D, D))
        w2_c = _w(ks[11], (2 * D, D))
        wsq.append(jnp.stack([
            wq_s * scale, wk_s, wv_s, wo_s,
            wq_c * scale, wk_c, wv_c, wo_c,
            wg_s[:D], wg_s[D:] - wg_s[:D],
            wg_c[:D], wg_c[D:] - wg_c[:D],
            w2_s[:D], w2_s[D:],
            w2_c[:D], w2_c[D:],
        ]))
        wff1.append(_w(ks[12], (D, FF)))
        wff2.append(_w(ks[13], (FF, D)))
        b1.append(jnp.zeros((1, FF), jnp.float32))
        vec.append(jnp.stack([zeros] * 13 + [ones, zeros, ones, zeros, ones, zeros]))
    return dict(
        wsq=jnp.stack(wsq).astype(jnp.bfloat16),
        wff1=jnp.stack(wff1).astype(jnp.bfloat16),
        wff2=jnp.stack(wff2).astype(jnp.bfloat16),
        b1=jnp.stack(b1),
        vec=jnp.stack(vec),
        fnorm=jnp.stack([ones, zeros]),
    )


# ---------------------------------------------------------------------------
if __name__ == "__main__":
    d_model, nhead, dim_ff = 32, 4, 64
    num_enc, num_dec = 2, 2
    w, h = 4, 4
    S, B = w * h, 2          # seq length = w*h tokens
    NQ = 9

    key = jax.random.PRNGKey(0)
    k_src, k_srcc, k_srcc2, k_pos, k_enc, k_dec = jax.random.split(key, 6)
    src = jax.random.normal(k_src, (S, B, d_model), dtype=jnp.float32)
    srcc = jax.random.normal(k_srcc, (S, B, d_model), dtype=jnp.float32)
    srcc2 = jax.random.normal(k_srcc2, (S, B, d_model), dtype=jnp.float32)
    pos = jax.random.normal(k_pos, (S, B, d_model), dtype=jnp.float32)

    enc_params = init_encoder_params(k_enc, d_model, dim_ff, nhead, num_enc)
    dec_params = init_decoder_params(k_dec, d_model, dim_ff, nhead, num_dec)

    idx = get_index_np(B, S, w, h, NQ)                 # compile-time constant neighbor index
    oneh = jnp.asarray(build_graph_onehot(idx, B, S, NQ))   # (NQ*B*S, B*S) one-hot gather
    mask = jnp.asarray(build_batch_mask(B, S))              # (B*S, B*S) block-diag batch mask

    # TODO(synk): the encoder layer's nn.Conv2d/GroupNorm `eles` block is constructed but
    # never invoked in the reference forward, so it is intentionally not implemented.
    out = tf_forward(src, srcc, srcc2, pos, oneh, mask, enc_params, dec_params,
                     nhead=nhead, nbatch=B, seq=S, nq=NQ)
    out = jax.block_until_ready(out)
    assert out.shape == (S, B, d_model)
    assert bool(jnp.all(jnp.isfinite(out)))
    print("KERNEL_OK")
</pallas_src>

<mosaic_0001>
module attributes {stable_mosaic.version = 11 : i64} {
  func.func @_encoder_stack_kernel(%arg0: i32, %arg1: memref<32x32xf32, #tpu.memory_space<vmem>>, %arg2: memref<32x32xf32, #tpu.memory_space<vmem>>, %arg3: memref<32x32xf32, #tpu.memory_space<vmem>>, %arg4: memref<288x32xf32, #tpu.memory_space<vmem>>, %arg5: memref<32x32xf32, #tpu.memory_space<vmem>>, %arg6: memref<1x8x32x32xbf16, #tpu.memory_space<vmem>>, %arg7: memref<1x32x64xbf16, #tpu.memory_space<vmem>>, %arg8: memref<1x64x32xbf16, #tpu.memory_space<vmem>>, %arg9: memref<1x1x64xf32, #tpu.memory_space<vmem>>, %arg10: memref<1x11x32xf32, #tpu.memory_space<vmem>>, %arg11: memref<2x32xf32, #tpu.memory_space<vmem>>, %arg12: memref<32x32xf32, #tpu.memory_space<vmem>>) attributes {dimension_semantics = [#tpu.dimension_semantics<arbitrary>], iteration_bounds = array<i64: 2>, scalar_prefetch = 0 : i64, scratch_operands = 0 : i64, tpu.core_type = #tpu.core_type<tc>, window_params = [{pipeline_mode = #tpu.pipeline_mode<synchronous>, transform_indices = @transform_0, window_bounds = array<i64: 32, 32>}, {pipeline_mode = #tpu.pipeline_mode<synchronous>, transform_indices = @transform_1, window_bounds = array<i64: 32, 32>}, {pipeline_mode = #tpu.pipeline_mode<synchronous>, transform_indices = @transform_2, window_bounds = array<i64: 32, 32>}, {pipeline_mode = #tpu.pipeline_mode<synchronous>, transform_indices = @transform_3, window_bounds = array<i64: 288, 32>}, {pipeline_mode = #tpu.pipeline_mode<synchronous>, transform_indices = @transform_4, window_bounds = array<i64: 32, 32>}, {transform_indices = @transform_5, window_bounds = array<i64: 1, 8, 32, 32>}, {transform_indices = @transform_6, window_bounds = array<i64: 1, 32, 64>}, {transform_indices = @transform_7, window_bounds = array<i64: 1, 64, 32>}, {transform_indices = @transform_8, window_bounds = array<i64: 1, 1, 64>}, {transform_indices = @transform_9, window_bounds = array<i64: 1, 11, 32>}, {pipeline_mode = #tpu.pipeline_mode<synchronous>, transform_indices = @transform_10, window_bounds = array<i64: 2, 32>}, {pipeline_mode = #tpu.pipeline_mode<synchronous>, transform_indices = @transform_11, window_bounds = array<i64: 32, 32>}]} {
    %c0_i32 = arith.constant 0 : i32
    %0 = arith.cmpi eq, %arg0, %c0_i32 : i32
    %1 = arith.extui %0 : i1 to i32
    %c0_i32_0 = arith.constant 0 : i32
    %2 = arith.cmpi ne, %1, %c0_i32_0 : i32
    scf.if %2 {
      %c0_132 = arith.constant 0 : index
      %c0_133 = arith.constant 0 : index
      %280 = vector.load %arg1[%c0_132, %c0_133] : memref<32x32xf32, #tpu.memory_space<vmem>>, vector<32x32xf32>
      %c0_134 = arith.constant 0 : index
      %c0_135 = arith.constant 0 : index
      %281 = vector.load %arg12[%c0_134, %c0_135] : memref<32x32xf32, #tpu.memory_space<vmem>>, vector<32x32xf32>
      tpu.vector_store %arg12[%c0_134, %c0_135], %280 {strides = array<i32>} : memref<32x32xf32, #tpu.memory_space<vmem>>, vector<32x32xf32>,
    } else {
    }
    %c0 = arith.constant 0 : index
    %c0_1 = arith.constant 0 : index
    %3 = vector.load %arg12[%c0, %c0_1] : memref<32x32xf32, #tpu.memory_space<vmem>>, vector<32x32xf32>
    %c0_2 = arith.constant 0 : index
    %c0_3 = arith.constant 0 : index
    %4 = vector.load %arg2[%c0_2, %c0_3] : memref<32x32xf32, #tpu.memory_space<vmem>>, vector<32x32xf32>
    %c0_4 = arith.constant 0 : index
    %c0_5 = arith.constant 0 : index
    %5 = vector.load %arg3[%c0_4, %c0_5] : memref<32x32xf32, #tpu.memory_space<vmem>>, vector<32x32xf32>
    %c0_6 = arith.constant 0 : index
    %c0_7 = arith.constant 0 : index
    %6 = vector.load %arg5[%c0_6, %c0_7] : memref<32x32xf32, #tpu.memory_space<vmem>>, vector<32x32xf32>
    %7 = arith.addf %3, %5 : vector<32x32xf32>
    %8 = arith.addf %4, %5 : vector<32x32xf32>
    %c0_8 = arith.constant 0 : index
    %c0_9 = arith.constant 0 : index
    %c0_10 = arith.constant 0 : index
    %c0_11 = arith.constant 0 : index
    %9 = vector.load %arg6[%c0_8, %c0_9, %c0_10, %c0_11] : memref<1x8x32x32xbf16, #tpu.memory_space<vmem>>, vector<1x1x32x32xbf16>
    %10 = vector.shape_cast %9 : vector<1x1x32x32xbf16> to vector<32x32xbf16>
    %c0_12 = arith.constant 0 : index
    %c1 = arith.constant 1 : index
    %c0_13 = arith.constant 0 : index
    %c0_14 = arith.constant 0 : index
    %11 = vector.load %arg6[%c0_12, %c1, %c0_13, %c0_14] : memref<1x8x32x32xbf16, #tpu.memory_space<vmem>>, vector<1x1x32x32xbf16>
    %12 = vector.shape_cast %11 : vector<1x1x32x32xbf16> to vector<32x32xbf16>
    %c0_15 = arith.constant 0 : index
    %c2 = arith.constant 2 : index
    %c0_16 = arith.constant 0 : index
    %c0_17 = arith.constant 0 : index
    %13 = vector.load %arg6[%c0_15, %c2, %c0_16, %c0_17] : memref<1x8x32x32xbf16, #tpu.memory_space<vmem>>, vector<1x1x32x32xbf16>
    %14 = vector.shape_cast %13 : vector<1x1x32x32xbf16> to vector<32x32xbf16>
    %c0_18 = arith.constant 0 : index
    %c3 = arith.constant 3 : index
    %c0_19 = arith.constant 0 : index
    %c0_20 = arith.constant 0 : index
    %15 = vector.load %arg6[%c0_18, %c3, %c0_19, %c0_20] : memref<1x8x32x32xbf16, #tpu.memory_space<vmem>>, vector<1x1x32x32xbf16>
    %16 = vector.shape_cast %15 : vector<1x1x32x32xbf16> to vector<32x32xbf16>
    %c0_21 = arith.constant 0 : index
    %c0_22 = arith.constant 0 : index
    %c0_23 = arith.constant 0 : index
    %17 = vector.load %arg10[%c0_21, %c0_22, %c0_23] : memref<1x11x32xf32, #tpu.memory_space<vmem>>, vector<1x1x32xf32>
    %18 = vector.shape_cast %17 : vector<1x1x32xf32> to vector<1x32xf32>
    %c0_24 = arith.constant 0 : index
    %c1_25 = arith.constant 1 : index
    %c0_26 = arith.constant 0 : index
    %19 = vector.load %arg10[%c0_24, %c1_25, %c0_26] : memref<1x11x32xf32, #tpu.memory_space<vmem>>, vector<1x1x32xf32>
    %20 = vector.shape_cast %19 : vector<1x1x32xf32> to vector<1x32xf32>
    %c0_27 = arith.constant 0 : index
    %c2_28 = arith.constant 2 : index
    %c0_29 = arith.constant 0 : index
    %21 = vector.load %arg10[%c0_27, %c2_28, %c0_29] : memref<1x11x32xf32, #tpu.memory_space<vmem>>, vector<1x1x32xf32>
    %22 = vector.shape_cast %21 : vector<1x1x32xf32> to vector<1x32xf32>
    %c0_30 = arith.constant 0 : index
    %c3_31 = arith.constant 3 : index
    %c0_32 = arith.constant 0 : index
    %23 = vector.load %arg10[%c0_30, %c3_31, %c0_32] : memref<1x11x32xf32, #tpu.memory_space<vmem>>, vector<1x1x32xf32>
    %24 = vector.shape_cast %23 : vector<1x1x32xf32> to vector<1x32xf32>
    %25 = arith.truncf %7 : vector<32x32xf32> to vector<32x32xbf16>
    %cst = arith.constant dense<0.000000e+00> : vector<32x32xf32>
    %26 = tpu.matmul %25, %10, %cst {dimension_numbers = #tpu.dot_dimension_numbers<[1], [0], [0], [1], [0, 0, 1, 1], [], []>} : vector<32x32xbf16>, vector<32x32xbf16>, vector<32x32xf32> -> vector<32x32xf32>
    %27 = vector.broadcast %18 : vector<1x32xf32> to vector<32x32xf32>
    %28 = arith.addf %26, %27 : vector<32x32xf32>
    %29 = arith.truncf %8 : vector<32x32xf32> to vector<32x32xbf16>
    %cst_33 = arith.constant dense<0.000000e+00> : vector<32x32xf32>
    %30 = tpu.matmul %29, %12, %cst_33 {dimension_numbers = #tpu.dot_dimension_numbers<[1], [0], [0], [1], [0, 0, 1, 1], [], []>} : vector<32x32xbf16>, vector<32x32xbf16>, vector<32x32xf32> -> vector<32x32xf32>
    %31 = vector.broadcast %20 : vector<1x32xf32> to vector<32x32xf32>
    %32 = arith.addf %30, %31 : vector<32x32xf32>
    %33 = arith.truncf %4 : vector<32x32xf32> to vector<32x32xbf16>
    %cst_34 = arith.constant dense<0.000000e+00> : vector<32x32xf32>
    %34 = tpu.matmul %33, %14, %cst_34 {dimension_numbers = #tpu.dot_dimension_numbers<[1], [0], [0], [1], [0, 0, 1, 1], [], []>} : vector<32x32xbf16>, vector<32x32xbf16>, vector<32x32xf32> -> vector<32x32xf32>
    %35 = vector.broadcast %22 : vector<1x32xf32> to vector<32x32xf32>
    %36 = arith.addf %34, %35 : vector<32x32xf32>
    %37 = vector.extract_strided_slice %28 {offsets = [0, 0], sizes = [32, 8], strides = [1, 1]} : vector<32x32xf32> to vector<32x8xf32>
    %38 = vector.extract_strided_slice %32 {offsets = [0, 0], sizes = [32, 8], strides = [1, 1]} : vector<32x32xf32> to vector<32x8xf32>
    %39 = vector.extract_strided_slice %36 {offsets = [0, 0], sizes = [32, 8], strides = [1, 1]} : vector<32x32xf32> to vector<32x8xf32>
    %cst_35 = arith.constant dense<0.000000e+00> : vector<32x32xf32>
    %40 = tpu.matmul %37, %38, %cst_35 {dimension_numbers = #tpu.dot_dimension_numbers<[1], [1], [0], [0], [0, 0, 1, 0], [], []>} : vector<32x8xf32>, vector<32x8xf32>, vector<32x32xf32> -> vector<32x32xf32>
    %41 = arith.addf %40, %6 : vector<32x32xf32>
    %cst_36 = arith.constant dense<0xFF800000> : vector<32xf32>
    %42 = vector.multi_reduction <maximumf>, %41, %cst_36 [1] : vector<32x32xf32> to vector<32xf32>
    %43 = vector.shape_cast %42 : vector<32xf32> to vector<32x1xf32>
    %44 = vector.broadcast %43 : vector<32x1xf32> to vector<32x32xf32>
    %45 = arith.subf %41, %44 : vector<32x32xf32>
    %46 = math.exp %45 : vector<32x32xf32>
    %cst_37 = arith.constant dense<0.000000e+00> : vector<32xf32>
    %47 = vector.multi_reduction <add>, %46, %cst_37 [1] : vector<32x32xf32> to vector<32xf32>
    %48 = vector.shape_cast %47 : vector<32xf32> to vector<32x1xf32>
    %49 = tpu.reciprocal %48 {approx = true} : vector<32x1xf32> -> vector<32x1xf32>
    %50 = vector.broadcast %49 : vector<32x1xf32> to vector<32x32xf32>
    %51 = arith.mulf %46, %50 : vector<32x32xf32>
    %cst_38 = arith.constant dense<0.000000e+00> : vector<32x8xf32>
    %52 = tpu.matmul %51, %39, %cst_38 {dimension_numbers = #tpu.dot_dimension_numbers<[1], [0], [0], [1], [0, 0, 1, 1], [], []>} : vector<32x32xf32>, vector<32x8xf32>, vector<32x8xf32> -> vector<32x8xf32>
    %53 = vector.extract_strided_slice %28 {offsets = [0, 8], sizes = [32, 8], strides = [1, 1]} : vector<32x32xf32> to vector<32x8xf32>
    %54 = vector.extract_strided_slice %32 {offsets = [0, 8], sizes = [32, 8], strides = [1, 1]} : vector<32x32xf32> to vector<32x8xf32>
    %55 = vector.extract_strided_slice %36 {offsets = [0, 8], sizes = [32, 8], strides = [1, 1]} : vector<32x32xf32> to vector<32x8xf32>
    %cst_39 = arith.constant dense<0.000000e+00> : vector<32x32xf32>
    %56 = tpu.matmul %53, %54, %cst_39 {dimension_numbers = #tpu.dot_dimension_numbers<[1], [1], [0], [0], [0, 0, 1, 0], [], []>} : vector<32x8xf32>, vector<32x8xf32>, vector<32x32xf32> -> vector<32x32xf32>
    %57 = arith.addf %56, %6 : vector<32x32xf32>
    %cst_40 = arith.constant dense<0xFF800000> : vector<32xf32>
    %58 = vector.multi_reduction <maximumf>, %57, %cst_40 [1] : vector<32x32xf32> to vector<32xf32>
    %59 = vector.shape_cast %58 : vector<32xf32> to vector<32x1xf32>
    %60 = vector.broadcast %59 : vector<32x1xf32> to vector<32x32xf32>
    %61 = arith.subf %57, %60 : vector<32x32xf32>
    %62 = math.exp %61 : vector<32x32xf32>
    %cst_41 = arith.constant dense<0.000000e+00> : vector<32xf32>
    %63 = vector.multi_reduction <add>, %62, %cst_41 [1] : vector<32x32xf32> to vector<32xf32>
    %64 = vector.shape_cast %63 : vector<32xf32> to vector<32x1xf32>
    %65 = tpu.reciprocal %64 {approx = true} : vector<32x1xf32> -> vector<32x1xf32>
    %66 = vector.broadcast %65 : vector<32x1xf32> to vector<32x32xf32>
    %67 = arith.mulf %62, %66 : vector<32x32xf32>
    %cst_42 = arith.constant dense<0.000000e+00> : vector<32x8xf32>
    %68 = tpu.matmul %67, %55, %cst_42 {dimension_numbers = #tpu.dot_dimension_numbers<[1], [0], [0], [1], [0, 0, 1, 1], [], []>} : vector<32x32xf32>, vector<32x8xf32>, vector<32x8xf32> -> vector<32x8xf32>
    %69 = vector.extract_strided_slice %28 {offsets = [0, 16], sizes = [32, 8], strides = [1, 1]} : vector<32x32xf32> to vector<32x8xf32>
    %70 = vector.extract_strided_slice %32 {offsets = [0, 16], sizes = [32, 8], strides = [1, 1]} : vector<32x32xf32> to vector<32x8xf32>
    %71 = vector.extract_strided_slice %36 {offsets = [0, 16], sizes = [32, 8], strides = [1, 1]} : vector<32x32xf32> to vector<32x8xf32>
    %cst_43 = arith.constant dense<0.000000e+00> : vector<32x32xf32>
    %72 = tpu.matmul %69, %70, %cst_43 {dimension_numbers = #tpu.dot_dimension_numbers<[1], [1], [0], [0], [0, 0, 1, 0], [], []>} : vector<32x8xf32>, vector<32x8xf32>, vector<32x32xf32> -> vector<32x32xf32>
    %73 = arith.addf %72, %6 : vector<32x32xf32>
    %cst_44 = arith.constant dense<0xFF800000> : vector<32xf32>
    %74 = vector.multi_reduction <maximumf>, %73, %cst_44 [1] : vector<32x32xf32> to vector<32xf32>
    %75 = vector.shape_cast %74 : vector<32xf32> to vector<32x1xf32>
    %76 = vector.broadcast %75 : vector<32x1xf32> to vector<32x32xf32>
    %77 = arith.subf %73, %76 : vector<32x32xf32>
    %78 = math.exp %77 : vector<32x32xf32>
    %cst_45 = arith.constant dense<0.000000e+00> : vector<32xf32>
    %79 = vector.multi_reduction <add>, %78, %cst_45 [1] : vector<32x32xf32> to vector<32xf32>
    %80 = vector.shape_cast %79 : vector<32xf32> to vector<32x1xf32>
    %81 = tpu.reciprocal %80 {approx = true} : vector<32x1xf32> -> vector<32x1xf32>
    %82 = vector.broadcast %81 : vector<32x1xf32> to vector<32x32xf32>
    %83 = arith.mulf %78, %82 : vector<32x32xf32>
    %cst_46 = arith.constant dense<0.000000e+00> : vector<32x8xf32>
    %84 = tpu.matmul %83, %71, %cst_46 {dimension_numbers = #tpu.dot_dimension_numbers<[1], [0], [0], [1], [0, 0, 1, 1], [], []>} : vector<32x32xf32>, vector<32x8xf32>, vector<32x8xf32> -> vector<32x8xf32>
    %85 = vector.extract_strided_slice %28 {offsets = [0, 24], sizes = [32, 8], strides = [1, 1]} : vector<32x32xf32> to vector<32x8xf32>
    %86 = vector.extract_strided_slice %32 {offsets = [0, 24], sizes = [32, 8], strides = [1, 1]} : vector<32x32xf32> to vector<32x8xf32>
    %87 = vector.extract_strided_slice %36 {offsets = [0, 24], sizes = [32, 8], strides = [1, 1]} : vector<32x32xf32> to vector<32x8xf32>
    %cst_47 = arith.constant dense<0.000000e+00> : vector<32x32xf32>
    %88 = tpu.matmul %85, %86, %cst_47 {dimension_numbers = #tpu.dot_dimension_numbers<[1], [1], [0], [0], [0, 0, 1, 0], [], []>} : vector<32x8xf32>, vector<32x8xf32>, vector<32x32xf32> -> vector<32x32xf32>
    %89 = arith.addf %88, %6 : vector<32x32xf32>
    %cst_48 = arith.constant dense<0xFF800000> : vector<32xf32>
    %90 = vector.multi_reduction <maximumf>, %89, %cst_48 [1] : vector<32x32xf32> to vector<32xf32>
    %91 = vector.shape_cast %90 : vector<32xf32> to vector<32x1xf32>
    %92 = vector.broadcast %91 : vector<32x1xf32> to vector<32x32xf32>
    %93 = arith.subf %89, %92 : vector<32x32xf32>
    %94 = math.exp %93 : vector<32x32xf32>
    %cst_49 = arith.constant dense<0.000000e+00> : vector<32xf32>
    %95 = vector.multi_reduction <add>, %94, %cst_49 [1] : vector<32x32xf32> to vector<32xf32>
    %96 = vector.shape_cast %95 : vector<32xf32> to vector<32x1xf32>
    %97 = tpu.reciprocal %96 {approx = true} : vector<32x1xf32> -> vector<32x1xf32>
    %98 = vector.broadcast %97 : vector<32x1xf32> to vector<32x32xf32>
    %99 = arith.mulf %94, %98 : vector<32x32xf32>
    %cst_50 = arith.constant dense<0.000000e+00> : vector<32x8xf32>
    %100 = tpu.matmul %99, %87, %cst_50 {dimension_numbers = #tpu.dot_dimension_numbers<[1], [0], [0], [1], [0, 0, 1, 1], [], []>} : vector<32x32xf32>, vector<32x8xf32>, vector<32x8xf32> -> vector<32x8xf32>
    %101 = tpu.concatenate %52, %68, %84, %100 in 1 : vector<32x8xf32>, vector<32x8xf32>, vector<32x8xf32>, vector<32x8xf32> -> vector<32x32xf32>
    %102 = arith.truncf %101 : vector<32x32xf32> to vector<32x32xbf16>
    %cst_51 = arith.constant dense<0.000000e+00> : vector<32x32xf32>
    %103 = tpu.matmul %102, %16, %cst_51 {dimension_numbers = #tpu.dot_dimension_numbers<[1], [0], [0], [1], [0, 0, 1, 1], [], []>} : vector<32x32xbf16>, vector<32x32xbf16>, vector<32x32xf32> -> vector<32x32xf32>
    %104 = vector.broadcast %24 : vector<1x32xf32> to vector<32x32xf32>
    %105 = arith.addf %103, %104 : vector<32x32xf32>
    %c0_52 = arith.constant 0 : index
    %c0_53 = arith.constant 0 : index
    %106 = vector.load %arg4[%c0_52, %c0_53] : memref<288x32xf32, #tpu.memory_space<vmem>>, vector<288x32xf32>
    %cst_54 = arith.constant dense<0.000000e+00> : vector<288x32xf32>
    %107 = tpu.matmul %106, %4, %cst_54 {dimension_numbers = #tpu.dot_dimension_numbers<[1], [0], [0], [1], [0, 0, 1, 1], [], []>} : vector<288x32xf32>, vector<32x32xf32>, vector<288x32xf32> -> vector<288x32xf32>
    %c0_55 = arith.constant 0 : index
    %c4 = arith.constant 4 : index
    %c0_56 = arith.constant 0 : index
    %c0_57 = arith.constant 0 : index
    %108 = vector.load %arg6[%c0_55, %c4, %c0_56, %c0_57] : memref<1x8x32x32xbf16, #tpu.memory_space<vmem>>, vector<1x1x32x32xbf16>
    %109 = vector.shape_cast %108 : vector<1x1x32x32xbf16> to vector<32x32xbf16>
    %c0_58 = arith.constant 0 : index
    %c5 = arith.constant 5 : index
    %c0_59 = arith.constant 0 : index
    %c0_60 = arith.constant 0 : index
    %110 = vector.load %arg6[%c0_58, %c5, %c0_59, %c0_60] : memref<1x8x32x32xbf16, #tpu.memory_space<vmem>>, vector<1x1x32x32xbf16>
    %111 = vector.shape_cast %110 : vector<1x1x32x32xbf16> to vector<32x32xbf16>
    %c0_61 = arith.constant 0 : index
    %c4_62 = arith.constant 4 : index
    %c0_63 = arith.constant 0 : index
    %112 = vector.load %arg10[%c0_61, %c4_62, %c0_63] : memref<1x11x32xf32, #tpu.memory_space<vmem>>, vector<1x1x32xf32>
    %113 = vector.shape_cast %112 : vector<1x1x32xf32> to vector<1x32xf32>
    %114 = arith.truncf %107 : vector<288x32xf32> to vector<288x32xbf16>
    %cst_64 = arith.constant dense<0.000000e+00> : vector<288x32xf32>
    %115 = tpu.matmul %114, %109, %cst_64 {dimension_numbers = #tpu.dot_dimension_numbers<[1], [0], [0], [1], [0, 0, 1, 1], [], []>} : vector<288x32xbf16>, vector<32x32xbf16>, vector<288x32xf32> -> vector<288x32xf32>
    %116 = arith.truncf %3 : vector<32x32xf32> to vector<32x32xbf16>
    %cst_65 = arith.constant dense<0.000000e+00> : vector<32x32xf32>
    %117 = tpu.matmul %116, %111, %cst_65 {dimension_numbers = #tpu.dot_dimension_numbers<[1], [0], [0], [1], [0, 0, 1, 1], [], []>} : vector<32x32xbf16>, vector<32x32xbf16>, vector<32x32xf32> -> vector<32x32xf32>
    %118 = vector.broadcast %113 : vector<1x32xf32> to vector<32x32xf32>
    %119 = arith.addf %117, %118 : vector<32x32xf32>
    %120 = vector.extract_strided_slice %115 {offsets = [0, 0], sizes = [32, 32], strides = [1, 1]} : vector<288x32xf32> to vector<32x32xf32>
    %121 = arith.addf %120, %119 : vector<32x32xf32>
    %cst_66 = arith.constant 0.000000e+00 : f32
    %122 = vector.broadcast %cst_66 : f32 to vector<32x32xf32>
    %123 = arith.cmpf oge, %121, %122 : vector<32x32xf32>
    %cst_67 = arith.constant 2.000000e-01 : f32
    %124 = vector.broadcast %cst_67 : f32 to vector<32x32xf32>
    %125 = arith.mulf %124, %121 : vector<32x32xf32>
    %126 = arith.select %123, %121, %125 : vector<32x32xi1>, vector<32x32xf32>
    %127 = vector.extract_strided_slice %115 {offsets = [32, 0], sizes = [32, 32], strides = [1, 1]} : vector<288x32xf32> to vector<32x32xf32>
    %128 = arith.addf %127, %119 : vector<32x32xf32>
    %cst_68 = arith.constant 0.000000e+00 : f32
    %129 = vector.broadcast %cst_68 : f32 to vector<32x32xf32>
    %130 = arith.cmpf oge, %128, %129 : vector<32x32xf32>
    %cst_69 = arith.constant 2.000000e-01 : f32
    %131 = vector.broadcast %cst_69 : f32 to vector<32x32xf32>
    %132 = arith.mulf %131, %128 : vector<32x32xf32>
    %133 = arith.select %130, %128, %132 : vector<32x32xi1>, vector<32x32xf32>
    %134 = arith.maximumf %126, %133 : vector<32x32xf32>
    %135 = vector.extract_strided_slice %115 {offsets = [64, 0], sizes = [32, 32], strides = [1, 1]} : vector<288x32xf32> to vector<32x32xf32>
    %136 = arith.addf %135, %119 : vector<32x32xf32>
    %cst_70 = arith.constant 0.000000e+00 : f32
    %137 = vector.broadcast %cst_70 : f32 to vector<32x32xf32>
    %138 = arith.cmpf oge, %136, %137 : vector<32x32xf32>
    %cst_71 = arith.constant 2.000000e-01 : f32
    %139 = vector.broadcast %cst_71 : f32 to vector<32x32xf32>
    %140 = arith.mulf %139, %136 : vector<32x32xf32>
    %141 = arith.select %138, %136, %140 : vector<32x32xi1>, vector<32x32xf32>
    %142 = arith.maximumf %134, %141 : vector<32x32xf32>
    %143 = vector.extract_strided_slice %115 {offsets = [96, 0], sizes = [32, 32], strides = [1, 1]} : vector<288x32xf32> to vector<32x32xf32>
    %144 = arith.addf %143, %119 : vector<32x32xf32>
    %cst_72 = arith.constant 0.000000e+00 : f32
    %145 = vector.broadcast %cst_72 : f32 to vector<32x32xf32>
    %146 = arith.cmpf oge, %144, %145 : vector<32x32xf32>
    %cst_73 = arith.constant 2.000000e-01 : f32
    %147 = vector.broadcast %cst_73 : f32 to vector<32x32xf32>
    %148 = arith.mulf %147, %144 : vector<32x32xf32>
    %149 = arith.select %146, %144, %148 : vector<32x32xi1>, vector<32x32xf32>
    %150 = arith.maximumf %142, %149 : vector<32x32xf32>
    %151 = vector.extract_strided_slice %115 {offsets = [128, 0], sizes = [32, 32], strides = [1, 1]} : vector<288x32xf32> to vector<32x32xf32>
    %152 = arith.addf %151, %119 : vector<32x32xf32>
    %cst_74 = arith.constant 0.000000e+00 : f32
    %153 = vector.broadcast %cst_74 : f32 to vector<32x32xf32>
    %154 = arith.cmpf oge, %152, %153 : vector<32x32xf32>
    %cst_75 = arith.constant 2.000000e-01 : f32
    %155 = vector.broadcast %cst_75 : f32 to vector<32x32xf32>
    %156 = arith.mulf %155, %152 : vector<32x32xf32>
    %157 = arith.select %154, %152, %156 : vector<32x32xi1>, vector<32x32xf32>
    %158 = arith.maximumf %150, %157 : vector<32x32xf32>
    %159 = vector.extract_strided_slice %115 {offsets = [160, 0], sizes = [32, 32], strides = [1, 1]} : vector<288x32xf32> to vector<32x32xf32>
    %160 = arith.addf %159, %119 : vector<32x32xf32>
    %cst_76 = arith.constant 0.000000e+00 : f32
    %161 = vector.broadcast %cst_76 : f32 to vector<32x32xf32>
    %162 = arith.cmpf oge, %160, %161 : vector<32x32xf32>
    %cst_77 = arith.constant 2.000000e-01 : f32
    %163 = vector.broadcast %cst_77 : f32 to vector<32x32xf32>
    %164 = arith.mulf %163, %160 : vector<32x32xf32>
    %165 = arith.select %162, %160, %164 : vector<32x32xi1>, vector<32x32xf32>
    %166 = arith.maximumf %158, %165 : vector<32x32xf32>
    %167 = vector.extract_strided_slice %115 {offsets = [192, 0], sizes = [32, 32], strides = [1, 1]} : vector<288x32xf32> to vector<32x32xf32>
    %168 = arith.addf %167, %119 : vector<32x32xf32>
    %cst_78 = arith.constant 0.000000e+00 : f32
    %169 = vector.broadcast %cst_78 : f32 to vector<32x32xf32>
    %170 = arith.cmpf oge, %168, %169 : vector<32x32xf32>
    %cst_79 = arith.constant 2.000000e-01 : f32
    %171 = vector.broadcast %cst_79 : f32 to vector<32x32xf32>
    %172 = arith.mulf %171, %168 : vector<32x32xf32>
    %173 = arith.select %170, %168, %172 : vector<32x32xi1>, vector<32x32xf32>
    %174 = arith.maximumf %166, %173 : vector<32x32xf32>
    %175 = vector.extract_strided_slice %115 {offsets = [224, 0], sizes = [32, 32], strides = [1, 1]} : vector<288x32xf32> to vector<32x32xf32>
    %176 = arith.addf %175, %119 : vector<32x32xf32>
    %cst_80 = arith.constant 0.000000e+00 : f32
    %177 = vector.broadcast %cst_80 : f32 to vector<32x32xf32>
    %178 = arith.cmpf oge, %176, %177 : vector<32x32xf32>
    %cst_81 = arith.constant 2.000000e-01 : f32
    %179 = vector.broadcast %cst_81 : f32 to vector<32x32xf32>
    %180 = arith.mulf %179, %176 : vector<32x32xf32>
    %181 = arith.select %178, %176, %180 : vector<32x32xi1>, vector<32x32xf32>
    %182 = arith.maximumf %174, %181 : vector<32x32xf32>
    %183 = vector.extract_strided_slice %115 {offsets = [256, 0], sizes = [32, 32], strides = [1, 1]} : vector<288x32xf32> to vector<32x32xf32>
    %184 = arith.addf %183, %119 : vector<32x32xf32>
    %cst_82 = arith.constant 0.000000e+00 : f32
    %185 = vector.broadcast %cst_82 : f32 to vector<32x32xf32>
    %186 = arith.cmpf oge, %184, %185 : vector<32x32xf32>
    %cst_83 = arith.constant 2.000000e-01 : f32
    %187 = vector.broadcast %cst_83 : f32 to vector<32x32xf32>
    %188 = arith.mulf %187, %184 : vector<32x32xf32>
    %189 = arith.select %186, %184, %188 : vector<32x32xi1>, vector<32x32xf32>
    %190 = arith.maximumf %182, %189 : vector<32x32xf32>
    %c0_84 = arith.constant 0 : index
    %c6 = arith.constant 6 : index
    %c0_85 = arith.constant 0 : index
    %c0_86 = arith.constant 0 : index
    %191 = vector.load %arg6[%c0_84, %c6, %c0_85, %c0_86] : memref<1x8x32x32xbf16, #tpu.memory_space<vmem>>, vector<1x1x32x32xbf16>
    %192 = vector.shape_cast %191 : vector<1x1x32x32xbf16> to vector<32x32xbf16>
    %193 = arith.truncf %105 : vector<32x32xf32> to vector<32x32xbf16>
    %cst_87 = arith.constant dense<0.000000e+00> : vector<32x32xf32>
    %194 = tpu.matmul %193, %192, %cst_87 {dimension_numbers = #tpu.dot_dimension_numbers<[1], [0], [0], [1], [0, 0, 1, 1], [], []>} : vector<32x32xbf16>, vector<32x32xbf16>, vector<32x32xf32> -> vector<32x32xf32>
    %c0_88 = arith.constant 0 : index
    %c7 = arith.constant 7 : index
    %c0_89 = arith.constant 0 : index
    %c0_90 = arith.constant 0 : index
    %195 = vector.load %arg6[%c0_88, %c7, %c0_89, %c0_90] : memref<1x8x32x32xbf16, #tpu.memory_space<vmem>>, vector<1x1x32x32xbf16>
    %196 = vector.shape_cast %195 : vector<1x1x32x32xbf16> to vector<32x32xbf16>
    %197 = arith.truncf %190 : vector<32x32xf32> to vector<32x32xbf16>
    %cst_91 = arith.constant dense<0.000000e+00> : vector<32x32xf32>
    %198 = tpu.matmul %197, %196, %cst_91 {dimension_numbers = #tpu.dot_dimension_numbers<[1], [0], [0], [1], [0, 0, 1, 1], [], []>} : vector<32x32xbf16>, vector<32x32xbf16>, vector<32x32xf32> -> vector<32x32xf32>
    %199 = arith.addf %194, %198 : vector<32x32xf32>
    %c0_92 = arith.constant 0 : index
    %c5_93 = arith.constant 5 : index
    %c0_94 = arith.constant 0 : index
    %200 = vector.load %arg10[%c0_92, %c5_93, %c0_94] : memref<1x11x32xf32, #tpu.memory_space<vmem>>, vector<1x1x32xf32>
    %201 = vector.shape_cast %200 : vector<1x1x32xf32> to vector<1x32xf32>
    %202 = vector.broadcast %201 : vector<1x32xf32> to vector<32x32xf32>
    %203 = arith.addf %199, %202 : vector<32x32xf32>
    %204 = arith.addf %3, %203 : vector<32x32xf32>
    %c0_95 = arith.constant 0 : index
    %c7_96 = arith.constant 7 : index
    %c0_97 = arith.constant 0 : index
    %205 = vector.load %arg10[%c0_95, %c7_96, %c0_97] : memref<1x11x32xf32, #tpu.memory_space<vmem>>, vector<1x1x32xf32>
    %206 = vector.shape_cast %205 : vector<1x1x32xf32> to vector<1x32xf32>
    %c0_98 = arith.constant 0 : index
    %c8 = arith.constant 8 : index
    %c0_99 = arith.constant 0 : index
    %207 = vector.load %arg10[%c0_98, %c8, %c0_99] : memref<1x11x32xf32, #tpu.memory_space<vmem>>, vector<1x1x32xf32>
    %208 = vector.shape_cast %207 : vector<1x1x32xf32> to vector<1x32xf32>
    %cst_100 = arith.constant dense<0.000000e+00> : vector<32xf32>
    %209 = vector.multi_reduction <add>, %204, %cst_100 [1] : vector<32x32xf32> to vector<32xf32>
    %210 = vector.shape_cast %209 : vector<32xf32> to vector<32x1xf32>
    %cst_101 = arith.constant 3.200000e+01 : f32
    %211 = vector.broadcast %cst_101 : f32 to vector<32x1xf32>
    %212 = arith.divf %210, %211 : vector<32x1xf32>
    %213 = vector.broadcast %212 : vector<32x1xf32> to vector<32x32xf32>
    %214 = arith.subf %204, %213 : vector<32x32xf32>
    %215 = arith.mulf %214, %214 : vector<32x32xf32>
    %cst_102 = arith.constant dense<0.000000e+00> : vector<32xf32>
    %216 = vector.multi_reduction <add>, %215, %cst_102 [1] : vector<32x32xf32> to vector<32xf32>
    %217 = vector.shape_cast %216 : vector<32xf32> to vector<32x1xf32>
    %cst_103 = arith.constant 3.200000e+01 : f32
    %218 = vector.broadcast %cst_103 : f32 to vector<32x1xf32>
    %219 = arith.divf %217, %218 : vector<32x1xf32>
    %220 = vector.broadcast %212 : vector<32x1xf32> to vector<32x32xf32>
    %221 = arith.subf %204, %220 : vector<32x32xf32>
    %cst_104 = arith.constant 9.99999974E-6 : f32
    %222 = vector.broadcast %cst_104 : f32 to vector<32x1xf32>
    %223 = arith.addf %219, %222 : vector<32x1xf32>
    %224 = math.rsqrt %223 : vector<32x1xf32>
    %225 = vector.broadcast %224 : vector<32x1xf32> to vector<32x32xf32>
    %226 = arith.mulf %221, %225 : vector<32x32xf32>
    %227 = vector.broadcast %206 : vector<1x32xf32> to vector<32x32xf32>
    %228 = arith.mulf %226, %227 : vector<32x32xf32>
    %229 = vector.broadcast %208 : vector<1x32xf32> to vector<32x32xf32>
    %230 = arith.addf %228, %229 : vector<32x32xf32>
    %c0_105 = arith.constant 0 : index
    %c0_106 = arith.constant 0 : index
    %c0_107 = arith.constant 0 : index
    %231 = vector.load %arg7[%c0_105, %c0_106, %c0_107] : memref<1x32x64xbf16, #tpu.memory_space<vmem>>, vector<1x32x64xbf16>
    %232 = vector.shape_cast %231 : vector<1x32x64xbf16> to vector<32x64xbf16>
    %233 = arith.truncf %230 : vector<32x32xf32> to vector<32x32xbf16>
    %cst_108 = arith.constant dense<0.000000e+00> : vector<32x64xf32>
    %234 = tpu.matmul %233, %232, %cst_108 {dimension_numbers = #tpu.dot_dimension_numbers<[1], [0], [0], [1], [0, 0, 1, 1], [], []>} : vector<32x32xbf16>, vector<32x64xbf16>, vector<32x64xf32> -> vector<32x64xf32>
    %c0_109 = arith.constant 0 : index
    %c0_110 = arith.constant 0 : index
    %c0_111 = arith.constant 0 : index
    %235 = vector.load %arg9[%c0_109, %c0_110, %c0_111] : memref<1x1x64xf32, #tpu.memory_space<vmem>>, vector<1x1x64xf32>
    %236 = vector.shape_cast %235 : vector<1x1x64xf32> to vector<1x64xf32>
    %237 = vector.broadcast %236 : vector<1x64xf32> to vector<32x64xf32>
    %238 = arith.addf %234, %237 : vector<32x64xf32>
    %cst_112 = arith.constant 0.000000e+00 : f32
    %239 = vector.broadcast %cst_112 : f32 to vector<32x64xf32>
    %240 = arith.maximumf %238, %239 : vector<32x64xf32>
    %c0_113 = arith.constant 0 : index
    %c0_114 = arith.constant 0 : index
    %c0_115 = arith.constant 0 : index
    %241 = vector.load %arg8[%c0_113, %c0_114, %c0_115] : memref<1x64x32xbf16, #tpu.memory_space<vmem>>, vector<1x64x32xbf16>
    %242 = vector.shape_cast %241 : vector<1x64x32xbf16> to vector<64x32xbf16>
    %243 = arith.truncf %240 : vector<32x64xf32> to vector<32x64xbf16>
    %cst_116 = arith.constant dense<0.000000e+00> : vector<32x32xf32>
    %244 = tpu.matmul %243, %242, %cst_116 {dimension_numbers = #tpu.dot_dimension_numbers<[1], [0], [0], [1], [0, 0, 1, 1], [], []>} : vector<32x64xbf16>, vector<64x32xbf16>, vector<32x32xf32> -> vector<32x32xf32>
    %c0_117 = arith.constant 0 : index
    %c6_118 = arith.constant 6 : index
    %c0_119 = arith.constant 0 : index
    %245 = vector.load %arg10[%c0_117, %c6_118, %c0_119] : memref<1x11x32xf32, #tpu.memory_space<vmem>>, vector<1x1x32xf32>
    %246 = vector.shape_cast %245 : vector<1x1x32xf32> to vector<1x32xf32>
    %247 = vector.broadcast %246 : vector<1x32xf32> to vector<32x32xf32>
    %248 = arith.addf %244, %247 : vector<32x32xf32>
    %249 = arith.addf %230, %248 : vector<32x32xf32>
    %c0_120 = arith.constant 0 : index
    %c9 = arith.constant 9 : index
    %c0_121 = arith.constant 0 : index
    %250 = vector.load %arg10[%c0_120, %c9, %c0_121] : memref<1x11x32xf32, #tpu.memory_space<vmem>>, vector<1x1x32xf32>
    %251 = vector.shape_cast %250 : vector<1x1x32xf32> to vector<1x32xf32>
    %c0_122 = arith.constant 0 : index
    %c10 = arith.constant 10 : index
    %c0_123 = arith.constant 0 : index
    %252 = vector.load %arg10[%c0_122, %c10, %c0_123] : memref<1x11x32xf32, #tpu.memory_space<vmem>>, vector<1x1x32xf32>
    %253 = vector.shape_cast %252 : vector<1x1x32xf32> to vector<1x32xf32>
    %cst_124 = arith.constant dense<0.000000e+00> : vector<32xf32>
    %254 = vector.multi_reduction <add>, %249, %cst_124 [1] : vector<32x32xf32> to vector<32xf32>
    %255 = vector.shape_cast %254 : vector<32xf32> to vector<32x1xf32>
    %cst_125 = arith.constant 3.200000e+01 : f32
    %256 = vector.broadcast %cst_125 : f32 to vector<32x1xf32>
    %257 = arith.divf %255, %256 : vector<32x1xf32>
    %258 = vector.broadcast %257 : vector<32x1xf32> to vector<32x32xf32>
    %259 = arith.subf %249, %258 : vector<32x32xf32>
    %260 = arith.mulf %259, %259 : vector<32x32xf32>
    %cst_126 = arith.constant dense<0.000000e+00> : vector<32xf32>
    %261 = vector.multi_reduction <add>, %260, %cst_126 [1] : vector<32x32xf32> to vector<32xf32>
    %262 = vector.shape_cast %261 : vector<32xf32> to vector<32x1xf32>
    %cst_127 = arith.constant 3.200000e+01 : f32
    %263 = vector.broadcast %cst_127 : f32 to vector<32x1xf32>
    %264 = arith.divf %262, %263 : vector<32x1xf32>
    %265 = vector.broadcast %257 : vector<32x1xf32> to vector<32x32xf32>
    %266 = arith.subf %249, %265 : vector<32x32xf32>
    %cst_128 = arith.constant 9.99999974E-6 : f32
    %267 = vector.broadcast %cst_128 : f32 to vector<32x1xf32>
    %268 = arith.addf %264, %267 : vector<32x1xf32>
    %269 = math.rsqrt %268 : vector<32x1xf32>
    %270 = vector.broadcast %269 : vector<32x1xf32> to vector<32x32xf32>
    %271 = arith.mulf %266, %270 : vector<32x32xf32>
    %272 = vector.broadcast %251 : vector<1x32xf32> to vector<32x32xf32>
    %273 = arith.mulf %271, %272 : vector<32x32xf32>
    %274 = vector.broadcast %253 : vector<1x32xf32> to vector<32x32xf32>
    %275 = arith.addf %273, %274 : vector<32x32xf32>
    %c0_129 = arith.constant 0 : index
    %c0_130 = arith.constant 0 : index
    %276 = vector.load %arg12[%c0_129, %c0_130] : memref<32x32xf32, #tpu.memory_space<vmem>>, vector<32x32xf32>
    tpu.vector_store %arg12[%c0_129, %c0_130], %275 {strides = array<i32>} : memref<32x32xf32, #tpu.memory_space<vmem>>, vector<32x32xf32>,
    %c1_i32 = arith.constant 1 : i32
    %277 = arith.cmpi eq, %arg0, %c1_i32 : i32
    %278 = arith.extui %277 : i1 to i32
    %c0_i32_131 = arith.constant 0 : i32
    %279 = arith.cmpi ne, %278, %c0_i32_131 : i32
    scf.if %279 {
      %c0_132 = arith.constant 0 : index
      %c0_133 = arith.constant 0 : index
      %280 = vector.load %arg11[%c0_132, %c0_133] : memref<2x32xf32, #tpu.memory_space<vmem>>, vector<1x32xf32>
      %c1_134 = arith.constant 1 : index
      %c0_135 = arith.constant 0 : index
      %281 = vector.load %arg11[%c1_134, %c0_135] : memref<2x32xf32, #tpu.memory_space<vmem>>, vector<1x32xf32>
      %cst_136 = arith.constant dense<0.000000e+00> : vector<32xf32>
      %282 = vector.multi_reduction <add>, %275, %cst_136 [1] : vector<32x32xf32> to vector<32xf32>
      %283 = vector.shape_cast %282 : vector<32xf32> to vector<32x1xf32>
      %cst_137 = arith.constant 3.200000e+01 : f32
      %284 = vector.broadcast %cst_137 : f32 to vector<32x1xf32>
      %285 = arith.divf %283, %284 : vector<32x1xf32>
      %286 = vector.broadcast %285 : vector<32x1xf32> to vector<32x32xf32>
      %287 = arith.subf %275, %286 : vector<32x32xf32>
      %288 = arith.mulf %287, %287 : vector<32x32xf32>
      %cst_138 = arith.constant dense<0.000000e+00> : vector<32xf32>
      %289 = vector.multi_reduction <add>, %288, %cst_138 [1] : vector<32x32xf32> to vector<32xf32>
      %290 = vector.shape_cast %289 : vector<32xf32> to vector<32x1xf32>
      %cst_139 = arith.constant 3.200000e+01 : f32
      %291 = vector.broadcast %cst_139 : f32 to vector<32x1xf32>
      %292 = arith.divf %290, %291 : vector<32x1xf32>
      %293 = vector.broadcast %285 : vector<32x1xf32> to vector<32x32xf32>
      %294 = arith.subf %275, %293 : vector<32x32xf32>
      %cst_140 = arith.constant 9.99999974E-6 : f32
      %295 = vector.broadcast %cst_140 : f32 to vector<32x1xf32>
      %296 = arith.addf %292, %295 : vector<32x1xf32>
      %297 = math.rsqrt %296 : vector<32x1xf32>
      %298 = vector.broadcast %297 : vector<32x1xf32> to vector<32x32xf32>
      %299 = arith.mulf %294, %298 : vector<32x32xf32>
      %300 = vector.broadcast %280 : vector<1x32xf32> to vector<32x32xf32>
      %301 = arith.mulf %299, %300 : vector<32x32xf32>
      %302 = vector.broadcast %281 : vector<1x32xf32> to vector<32x32xf32>
      %303 = arith.addf %301, %302 : vector<32x32xf32>
      %c0_141 = arith.constant 0 : index
      %c0_142 = arith.constant 0 : index
      %304 = vector.load %arg12[%c0_141, %c0_142] : memref<32x32xf32, #tpu.memory_space<vmem>>, vector<32x32xf32>
      tpu.vector_store %arg12[%c0_141, %c0_142], %303 {strides = array<i32>} : memref<32x32xf32, #tpu.memory_space<vmem>>, vector<32x32xf32>,
    } else {
    }
    return
  }
  func.func @transform_0(%arg0: i32) -> (i32, i32) {
    %c0_i32 = arith.constant 0 : i32
    %c0_i32_0 = arith.constant 0 : i32
    %c0_i32_1 = arith.constant 0 : i32
    return %c0_i32, %c0_i32_0 : i32, i32
  }
  func.func @transform_1(%arg0: i32) -> (i32, i32) {
    %c0_i32 = arith.constant 0 : i32
    %c0_i32_0 = arith.constant 0 : i32
    %c0_i32_1 = arith.constant 0 : i32
    return %c0_i32, %c0_i32_0 : i32, i32
  }
  func.func @transform_2(%arg0: i32) -> (i32, i32) {
    %c0_i32 = arith.constant 0 : i32
    %c0_i32_0 = arith.constant 0 : i32
    %c0_i32_1 = arith.constant 0 : i32
    return %c0_i32, %c0_i32_0 : i32, i32
  }
  func.func @transform_3(%arg0: i32) -> (i32, i32) {
    %c0_i32 = arith.constant 0 : i32
    %c0_i32_0 = arith.constant 0 : i32
    %c0_i32_1 = arith.constant 0 : i32
    return %c0_i32, %c0_i32_0 : i32, i32
  }
  func.func @transform_4(%arg0: i32) -> (i32, i32) {
    %c0_i32 = arith.constant 0 : i32
    %c0_i32_0 = arith.constant 0 : i32
    %c0_i32_1 = arith.constant 0 : i32
    return %c0_i32, %c0_i32_0 : i32, i32
  }
  func.func @transform_5(%arg0: i32) -> (i32, i32, i32, i32) {
    %c0_i32 = arith.constant 0 : i32
    %c0_i32_0 = arith.constant 0 : i32
    %c0_i32_1 = arith.constant 0 : i32
    %c0_i32_2 = arith.constant 0 : i32
    return %arg0, %c0_i32, %c0_i32_0, %c0_i32_1 : i32, i32, i32, i32
  }
  func.func @transform_6(%arg0: i32) -> (i32, i32, i32) {
    %c0_i32 = arith.constant 0 : i32
    %c0_i32_0 = arith.constant 0 : i32
    %c0_i32_1 = arith.constant 0 : i32
    return %arg0, %c0_i32, %c0_i32_0 : i32, i32, i32
  }
  func.func @transform_7(%arg0: i32) -> (i32, i32, i32) {
    %c0_i32 = arith.constant 0 : i32
    %c0_i32_0 = arith.constant 0 : i32
    %c0_i32_1 = arith.constant 0 : i32
    return %arg0, %c0_i32, %c0_i32_0 : i32, i32, i32
  }
  func.func @transform_8(%arg0: i32) -> (i32, i32, i32) {
    %c0_i32 = arith.constant 0 : i32
    %c0_i32_0 = arith.constant 0 : i32
    %c0_i32_1 = arith.constant 0 : i32
    return %arg0, %c0_i32, %c0_i32_0 : i32, i32, i32
  }
  func.func @transform_9(%arg0: i32) -> (i32, i32, i32) {
    %c0_i32 = arith.constant 0 : i32
    %c0_i32_0 = arith.constant 0 : i32
    %c0_i32_1 = arith.constant 0 : i32
    return %arg0, %c0_i32, %c0_i32_0 : i32, i32, i32
  }
  func.func @transform_10(%arg0: i32) -> (i32, i32) {
    %c0_i32 = arith.constant 0 : i32
    %c0_i32_0 = arith.constant 0 : i32
    %c0_i32_1 = arith.constant 0 : i32
    return %c0_i32, %c0_i32_0 : i32, i32
  }
  func.func @transform_11(%arg0: i32) -> (i32, i32) {
    %c0_i32 = arith.constant 0 : i32
    %c0_i32_0 = arith.constant 0 : i32
    %c0_i32_1 = arith.constant 0 : i32
    return %c0_i32, %c0_i32_0 : i32, i32
  }
}

module attributes {stable_mosaic.version = 11 : i64} {
  func.func @_decoder_stack_kernel(%arg0: i32, %arg1: memref<32x32xf32, #tpu.memory_space<vmem>>, %arg2: memref<32x32xf32, #tpu.memory_space<vmem>>, %arg3: memref<32x32xf32, #tpu.memory_space<vmem>>, %arg4: memref<288x32xf32, #tpu.memory_space<vmem>>, %arg5: memref<32x32xf32, #tpu.memory_space<vmem>>, %arg6: memref<1x16x32x32xbf16, #tpu.memory_space<vmem>>, %arg7: memref<1x32x64xbf16, #tpu.memory_space<vmem>>, %arg8: memref<1x64x32xbf16, #tpu.memory_space<vmem>>, %arg9: memref<1x1x64xf32, #tpu.memory_space<vmem>>, %arg10: memref<1x19x32xf32, #tpu.memory_space<vmem>>, %arg11: memref<2x32xf32, #tpu.memory_space<vmem>>, %arg12: memref<32x32xf32, #tpu.memory_space<vmem>>) attributes {dimension_semantics = [#tpu.dimension_semantics<arbitrary>], iteration_bounds = array<i64: 2>, scalar_prefetch = 0 : i64, scratch_operands = 0 : i64, tpu.core_type = #tpu.core_type<tc>, window_params = [{pipeline_mode = #tpu.pipeline_mode<synchronous>, transform_indices = @transform_0, window_bounds = array<i64: 32, 32>}, {pipeline_mode = #tpu.pipeline_mode<synchronous>, transform_indices = @transform_1, window_bounds = array<i64: 32, 32>}, {pipeline_mode = #tpu.pipeline_mode<synchronous>, transform_indices = @transform_2, window_bounds = array<i64: 32, 32>}, {pipeline_mode = #tpu.pipeline_mode<synchronous>, transform_indices = @transform_3, window_bounds = array<i64: 288, 32>}, {pipeline_mode = #tpu.pipeline_mode<synchronous>, transform_indices = @transform_4, window_bounds = array<i64: 32, 32>}, {transform_indices = @transform_5, window_bounds = array<i64: 1, 16, 32, 32>}, {transform_indices = @transform_6, window_bounds = array<i64: 1, 32, 64>}, {transform_indices = @transform_7, window_bounds = array<i64: 1, 64, 32>}, {transform_indices = @transform_8, window_bounds = array<i64: 1, 1, 64>}, {transform_indices = @transform_9, window_bounds = array<i64: 1, 19, 32>}, {pipeline_mode = #tpu.pipeline_mode<synchronous>, transform_indices = @transform_10, window_bounds = array<i64: 2, 32>}, {pipeline_mode = #tpu.pipeline_mode<synchronous>, transform_indices = @transform_11, window_bounds = array<i64: 32, 32>}]} {
    %c0_i32 = arith.constant 0 : i32
    %0 = arith.cmpi eq, %arg0, %c0_i32 : i32
    %1 = arith.extui %0 : i1 to i32
    %c0_i32_0 = arith.constant 0 : i32
    %2 = arith.cmpi ne, %1, %c0_i32_0 : i32
    scf.if %2 {
      %c0_228 = arith.constant 0 : index
      %c0_229 = arith.constant 0 : index
      %503 = vector.load %arg1[%c0_228, %c0_229] : memref<32x32xf32, #tpu.memory_space<vmem>>, vector<32x32xf32>
      %c0_230 = arith.constant 0 : index
      %c0_231 = arith.constant 0 : index
      %504 = vector.load %arg12[%c0_230, %c0_231] : memref<32x32xf32, #tpu.memory_space<vmem>>, vector<32x32xf32>
      tpu.vector_store %arg12[%c0_230, %c0_231], %503 {strides = array<i32>} : memref<32x32xf32, #tpu.memory_space<vmem>>, vector<32x32xf32>,
    } else {
    }
    %c0 = arith.constant 0 : index
    %c0_1 = arith.constant 0 : index
    %3 = vector.load %arg12[%c0, %c0_1] : memref<32x32xf32, #tpu.memory_space<vmem>>, vector<32x32xf32>
    %c0_2 = arith.constant 0 : index
    %c0_3 = arith.constant 0 : index
    %4 = vector.load %arg2[%c0_2, %c0_3] : memref<32x32xf32, #tpu.memory_space<vmem>>, vector<32x32xf32>
    %c0_4 = arith.constant 0 : index
    %c0_5 = arith.constant 0 : index
    %5 = vector.load %arg3[%c0_4, %c0_5] : memref<32x32xf32, #tpu.memory_space<vmem>>, vector<32x32xf32>
    %c0_6 = arith.constant 0 : index
    %c0_7 = arith.constant 0 : index
    %6 = vector.load %arg5[%c0_6, %c0_7] : memref<32x32xf32, #tpu.memory_space<vmem>>, vector<32x32xf32>
    %c0_8 = arith.constant 0 : index
    %c0_9 = arith.constant 0 : index
    %7 = vector.load %arg4[%c0_8, %c0_9] : memref<288x32xf32, #tpu.memory_space<vmem>>, vector<288x32xf32>
    %8 = arith.addf %3, %5 : vector<32x32xf32>
    %9 = arith.addf %3, %5 : vector<32x32xf32>
    %c0_10 = arith.constant 0 : index
    %c0_11 = arith.constant 0 : index
    %c0_12 = arith.constant 0 : index
    %c0_13 = arith.constant 0 : index
    %10 = vector.load %arg6[%c0_10, %c0_11, %c0_12, %c0_13] : memref<1x16x32x32xbf16, #tpu.memory_space<vmem>>, vector<1x1x32x32xbf16>
    %11 = vector.shape_cast %10 : vector<1x1x32x32xbf16> to vector<32x32xbf16>
    %c0_14 = arith.constant 0 : index
    %c1 = arith.constant 1 : index
    %c0_15 = arith.constant 0 : index
    %c0_16 = arith.constant 0 : index
    %12 = vector.load %arg6[%c0_14, %c1, %c0_15, %c0_16] : memref<1x16x32x32xbf16, #tpu.memory_space<vmem>>, vector<1x1x32x32xbf16>
    %13 = vector.shape_cast %12 : vector<1x1x32x32xbf16> to vector<32x32xbf16>
    %c0_17 = arith.constant 0 : index
    %c2 = arith.constant 2 : index
    %c0_18 = arith.constant 0 : index
    %c0_19 = arith.constant 0 : index
    %14 = vector.load %arg6[%c0_17, %c2, %c0_18, %c0_19] : memref<1x16x32x32xbf16, #tpu.memory_space<vmem>>, vector<1x1x32x32xbf16>
    %15 = vector.shape_cast %14 : vector<1x1x32x32xbf16> to vector<32x32xbf16>
    %c0_20 = arith.constant 0 : index
    %c3 = arith.constant 3 : index
    %c0_21 = arith.constant 0 : index
    %c0_22 = arith.constant 0 : index
    %16 = vector.load %arg6[%c0_20, %c3, %c0_21, %c0_22] : memref<1x16x32x32xbf16, #tpu.memory_space<vmem>>, vector<1x1x32x32xbf16>
    %17 = vector.shape_cast %16 : vector<1x1x32x32xbf16> to vector<32x32xbf16>
    %c0_23 = arith.constant 0 : index
    %c0_24 = arith.constant 0 : index
    %c0_25 = arith.constant 0 : index
    %18 = vector.load %arg10[%c0_23, %c0_24, %c0_25] : memref<1x19x32xf32, #tpu.memory_space<vmem>>, vector<1x1x32xf32>
    %19 = vector.shape_cast %18 : vector<1x1x32xf32> to vector<1x32xf32>
    %c0_26 = arith.constant 0 : index
    %c1_27 = arith.constant 1 : index
    %c0_28 = arith.constant 0 : index
    %20 = vector.load %arg10[%c0_26, %c1_27, %c0_28] : memref<1x19x32xf32, #tpu.memory_space<vmem>>, vector<1x1x32xf32>
    %21 = vector.shape_cast %20 : vector<1x1x32xf32> to vector<1x32xf32>
    %c0_29 = arith.constant 0 : index
    %c2_30 = arith.constant 2 : index
    %c0_31 = arith.constant 0 : index
    %22 = vector.load %arg10[%c0_29, %c2_30, %c0_31] : memref<1x19x32xf32, #tpu.memory_space<vmem>>, vector<1x1x32xf32>
    %23 = vector.shape_cast %22 : vector<1x1x32xf32> to vector<1x32xf32>
    %c0_32 = arith.constant 0 : index
    %c3_33 = arith.constant 3 : index
    %c0_34 = arith.constant 0 : index
    %24 = vector.load %arg10[%c0_32, %c3_33, %c0_34] : memref<1x19x32xf32, #tpu.memory_space<vmem>>, vector<1x1x32xf32>
    %25 = vector.shape_cast %24 : vector<1x1x32xf32> to vector<1x32xf32>
    %26 = arith.truncf %8 : vector<32x32xf32> to vector<32x32xbf16>
    %cst = arith.constant dense<0.000000e+00> : vector<32x32xf32>
    %27 = tpu.matmul %26, %11, %cst {dimension_numbers = #tpu.dot_dimension_numbers<[1], [0], [0], [1], [0, 0, 1, 1], [], []>} : vector<32x32xbf16>, vector<32x32xbf16>, vector<32x32xf32> -> vector<32x32xf32>
    %28 = vector.broadcast %19 : vector<1x32xf32> to vector<32x32xf32>
    %29 = arith.addf %27, %28 : vector<32x32xf32>
    %30 = arith.truncf %9 : vector<32x32xf32> to vector<32x32xbf16>
    %cst_35 = arith.constant dense<0.000000e+00> : vector<32x32xf32>
    %31 = tpu.matmul %30, %13, %cst_35 {dimension_numbers = #tpu.dot_dimension_numbers<[1], [0], [0], [1], [0, 0, 1, 1], [], []>} : vector<32x32xbf16>, vector<32x32xbf16>, vector<32x32xf32> -> vector<32x32xf32>
    %32 = vector.broadcast %21 : vector<1x32xf32> to vector<32x32xf32>
    %33 = arith.addf %31, %32 : vector<32x32xf32>
    %34 = arith.truncf %3 : vector<32x32xf32> to vector<32x32xbf16>
    %cst_36 = arith.constant dense<0.000000e+00> : vector<32x32xf32>
    %35 = tpu.matmul %34, %15, %cst_36 {dimension_numbers = #tpu.dot_dimension_numbers<[1], [0], [0], [1], [0, 0, 1, 1], [], []>} : vector<32x32xbf16>, vector<32x32xbf16>, vector<32x32xf32> -> vector<32x32xf32>
    %36 = vector.broadcast %23 : vector<1x32xf32> to vector<32x32xf32>
    %37 = arith.addf %35, %36 : vector<32x32xf32>
    %38 = vector.extract_strided_slice %29 {offsets = [0, 0], sizes = [32, 8], strides = [1, 1]} : vector<32x32xf32> to vector<32x8xf32>
    %39 = vector.extract_strided_slice %33 {offsets = [0, 0], sizes = [32, 8], strides = [1, 1]} : vector<32x32xf32> to vector<32x8xf32>
    %40 = vector.extract_strided_slice %37 {offsets = [0, 0], sizes = [32, 8], strides = [1, 1]} : vector<32x32xf32> to vector<32x8xf32>
    %cst_37 = arith.constant dense<0.000000e+00> : vector<32x32xf32>
    %41 = tpu.matmul %38, %39, %cst_37 {dimension_numbers = #tpu.dot_dimension_numbers<[1], [1], [0], [0], [0, 0, 1, 0], [], []>} : vector<32x8xf32>, vector<32x8xf32>, vector<32x32xf32> -> vector<32x32xf32>
    %42 = arith.addf %41, %6 : vector<32x32xf32>
    %cst_38 = arith.constant dense<0xFF800000> : vector<32xf32>
    %43 = vector.multi_reduction <maximumf>, %42, %cst_38 [1] : vector<32x32xf32> to vector<32xf32>
    %44 = vector.shape_cast %43 : vector<32xf32> to vector<32x1xf32>
    %45 = vector.broadcast %44 : vector<32x1xf32> to vector<32x32xf32>
    %46 = arith.subf %42, %45 : vector<32x32xf32>
    %47 = math.exp %46 : vector<32x32xf32>
    %cst_39 = arith.constant dense<0.000000e+00> : vector<32xf32>
    %48 = vector.multi_reduction <add>, %47, %cst_39 [1] : vector<32x32xf32> to vector<32xf32>
    %49 = vector.shape_cast %48 : vector<32xf32> to vector<32x1xf32>
    %50 = tpu.reciprocal %49 {approx = true} : vector<32x1xf32> -> vector<32x1xf32>
    %51 = vector.broadcast %50 : vector<32x1xf32> to vector<32x32xf32>
    %52 = arith.mulf %47, %51 : vector<32x32xf32>
    %cst_40 = arith.constant dense<0.000000e+00> : vector<32x8xf32>
    %53 = tpu.matmul %52, %40, %cst_40 {dimension_numbers = #tpu.dot_dimension_numbers<[1], [0], [0], [1], [0, 0, 1, 1], [], []>} : vector<32x32xf32>, vector<32x8xf32>, vector<32x8xf32> -> vector<32x8xf32>
    %54 = vector.extract_strided_slice %29 {offsets = [0, 8], sizes = [32, 8], strides = [1, 1]} : vector<32x32xf32> to vector<32x8xf32>
    %55 = vector.extract_strided_slice %33 {offsets = [0, 8], sizes = [32, 8], strides = [1, 1]} : vector<32x32xf32> to vector<32x8xf32>
    %56 = vector.extract_strided_slice %37 {offsets = [0, 8], sizes = [32, 8], strides = [1, 1]} : vector<32x32xf32> to vector<32x8xf32>
    %cst_41 = arith.constant dense<0.000000e+00> : vector<32x32xf32>
    %57 = tpu.matmul %54, %55, %cst_41 {dimension_numbers = #tpu.dot_dimension_numbers<[1], [1], [0], [0], [0, 0, 1, 0], [], []>} : vector<32x8xf32>, vector<32x8xf32>, vector<32x32xf32> -> vector<32x32xf32>
    %58 = arith.addf %57, %6 : vector<32x32xf32>
    %cst_42 = arith.constant dense<0xFF800000> : vector<32xf32>
    %59 = vector.multi_reduction <maximumf>, %58, %cst_42 [1] : vector<32x32xf32> to vector<32xf32>
    %60 = vector.shape_cast %59 : vector<32xf32> to vector<32x1xf32>
    %61 = vector.broadcast %60 : vector<32x1xf32> to vector<32x32xf32>
    %62 = arith.subf %58, %61 : vector<32x32xf32>
    %63 = math.exp %62 : vector<32x32xf32>
    %cst_43 = arith.constant dense<0.000000e+00> : vector<32xf32>
    %64 = vector.multi_reduction <add>, %63, %cst_43 [1] : vector<32x32xf32> to vector<32xf32>
    %65 = vector.shape_cast %64 : vector<32xf32> to vector<32x1xf32>
    %66 = tpu.reciprocal %65 {approx = true} : vector<32x1xf32> -> vector<32x1xf32>
    %67 = vector.broadcast %66 : vector<32x1xf32> to vector<32x32xf32>
    %68 = arith.mulf %63, %67 : vector<32x32xf32>
    %cst_44 = arith.constant dense<0.000000e+00> : vector<32x8xf32>
    %69 = tpu.matmul %68, %56, %cst_44 {dimension_numbers = #tpu.dot_dimension_numbers<[1], [0], [0], [1], [0, 0, 1, 1], [], []>} : vector<32x32xf32>, vector<32x8xf32>, vector<32x8xf32> -> vector<32x8xf32>
    %70 = vector.extract_strided_slice %29 {offsets = [0, 16], sizes = [32, 8], strides = [1, 1]} : vector<32x32xf32> to vector<32x8xf32>
    %71 = vector.extract_strided_slice %33 {offsets = [0, 16], sizes = [32, 8], strides = [1, 1]} : vector<32x32xf32> to vector<32x8xf32>
    %72 = vector.extract_strided_slice %37 {offsets = [0, 16], sizes = [32, 8], strides = [1, 1]} : vector<32x32xf32> to vector<32x8xf32>
    %cst_45 = arith.constant dense<0.000000e+00> : vector<32x32xf32>
    %73 = tpu.matmul %70, %71, %cst_45 {dimension_numbers = #tpu.dot_dimension_numbers<[1], [1], [0], [0], [0, 0, 1, 0], [], []>} : vector<32x8xf32>, vector<32x8xf32>, vector<32x32xf32> -> vector<32x32xf32>
    %74 = arith.addf %73, %6 : vector<32x32xf32>
    %cst_46 = arith.constant dense<0xFF800000> : vector<32xf32>
    %75 = vector.multi_reduction <maximumf>, %74, %cst_46 [1] : vector<32x32xf32> to vector<32xf32>
    %76 = vector.shape_cast %75 : vector<32xf32> to vector<32x1xf32>
    %77 = vector.broadcast %76 : vector<32x1xf32> to vector<32x32xf32>
    %78 = arith.subf %74, %77 : vector<32x32xf32>
    %79 = math.exp %78 : vector<32x32xf32>
    %cst_47 = arith.constant dense<0.000000e+00> : vector<32xf32>
    %80 = vector.multi_reduction <add>, %79, %cst_47 [1] : vector<32x32xf32> to vector<32xf32>
    %81 = vector.shape_cast %80 : vector<32xf32> to vector<32x1xf32>
    %82 = tpu.reciprocal %81 {approx = true} : vector<32x1xf32> -> vector<32x1xf32>
    %83 = vector.broadcast %82 : vector<32x1xf32> to vector<32x32xf32>
    %84 = arith.mulf %79, %83 : vector<32x32xf32>
    %cst_48 = arith.constant dense<0.000000e+00> : vector<32x8xf32>
    %85 = tpu.matmul %84, %72, %cst_48 {dimension_numbers = #tpu.dot_dimension_numbers<[1], [0], [0], [1], [0, 0, 1, 1], [], []>} : vector<32x32xf32>, vector<32x8xf32>, vector<32x8xf32> -> vector<32x8xf32>
    %86 = vector.extract_strided_slice %29 {offsets = [0, 24], sizes = [32, 8], strides = [1, 1]} : vector<32x32xf32> to vector<32x8xf32>
    %87 = vector.extract_strided_slice %33 {offsets = [0, 24], sizes = [32, 8], strides = [1, 1]} : vector<32x32xf32> to vector<32x8xf32>
    %88 = vector.extract_strided_slice %37 {offsets = [0, 24], sizes = [32, 8], strides = [1, 1]} : vector<32x32xf32> to vector<32x8xf32>
    %cst_49 = arith.constant dense<0.000000e+00> : vector<32x32xf32>
    %89 = tpu.matmul %86, %87, %cst_49 {dimension_numbers = #tpu.dot_dimension_numbers<[1], [1], [0], [0], [0, 0, 1, 0], [], []>} : vector<32x8xf32>, vector<32x8xf32>, vector<32x32xf32> -> vector<32x32xf32>
    %90 = arith.addf %89, %6 : vector<32x32xf32>
    %cst_50 = arith.constant dense<0xFF800000> : vector<32xf32>
    %91 = vector.multi_reduction <maximumf>, %90, %cst_50 [1] : vector<32x32xf32> to vector<32xf32>
    %92 = vector.shape_cast %91 : vector<32xf32> to vector<32x1xf32>
    %93 = vector.broadcast %92 : vector<32x1xf32> to vector<32x32xf32>
    %94 = arith.subf %90, %93 : vector<32x32xf32>
    %95 = math.exp %94 : vector<32x32xf32>
    %cst_51 = arith.constant dense<0.000000e+00> : vector<32xf32>
    %96 = vector.multi_reduction <add>, %95, %cst_51 [1] : vector<32x32xf32> to vector<32xf32>
    %97 = vector.shape_cast %96 : vector<32xf32> to vector<32x1xf32>
    %98 = tpu.reciprocal %97 {approx = true} : vector<32x1xf32> -> vector<32x1xf32>
    %99 = vector.broadcast %98 : vector<32x1xf32> to vector<32x32xf32>
    %100 = arith.mulf %95, %99 : vector<32x32xf32>
    %cst_52 = arith.constant dense<0.000000e+00> : vector<32x8xf32>
    %101 = tpu.matmul %100, %88, %cst_52 {dimension_numbers = #tpu.dot_dimension_numbers<[1], [0], [0], [1], [0, 0, 1, 1], [], []>} : vector<32x32xf32>, vector<32x8xf32>, vector<32x8xf32> -> vector<32x8xf32>
    %102 = tpu.concatenate %53, %69, %85, %101 in 1 : vector<32x8xf32>, vector<32x8xf32>, vector<32x8xf32>, vector<32x8xf32> -> vector<32x32xf32>
    %103 = arith.truncf %102 : vector<32x32xf32> to vector<32x32xbf16>
    %cst_53 = arith.constant dense<0.000000e+00> : vector<32x32xf32>
    %104 = tpu.matmul %103, %17, %cst_53 {dimension_numbers = #tpu.dot_dimension_numbers<[1], [0], [0], [1], [0, 0, 1, 1], [], []>} : vector<32x32xbf16>, vector<32x32xbf16>, vector<32x32xf32> -> vector<32x32xf32>
    %105 = vector.broadcast %25 : vector<1x32xf32> to vector<32x32xf32>
    %106 = arith.addf %104, %105 : vector<32x32xf32>
    %cst_54 = arith.constant dense<0.000000e+00> : vector<288x32xf32>
    %107 = tpu.matmul %7, %3, %cst_54 {dimension_numbers = #tpu.dot_dimension_numbers<[1], [0], [0], [1], [0, 0, 1, 1], [], []>} : vector<288x32xf32>, vector<32x32xf32>, vector<288x32xf32> -> vector<288x32xf32>
    %c0_55 = arith.constant 0 : index
    %c8 = arith.constant 8 : index
    %c0_56 = arith.constant 0 : index
    %c0_57 = arith.constant 0 : index
    %108 = vector.load %arg6[%c0_55, %c8, %c0_56, %c0_57] : memref<1x16x32x32xbf16, #tpu.memory_space<vmem>>, vector<1x1x32x32xbf16>
    %109 = vector.shape_cast %108 : vector<1x1x32x32xbf16> to vector<32x32xbf16>
    %c0_58 = arith.constant 0 : index
    %c9 = arith.constant 9 : index
    %c0_59 = arith.constant 0 : index
    %c0_60 = arith.constant 0 : index
    %110 = vector.load %arg6[%c0_58, %c9, %c0_59, %c0_60] : memref<1x16x32x32xbf16, #tpu.memory_space<vmem>>, vector<1x1x32x32xbf16>
    %111 = vector.shape_cast %110 : vector<1x1x32x32xbf16> to vector<32x32xbf16>
    %c0_61 = arith.constant 0 : index
    %c4 = arith.constant 4 : index
    %c0_62 = arith.constant 0 : index
    %112 = vector.load %arg10[%c0_61, %c4, %c0_62] : memref<1x19x32xf32, #tpu.memory_space<vmem>>, vector<1x1x32xf32>
    %113 = vector.shape_cast %112 : vector<1x1x32xf32> to vector<1x32xf32>
    %114 = arith.truncf %107 : vector<288x32xf32> to vector<288x32xbf16>
    %cst_63 = arith.constant dense<0.000000e+00> : vector<288x32xf32>
    %115 = tpu.matmul %114, %109, %cst_63 {dimension_numbers = #tpu.dot_dimension_numbers<[1], [0], [0], [1], [0, 0, 1, 1], [], []>} : vector<288x32xbf16>, vector<32x32xbf16>, vector<288x32xf32> -> vector<288x32xf32>
    %116 = arith.truncf %3 : vector<32x32xf32> to vector<32x32xbf16>
    %cst_64 = arith.constant dense<0.000000e+00> : vector<32x32xf32>
    %117 = tpu.matmul %116, %111, %cst_64 {dimension_numbers = #tpu.dot_dimension_numbers<[1], [0], [0], [1], [0, 0, 1, 1], [], []>} : vector<32x32xbf16>, vector<32x32xbf16>, vector<32x32xf32> -> vector<32x32xf32>
    %118 = vector.broadcast %113 : vector<1x32xf32> to vector<32x32xf32>
    %119 = arith.addf %117, %118 : vector<32x32xf32>
    %120 = vector.extract_strided_slice %115 {offsets = [0, 0], sizes = [32, 32], strides = [1, 1]} : vector<288x32xf32> to vector<32x32xf32>
    %121 = arith.addf %120, %119 : vector<32x32xf32>
    %cst_65 = arith.constant 0.000000e+00 : f32
    %122 = vector.broadcast %cst_65 : f32 to vector<32x32xf32>
    %123 = arith.cmpf oge, %121, %122 : vector<32x32xf32>
    %cst_66 = arith.constant 2.000000e-01 : f32
    %124 = vector.broadcast %cst_66 : f32 to vector<32x32xf32>
    %125 = arith.mulf %124, %121 : vector<32x32xf32>
    %126 = arith.select %123, %121, %125 : vector<32x32xi1>, vector<32x32xf32>
    %127 = vector.extract_strided_slice %115 {offsets = [32, 0], sizes = [32, 32], strides = [1, 1]} : vector<288x32xf32> to vector<32x32xf32>
    %128 = arith.addf %127, %119 : vector<32x32xf32>
    %cst_67 = arith.constant 0.000000e+00 : f32
    %129 = vector.broadcast %cst_67 : f32 to vector<32x32xf32>
    %130 = arith.cmpf oge, %128, %129 : vector<32x32xf32>
    %cst_68 = arith.constant 2.000000e-01 : f32
    %131 = vector.broadcast %cst_68 : f32 to vector<32x32xf32>
    %132 = arith.mulf %131, %128 : vector<32x32xf32>
    %133 = arith.select %130, %128, %132 : vector<32x32xi1>, vector<32x32xf32>
    %134 = arith.maximumf %126, %133 : vector<32x32xf32>
    %135 = vector.extract_strided_slice %115 {offsets = [64, 0], sizes = [32, 32], strides = [1, 1]} : vector<288x32xf32> to vector<32x32xf32>
    %136 = arith.addf %135, %119 : vector<32x32xf32>
    %cst_69 = arith.constant 0.000000e+00 : f32
    %137 = vector.broadcast %cst_69 : f32 to vector<32x32xf32>
    %138 = arith.cmpf oge, %136, %137 : vector<32x32xf32>
    %cst_70 = arith.constant 2.000000e-01 : f32
    %139 = vector.broadcast %cst_70 : f32 to vector<32x32xf32>
    %140 = arith.mulf %139, %136 : vector<32x32xf32>
    %141 = arith.select %138, %136, %140 : vector<32x32xi1>, vector<32x32xf32>
    %142 = arith.maximumf %134, %141 : vector<32x32xf32>
    %143 = vector.extract_strided_slice %115 {offsets = [96, 0], sizes = [32, 32], strides = [1, 1]} : vector<288x32xf32> to vector<32x32xf32>
    %144 = arith.addf %143, %119 : vector<32x32xf32>
    %cst_71 = arith.constant 0.000000e+00 : f32
    %145 = vector.broadcast %cst_71 : f32 to vector<32x32xf32>
    %146 = arith.cmpf oge, %144, %145 : vector<32x32xf32>
    %cst_72 = arith.constant 2.000000e-01 : f32
    %147 = vector.broadcast %cst_72 : f32 to vector<32x32xf32>
    %148 = arith.mulf %147, %144 : vector<32x32xf32>
    %149 = arith.select %146, %144, %148 : vector<32x32xi1>, vector<32x32xf32>
    %150 = arith.maximumf %142, %149 : vector<32x32xf32>
    %151 = vector.extract_strided_slice %115 {offsets = [128, 0], sizes = [32, 32], strides = [1, 1]} : vector<288x32xf32> to vector<32x32xf32>
    %152 = arith.addf %151, %119 : vector<32x32xf32>
    %cst_73 = arith.constant 0.000000e+00 : f32
    %153 = vector.broadcast %cst_73 : f32 to vector<32x32xf32>
    %154 = arith.cmpf oge, %152, %153 : vector<32x32xf32>
    %cst_74 = arith.constant 2.000000e-01 : f32
    %155 = vector.broadcast %cst_74 : f32 to vector<32x32xf32>
    %156 = arith.mulf %155, %152 : vector<32x32xf32>
    %157 = arith.select %154, %152, %156 : vector<32x32xi1>, vector<32x32xf32>
    %158 = arith.maximumf %150, %157 : vector<32x32xf32>
    %159 = vector.extract_strided_slice %115 {offsets = [160, 0], sizes = [32, 32], strides = [1, 1]} : vector<288x32xf32> to vector<32x32xf32>
    %160 = arith.addf %159, %119 : vector<32x32xf32>
    %cst_75 = arith.constant 0.000000e+00 : f32
    %161 = vector.broadcast %cst_75 : f32 to vector<32x32xf32>
    %162 = arith.cmpf oge, %160, %161 : vector<32x32xf32>
    %cst_76 = arith.constant 2.000000e-01 : f32
    %163 = vector.broadcast %cst_76 : f32 to vector<32x32xf32>
    %164 = arith.mulf %163, %160 : vector<32x32xf32>
    %165 = arith.select %162, %160, %164 : vector<32x32xi1>, vector<32x32xf32>
    %166 = arith.maximumf %158, %165 : vector<32x32xf32>
    %167 = vector.extract_strided_slice %115 {offsets = [192, 0], sizes = [32, 32], strides = [1, 1]} : vector<288x32xf32> to vector<32x32xf32>
    %168 = arith.addf %167, %119 : vector<32x32xf32>
    %cst_77 = arith.constant 0.000000e+00 : f32
    %169 = vector.broadcast %cst_77 : f32 to vector<32x32xf32>
    %170 = arith.cmpf oge, %168, %169 : vector<32x32xf32>
    %cst_78 = arith.constant 2.000000e-01 : f32
    %171 = vector.broadcast %cst_78 : f32 to vector<32x32xf32>
    %172 = arith.mulf %171, %168 : vector<32x32xf32>
    %173 = arith.select %170, %168, %172 : vector<32x32xi1>, vector<32x32xf32>
    %174 = arith.maximumf %166, %173 : vector<32x32xf32>
    %175 = vector.extract_strided_slice %115 {offsets = [224, 0], sizes = [32, 32], strides = [1, 1]} : vector<288x32xf32> to vector<32x32xf32>
    %176 = arith.addf %175, %119 : vector<32x32xf32>
    %cst_79 = arith.constant 0.000000e+00 : f32
    %177 = vector.broadcast %cst_79 : f32 to vector<32x32xf32>
    %178 = arith.cmpf oge, %176, %177 : vector<32x32xf32>
    %cst_80 = arith.constant 2.000000e-01 : f32
    %179 = vector.broadcast %cst_80 : f32 to vector<32x32xf32>
    %180 = arith.mulf %179, %176 : vector<32x32xf32>
    %181 = arith.select %178, %176, %180 : vector<32x32xi1>, vector<32x32xf32>
    %182 = arith.maximumf %174, %181 : vector<32x32xf32>
    %183 = vector.extract_strided_slice %115 {offsets = [256, 0], sizes = [32, 32], strides = [1, 1]} : vector<288x32xf32> to vector<32x32xf32>
    %184 = arith.addf %183, %119 : vector<32x32xf32>
    %cst_81 = arith.constant 0.000000e+00 : f32
    %185 = vector.broadcast %cst_81 : f32 to vector<32x32xf32>
    %186 = arith.cmpf oge, %184, %185 : vector<32x32xf32>
    %cst_82 = arith.constant 2.000000e-01 : f32
    %187 = vector.broadcast %cst_82 : f32 to vector<32x32xf32>
    %188 = arith.mulf %187, %184 : vector<32x32xf32>
    %189 = arith.select %186, %184, %188 : vector<32x32xi1>, vector<32x32xf32>
    %190 = arith.maximumf %182, %189 : vector<32x32xf32>
    %c0_83 = arith.constant 0 : index
    %c12 = arith.constant 12 : index
    %c0_84 = arith.constant 0 : index
    %c0_85 = arith.constant 0 : index
    %191 = vector.load %arg6[%c0_83, %c12, %c0_84, %c0_85] : memref<1x16x32x32xbf16, #tpu.memory_space<vmem>>, vector<1x1x32x32xbf16>
    %192 = vector.shape_cast %191 : vector<1x1x32x32xbf16> to vector<32x32xbf16>
    %193 = arith.truncf %106 : vector<32x32xf32> to vector<32x32xbf16>
    %cst_86 = arith.constant dense<0.000000e+00> : vector<32x32xf32>
    %194 = tpu.matmul %193, %192, %cst_86 {dimension_numbers = #tpu.dot_dimension_numbers<[1], [0], [0], [1], [0, 0, 1, 1], [], []>} : vector<32x32xbf16>, vector<32x32xbf16>, vector<32x32xf32> -> vector<32x32xf32>
    %c0_87 = arith.constant 0 : index
    %c13 = arith.constant 13 : index
    %c0_88 = arith.constant 0 : index
    %c0_89 = arith.constant 0 : index
    %195 = vector.load %arg6[%c0_87, %c13, %c0_88, %c0_89] : memref<1x16x32x32xbf16, #tpu.memory_space<vmem>>, vector<1x1x32x32xbf16>
    %196 = vector.shape_cast %195 : vector<1x1x32x32xbf16> to vector<32x32xbf16>
    %197 = arith.truncf %190 : vector<32x32xf32> to vector<32x32xbf16>
    %cst_90 = arith.constant dense<0.000000e+00> : vector<32x32xf32>
    %198 = tpu.matmul %197, %196, %cst_90 {dimension_numbers = #tpu.dot_dimension_numbers<[1], [0], [0], [1], [0, 0, 1, 1], [], []>} : vector<32x32xbf16>, vector<32x32xbf16>, vector<32x32xf32> -> vector<32x32xf32>
    %199 = arith.addf %194, %198 : vector<32x32xf32>
    %c0_91 = arith.constant 0 : index
    %c5 = arith.constant 5 : index
    %c0_92 = arith.constant 0 : index
    %200 = vector.load %arg10[%c0_91, %c5, %c0_92] : memref<1x19x32xf32, #tpu.memory_space<vmem>>, vector<1x1x32xf32>
    %201 = vector.shape_cast %200 : vector<1x1x32xf32> to vector<1x32xf32>
    %202 = vector.broadcast %201 : vector<1x32xf32> to vector<32x32xf32>
    %203 = arith.addf %199, %202 : vector<32x32xf32>
    %204 = arith.addf %3, %203 : vector<32x32xf32>
    %c0_93 = arith.constant 0 : index
    %c13_94 = arith.constant 13 : index
    %c0_95 = arith.constant 0 : index
    %205 = vector.load %arg10[%c0_93, %c13_94, %c0_95] : memref<1x19x32xf32, #tpu.memory_space<vmem>>, vector<1x1x32xf32>
    %206 = vector.shape_cast %205 : vector<1x1x32xf32> to vector<1x32xf32>
    %c0_96 = arith.constant 0 : index
    %c14 = arith.constant 14 : index
    %c0_97 = arith.constant 0 : index
    %207 = vector.load %arg10[%c0_96, %c14, %c0_97] : memref<1x19x32xf32, #tpu.memory_space<vmem>>, vector<1x1x32xf32>
    %208 = vector.shape_cast %207 : vector<1x1x32xf32> to vector<1x32xf32>
    %cst_98 = arith.constant dense<0.000000e+00> : vector<32xf32>
    %209 = vector.multi_reduction <add>, %204, %cst_98 [1] : vector<32x32xf32> to vector<32xf32>
    %210 = vector.shape_cast %209 : vector<32xf32> to vector<32x1xf32>
    %cst_99 = arith.constant 3.200000e+01 : f32
    %211 = vector.broadcast %cst_99 : f32 to vector<32x1xf32>
    %212 = arith.divf %210, %211 : vector<32x1xf32>
    %213 = vector.broadcast %212 : vector<32x1xf32> to vector<32x32xf32>
    %214 = arith.subf %204, %213 : vector<32x32xf32>
    %215 = arith.mulf %214, %214 : vector<32x32xf32>
    %cst_100 = arith.constant dense<0.000000e+00> : vector<32xf32>
    %216 = vector.multi_reduction <add>, %215, %cst_100 [1] : vector<32x32xf32> to vector<32xf32>
    %217 = vector.shape_cast %216 : vector<32xf32> to vector<32x1xf32>
    %cst_101 = arith.constant 3.200000e+01 : f32
    %218 = vector.broadcast %cst_101 : f32 to vector<32x1xf32>
    %219 = arith.divf %217, %218 : vector<32x1xf32>
    %220 = vector.broadcast %212 : vector<32x1xf32> to vector<32x32xf32>
    %221 = arith.subf %204, %220 : vector<32x32xf32>
    %cst_102 = arith.constant 9.99999974E-6 : f32
    %222 = vector.broadcast %cst_102 : f32 to vector<32x1xf32>
    %223 = arith.addf %219, %222 : vector<32x1xf32>
    %224 = math.rsqrt %223 : vector<32x1xf32>
    %225 = vector.broadcast %224 : vector<32x1xf32> to vector<32x32xf32>
    %226 = arith.mulf %221, %225 : vector<32x32xf32>
    %227 = vector.broadcast %206 : vector<1x32xf32> to vector<32x32xf32>
    %228 = arith.mulf %226, %227 : vector<32x32xf32>
    %229 = vector.broadcast %208 : vector<1x32xf32> to vector<32x32xf32>
    %230 = arith.addf %228, %229 : vector<32x32xf32>
    %231 = arith.addf %230, %5 : vector<32x32xf32>
    %232 = arith.addf %4, %5 : vector<32x32xf32>
    %c0_103 = arith.constant 0 : index
    %c4_104 = arith.constant 4 : index
    %c0_105 = arith.constant 0 : index
    %c0_106 = arith.constant 0 : index
    %233 = vector.load %arg6[%c0_103, %c4_104, %c0_105, %c0_106] : memref<1x16x32x32xbf16, #tpu.memory_space<vmem>>, vector<1x1x32x32xbf16>
    %234 = vector.shape_cast %233 : vector<1x1x32x32xbf16> to vector<32x32xbf16>
    %c0_107 = arith.constant 0 : index
    %c5_108 = arith.constant 5 : index
    %c0_109 = arith.constant 0 : index
    %c0_110 = arith.constant 0 : index
    %235 = vector.load %arg6[%c0_107, %c5_108, %c0_109, %c0_110] : memref<1x16x32x32xbf16, #tpu.memory_space<vmem>>, vector<1x1x32x32xbf16>
    %236 = vector.shape_cast %235 : vector<1x1x32x32xbf16> to vector<32x32xbf16>
    %c0_111 = arith.constant 0 : index
    %c6 = arith.constant 6 : index
    %c0_112 = arith.constant 0 : index
    %c0_113 = arith.constant 0 : index
    %237 = vector.load %arg6[%c0_111, %c6, %c0_112, %c0_113] : memref<1x16x32x32xbf16, #tpu.memory_space<vmem>>, vector<1x1x32x32xbf16>
    %238 = vector.shape_cast %237 : vector<1x1x32x32xbf16> to vector<32x32xbf16>
    %c0_114 = arith.constant 0 : index
    %c7 = arith.constant 7 : index
    %c0_115 = arith.constant 0 : index
    %c0_116 = arith.constant 0 : index
    %239 = vector.load %arg6[%c0_114, %c7, %c0_115, %c0_116] : memref<1x16x32x32xbf16, #tpu.memory_space<vmem>>, vector<1x1x32x32xbf16>
    %240 = vector.shape_cast %239 : vector<1x1x32x32xbf16> to vector<32x32xbf16>
    %c0_117 = arith.constant 0 : index
    %c6_118 = arith.constant 6 : index
    %c0_119 = arith.constant 0 : index
    %241 = vector.load %arg10[%c0_117, %c6_118, %c0_119] : memref<1x19x32xf32, #tpu.memory_space<vmem>>, vector<1x1x32xf32>
    %242 = vector.shape_cast %241 : vector<1x1x32xf32> to vector<1x32xf32>
    %c0_120 = arith.constant 0 : index
    %c7_121 = arith.constant 7 : index
    %c0_122 = arith.constant 0 : index
    %243 = vector.load %arg10[%c0_120, %c7_121, %c0_122] : memref<1x19x32xf32, #tpu.memory_space<vmem>>, vector<1x1x32xf32>
    %244 = vector.shape_cast %243 : vector<1x1x32xf32> to vector<1x32xf32>
    %c0_123 = arith.constant 0 : index
    %c8_124 = arith.constant 8 : index
    %c0_125 = arith.constant 0 : index
    %245 = vector.load %arg10[%c0_123, %c8_124, %c0_125] : memref<1x19x32xf32, #tpu.memory_space<vmem>>, vector<1x1x32xf32>
    %246 = vector.shape_cast %245 : vector<1x1x32xf32> to vector<1x32xf32>
    %c0_126 = arith.constant 0 : index
    %c9_127 = arith.constant 9 : index
    %c0_128 = arith.constant 0 : index
    %247 = vector.load %arg10[%c0_126, %c9_127, %c0_128] : memref<1x19x32xf32, #tpu.memory_space<vmem>>, vector<1x1x32xf32>
    %248 = vector.shape_cast %247 : vector<1x1x32xf32> to vector<1x32xf32>
    %249 = arith.truncf %231 : vector<32x32xf32> to vector<32x32xbf16>
    %cst_129 = arith.constant dense<0.000000e+00> : vector<32x32xf32>
    %250 = tpu.matmul %249, %234, %cst_129 {dimension_numbers = #tpu.dot_dimension_numbers<[1], [0], [0], [1], [0, 0, 1, 1], [], []>} : vector<32x32xbf16>, vector<32x32xbf16>, vector<32x32xf32> -> vector<32x32xf32>
    %251 = vector.broadcast %242 : vector<1x32xf32> to vector<32x32xf32>
    %252 = arith.addf %250, %251 : vector<32x32xf32>
    %253 = arith.truncf %232 : vector<32x32xf32> to vector<32x32xbf16>
    %cst_130 = arith.constant dense<0.000000e+00> : vector<32x32xf32>
    %254 = tpu.matmul %253, %236, %cst_130 {dimension_numbers = #tpu.dot_dimension_numbers<[1], [0], [0], [1], [0, 0, 1, 1], [], []>} : vector<32x32xbf16>, vector<32x32xbf16>, vector<32x32xf32> -> vector<32x32xf32>
    %255 = vector.broadcast %244 : vector<1x32xf32> to vector<32x32xf32>
    %256 = arith.addf %254, %255 : vector<32x32xf32>
    %257 = arith.truncf %4 : vector<32x32xf32> to vector<32x32xbf16>
    %cst_131 = arith.constant dense<0.000000e+00> : vector<32x32xf32>
    %258 = tpu.matmul %257, %238, %cst_131 {dimension_numbers = #tpu.dot_dimension_numbers<[1], [0], [0], [1], [0, 0, 1, 1], [], []>} : vector<32x32xbf16>, vector<32x32xbf16>, vector<32x32xf32> -> vector<32x32xf32>
    %259 = vector.broadcast %246 : vector<1x32xf32> to vector<32x32xf32>
    %260 = arith.addf %258, %259 : vector<32x32xf32>
    %261 = vector.extract_strided_slice %252 {offsets = [0, 0], sizes = [32, 8], strides = [1, 1]} : vector<32x32xf32> to vector<32x8xf32>
    %262 = vector.extract_strided_slice %256 {offsets = [0, 0], sizes = [32, 8], strides = [1, 1]} : vector<32x32xf32> to vector<32x8xf32>
    %263 = vector.extract_strided_slice %260 {offsets = [0, 0], sizes = [32, 8], strides = [1, 1]} : vector<32x32xf32> to vector<32x8xf32>
    %cst_132 = arith.constant dense<0.000000e+00> : vector<32x32xf32>
    %264 = tpu.matmul %261, %262, %cst_132 {dimension_numbers = #tpu.dot_dimension_numbers<[1], [1], [0], [0], [0, 0, 1, 0], [], []>} : vector<32x8xf32>, vector<32x8xf32>, vector<32x32xf32> -> vector<32x32xf32>
    %265 = arith.addf %264, %6 : vector<32x32xf32>
    %cst_133 = arith.constant dense<0xFF800000> : vector<32xf32>
    %266 = vector.multi_reduction <maximumf>, %265, %cst_133 [1] : vector<32x32xf32> to vector<32xf32>
    %267 = vector.shape_cast %266 : vector<32xf32> to vector<32x1xf32>
    %268 = vector.broadcast %267 : vector<32x1xf32> to vector<32x32xf32>
    %269 = arith.subf %265, %268 : vector<32x32xf32>
    %270 = math.exp %269 : vector<32x32xf32>
    %cst_134 = arith.constant dense<0.000000e+00> : vector<32xf32>
    %271 = vector.multi_reduction <add>, %270, %cst_134 [1] : vector<32x32xf32> to vector<32xf32>
    %272 = vector.shape_cast %271 : vector<32xf32> to vector<32x1xf32>
    %273 = tpu.reciprocal %272 {approx = true} : vector<32x1xf32> -> vector<32x1xf32>
    %274 = vector.broadcast %273 : vector<32x1xf32> to vector<32x32xf32>
    %275 = arith.mulf %270, %274 : vector<32x32xf32>
    %cst_135 = arith.constant dense<0.000000e+00> : vector<32x8xf32>
    %276 = tpu.matmul %275, %263, %cst_135 {dimension_numbers = #tpu.dot_dimension_numbers<[1], [0], [0], [1], [0, 0, 1, 1], [], []>} : vector<32x32xf32>, vector<32x8xf32>, vector<32x8xf32> -> vector<32x8xf32>
    %277 = vector.extract_strided_slice %252 {offsets = [0, 8], sizes = [32, 8], strides = [1, 1]} : vector<32x32xf32> to vector<32x8xf32>
    %278 = vector.extract_strided_slice %256 {offsets = [0, 8], sizes = [32, 8], strides = [1, 1]} : vector<32x32xf32> to vector<32x8xf32>
    %279 = vector.extract_strided_slice %260 {offsets = [0, 8], sizes = [32, 8], strides = [1, 1]} : vector<32x32xf32> to vector<32x8xf32>
    %cst_136 = arith.constant dense<0.000000e+00> : vector<32x32xf32>
    %280 = tpu.matmul %277, %278, %cst_136 {dimension_numbers = #tpu.dot_dimension_numbers<[1], [1], [0], [0], [0, 0, 1, 0], [], []>} : vector<32x8xf32>, vector<32x8xf32>, vector<32x32xf32> -> vector<32x32xf32>
    %281 = arith.addf %280, %6 : vector<32x32xf32>
    %cst_137 = arith.constant dense<0xFF800000> : vector<32xf32>
    %282 = vector.multi_reduction <maximumf>, %281, %cst_137 [1] : vector<32x32xf32> to vector<32xf32>
    %283 = vector.shape_cast %282 : vector<32xf32> to vector<32x1xf32>
    %284 = vector.broadcast %283 : vector<32x1xf32> to vector<32x32xf32>
    %285 = arith.subf %281, %284 : vector<32x32xf32>
    %286 = math.exp %285 : vector<32x32xf32>
    %cst_138 = arith.constant dense<0.000000e+00> : vector<32xf32>
    %287 = vector.multi_reduction <add>, %286, %cst_138 [1] : vector<32x32xf32> to vector<32xf32>
    %288 = vector.shape_cast %287 : vector<32xf32> to vector<32x1xf32>
    %289 = tpu.reciprocal %288 {approx = true} : vector<32x1xf32> -> vector<32x1xf32>
    %290 = vector.broadcast %289 : vector<32x1xf32> to vector<32x32xf32>
    %291 = arith.mulf %286, %290 : vector<32x32xf32>
    %cst_139 = arith.constant dense<0.000000e+00> : vector<32x8xf32>
    %292 = tpu.matmul %291, %279, %cst_139 {dimension_numbers = #tpu.dot_dimension_numbers<[1], [0], [0], [1], [0, 0, 1, 1], [], []>} : vector<32x32xf32>, vector<32x8xf32>, vector<32x8xf32> -> vector<32x8xf32>
    %293 = vector.extract_strided_slice %252 {offsets = [0, 16], sizes = [32, 8], strides = [1, 1]} : vector<32x32xf32> to vector<32x8xf32>
    %294 = vector.extract_strided_slice %256 {offsets = [0, 16], sizes = [32, 8], strides = [1, 1]} : vector<32x32xf32> to vector<32x8xf32>
    %295 = vector.extract_strided_slice %260 {offsets = [0, 16], sizes = [32, 8], strides = [1, 1]} : vector<32x32xf32> to vector<32x8xf32>
    %cst_140 = arith.constant dense<0.000000e+00> : vector<32x32xf32>
    %296 = tpu.matmul %293, %294, %cst_140 {dimension_numbers = #tpu.dot_dimension_numbers<[1], [1], [0], [0], [0, 0, 1, 0], [], []>} : vector<32x8xf32>, vector<32x8xf32>, vector<32x32xf32> -> vector<32x32xf32>
    %297 = arith.addf %296, %6 : vector<32x32xf32>
    %cst_141 = arith.constant dense<0xFF800000> : vector<32xf32>
    %298 = vector.multi_reduction <maximumf>, %297, %cst_141 [1] : vector<32x32xf32> to vector<32xf32>
    %299 = vector.shape_cast %298 : vector<32xf32> to vector<32x1xf32>
    %300 = vector.broadcast %299 : vector<32x1xf32> to vector<32x32xf32>
    %301 = arith.subf %297, %300 : vector<32x32xf32>
    %302 = math.exp %301 : vector<32x32xf32>
    %cst_142 = arith.constant dense<0.000000e+00> : vector<32xf32>
    %303 = vector.multi_reduction <add>, %302, %cst_142 [1] : vector<32x32xf32> to vector<32xf32>
    %304 = vector.shape_cast %303 : vector<32xf32> to vector<32x1xf32>
    %305 = tpu.reciprocal %304 {approx = true} : vector<32x1xf32> -> vector<32x1xf32>
    %306 = vector.broadcast %305 : vector<32x1xf32> to vector<32x32xf32>
    %307 = arith.mulf %302, %306 : vector<32x32xf32>
    %cst_143 = arith.constant dense<0.000000e+00> : vector<32x8xf32>
    %308 = tpu.matmul %307, %295, %cst_143 {dimension_numbers = #tpu.dot_dimension_numbers<[1], [0], [0], [1], [0, 0, 1, 1], [], []>} : vector<32x32xf32>, vector<32x8xf32>, vector<32x8xf32> -> vector<32x8xf32>
    %309 = vector.extract_strided_slice %252 {offsets = [0, 24], sizes = [32, 8], strides = [1, 1]} : vector<32x32xf32> to vector<32x8xf32>
    %310 = vector.extract_strided_slice %256 {offsets = [0, 24], sizes = [32, 8], strides = [1, 1]} : vector<32x32xf32> to vector<32x8xf32>
    %311 = vector.extract_strided_slice %260 {offsets = [0, 24], sizes = [32, 8], strides = [1, 1]} : vector<32x32xf32> to vector<32x8xf32>
    %cst_144 = arith.constant dense<0.000000e+00> : vector<32x32xf32>
    %312 = tpu.matmul %309, %310, %cst_144 {dimension_numbers = #tpu.dot_dimension_numbers<[1], [1], [0], [0], [0, 0, 1, 0], [], []>} : vector<32x8xf32>, vector<32x8xf32>, vector<32x32xf32> -> vector<32x32xf32>
    %313 = arith.addf %312, %6 : vector<32x32xf32>
    %cst_145 = arith.constant dense<0xFF800000> : vector<32xf32>
    %314 = vector.multi_reduction <maximumf>, %313, %cst_145 [1] : vector<32x32xf32> to vector<32xf32>
    %315 = vector.shape_cast %314 : vector<32xf32> to vector<32x1xf32>
    %316 = vector.broadcast %315 : vector<32x1xf32> to vector<32x32xf32>
    %317 = arith.subf %313, %316 : vector<32x32xf32>
    %318 = math.exp %317 : vector<32x32xf32>
    %cst_146 = arith.constant dense<0.000000e+00> : vector<32xf32>
    %319 = vector.multi_reduction <add>, %318, %cst_146 [1] : vector<32x32xf32> to vector<32xf32>
    %320 = vector.shape_cast %319 : vector<32xf32> to vector<32x1xf32>
    %321 = tpu.reciprocal %320 {approx = true} : vector<32x1xf32> -> vector<32x1xf32>
    %322 = vector.broadcast %321 : vector<32x1xf32> to vector<32x32xf32>
    %323 = arith.mulf %318, %322 : vector<32x32xf32>
    %cst_147 = arith.constant dense<0.000000e+00> : vector<32x8xf32>
    %324 = tpu.matmul %323, %311, %cst_147 {dimension_numbers = #tpu.dot_dimension_numbers<[1], [0], [0], [1], [0, 0, 1, 1], [], []>} : vector<32x32xf32>, vector<32x8xf32>, vector<32x8xf32> -> vector<32x8xf32>
    %325 = tpu.concatenate %276, %292, %308, %324 in 1 : vector<32x8xf32>, vector<32x8xf32>, vector<32x8xf32>, vector<32x8xf32> -> vector<32x32xf32>
    %326 = arith.truncf %325 : vector<32x32xf32> to vector<32x32xbf16>
    %cst_148 = arith.constant dense<0.000000e+00> : vector<32x32xf32>
    %327 = tpu.matmul %326, %240, %cst_148 {dimension_numbers = #tpu.dot_dimension_numbers<[1], [0], [0], [1], [0, 0, 1, 1], [], []>} : vector<32x32xbf16>, vector<32x32xbf16>, vector<32x32xf32> -> vector<32x32xf32>
    %328 = vector.broadcast %248 : vector<1x32xf32> to vector<32x32xf32>
    %329 = arith.addf %327, %328 : vector<32x32xf32>
    %cst_149 = arith.constant dense<0.000000e+00> : vector<288x32xf32>
    %330 = tpu.matmul %7, %4, %cst_149 {dimension_numbers = #tpu.dot_dimension_numbers<[1], [0], [0], [1], [0, 0, 1, 1], [], []>} : vector<288x32xf32>, vector<32x32xf32>, vector<288x32xf32> -> vector<288x32xf32>
    %c0_150 = arith.constant 0 : index
    %c10 = arith.constant 10 : index
    %c0_151 = arith.constant 0 : index
    %c0_152 = arith.constant 0 : index
    %331 = vector.load %arg6[%c0_150, %c10, %c0_151, %c0_152] : memref<1x16x32x32xbf16, #tpu.memory_space<vmem>>, vector<1x1x32x32xbf16>
    %332 = vector.shape_cast %331 : vector<1x1x32x32xbf16> to vector<32x32xbf16>
    %c0_153 = arith.constant 0 : index
    %c11 = arith.constant 11 : index
    %c0_154 = arith.constant 0 : index
    %c0_155 = arith.constant 0 : index
    %333 = vector.load %arg6[%c0_153, %c11, %c0_154, %c0_155] : memref<1x16x32x32xbf16, #tpu.memory_space<vmem>>, vector<1x1x32x32xbf16>
    %334 = vector.shape_cast %333 : vector<1x1x32x32xbf16> to vector<32x32xbf16>
    %c0_156 = arith.constant 0 : index
    %c10_157 = arith.constant 10 : index
    %c0_158 = arith.constant 0 : index
    %335 = vector.load %arg10[%c0_156, %c10_157, %c0_158] : memref<1x19x32xf32, #tpu.memory_space<vmem>>, vector<1x1x32xf32>
    %336 = vector.shape_cast %335 : vector<1x1x32xf32> to vector<1x32xf32>
    %337 = arith.truncf %330 : vector<288x32xf32> to vector<288x32xbf16>
    %cst_159 = arith.constant dense<0.000000e+00> : vector<288x32xf32>
    %338 = tpu.matmul %337, %332, %cst_159 {dimension_numbers = #tpu.dot_dimension_numbers<[1], [0], [0], [1], [0, 0, 1, 1], [], []>} : vector<288x32xbf16>, vector<32x32xbf16>, vector<288x32xf32> -> vector<288x32xf32>
    %339 = arith.truncf %230 : vector<32x32xf32> to vector<32x32xbf16>
    %cst_160 = arith.constant dense<0.000000e+00> : vector<32x32xf32>
    %340 = tpu.matmul %339, %334, %cst_160 {dimension_numbers = #tpu.dot_dimension_numbers<[1], [0], [0], [1], [0, 0, 1, 1], [], []>} : vector<32x32xbf16>, vector<32x32xbf16>, vector<32x32xf32> -> vector<32x32xf32>
    %341 = vector.broadcast %336 : vector<1x32xf32> to vector<32x32xf32>
    %342 = arith.addf %340, %341 : vector<32x32xf32>
    %343 = vector.extract_strided_slice %338 {offsets = [0, 0], sizes = [32, 32], strides = [1, 1]} : vector<288x32xf32> to vector<32x32xf32>
    %344 = arith.addf %343, %342 : vector<32x32xf32>
    %cst_161 = arith.constant 0.000000e+00 : f32
    %345 = vector.broadcast %cst_161 : f32 to vector<32x32xf32>
    %346 = arith.cmpf oge, %344, %345 : vector<32x32xf32>
    %cst_162 = arith.constant 2.000000e-01 : f32
    %347 = vector.broadcast %cst_162 : f32 to vector<32x32xf32>
    %348 = arith.mulf %347, %344 : vector<32x32xf32>
    %349 = arith.select %346, %344, %348 : vector<32x32xi1>, vector<32x32xf32>
    %350 = vector.extract_strided_slice %338 {offsets = [32, 0], sizes = [32, 32], strides = [1, 1]} : vector<288x32xf32> to vector<32x32xf32>
    %351 = arith.addf %350, %342 : vector<32x32xf32>
    %cst_163 = arith.constant 0.000000e+00 : f32
    %352 = vector.broadcast %cst_163 : f32 to vector<32x32xf32>
    %353 = arith.cmpf oge, %351, %352 : vector<32x32xf32>
    %cst_164 = arith.constant 2.000000e-01 : f32
    %354 = vector.broadcast %cst_164 : f32 to vector<32x32xf32>
    %355 = arith.mulf %354, %351 : vector<32x32xf32>
    %356 = arith.select %353, %351, %355 : vector<32x32xi1>, vector<32x32xf32>
    %357 = arith.maximumf %349, %356 : vector<32x32xf32>
    %358 = vector.extract_strided_slice %338 {offsets = [64, 0], sizes = [32, 32], strides = [1, 1]} : vector<288x32xf32> to vector<32x32xf32>
    %359 = arith.addf %358, %342 : vector<32x32xf32>
    %cst_165 = arith.constant 0.000000e+00 : f32
    %360 = vector.broadcast %cst_165 : f32 to vector<32x32xf32>
    %361 = arith.cmpf oge, %359, %360 : vector<32x32xf32>
    %cst_166 = arith.constant 2.000000e-01 : f32
    %362 = vector.broadcast %cst_166 : f32 to vector<32x32xf32>
    %363 = arith.mulf %362, %359 : vector<32x32xf32>
    %364 = arith.select %361, %359, %363 : vector<32x32xi1>, vector<32x32xf32>
    %365 = arith.maximumf %357, %364 : vector<32x32xf32>
    %366 = vector.extract_strided_slice %338 {offsets = [96, 0], sizes = [32, 32], strides = [1, 1]} : vector<288x32xf32> to vector<32x32xf32>
    %367 = arith.addf %366, %342 : vector<32x32xf32>
    %cst_167 = arith.constant 0.000000e+00 : f32
    %368 = vector.broadcast %cst_167 : f32 to vector<32x32xf32>
    %369 = arith.cmpf oge, %367, %368 : vector<32x32xf32>
    %cst_168 = arith.constant 2.000000e-01 : f32
    %370 = vector.broadcast %cst_168 : f32 to vector<32x32xf32>
    %371 = arith.mulf %370, %367 : vector<32x32xf32>
    %372 = arith.select %369, %367, %371 : vector<32x32xi1>, vector<32x32xf32>
    %373 = arith.maximumf %365, %372 : vector<32x32xf32>
    %374 = vector.extract_strided_slice %338 {offsets = [128, 0], sizes = [32, 32], strides = [1, 1]} : vector<288x32xf32> to vector<32x32xf32>
    %375 = arith.addf %374, %342 : vector<32x32xf32>
    %cst_169 = arith.constant 0.000000e+00 : f32
    %376 = vector.broadcast %cst_169 : f32 to vector<32x32xf32>
    %377 = arith.cmpf oge, %375, %376 : vector<32x32xf32>
    %cst_170 = arith.constant 2.000000e-01 : f32
    %378 = vector.broadcast %cst_170 : f32 to vector<32x32xf32>
    %379 = arith.mulf %378, %375 : vector<32x32xf32>
    %380 = arith.select %377, %375, %379 : vector<32x32xi1>, vector<32x32xf32>
    %381 = arith.maximumf %373, %380 : vector<32x32xf32>
    %382 = vector.extract_strided_slice %338 {offsets = [160, 0], sizes = [32, 32], strides = [1, 1]} : vector<288x32xf32> to vector<32x32xf32>
    %383 = arith.addf %382, %342 : vector<32x32xf32>
    %cst_171 = arith.constant 0.000000e+00 : f32
    %384 = vector.broadcast %cst_171 : f32 to vector<32x32xf32>
    %385 = arith.cmpf oge, %383, %384 : vector<32x32xf32>
    %cst_172 = arith.constant 2.000000e-01 : f32
    %386 = vector.broadcast %cst_172 : f32 to vector<32x32xf32>
    %387 = arith.mulf %386, %383 : vector<32x32xf32>
    %388 = arith.select %385, %383, %387 : vector<32x32xi1>, vector<32x32xf32>
    %389 = arith.maximumf %381, %388 : vector<32x32xf32>
    %390 = vector.extract_strided_slice %338 {offsets = [192, 0], sizes = [32, 32], strides = [1, 1]} : vector<288x32xf32> to vector<32x32xf32>
    %391 = arith.addf %390, %342 : vector<32x32xf32>
    %cst_173 = arith.constant 0.000000e+00 : f32
    %392 = vector.broadcast %cst_173 : f32 to vector<32x32xf32>
    %393 = arith.cmpf oge, %391, %392 : vector<32x32xf32>
    %cst_174 = arith.constant 2.000000e-01 : f32
    %394 = vector.broadcast %cst_174 : f32 to vector<32x32xf32>
    %395 = arith.mulf %394, %391 : vector<32x32xf32>
    %396 = arith.select %393, %391, %395 : vector<32x32xi1>, vector<32x32xf32>
    %397 = arith.maximumf %389, %396 : vector<32x32xf32>
    %398 = vector.extract_strided_slice %338 {offsets = [224, 0], sizes = [32, 32], strides = [1, 1]} : vector<288x32xf32> to vector<32x32xf32>
    %399 = arith.addf %398, %342 : vector<32x32xf32>
    %cst_175 = arith.constant 0.000000e+00 : f32
    %400 = vector.broadcast %cst_175 : f32 to vector<32x32xf32>
    %401 = arith.cmpf oge, %399, %400 : vector<32x32xf32>
    %cst_176 = arith.constant 2.000000e-01 : f32
    %402 = vector.broadcast %cst_176 : f32 to vector<32x32xf32>
    %403 = arith.mulf %402, %399 : vector<32x32xf32>
    %404 = arith.select %401, %399, %403 : vector<32x32xi1>, vector<32x32xf32>
    %405 = arith.maximumf %397, %404 : vector<32x32xf32>
    %406 = vector.extract_strided_slice %338 {offsets = [256, 0], sizes = [32, 32], strides = [1, 1]} : vector<288x32xf32> to vector<32x32xf32>
    %407 = arith.addf %406, %342 : vector<32x32xf32>
    %cst_177 = arith.constant 0.000000e+00 : f32
    %408 = vector.broadcast %cst_177 : f32 to vector<32x32xf32>
    %409 = arith.cmpf oge, %407, %408 : vector<32x32xf32>
    %cst_178 = arith.constant 2.000000e-01 : f32
    %410 = vector.broadcast %cst_178 : f32 to vector<32x32xf32>
    %411 = arith.mulf %410, %407 : vector<32x32xf32>
    %412 = arith.select %409, %407, %411 : vector<32x32xi1>, vector<32x32xf32>
    %413 = arith.maximumf %405, %412 : vector<32x32xf32>
    %c0_179 = arith.constant 0 : index
    %c14_180 = arith.constant 14 : index
    %c0_181 = arith.constant 0 : index
    %c0_182 = arith.constant 0 : index
    %414 = vector.load %arg6[%c0_179, %c14_180, %c0_181, %c0_182] : memref<1x16x32x32xbf16, #tpu.memory_space<vmem>>, vector<1x1x32x32xbf16>
    %415 = vector.shape_cast %414 : vector<1x1x32x32xbf16> to vector<32x32xbf16>
    %416 = arith.truncf %329 : vector<32x32xf32> to vector<32x32xbf16>
    %cst_183 = arith.constant dense<0.000000e+00> : vector<32x32xf32>
    %417 = tpu.matmul %416, %415, %cst_183 {dimension_numbers = #tpu.dot_dimension_numbers<[1], [0], [0], [1], [0, 0, 1, 1], [], []>} : vector<32x32xbf16>, vector<32x32xbf16>, vector<32x32xf32> -> vector<32x32xf32>
    %c0_184 = arith.constant 0 : index
    %c15 = arith.constant 15 : index
    %c0_185 = arith.constant 0 : index
    %c0_186 = arith.constant 0 : index
    %418 = vector.load %arg6[%c0_184, %c15, %c0_185, %c0_186] : memref<1x16x32x32xbf16, #tpu.memory_space<vmem>>, vector<1x1x32x32xbf16>
    %419 = vector.shape_cast %418 : vector<1x1x32x32xbf16> to vector<32x32xbf16>
    %420 = arith.truncf %413 : vector<32x32xf32> to vector<32x32xbf16>
    %cst_187 = arith.constant dense<0.000000e+00> : vector<32x32xf32>
    %421 = tpu.matmul %420, %419, %cst_187 {dimension_numbers = #tpu.dot_dimension_numbers<[1], [0], [0], [1], [0, 0, 1, 1], [], []>} : vector<32x32xbf16>, vector<32x32xbf16>, vector<32x32xf32> -> vector<32x32xf32>
    %422 = arith.addf %417, %421 : vector<32x32xf32>
    %c0_188 = arith.constant 0 : index
    %c11_189 = arith.constant 11 : index
    %c0_190 = arith.constant 0 : index
    %423 = vector.load %arg10[%c0_188, %c11_189, %c0_190] : memref<1x19x32xf32, #tpu.memory_space<vmem>>, vector<1x1x32xf32>
    %424 = vector.shape_cast %423 : vector<1x1x32xf32> to vector<1x32xf32>
    %425 = vector.broadcast %424 : vector<1x32xf32> to vector<32x32xf32>
    %426 = arith.addf %422, %425 : vector<32x32xf32>
    %427 = arith.addf %230, %426 : vector<32x32xf32>
    %c0_191 = arith.constant 0 : index
    %c15_192 = arith.constant 15 : index
    %c0_193 = arith.constant 0 : index
    %428 = vector.load %arg10[%c0_191, %c15_192, %c0_193] : memref<1x19x32xf32, #tpu.memory_space<vmem>>, vector<1x1x32xf32>
    %429 = vector.shape_cast %428 : vector<1x1x32xf32> to vector<1x32xf32>
    %c0_194 = arith.constant 0 : index
    %c16 = arith.constant 16 : index
    %c0_195 = arith.constant 0 : index
    %430 = vector.load %arg10[%c0_194, %c16, %c0_195] : memref<1x19x32xf32, #tpu.memory_space<vmem>>, vector<1x1x32xf32>
    %431 = vector.shape_cast %430 : vector<1x1x32xf32> to vector<1x32xf32>
    %cst_196 = arith.constant dense<0.000000e+00> : vector<32xf32>
    %432 = vector.multi_reduction <add>, %427, %cst_196 [1] : vector<32x32xf32> to vector<32xf32>
    %433 = vector.shape_cast %432 : vector<32xf32> to vector<32x1xf32>
    %cst_197 = arith.constant 3.200000e+01 : f32
    %434 = vector.broadcast %cst_197 : f32 to vector<32x1xf32>
    %435 = arith.divf %433, %434 : vector<32x1xf32>
    %436 = vector.broadcast %435 : vector<32x1xf32> to vector<32x32xf32>
    %437 = arith.subf %427, %436 : vector<32x32xf32>
    %438 = arith.mulf %437, %437 : vector<32x32xf32>
    %cst_198 = arith.constant dense<0.000000e+00> : vector<32xf32>
    %439 = vector.multi_reduction <add>, %438, %cst_198 [1] : vector<32x32xf32> to vector<32xf32>
    %440 = vector.shape_cast %439 : vector<32xf32> to vector<32x1xf32>
    %cst_199 = arith.constant 3.200000e+01 : f32
    %441 = vector.broadcast %cst_199 : f32 to vector<32x1xf32>
    %442 = arith.divf %440, %441 : vector<32x1xf32>
    %443 = vector.broadcast %435 : vector<32x1xf32> to vector<32x32xf32>
    %444 = arith.subf %427, %443 : vector<32x32xf32>
    %cst_200 = arith.constant 9.99999974E-6 : f32
    %445 = vector.broadcast %cst_200 : f32 to vector<32x1xf32>
    %446 = arith.addf %442, %445 : vector<32x1xf32>
    %447 = math.rsqrt %446 : vector<32x1xf32>
    %448 = vector.broadcast %447 : vector<32x1xf32> to vector<32x32xf32>
    %449 = arith.mulf %444, %448 : vector<32x32xf32>
    %450 = vector.broadcast %429 : vector<1x32xf32> to vector<32x32xf32>
    %451 = arith.mulf %449, %450 : vector<32x32xf32>
    %452 = vector.broadcast %431 : vector<1x32xf32> to vector<32x32xf32>
    %453 = arith.addf %451, %452 : vector<32x32xf32>
    %c0_201 = arith.constant 0 : index
    %c0_202 = arith.constant 0 : index
    %c0_203 = arith.constant 0 : index
    %454 = vector.load %arg7[%c0_201, %c0_202, %c0_203] : memref<1x32x64xbf16, #tpu.memory_space<vmem>>, vector<1x32x64xbf16>
    %455 = vector.shape_cast %454 : vector<1x32x64xbf16> to vector<32x64xbf16>
    %456 = arith.truncf %453 : vector<32x32xf32> to vector<32x32xbf16>
    %cst_204 = arith.constant dense<0.000000e+00> : vector<32x64xf32>
    %457 = tpu.matmul %456, %455, %cst_204 {dimension_numbers = #tpu.dot_dimension_numbers<[1], [0], [0], [1], [0, 0, 1, 1], [], []>} : vector<32x32xbf16>, vector<32x64xbf16>, vector<32x64xf32> -> vector<32x64xf32>
    %c0_205 = arith.constant 0 : index
    %c0_206 = arith.constant 0 : index
    %c0_207 = arith.constant 0 : index
    %458 = vector.load %arg9[%c0_205, %c0_206, %c0_207] : memref<1x1x64xf32, #tpu.memory_space<vmem>>, vector<1x1x64xf32>
    %459 = vector.shape_cast %458 : vector<1x1x64xf32> to vector<1x64xf32>
    %460 = vector.broadcast %459 : vector<1x64xf32> to vector<32x64xf32>
    %461 = arith.addf %457, %460 : vector<32x64xf32>
    %cst_208 = arith.constant 0.000000e+00 : f32
    %462 = vector.broadcast %cst_208 : f32 to vector<32x64xf32>
    %463 = arith.maximumf %461, %462 : vector<32x64xf32>
    %c0_209 = arith.constant 0 : index
    %c0_210 = arith.constant 0 : index
    %c0_211 = arith.constant 0 : index
    %464 = vector.load %arg8[%c0_209, %c0_210, %c0_211] : memref<1x64x32xbf16, #tpu.memory_space<vmem>>, vector<1x64x32xbf16>
    %465 = vector.shape_cast %464 : vector<1x64x32xbf16> to vector<64x32xbf16>
    %466 = arith.truncf %463 : vector<32x64xf32> to vector<32x64xbf16>
    %cst_212 = arith.constant dense<0.000000e+00> : vector<32x32xf32>
    %467 = tpu.matmul %466, %465, %cst_212 {dimension_numbers = #tpu.dot_dimension_numbers<[1], [0], [0], [1], [0, 0, 1, 1], [], []>} : vector<32x64xbf16>, vector<64x32xbf16>, vector<32x32xf32> -> vector<32x32xf32>
    %c0_213 = arith.constant 0 : index
    %c12_214 = arith.constant 12 : index
    %c0_215 = arith.constant 0 : index
    %468 = vector.load %arg10[%c0_213, %c12_214, %c0_215] : memref<1x19x32xf32, #tpu.memory_space<vmem>>, vector<1x1x32xf32>
    %469 = vector.shape_cast %468 : vector<1x1x32xf32> to vector<1x32xf32>
    %470 = vector.broadcast %469 : vector<1x32xf32> to vector<32x32xf32>
    %471 = arith.addf %467, %470 : vector<32x32xf32>
    %472 = arith.addf %453, %471 : vector<32x32xf32>
    %c0_216 = arith.constant 0 : index
    %c17 = arith.constant 17 : index
    %c0_217 = arith.constant 0 : index
    %473 = vector.load %arg10[%c0_216, %c17, %c0_217] : memref<1x19x32xf32, #tpu.memory_space<vmem>>, vector<1x1x32xf32>
    %474 = vector.shape_cast %473 : vector<1x1x32xf32> to vector<1x32xf32>
    %c0_218 = arith.constant 0 : index
    %c18 = arith.constant 18 : index
    %c0_219 = arith.constant 0 : index
    %475 = vector.load %arg10[%c0_218, %c18, %c0_219] : memref<1x19x32xf32, #tpu.memory_space<vmem>>, vector<1x1x32xf32>
    %476 = vector.shape_cast %475 : vector<1x1x32xf32> to vector<1x32xf32>
    %cst_220 = arith.constant dense<0.000000e+00> : vector<32xf32>
    %477 = vector.multi_reduction <add>, %472, %cst_220 [1] : vector<32x32xf32> to vector<32xf32>
    %478 = vector.shape_cast %477 : vector<32xf32> to vector<32x1xf32>
    %cst_221 = arith.constant 3.200000e+01 : f32
    %479 = vector.broadcast %cst_221 : f32 to vector<32x1xf32>
    %480 = arith.divf %478, %479 : vector<32x1xf32>
    %481 = vector.broadcast %480 : vector<32x1xf32> to vector<32x32xf32>
    %482 = arith.subf %472, %481 : vector<32x32xf32>
    %483 = arith.mulf %482, %482 : vector<32x32xf32>
    %cst_222 = arith.constant dense<0.000000e+00> : vector<32xf32>
    %484 = vector.multi_reduction <add>, %483, %cst_222 [1] : vector<32x32xf32> to vector<32xf32>
    %485 = vector.shape_cast %484 : vector<32xf32> to vector<32x1xf32>
    %cst_223 = arith.constant 3.200000e+01 : f32
    %486 = vector.broadcast %cst_223 : f32 to vector<32x1xf32>
    %487 = arith.divf %485, %486 : vector<32x1xf32>
    %488 = vector.broadcast %480 : vector<32x1xf32> to vector<32x32xf32>
    %489 = arith.subf %472, %488 : vector<32x32xf32>
    %cst_224 = arith.constant 9.99999974E-6 : f32
    %490 = vector.broadcast %cst_224 : f32 to vector<32x1xf32>
    %491 = arith.addf %487, %490 : vector<32x1xf32>
    %492 = math.rsqrt %491 : vector<32x1xf32>
    %493 = vector.broadcast %492 : vector<32x1xf32> to vector<32x32xf32>
    %494 = arith.mulf %489, %493 : vector<32x32xf32>
    %495 = vector.broadcast %474 : vector<1x32xf32> to vector<32x32xf32>
    %496 = arith.mulf %494, %495 : vector<32x32xf32>
    %497 = vector.broadcast %476 : vector<1x32xf32> to vector<32x32xf32>
    %498 = arith.addf %496, %497 : vector<32x32xf32>
    %c0_225 = arith.constant 0 : index
    %c0_226 = arith.constant 0 : index
    %499 = vector.load %arg12[%c0_225, %c0_226] : memref<32x32xf32, #tpu.memory_space<vmem>>, vector<32x32xf32>
    tpu.vector_store %arg12[%c0_225, %c0_226], %498 {strides = array<i32>} : memref<32x32xf32, #tpu.memory_space<vmem>>, vector<32x32xf32>,
    %c1_i32 = arith.constant 1 : i32
    %500 = arith.cmpi eq, %arg0, %c1_i32 : i32
    %501 = arith.extui %500 : i1 to i32
    %c0_i32_227 = arith.constant 0 : i32
    %502 = arith.cmpi ne, %501, %c0_i32_227 : i32
    scf.if %502 {
      %c0_228 = arith.constant 0 : index
      %c0_229 = arith.constant 0 : index
      %503 = vector.load %arg11[%c0_228, %c0_229] : memref<2x32xf32, #tpu.memory_space<vmem>>, vector<1x32xf32>
      %c1_230 = arith.constant 1 : index
      %c0_231 = arith.constant 0 : index
      %504 = vector.load %arg11[%c1_230, %c0_231] : memref<2x32xf32, #tpu.memory_space<vmem>>, vector<1x32xf32>
      %cst_232 = arith.constant dense<0.000000e+00> : vector<32xf32>
      %505 = vector.multi_reduction <add>, %498, %cst_232 [1] : vector<32x32xf32> to vector<32xf32>
      %506 = vector.shape_cast %505 : vector<32xf32> to vector<32x1xf32>
      %cst_233 = arith.constant 3.200000e+01 : f32
      %507 = vector.broadcast %cst_233 : f32 to vector<32x1xf32>
      %508 = arith.divf %506, %507 : vector<32x1xf32>
      %509 = vector.broadcast %508 : vector<32x1xf32> to vector<32x32xf32>
      %510 = arith.subf %498, %509 : vector<32x32xf32>
      %511 = arith.mulf %510, %510 : vector<32x32xf32>
      %cst_234 = arith.constant dense<0.000000e+00> : vector<32xf32>
      %512 = vector.multi_reduction <add>, %511, %cst_234 [1] : vector<32x32xf32> to vector<32xf32>
      %513 = vector.shape_cast %512 : vector<32xf32> to vector<32x1xf32>
      %cst_235 = arith.constant 3.200000e+01 : f32
      %514 = vector.broadcast %cst_235 : f32 to vector<32x1xf32>
      %515 = arith.divf %513, %514 : vector<32x1xf32>
      %516 = vector.broadcast %508 : vector<32x1xf32> to vector<32x32xf32>
      %517 = arith.subf %498, %516 : vector<32x32xf32>
      %cst_236 = arith.constant 9.99999974E-6 : f32
      %518 = vector.broadcast %cst_236 : f32 to vector<32x1xf32>
      %519 = arith.addf %515, %518 : vector<32x1xf32>
      %520 = math.rsqrt %519 : vector<32x1xf32>
      %521 = vector.broadcast %520 : vector<32x1xf32> to vector<32x32xf32>
      %522 = arith.mulf %517, %521 : vector<32x32xf32>
      %523 = vector.broadcast %503 : vector<1x32xf32> to vector<32x32xf32>
      %524 = arith.mulf %522, %523 : vector<32x32xf32>
      %525 = vector.broadcast %504 : vector<1x32xf32> to vector<32x32xf32>
      %526 = arith.addf %524, %525 : vector<32x32xf32>
      %c0_237 = arith.constant 0 : index
      %c0_238 = arith.constant 0 : index
      %527 = vector.load %arg12[%c0_237, %c0_238] : memref<32x32xf32, #tpu.memory_space<vmem>>, vector<32x32xf32>
      tpu.vector_store %arg12[%c0_237, %c0_238], %526 {strides = array<i32>} : memref<32x32xf32, #tpu.memory_space<vmem>>, vector<32x32xf32>,
    } else {
    }
    return
  }
  func.func @transform_0(%arg0: i32) -> (i32, i32) {
    %c0_i32 = arith.constant 0 : i32
    %c0_i32_0 = arith.constant 0 : i32
    %c0_i32_1 = arith.constant 0 : i32
    return %c0_i32, %c0_i32_0 : i32, i32
  }
  func.func @transform_1(%arg0: i32) -> (i32, i32) {
    %c0_i32 = arith.constant 0 : i32
    %c0_i32_0 = arith.constant 0 : i32
    %c0_i32_1 = arith.constant 0 : i32
    return %c0_i32, %c0_i32_0 : i32, i32
  }
  func.func @transform_2(%arg0: i32) -> (i32, i32) {
    %c0_i32 = arith.constant 0 : i32
    %c0_i32_0 = arith.constant 0 : i32
    %c0_i32_1 = arith.constant 0 : i32
    return %c0_i32, %c0_i32_0 : i32, i32
  }
  func.func @transform_3(%arg0: i32) -> (i32, i32) {
    %c0_i32 = arith.constant 0 : i32
    %c0_i32_0 = arith.constant 0 : i32
    %c0_i32_1 = arith.constant 0 : i32
    return %c0_i32, %c0_i32_0 : i32, i32
  }
  func.func @transform_4(%arg0: i32) -> (i32, i32) {
    %c0_i32 = arith.constant 0 : i32
    %c0_i32_0 = arith.constant 0 : i32
    %c0_i32_1 = arith.constant 0 : i32
    return %c0_i32, %c0_i32_0 : i32, i32
  }
  func.func @transform_5(%arg0: i32) -> (i32, i32, i32, i32) {
    %c0_i32 = arith.constant 0 : i32
    %c0_i32_0 = arith.constant 0 : i32
    %c0_i32_1 = arith.constant 0 : i32
    %c0_i32_2 = arith.constant 0 : i32
    return %arg0, %c0_i32, %c0_i32_0, %c0_i32_1 : i32, i32, i32, i32
  }
  func.func @transform_6(%arg0: i32) -> (i32, i32, i32) {
    %c0_i32 = arith.constant 0 : i32
    %c0_i32_0 = arith.constant 0 : i32
    %c0_i32_1 = arith.constant 0 : i32
    return %arg0, %c0_i32, %c0_i32_0 : i32, i32, i32
  }
  func.func @transform_7(%arg0: i32) -> (i32, i32, i32) {
    %c0_i32 = arith.constant 0 : i32
    %c0_i32_0 = arith.constant 0 : i32
    %c0_i32_1 = arith.constant 0 : i32
    return %arg0, %c0_i32, %c0_i32_0 : i32, i32, i32
  }
  func.func @transform_8(%arg0: i32) -> (i32, i32, i32) {
    %c0_i32 = arith.constant 0 : i32
    %c0_i32_0 = arith.constant 0 : i32
    %c0_i32_1 = arith.constant 0 : i32
    return %arg0, %c0_i32, %c0_i32_0 : i32, i32, i32
  }
  func.func @transform_9(%arg0: i32) -> (i32, i32, i32) {
    %c0_i32 = arith.constant 0 : i32
    %c0_i32_0 = arith.constant 0 : i32
    %c0_i32_1 = arith.constant 0 : i32
    return %arg0, %c0_i32, %c0_i32_0 : i32, i32, i32
  }
  func.func @transform_10(%arg0: i32) -> (i32, i32) {
    %c0_i32 = arith.constant 0 : i32
    %c0_i32_0 = arith.constant 0 : i32
    %c0_i32_1 = arith.constant 0 : i32
    return %c0_i32, %c0_i32_0 : i32, i32
  }
  func.func @transform_11(%arg0: i32) -> (i32, i32) {
    %c0_i32 = arith.constant 0 : i32
    %c0_i32_0 = arith.constant 0 : i32
    %c0_i32_1 = arith.constant 0 : i32
    return %c0_i32, %c0_i32_0 : i32, i32
  }
}

</mosaic_0001>

<bundles_post_ra>
// kernel: tf_forward.2
= control target key start
LH: loop header
LB: loop body
LE: loop exit
PB: predicated region body
PF: predicated region fallthrough
CT: control target
= control target key end

     0   :  { %s4517_s17 = smov 0   ;;  %s5442_s0 = inlined_call_operand.vmem [shape: f32[32,32], index: 0, kind: input, shape index: {}]   ;;  %s5443_s1 = inlined_call_operand.vmem [shape: f32[32,32], index: 1, kind: input, shape index: {}]   ;;  %s5444_s2 = inlined_call_operand.vmem [shape: f32[32,32], index: 2, kind: input, shape index: {}]   ;;  %s5445_s3 = inlined_call_operand.vmem [shape: f32[288,32], index: 3, kind: input, shape index: {}]   ;;  %s5446_s4 = inlined_call_operand.vmem [shape: f32[32,32], index: 4, kind: input, shape index: {}]   ;;  %s5447_s5 = inlined_call_operand.vmem [shape: bf16[2,8,32,32], index: 5, kind: input, shape index: {}]   ;;  %s5448_s6 = inlined_call_operand.vmem [shape: bf16[2,32,64], index: 6, kind: input, shape index: {}]   ;;  %s5449_s7 = inlined_call_operand.vmem [shape: bf16[2,64,32], index: 7, kind: input, shape index: {}]   ;;  %s5450_s8 = inlined_call_operand.vmem [shape: f32[2,1,64], index: 8, kind: input, shape index: {}]   ;;  %s5451_s9 = inlined_call_operand.vmem [shape: f32[2,11,32], index: 9, kind: input, shape index: {}]   ;;  %s5452_s10 = inlined_call_operand.vmem [shape: f32[2,32], index: 10, kind: input, shape index: {}]   ;;  %s5453_s11 = inlined_call_operand.vmem [shape: f32[32,32], index: 11, kind: output, shape index: {}]  }
   0x1 LB: > { %5455 = sst [smem:[#allocation2_spill]] %s4449_s17  ;;  %s4523_s18 = sadd.s32 4294967295, %s4449_s17   ;;  %s4449_s17 = sphi %s4517_s17, %s21_s17  }
   0x2   : > { %p3480_p0 = scmp.ge.s32.totalorder %s4449_s17, 1  ;;  %p370_p1 = scmp.lt.s32.totalorder %s4449_s17, 3 }
   0x4   : > { %p371_p2 = pnand %p3480_p0, %p370_p1 }
   0x5   : > { %p423_p3 = scmp.lt.s32.totalorder (!%p371_p2), %s4523_s18, 1  ;;  %p3489_p4 = scmp.ne.s32.totalorder (!%p371_p2), %s4523_s18, 0 }
   0x6   : > { %374 = sbr.rel (%p371_p2) target bundleno = 4807 (0x12c7), region = 64 }
   0xd   : > { %s4529_s19 = scalar_select %p423_p3, %s4523_s18, 1 }
   0xe   : > { %450 = sbr.rel (%p3489_p4) target bundleno = 21 (0x15), region = 68  ;;  %v451_v0 = vld [vmem:[%s5442_s0] sm:$0xff] (!%p3489_p4)  ;;  %vm455_vm0 = vcmask (!%p3489_p4), 261120   ;;  %v452_v1 = vld [vmem:[%s5442_s0 + $0x8] sm:$0xff] (!%p3489_p4)  ;;  %v453_v2 = vld [vmem:[%s5442_s0 + $0x10] sm:$0xff] (!%p3489_p4) }
   0xf   : > { %s3677_s20 = sshll.u32 %s4529_s19, 7  ;;  %s3678_s21 = sshll.u32 %s4529_s19, 4  ;;  %456 = vst.msk [vmem:[%s5453_s11] sm:$0xff] (!%p3489_p4), %vm455_vm0, %v451_v0  ;;  %457 = vst.msk [vmem:[%s5453_s11 + $0x8] sm:$0xff] (!%p3489_p4), %vm455_vm0, %v452_v1  ;;  %v454_v3 = vld [vmem:[%s5442_s0 + $0x18] sm:$0xff] (!%p3489_p4) }
  0x10   : > { %s4536_s24 = scalar_lea.vmem %s5447_s5, %s3677_s20  ;;  %s4541_s27 = scalar_lea.vmem %s5448_s6, %s3678_s21  ;;  %458 = vst.msk [vmem:[%s5453_s11 + $0x10] sm:$0xff] (!%p3489_p4), %vm455_vm0, %v453_v2  ;;  %459 = vst.msk [vmem:[%s5453_s11 + $0x18] sm:$0xff] (!%p3489_p4), %vm455_vm0, %v454_v3 }
  0x11   : > { %s3679_s28 = sshll.u32 %s4529_s19, 5  ;;  %s440_s12 = scalar_lea.vmem %s5450_s8, %s4529_s19 }
  0x12   : > { %s4551_s15 = scalar_lea.vmem %s5449_s7, %s3679_s28  ;;  %s4556_s20 = scalar_lea.vmem %s5451_s9, %s3678_s21 }
  0x15 PF: > { %v4329_v4 = vld [vmem:[%s4536_s24] sm:$0xff]   ;;  %v4330_v5 = vld [vmem:[%s4536_s24 + $0x8] sm:$0xff]   ;;  %vm525_vm1 = vcmask 261120   ;;  %v466_v18 = vld [vmem:[%s5443_s1 + $0x10] sm:$0xff]  ;;  %vm727_vm2 = vcmask 64512   ;;  %s4451_s22 = smov 120  }
  0x16   : > { %3843 = vmatprep.subr.bf16.mxu1 %v4329_v4  ;;  %v460_v6 = vld [vmem:[%s5453_s11] sm:$0xff]  ;;  %v461_v7 = vld [vmem:[%s5453_s11 + $0x8] sm:$0xff]  ;;  %v467_v19 = vld [vmem:[%s5443_s1 + $0x18] sm:$0xff]  ;;  %s4452_s23 = smov 112   ;;  %s4453_s25 = smov 104   ;;  %vm1844_vm4 = vcmask 130048  }
  0x17   : > { %v4594_v8 = vld [vmem:[%s5443_s1] sm:$0xff]  ;;  %3844 = vmatpush3.bf16.msra.mxu1 %v4329_v4  ;;  %v4599_v9 = vld [vmem:[%s5443_s1 + $0x8] sm:$0xff]  ;;  %v462_v16 = vld [vmem:[%s5453_s11 + $0x10] sm:$0xff]  ;;  %v4677_v58 = vpack.c.bf16 %v467_v19, %v466_v18  ;;  %s4454_s26 = smov 8   ;;  %s4455_s29 = smov 16   ;;  %vm1849_vm5 = vcmask 195584  }
  0x18   : > { %v468_v10 = vld [vmem:[%s5444_s2] sm:$0xff]  ;;  %v469_v11 = vld [vmem:[%s5444_s2 + $0x8] sm:$0xff]  ;;  %3845 = vmatprep.subr.bf16.mxu1 %v4330_v5  ;;  %v463_v17 = vld [vmem:[%s5453_s11 + $0x18] sm:$0xff]  ;;  %v4673_v57 = vpack.c.bf16 %v4599_v9, %v4594_v8  ;;  %s4456_s13 = smov 24   ;;  %p3672_p5 = scmp.ne.s32.totalorder %s4523_s18, 1 }
  0x19   : > { %v476_v12 = vadd.f32 %v468_v10, %v460_v6  ;;  %v477_v13 = vadd.f32 %v469_v11, %v461_v7  ;;  %v480_v14 = vadd.f32 %v468_v10, %v4594_v8  ;;  %v481_v15 = vadd.f32 %v469_v11, %v4599_v9  ;;  %v470_v20 = vld [vmem:[%s5444_s2 + $0x10] sm:$0xff]  ;;  %v471_v21 = vld [vmem:[%s5444_s2 + $0x18] sm:$0xff]  ;;  %v3502_v32 = vld [vmem:[%s4556_s20] ss:$0 sm:$0xff] }
  0x1a   : > { %v478_v23 = vadd.f32 %v470_v20, %v462_v16  ;;  %v479_v24 = vadd.f32 %v471_v21, %v463_v17  ;;  %v4331_v25 = vld [vmem:[%s4536_s24 + $0x10] sm:$0xff]   ;;  %v4332_v26 = vld [vmem:[%s4536_s24 + $0x18] sm:$0xff]   ;;  %v482_v29 = vadd.f32 %v470_v20, %v466_v18  ;;  %v483_v30 = vadd.f32 %v471_v21, %v467_v19  ;;  %v3507_v39 = vld [vmem:[%s4556_s20 + $0x1] ss:$0 sm:$0xff]  ;;  %3863 = vmatprep.mubr.msk.bf16.mxu0 %vm525_vm1, %v4673_v57 }
  0x1b   : > { %v507_v22 = vpack.c.bf16 %v477_v13, %v476_v12  ;;  %3846 = vmatpush3.bf16.msra.mxu1 %v4330_v5  ;;  %v581_v27 = vpack.c.bf16 %v481_v15, %v480_v14  ;;  %vm4641_vm3 = vmpackc.low %vm727_vm2, %vm727_vm2  ;;  %v4333_v55 = vld [vmem:[%s4536_s24 + $0x20] sm:$0xff]   ;;  %v4334_v56 = vld [vmem:[%s4536_s24 + $0x28] sm:$0xff]  }
  0x1c   : > { %v508_v28 = vpack.c.bf16 %v479_v24, %v478_v23  ;;  %3851 = vmatprep.subr.bf16.mxu1 %v4331_v25  ;;  %v582_v31 = vpack.c.bf16 %v483_v30, %v482_v29  ;;  %3859 = vmatprep.subr.bf16.mxu0 %v4333_v55  ;;  %v4684_v59 = vld [vmem:[%s5446_s4] sm:$0xff]  ;;  %v4689_v61 = vld [vmem:[%s5446_s4 + $0x8] sm:$0xff]  ;;  %v4695_v0 = vld [vmem:[%s5446_s4 + $0x10] sm:$0xff] }
  0x1d   : > { %3847 = vmatprep.mubr.msk.bf16.mxu1 %vm525_vm1, %v507_v22  ;;  %3860 = vmatpush3.bf16.msra.mxu0 %v4333_v55  ;;  %v4702_v4 = vld [vmem:[%s5446_s4 + $0x18] sm:$0xff]  ;;  %v3512_v11 = vld [vmem:[%s4556_s20 + $0x2] ss:$0 sm:$0xff] }
  0x1e   : > { %3848 = vmatmul.mubr.msk.bf16.vlgmr.msra.gmra.mrb[0].mxu1 %vm525_vm1, %v508_v28  ;;  %3861 = vmatprep.subr.bf16.mxu0 %v4334_v56 }
  0x1f   : > { %3852 = vmatpush3.bf16.msra.mxu1 %v4331_v25  ;;  %3855 = vmatprep.mubr.msk.bf16.mxu1 %vm525_vm1, %v581_v27 }
  0x20   : > { %3853 = vmatprep.subr.bf16.mxu1 %v4332_v26 }
  0x21   : > { %3862 = vmatpush3.bf16.msra.mxu0 %v4334_v56 }
  0x23   : > { %3854 = vmatpush3.bf16.msra.mxu1 %v4332_v26 }
  0x24   : > { %3864 = vmatmul.mubr.msk.bf16.vlgmr.msra.gmra.mrb[0].mxu0 %vm525_vm1, %v4677_v58 }
  0x26   : > { %3856 = vmatmul.mubr.msk.bf16.vlgmr.msra.gmra.mrb[4].mxu1 %vm525_vm1, %v582_v31 }
  0xf1   : > { %v3849_v33 = vpop.f32.mrb[0].mxu1 }
  0xf2   : > { %v566_v34 = vpop.f32.mrb[1].mxu1  ;;  %v4659_v53 = vadd.f32 %v3849_v33, %v3502_v32 }
  0xf3   : > { %v4634_v35 = vadd.f32 %v3502_v32, %v566_v34  ;;  %v3850_v36 = vpop.f32.mrb[2].mxu1 }
  0xf4   : > { %v569_v37 = vpop.f32.mrb[3].mxu1  ;;  %v4665_v54 = vadd.f32 %v3850_v36, %v3502_v32 }
  0xf5   : > { %3875 = vmatprep.mubr.msk.f32.mxu1 %vm727_vm2, %v4634_v35  ;;  %v4657_v52 = vadd.f32 %v3502_v32, %v569_v37 }
  0xf7   : > { %v3865_v12 = vpop.f32.mrb[0].mxu0 }
  0xf8   : > { %v712_v13 = vpop.f32.mrb[1].mxu0  ;;  %v4710_v14 = vadd.f32 %v3865_v12, %v3512_v11 }
  0xf9   : > { %v3857_v38 = vpop.f32.mrb[4].mxu1  ;;  %v4712_v15 = vadd.f32 %v3512_v11, %v712_v13  ;;  %v3866_v16 = vpop.f32.mrb[2].mxu0 }
  0xfa   : > { %v639_v40 = vpop.f32.mrb[5].mxu1  ;;  %v648_v42 = vadd.f32 %v3857_v38, %v3507_v39  ;;  %v4714_v17 = vadd.f32 %v3866_v16, %v3512_v11  ;;  %v715_v18 = vpop.f32.mrb[3].mxu0 }
  0xfb   : > { %v3858_v41 = vpop.f32.mrb[6].mxu1  ;;  %v640_v45 = vadd.f32 %v3507_v39, %v639_v40  ;;  %v4716_v19 = vadd.f32 %v3512_v11, %v715_v18 }
  0xfc   : > { %v651_v43 = vadd.f32 %v3858_v41, %v3507_v39  ;;  %v642_v44 = vpop.f32.mrb[7].mxu1  ;;  %v4149_v21 = vpack.c.bf16 %v4714_v17, %v4710_v14 }
  0xfd   : > { %v643_v46 = vadd.f32 %v3507_v39, %v642_v44  ;;  %v4145_v20 = vpack.c.bf16 %v4716_v19, %v4712_v15 }
  0xfe   : > { %v4139_v48 = vpack.c.bf16 %v651_v43, %v648_v42  ;;  %v4645_v49 = vpack.i.bf16 %v651_v43, %v648_v42 }
  0xff   : > { %v4133_v50 = vpack.c.bf16 %v643_v46, %v640_v45  ;;  %v4647_v51 = vpack.i.bf16 %v643_v46, %v640_v45  ;;  %4146 = vmatprep.subr.bf16.mxu0 %v4145_v20 }
 0x100   : > { %4148 = vmatpush3.bf16.msra.mxu0 %v4145_v20 }
 0x101   : > { %4135 = vmatprep.subr.msk.bf16.mxu1 %vm4641_vm3, %v4133_v50  ;;  %4150 = vmatprep.subr.bf16.mxu0 %v4149_v21 }
 0x102   : > { %4138 = vmatpush3.bf16.xpose.msk.msra.mxu1 %vm4641_vm3, %v4133_v50 }
 0x103   : > { %4141 = vmatprep.subr.msk.bf16.mxu1 %vm4641_vm3, %v4139_v48 }
 0x104   : > { %4152 = vmatpush3.bf16.msra.mxu0 %v4149_v21 }
 0x10a   : > { %4144 = vmatpush3.bf16.xpose.msk.msra.mxu1 %vm4641_vm3, %v4139_v48 }
 0x111   : > { %3876 = vmatmul.mubr.msk.f32.vlgmr.msra.gmra.mrb[8].mxu1 %vm727_vm2, %v4657_v52 }
 0x112   : > { %3878 = vmatprep.mubr.msk.f32.mxu1 %vm727_vm2, %v4659_v53 }
 0x115   : > { %3879 = vmatmul.mubr.msk.f32.gmra.mrb[10].mxu1 %vm727_vm2, %v4665_v54 }
 0x1e4   : > { %v3877_v60 = vpop.f32.mrb[8].mxu1 }
 0x1e5   : > { %v818_v62 = vpop.f32.mrb[9].mxu1  ;;  %v824_v1 = vadd.f32 %v3877_v60, %v4689_v61 }
 0x1e6   : > { %v819_v63 = vadd.f32 %v818_v62, %v4684_v59 }
 0x1e7   : > { %v840_v9 = vsel %vm525_vm1, %v824_v1, -inf }
 0x1e8   : > { %v3880_v2 = vpop.f32.mrb[10].mxu1  ;;  %v837_v3 = vsel %vm525_vm1, %v819_v63, -inf }
 0x1e9   : > { %v828_v5 = vpop.f32.mrb[11].mxu1  ;;  %838 = vmax.xlane.f32.xlu0 %v837_v3  ;;  %v834_v7 = vadd.f32 %v3880_v2, %v4702_v4 }
 0x1ea   : > { %v829_v6 = vadd.f32 %v828_v5, %v4695_v0 }
 0x1eb   : > { %v846_v10 = vsel %vm525_vm1, %v834_v7, -inf }
 0x1ec   : > { %v843_v8 = vsel %vm525_vm1, %v829_v6, -inf }
 0x1ed   : > { %844 = vmax.xlane.f32.xlu1 %v843_v8  ;;  %841 = vmax.xlane.f32.xlu0 %v840_v9 }
 0x1f1   : > { %847 = vmax.xlane.f32.xlu1 %v846_v10 }
 0x276   : > { %v839_v22 = vpop.xlane.xlu0 %838 }
 0x277   : > { %v849_v23 = vsub.f32 %v819_v63, %v839_v22 }
 0x279   : > { %v853_v24 = vmul.f32 1.442695, %v849_v23 }
 0x27a   : > { %v845_v25 = vpop.xlane.xlu1 %844  ;;  %v842_v26 = vpop.xlane.xlu0 %841 }
 0x27b   : > { %4351 = vpow2.f32 %v853_v24  ;;  %v851_v27 = vsub.f32 %v829_v6, %v845_v25  ;;  %v850_v28 = vsub.f32 %v824_v1, %v842_v26 }
 0x27d   : > { %v857_v29 = vmul.f32 1.442695, %v851_v27  ;;  %v855_v30 = vmul.f32 1.442695, %v850_v28 }
 0x27e   : > { %v848_v31 = vpop.xlane.xlu1 %847 }
 0x27f   : > { %4353 = vpow2.f32 %v857_v29  ;;  %v852_v32 = vsub.f32 %v834_v7, %v848_v31 }
 0x280   : > { %4355 = vpow2.f32 %v855_v30 }
 0x281   : > { %v859_v33 = vmul.f32 1.442695, %v852_v32 }
 0x283   : > { %4357 = vpow2.f32 %v859_v33 }
 0x285   : > { %v4352_v34 = vpop.eup %4351 }
 0x286   : > { %v861_v36 = vsel %vm525_vm1, %v4352_v34, 0.0 }
 0x287   : > { %862 = vadd.xlane.f32.xlu0 %v861_v36 }
 0x289   : > { %v4354_v37 = vpop.eup %4353 }
 0x28a   : > { %v4356_v38 = vpop.eup %4355  ;;  %v867_v39 = vsel %vm525_vm1, %v4354_v37, 0.0 }
 0x28b   : > { %868 = vadd.xlane.f32.xlu0 %v867_v39  ;;  %v864_v40 = vsel %vm525_vm1, %v4356_v38, 0.0 }
 0x28c   : > { %865 = vadd.xlane.f32.xlu1 %v864_v40 }
 0x28d   : > { %v4358_v41 = vpop.eup %4357 }
 0x28e   : > { %v870_v42 = vsel %vm525_vm1, %v4358_v41, 0.0 }
 0x290   : > { %871 = vadd.xlane.f32.xlu1 %v870_v42 }
 0x2a1   : > { %4245 = vrot.lane.b32.xlu1 %v4645_v49, %s4451_s22  ;;  %4240 = vrot.lane.b32.xlu0 %v4647_v51, %s4451_s22 }
 0x2a5   : > { %978 = vrot.lane.b32.xlu1 %v4634_v35, %s4451_s22  ;;  %982 = vrot.lane.b32.xlu0 %v4659_v53, %s4451_s22 }
 0x2a9   : > { %980 = vrot.lane.b32.xlu1 %v4657_v52, %s4451_s22 }
 0x2ad   : > { %984 = vrot.lane.b32.xlu1 %v4665_v54, %s4451_s22 }
 0x314   : > { %v863_v43 = vpop.xlane.xlu0 %862 }
 0x315   : > { %4359 = vrcp.f32 %v863_v43 }
 0x318   : > { %v869_v44 = vpop.xlane.xlu0 %868 }
 0x319   : > { %v866_v45 = vpop.xlane.xlu1 %865  ;;  %4361 = vrcp.f32 %v869_v44 }
 0x31a   : > { %4363 = vrcp.f32 %v866_v45 }
 0x31c   : > { %v4241_v46 = vpop.permute.xlu0 %4240 }
 0x31d   : > { %v872_v48 = vpop.xlane.xlu1 %871  ;;  %v4243_v50 = vunpack.i.h.bf16 %v4241_v46  ;;  %v4242_v55 = vunpack.i.l.bf16 %v4241_v46  ;;  %v4774_v46 = vpack.i.bf16 %v4714_v17, %v4710_v14 }
 0x31e   : > { %4365 = vrcp.f32 %v872_v48  ;;  %v4782_v48 = vpack.i.bf16 %v4716_v19, %v4712_v15 }
 0x31f   : > { %v4360_v56 = vpop.eup %4359  ;;  %v4153_v60 = vpack.c.bf16 %v4243_v50, %v4242_v55 }
 0x320   : > { %v877_v62 = vmul.f32 %v4360_v56, %v4352_v34  ;;  %v983_v13 = vpop.permute.xlu0 %982 }
 0x321   : > { %v4246_v63 = vpop.permute.xlu1 %4245  ;;  %4155 = vmatprep.subr.msk.bf16.mxu0 %vm4641_vm3, %v4153_v60 }
 0x322   : > { %3889 = vmatprep.mubr.msk.f32.mxu0 %vm525_vm1, %v877_v62  ;;  %v4248_v2 = vunpack.i.h.bf16 %v4246_v63  ;;  %v4247_v3 = vunpack.i.l.bf16 %v4246_v63 }
 0x323   : > { %v4362_v1 = vpop.eup %4361 }
 0x324   : > { %v4364_v5 = vpop.eup %4363  ;;  %v879_v6 = vmul.f32 %v4362_v1, %v4354_v37  ;;  %v4159_v8 = vpack.c.bf16 %v4248_v2, %v4247_v3 }
 0x325   : > { %v878_v7 = vmul.f32 %v4364_v5, %v4356_v38  ;;  %v979_v11 = vpop.permute.xlu1 %978 }
 0x327   : > { %3890 = vmatmul.mubr.msk.f32.vlgmr.msra.gmra.mrb[4].mxu0 %vm525_vm1, %v878_v7 }
 0x328   : > { %v4366_v9 = vpop.eup %4365  ;;  %4158 = vmatpush3.bf16.xpose.msk.msra.mxu0 %vm4641_vm3, %v4153_v60  ;;  %3892 = vmatprep.mubr.msk.f32.mxu0 %vm525_vm1, %v879_v6 }
 0x329   : > { %4161 = vmatprep.subr.msk.bf16.mxu0 %vm4641_vm3, %v4159_v8  ;;  %v880_v10 = vmul.f32 %v4366_v9, %v4358_v41  ;;  %v981_v12 = vpop.permute.xlu1 %980 }
 0x32b   : > { %3893 = vmatmul.mubr.msk.f32.gmra.mrb[6].mxu0 %vm525_vm1, %v880_v10 }
 0x32c   : > { %3903 = vmatprep.mubr.msk.f32.mxu0 %vm727_vm2, %v979_v11 }
 0x32d   : > { %v985_v16 = vpop.permute.xlu1 %984 }
 0x330   : > { %4164 = vmatpush3.bf16.xpose.msk.msra.mxu0 %vm4641_vm3, %v4159_v8 }
 0x337   : > { %3904 = vmatmul.mubr.msk.f32.vlgmr.msra.gmra.mrb[8].mxu0 %vm727_vm2, %v981_v12 }
 0x338   : > { %3906 = vmatprep.mubr.msk.f32.mxu0 %vm727_vm2, %v983_v13 }
 0x33b   : > { %3907 = vmatmul.mubr.msk.f32.gmra.mrb[10].mxu0 %vm727_vm2, %v985_v16 }
 0x3fa   : > { %v4754_v18 = vpop.f32.mrb[4].mxu0 }
 0x3fb   : > { %v4756_v20 = vpop.f32.mrb[5].mxu0 }
 0x3fe   : > { %v4758_v21 = vpop.f32.mrb[6].mxu0 }
 0x3ff   : > { %v4760_v22 = vpop.f32.mrb[7].mxu0 }
 0x40a   : > { %v3905_v23 = vpop.f32.mrb[8].mxu0 }
 0x40b   : > { %v1082_v24 = vadd.f32 %v3905_v23, %v4689_v61  ;;  %v1076_v25 = vpop.f32.mrb[9].mxu0 }
 0x40c   : > { %v1077_v26 = vadd.f32 %v1076_v25, %v4684_v59 }
 0x40d   : > { %v1098_v27 = vsel %vm525_vm1, %v1082_v24, -inf }
 0x40e   : > { %1099 = vmax.xlane.f32.xlu1 %v1098_v27  ;;  %v3908_v28 = vpop.f32.mrb[10].mxu0  ;;  %v1095_v29 = vsel %vm525_vm1, %v1077_v26, -inf }
 0x40f   : > { %v1086_v30 = vpop.f32.mrb[11].mxu0  ;;  %1096 = vmax.xlane.f32.xlu0 %v1095_v29  ;;  %v1092_v32 = vadd.f32 %v3908_v28, %v4702_v4 }
 0x410   : > { %v1087_v31 = vadd.f32 %v1086_v30, %v4695_v0 }
 0x411   : > { %v1104_v34 = vsel %vm525_vm1, %v1092_v32, -inf }
 0x412   : > { %v1101_v33 = vsel %vm525_vm1, %v1087_v31, -inf }
 0x413   : > { %1102 = vmax.xlane.f32.xlu0 %v1101_v33 }
 0x417   : > { %1105 = vmax.xlane.f32.xlu0 %v1104_v34 }
 0x49b   : > { %v1100_v36 = vpop.xlane.xlu1 %1099 }
 0x49c   : > { %v1108_v37 = vsub.f32 %v1082_v24, %v1100_v36  ;;  %v1097_v38 = vpop.xlane.xlu0 %1096 }
 0x49d   : > { %v1107_v39 = vsub.f32 %v1077_v26, %v1097_v38 }
 0x49e   : > { %v1113_v40 = vmul.f32 1.442695, %v1108_v37 }
 0x49f   : > { %v1111_v41 = vmul.f32 1.442695, %v1107_v39 }
 0x4a0   : > { %4367 = vpow2.f32 %v1113_v40  ;;  %v1103_v50 = vpop.xlane.xlu0 %1102 }
 0x4a1   : > { %4369 = vpow2.f32 %v1111_v41  ;;  %v1109_v14 = vsub.f32 %v1087_v31, %v1103_v50 }
 0x4a3   : > { %v1115_v17 = vmul.f32 1.442695, %v1109_v14 }
 0x4a4   : > { %v1106_v55 = vpop.xlane.xlu0 %1105 }
 0x4a5   : > { %v1110_v56 = vsub.f32 %v1092_v32, %v1106_v55  ;;  %4371 = vpow2.f32 %v1115_v17 }
 0x4a7   : > { %v1117_v60 = vmul.f32 1.442695, %v1110_v56 }
 0x4a9   : > { %4373 = vpow2.f32 %v1117_v60 }
 0x4aa   : > { %v4368_v42 = vpop.eup %4367 }
 0x4ab   : > { %v4370_v43 = vpop.eup %4369  ;;  %v1122_v44 = vsel %vm525_vm1, %v4368_v42, 0.0 }
 0x4ac   : > { %1123 = vadd.xlane.f32.xlu1 %v1122_v44  ;;  %v1119_v45 = vsel %vm525_vm1, %v4370_v43, 0.0 }
 0x4ad   : > { %1120 = vadd.xlane.f32.xlu0 %v1119_v45 }
 0x4af   : > { %v4372_v62 = vpop.eup %4371 }
 0x4b0   : > { %v1125_v63 = vsel %vm525_vm1, %v4372_v62, 0.0 }
 0x4b3   : > { %v4374_v15 = vpop.eup %4373 }
 0x4b4   : > { %v1128_v19 = vsel %vm525_vm1, %v4374_v15, 0.0 }
 0x4bd   : > { %4255 = vrot.lane.b32.xlu1 %v4774_v46, %s4451_s22 }
 0x4c1   : > { %4260 = vrot.lane.b32.xlu1 %v4647_v51, %s4452_s23 }
 0x4c3   : > { %4250 = vrot.lane.b32.xlu0 %v4782_v48, %s4451_s22 }
 0x4c5   : > { %4265 = vrot.lane.b32.xlu1 %v4645_v49, %s4452_s23 }
 0x4e2   : > { %1126 = vadd.xlane.f32.xlu0 %v1125_v63 }
 0x4e9   : > { %1129 = vadd.xlane.f32.xlu1 %v1128_v19 }
 0x4f8   : > { %1252 = vrot.lane.b32.xlu0 %v4634_v35, %s4452_s23 }
 0x4fa   : > { %1254 = vrot.lane.b32.xlu1 %v4657_v52, %s4452_s23 }
 0x4fc   : > { %1256 = vrot.lane.b32.xlu0 %v4659_v53, %s4452_s23 }
 0x4fe   : > { %1258 = vrot.lane.b32.xlu1 %v4665_v54, %s4452_s23 }
 0x539   : > { %v1124_v1 = vpop.xlane.xlu1 %1123 }
 0x53a   : > { %v1121_v2 = vpop.xlane.xlu0 %1120 }
 0x53b   : > { %4375 = vrcp.f32 %v1121_v2 }
 0x53c   : > { %4377 = vrcp.f32 %v1124_v1 }
 0x53d   : > { %v4256_v3 = vpop.permute.xlu1 %4255 }
 0x53e   : > { %v4251_v5 = vpop.permute.xlu0 %4250  ;;  %v4258_v6 = vunpack.i.h.bf16 %v4256_v3  ;;  %v4257_v7 = vunpack.i.l.bf16 %v4256_v3 }
 0x53f   : > { %v4253_v8 = vunpack.i.h.bf16 %v4251_v5  ;;  %v4252_v9 = vunpack.i.l.bf16 %v4251_v5 }
 0x540   : > { %v4169_v12 = vpack.c.bf16 %v4258_v6, %v4257_v7 }
 0x541   : > { %v4165_v10 = vpack.c.bf16 %v4253_v8, %v4252_v9  ;;  %v4261_v11 = vpop.permute.xlu1 %4260 }
 0x542   : > { %v4263_v13 = vunpack.i.h.bf16 %v4261_v11  ;;  %v4262_v16 = vunpack.i.l.bf16 %v4261_v11 }
 0x543   : > { %4166 = vmatprep.subr.bf16.mxu1 %v4165_v10 }
 0x544   : > { %4168 = vmatpush3.bf16.msra.mxu1 %v4165_v10  ;;  %v4173_v26 = vpack.c.bf16 %v4263_v13, %v4262_v16 }
 0x545   : > { %v4376_v23 = vpop.eup %4375  ;;  %4170 = vmatprep.subr.bf16.mxu1 %v4169_v12  ;;  %v4266_v28 = vpop.permute.xlu1 %4265 }
 0x546   : > { %v4378_v24 = vpop.eup %4377  ;;  %v1135_v25 = vmul.f32 %v4376_v23, %v4370_v43  ;;  %v4268_v29 = vunpack.i.h.bf16 %v4266_v28  ;;  %v4267_v30 = vunpack.i.l.bf16 %v4266_v28 }
 0x547   : > { %v1136_v27 = vmul.f32 %v4378_v24, %v4368_v42 }
 0x548   : > { %4172 = vmatpush3.bf16.msra.mxu1 %v4169_v12  ;;  %3917 = vmatprep.mubr.msk.f32.mxu1 %vm525_vm1, %v1135_v25  ;;  %v4179_v31 = vpack.c.bf16 %v4268_v29, %v4267_v30 }
 0x549   : > { %4175 = vmatprep.subr.msk.bf16.mxu1 %vm4641_vm3, %v4173_v26 }
 0x54b   : > { %3918 = vmatmul.mubr.msk.f32.vlgmr.msra.gmra.mrb[12].mxu1 %vm525_vm1, %v1136_v27 }
 0x551   : > { %4178 = vmatpush3.bf16.xpose.msk.msra.mxu1 %vm4641_vm3, %v4173_v26 }
 0x552   : > { %4181 = vmatprep.subr.msk.bf16.mxu1 %vm4641_vm3, %v4179_v31 }
 0x559   : > { %4184 = vmatpush3.bf16.xpose.msk.msra.mxu1 %vm4641_vm3, %v4179_v31 }
 0x56f   : > { %v1127_v32 = vpop.xlane.xlu0 %1126 }
 0x570   : > { %4379 = vrcp.f32 %v1127_v32 }
 0x573   : > { %v1253_v38 = vpop.permute.xlu0 %1252 }
 0x576   : > { %v1130_v33 = vpop.xlane.xlu1 %1129 }
 0x577   : > { %4381 = vrcp.f32 %v1130_v33  ;;  %v1257_v41 = vpop.permute.xlu0 %1256 }
 0x57a   : > { %v4380_v34 = vpop.eup %4379  ;;  %v1255_v40 = vpop.permute.xlu1 %1254 }
 0x57b   : > { %v1137_v36 = vmul.f32 %v4380_v34, %v4372_v62 }
 0x57d   : > { %3920 = vmatprep.mubr.msk.f32.mxu1 %vm525_vm1, %v1137_v36 }
 0x57e   : > { %v1259_v42 = vpop.permute.xlu1 %1258 }
 0x581   : > { %v4382_v37 = vpop.eup %4381 }
 0x582   : > { %v1138_v39 = vmul.f32 %v4382_v37, %v4374_v15 }
 0x584   : > { %3921 = vmatmul.mubr.msk.f32.gmra.mrb[14].mxu1 %vm525_vm1, %v1138_v39 }
 0x585   : > { %3931 = vmatprep.mubr.msk.f32.mxu1 %vm727_vm2, %v1253_v38 }
 0x588   : > { %3932 = vmatmul.mubr.msk.f32.vlgmr.msra.gmra.mrb[16].mxu1 %vm727_vm2, %v1255_v40 }
 0x589   : > { %3934 = vmatprep.mubr.msk.f32.mxu1 %vm727_vm2, %v1257_v41 }
 0x58c   : > { %3935 = vmatmul.mubr.msk.f32.gmra.mrb[18].mxu1 %vm727_vm2, %v1259_v42 }
 0x61e   : > { %v4814_v43 = vpop.f32.mrb[12].mxu1 }
 0x61f   : > { %v4816_v44 = vpop.f32.mrb[13].mxu1 }
 0x620   : > { %v4299_v45 = vpack.i.bf16 %v4814_v43, %v4816_v44  ;;  %v1930_v43 = vld [vmem:[%s5445_s3 + $0x18] sm:$0xff]  ;;  %v1931_v44 = vld [vmem:[%s5445_s3 + $0x20] sm:$0xff] }
 0x657   : > { %v4820_v50 = vpop.f32.mrb[14].mxu1 }
 0x658   : > { %v4822_v14 = vpop.f32.mrb[15].mxu1 }
 0x659   : > { %v4304_v17 = vpack.i.bf16 %v4820_v50, %v4822_v14  ;;  %v1933_v50 = vld [vmem:[%s5445_s3 + $0x30] sm:$0xff]  ;;  %v1934_v14 = vld [vmem:[%s5445_s3 + $0x38] sm:$0xff] }
 0x65b   : > { %v3933_v55 = vpop.f32.mrb[16].mxu1 }
 0x65c   : > { %v1356_v56 = vadd.f32 %v3933_v55, %v4689_v61  ;;  %v1350_v60 = vpop.f32.mrb[17].mxu1 }
 0x65d   : > { %v1351_v62 = vadd.f32 %v1350_v60, %v4684_v59 }
 0x65e   : > { %v1372_v63 = vsel %vm525_vm1, %v1356_v56, -inf }
 0x65f   : > { %1373 = vmax.xlane.f32.xlu1 %v1372_v63  ;;  %v3936_v15 = vpop.f32.mrb[18].mxu1  ;;  %v1369_v19 = vsel %vm525_vm1, %v1351_v62, -inf }
 0x660   : > { %v1360_v1 = vpop.f32.mrb[19].mxu1  ;;  %1370 = vmax.xlane.f32.xlu0 %v1369_v19  ;;  %v1366_v3 = vadd.f32 %v3936_v15, %v4702_v4 }
 0x661   : > { %v1361_v2 = vadd.f32 %v1360_v1, %v4695_v0 }
 0x662   : > { %v1378_v6 = vsel %vm525_vm1, %v1366_v3, -inf }
 0x663   : > { %v1375_v5 = vsel %vm525_vm1, %v1361_v2, -inf }
 0x664   : > { %1376 = vmax.xlane.f32.xlu0 %v1375_v5 }
 0x668   : > { %1379 = vmax.xlane.f32.xlu0 %v1378_v6 }
 0x6ec   : > { %v1374_v7 = vpop.xlane.xlu1 %1373 }
 0x6ed   : > { %v1382_v8 = vsub.f32 %v1356_v56, %v1374_v7  ;;  %v1371_v9 = vpop.xlane.xlu0 %1370 }
 0x6ee   : > { %v1381_v10 = vsub.f32 %v1351_v62, %v1371_v9 }
 0x6ef   : > { %v1387_v11 = vmul.f32 1.442695, %v1382_v8 }
 0x6f0   : > { %v1385_v12 = vmul.f32 1.442695, %v1381_v10 }
 0x6f1   : > { %4383 = vpow2.f32 %v1387_v11  ;;  %v1377_v25 = vpop.xlane.xlu0 %1376 }
 0x6f2   : > { %4385 = vpow2.f32 %v1385_v12  ;;  %v1383_v26 = vsub.f32 %v1361_v2, %v1377_v25 }
 0x6f4   : > { %v1389_v27 = vmul.f32 1.442695, %v1383_v26 }
 0x6f5   : > { %v1380_v28 = vpop.xlane.xlu0 %1379 }
 0x6f6   : > { %v1384_v29 = vsub.f32 %v1366_v3, %v1380_v28  ;;  %4387 = vpow2.f32 %v1389_v27 }
 0x6f8   : > { %v1391_v30 = vmul.f32 1.442695, %v1384_v29 }
 0x6fa   : > { %4389 = vpow2.f32 %v1391_v30 }
 0x6fb   : > { %v4384_v13 = vpop.eup %4383 }
 0x6fc   : > { %v4386_v16 = vpop.eup %4385  ;;  %v1396_v23 = vsel %vm525_vm1, %v4384_v13, 0.0 }
 0x6fd   : > { %1397 = vadd.xlane.f32.xlu1 %v1396_v23  ;;  %v1393_v24 = vsel %vm525_vm1, %v4386_v16, 0.0 }
 0x6fe   : > { %1394 = vadd.xlane.f32.xlu0 %v1393_v24 }
 0x700   : > { %v4388_v31 = vpop.eup %4387 }
 0x701   : > { %v1399_v32 = vsel %vm525_vm1, %v4388_v31, 0.0 }
 0x704   : > { %v4390_v33 = vpop.eup %4389 }
 0x70e   : > { %4275 = vrot.lane.b32.xlu1 %v4774_v46, %s4452_s23 }
 0x712   : > { %4280 = vrot.lane.b32.xlu1 %v4647_v51, %s4453_s25  ;;  %v1402_v51 = vsel %vm525_vm1, %v4390_v33, 0.0 }
 0x714   : > { %4270 = vrot.lane.b32.xlu0 %v4782_v48, %s4452_s23 }
 0x716   : > { %4285 = vrot.lane.b32.xlu1 %v4645_v49, %s4453_s25 }
 0x733   : > { %1400 = vadd.xlane.f32.xlu0 %v1399_v32 }
 0x73a   : > { %1403 = vadd.xlane.f32.xlu1 %v1402_v51 }
 0x749   : > { %1522 = vrot.lane.b32.xlu0 %v4634_v35, %s4453_s25 }
 0x74b   : > { %1524 = vrot.lane.b32.xlu1 %v4657_v52, %s4453_s25 }
 0x74d   : > { %1526 = vrot.lane.b32.xlu0 %v4659_v53, %s4453_s25 }
 0x74f   : > { %1528 = vrot.lane.b32.xlu1 %v4665_v54, %s4453_s25 }
 0x78a   : > { %v1398_v49 = vpop.xlane.xlu1 %1397 }
 0x78b   : > { %v1395_v34 = vpop.xlane.xlu0 %1394 }
 0x78c   : > { %4391 = vrcp.f32 %v1395_v34 }
 0x78d   : > { %4393 = vrcp.f32 %v1398_v49 }
 0x78e   : > { %v4276_v36 = vpop.permute.xlu1 %4275 }
 0x78f   : > { %v4271_v37 = vpop.permute.xlu0 %4270  ;;  %v4278_v38 = vunpack.i.h.bf16 %v4276_v36  ;;  %v4277_v39 = vunpack.i.l.bf16 %v4276_v36 }
 0x790   : > { %v4273_v40 = vunpack.i.h.bf16 %v4271_v37  ;;  %v4272_v41 = vunpack.i.l.bf16 %v4271_v37 }
 0x791   : > { %v4189_v55 = vpack.c.bf16 %v4278_v38, %v4277_v39 }
 0x792   : > { %v4185_v35 = vpack.c.bf16 %v4273_v40, %v4272_v41  ;;  %v4281_v42 = vpop.permute.xlu1 %4280 }
 0x793   : > { %v4283_v52 = vunpack.i.h.bf16 %v4281_v42  ;;  %v4282_v56 = vunpack.i.l.bf16 %v4281_v42 }
 0x794   : > { %4186 = vmatprep.subr.bf16.mxu0 %v4185_v35 }
 0x795   : > { %4188 = vmatpush3.bf16.msra.mxu0 %v4185_v35  ;;  %v4193_v62 = vpack.c.bf16 %v4283_v52, %v4282_v56 }
 0x796   : > { %v4392_v53 = vpop.eup %4391  ;;  %4190 = vmatprep.subr.bf16.mxu0 %v4189_v55  ;;  %v4286_v15 = vpop.permute.xlu1 %4285 }
 0x797   : > { %v4394_v54 = vpop.eup %4393  ;;  %v1409_v60 = vmul.f32 %v4392_v53, %v4386_v16  ;;  %v4288_v19 = vunpack.i.h.bf16 %v4286_v15  ;;  %v4287_v1 = vunpack.i.l.bf16 %v4286_v15  ;;  %v1927_v15 = vld [vmem:[%s5445_s3] sm:$0xff] }
 0x798   : > { %v1410_v63 = vmul.f32 %v4394_v54, %v4384_v13 }
 0x799   : > { %4192 = vmatpush3.bf16.msra.mxu0 %v4189_v55  ;;  %3945 = vmatprep.mubr.msk.f32.mxu0 %vm525_vm1, %v1409_v60  ;;  %v4199_v2 = vpack.c.bf16 %v4288_v19, %v4287_v1  ;;  %v1936_v19 = vld [vmem:[%s5445_s3 + $0x48] sm:$0xff]  ;;  %v1937_v1 = vld [vmem:[%s5445_s3 + $0x50] sm:$0xff] }
 0x79a   : > { %4195 = vmatprep.subr.msk.bf16.mxu0 %vm4641_vm3, %v4193_v62 }
 0x79c   : > { %3946 = vmatmul.mubr.msk.f32.vlgmr.msra.gmra.mrb[12].mxu0 %vm525_vm1, %v1410_v63 }
 0x7a2   : > { %4198 = vmatpush3.bf16.xpose.msk.msra.mxu0 %vm4641_vm3, %v4193_v62 }
 0x7a3   : > { %4201 = vmatprep.subr.msk.bf16.mxu0 %vm4641_vm3, %v4199_v2 }
 0x7aa   : > { %4204 = vmatpush3.bf16.xpose.msk.msra.mxu0 %vm4641_vm3, %v4199_v2  ;;  %v1938_v2 = vld [vmem:[%s5445_s3 + $0x58] sm:$0xff] }
 0x7ab   : > { %4214 = vmatprep.subr.bf16.mxu0 %v4673_v57 }
 0x7c0   : > { %v1401_v3 = vpop.xlane.xlu0 %1400 }
 0x7c1   : > { %4395 = vrcp.f32 %v1401_v3  ;;  %v1939_v3 = vld [vmem:[%s5445_s3 + $0x60] sm:$0xff] }
 0x7c4   : > { %v1523_v9 = vpop.permute.xlu0 %1522 }
 0x7c7   : > { %v1404_v5 = vpop.xlane.xlu1 %1403 }
 0x7c8   : > { %4397 = vrcp.f32 %v1404_v5  ;;  %v1527_v47 = vpop.permute.xlu0 %1526  ;;  %v1940_v5 = vld [vmem:[%s5445_s3 + $0x68] sm:$0xff] }
 0x7cb   : > { %v4396_v6 = vpop.eup %4395  ;;  %v1525_v11 = vpop.permute.xlu1 %1524 }
 0x7cc   : > { %v1411_v7 = vmul.f32 %v4396_v6, %v4388_v31  ;;  %v1941_v6 = vld [vmem:[%s5445_s3 + $0x70] sm:$0xff] }
 0x7ce   : > { %3948 = vmatprep.mubr.msk.f32.mxu0 %vm525_vm1, %v1411_v7  ;;  %v1942_v7 = vld [vmem:[%s5445_s3 + $0x78] sm:$0xff] }
 0x7cf   : > { %v1529_v12 = vpop.permute.xlu1 %1528 }
 0x7d2   : > { %v4398_v8 = vpop.eup %4397 }
 0x7d3   : > { %v1412_v10 = vmul.f32 %v4398_v8, %v4390_v33  ;;  %v1943_v8 = vld [vmem:[%s5445_s3 + $0x80] sm:$0xff] }
 0x7d5   : > { %3949 = vmatmul.mubr.msk.f32.gmra.mrb[14].mxu0 %vm525_vm1, %v1412_v10  ;;  %v1945_v10 = vld [vmem:[%s5445_s3 + $0x90] sm:$0xff] }
 0x7d6   : > { %3959 = vmatprep.mubr.msk.f32.mxu0 %vm727_vm2, %v1523_v9  ;;  %v1944_v9 = vld [vmem:[%s5445_s3 + $0x88] sm:$0xff] }
 0x7d9   : > { %3960 = vmatmul.mubr.msk.f32.vlgmr.msra.gmra.mrb[16].mxu0 %vm727_vm2, %v1525_v11  ;;  %v1946_v11 = vld [vmem:[%s5445_s3 + $0x98] sm:$0xff] }
 0x7da   : > { %3962 = vmatprep.mubr.msk.f32.mxu0 %vm727_vm2, %v1527_v47  ;;  %4216 = vmatpush3.bf16.msra.mxu0 %v4673_v57  ;;  %v1947_v47 = vld [vmem:[%s5445_s3 + $0xa0] sm:$0xff] }
 0x7db   : > { %4218 = vmatprep.subr.bf16.mxu0 %v4677_v58 }
 0x7dd   : > { %3963 = vmatmul.mubr.msk.f32.gmra.mrb[18].mxu0 %vm727_vm2, %v1529_v12  ;;  %v1948_v12 = vld [vmem:[%s5445_s3 + $0xa8] sm:$0xff] }
 0x7de   : > { %4220 = vmatpush3.bf16.msra.mxu0 %v4677_v58  ;;  %3995 = vmatprep.mubr.msk.f32.mxu0 %vm525_vm1, %v1927_v15  ;;  %v4336_v15 = vld [vmem:[%s4536_s24 + $0x30] sm:$0xff]  }
 0x86f   : > { %v3947_v13 = vpop.f32.mrb[12].mxu0 }
 0x870   : > { %v1503_v16 = vpop.f32.mrb[13].mxu0 }
 0x871   : > { %v4309_v23 = vpack.i.bf16 %v3947_v13, %v1503_v16  ;;  %v1949_v13 = vld [vmem:[%s5445_s3 + $0xb0] sm:$0xff]  ;;  %v1950_v16 = vld [vmem:[%s5445_s3 + $0xb8] sm:$0xff] }
 0x8a8   : > { %v3950_v24 = vpop.f32.mrb[14].mxu0 }
 0x8a9   : > { %v1513_v25 = vpop.f32.mrb[15].mxu0 }
 0x8aa   : > { %v4314_v26 = vpack.i.bf16 %v3950_v24, %v1513_v25  ;;  %v1952_v24 = vld [vmem:[%s5445_s3 + $0xc8] sm:$0xff]  ;;  %v1953_v25 = vld [vmem:[%s5445_s3 + $0xd0] sm:$0xff] }
 0x8ac   : > { %v3961_v27 = vpop.f32.mrb[16].mxu0 }
 0x8ad   : > { %v1626_v28 = vadd.f32 %v3961_v27, %v4689_v61  ;;  %v1620_v29 = vpop.f32.mrb[17].mxu0  ;;  %v1955_v27 = vld [vmem:[%s5445_s3 + $0xe0] sm:$0xff] }
 0x8ae   : > { %v1621_v30 = vadd.f32 %v1620_v29, %v4684_v59  ;;  %v1957_v29 = vld [vmem:[%s5445_s3 + $0xf0] sm:$0xff] }
 0x8af   : > { %v1642_v57 = vsel %vm525_vm1, %v1626_v28, -inf }
 0x8b0   : > { %1643 = vmax.xlane.f32.xlu1 %v1642_v57  ;;  %v3964_v31 = vpop.f32.mrb[18].mxu0  ;;  %v1639_v32 = vsel %vm525_vm1, %v1621_v30, -inf  ;;  %v1959_v57 = vld [vmem:[%s5445_s3 + $0x100] sm:$0xff] }
 0x8b1   : > { %v1630_v33 = vpop.f32.mrb[19].mxu0  ;;  %1640 = vmax.xlane.f32.xlu0 %v1639_v32  ;;  %v1636_v51 = vadd.f32 %v3964_v31, %v4702_v4  ;;  %v1960_v31 = vld [vmem:[%s5445_s3 + $0x108] sm:$0xff]  ;;  %v1961_v32 = vld [vmem:[%s5445_s3 + $0x110] sm:$0xff] }
 0x8b2   : > { %v1631_v58 = vadd.f32 %v1630_v33, %v4695_v0  ;;  %v1962_v33 = vld [vmem:[%s5445_s3 + $0x118] sm:$0xff] }
 0x8b3   : > { %v1648_v61 = vsel %vm525_vm1, %v1636_v51, -inf }
 0x8b4   : > { %v1645_v49 = vsel %vm525_vm1, %v1631_v58, -inf }
 0x8b5   : > { %1646 = vmax.xlane.f32.xlu0 %v1645_v49 }
 0x8b9   : > { %1649 = vmax.xlane.f32.xlu0 %v1648_v61 }
 0x93d   : > { %v1644_v34 = vpop.xlane.xlu1 %1643 }
 0x93e   : > { %v1652_v59 = vsub.f32 %v1626_v28, %v1644_v34  ;;  %v1641_v36 = vpop.xlane.xlu0 %1640  ;;  %v1956_v28 = vld [vmem:[%s5445_s3 + $0xe8] sm:$0xff] }
 0x93f   : > { %v1651_v37 = vsub.f32 %v1621_v30, %v1641_v36  ;;  %v1958_v30 = vld [vmem:[%s5445_s3 + $0xf8] sm:$0xff] }
 0x940   : > { %v1657_v38 = vmul.f32 1.442695, %v1652_v59 }
 0x941   : > { %v1655_v39 = vmul.f32 1.442695, %v1651_v37 }
 0x942   : > { %4399 = vpow2.f32 %v1657_v38  ;;  %v1647_v40 = vpop.xlane.xlu0 %1646 }
 0x943   : > { %4401 = vpow2.f32 %v1655_v39  ;;  %v1653_v41 = vsub.f32 %v1631_v58, %v1647_v40 }
 0x945   : > { %v1659_v35 = vmul.f32 1.442695, %v1653_v41 }
 0x946   : > { %v1650_v0 = vpop.xlane.xlu0 %1649 }
 0x947   : > { %4403 = vpow2.f32 %v1659_v35  ;;  %v1654_v4 = vsub.f32 %v1636_v51, %v1650_v0 }
 0x949   : > { %v1661_v42 = vmul.f32 1.442695, %v1654_v4 }
 0x94b   : > { %4405 = vpow2.f32 %v1661_v42 }
 0x94c   : > { %v4882_v55 = vpop.eup %4399 }
 0x94d   : > { %v4884_v52 = vpop.eup %4401  ;;  %v1666_v56 = vsel %vm525_vm1, %v4882_v55, 0.0 }
 0x94e   : > { %1667 = vadd.xlane.f32.xlu1 %v1666_v56  ;;  %v1663_v53 = vsel %vm525_vm1, %v4884_v52, 0.0 }
 0x94f   : > { %1664 = vadd.xlane.f32.xlu0 %v1663_v53 }
 0x951   : > { %v4890_v54 = vpop.eup %4403 }
 0x952   : > { %v1669_v60 = vsel %vm525_vm1, %v4890_v54, 0.0 }
 0x953   : > { %1670 = vadd.xlane.f32.xlu0 %v1669_v60 }
 0x955   : > { %v4894_v62 = vpop.eup %4405 }
 0x956   : > { %v1672_v63 = vsel %vm525_vm1, %v4894_v62, 0.0 }
 0x957   : > { %1673 = vadd.xlane.f32.xlu1 %v1672_v63  ;;  %v4335_v63 = vld [vmem:[%s4536_s24 + $0x50] sm:$0xff]  }
 0x958   : > { %4089 = vmatprep.subr.bf16.mxu0 %v4335_v63 }
 0x968   : > { %4295 = vrot.lane.b32.xlu1 %v4774_v46, %s4453_s25  ;;  %v1928_v46 = vld [vmem:[%s5445_s3 + $0x8] sm:$0xff] }
 0x969   : > { %4290 = vrot.lane.b32.xlu0 %v4782_v48, %s4453_s25  ;;  %v1929_v48 = vld [vmem:[%s5445_s3 + $0x10] sm:$0xff]  ;;  %3996 = vmatmul.mubr.msk.f32.vlgmr.msra.gmra.mrb[20].mxu0 %vm525_vm1, %v1928_v46  ;;  %v5064_v46 = vld [vmem:[%s4536_s24 + $0x40] sm:$0xff]  }
 0x96a   : > { %3998 = vmatprep.mubr.msk.f32.mxu0 %vm525_vm1, %v1929_v48  ;;  %4090 = vmatpush3.bf16.msra.mxu0 %v4335_v63 }
 0x96c   : > { %4300 = vrot.lane.b32.xlu1 %v4299_v45, %s4454_s26  ;;  %v1932_v45 = vld [vmem:[%s5445_s3 + $0x28] sm:$0xff] }
 0x96d   : > { %4310 = vrot.lane.b32.xlu0 %v4309_v23, %s4455_s29  ;;  %3999 = vmatmul.mubr.msk.f32.gmra.mrb[22].mxu0 %vm525_vm1, %v1930_v43  ;;  %v1951_v23 = vld [vmem:[%s5445_s3 + $0xc0] sm:$0xff]  ;;  %v4339_v43 = vld [vmem:[%s4536_s24 + $0x58] sm:$0xff]  }
 0x96e   : > { %4001 = vmatprep.mubr.msk.f32.mxu0 %vm525_vm1, %v1931_v44  ;;  %4091 = vmatprep.subr.bf16.mxu0 %v4339_v43 }
 0x96f   : > { %4092 = vmatpush3.bf16.msra.mxu0 %v4339_v43 }
 0x970   : > { %4305 = vrot.lane.b32.xlu1 %v4304_v17, %s4454_s26  ;;  %v1935_v17 = vld [vmem:[%s5445_s3 + $0x40] sm:$0xff] }
 0x971   : > { %4002 = vmatmul.mubr.msk.f32.gmra.mrb[24].mxu0 %vm525_vm1, %v1932_v45 }
 0x972   : > { %4004 = vmatprep.mubr.msk.f32.mxu0 %vm525_vm1, %v1933_v50 }
 0x974   : > { %4315 = vrot.lane.b32.xlu1 %v4314_v26, %s4455_s29  ;;  %v1954_v26 = vld [vmem:[%s5445_s3 + $0xd8] sm:$0xff] }
 0x975   : > { %4005 = vmatmul.mubr.msk.f32.gmra.mrb[26].mxu0 %vm525_vm1, %v1934_v14 }
 0x976   : > { %4007 = vmatprep.mubr.msk.f32.mxu0 %vm525_vm1, %v1935_v17 }
 0x979   : > { %4008 = vmatmul.mubr.msk.f32.gmra.mrb[28].mxu0 %vm525_vm1, %v1936_v19 }
 0x97a   : > { %4010 = vmatprep.mubr.msk.f32.mxu0 %vm525_vm1, %v1937_v1  ;;  %v5083_v1 = vld [vmem:[%s5453_s11] sm:$0xff] }
 0x97d   : > { %4011 = vmatmul.mubr.msk.f32.gmra.mrb[30].mxu0 %vm525_vm1, %v1938_v2  ;;  %v5088_v2 = vld [vmem:[%s5453_s11 + $0x8] sm:$0xff] }
 0x97e   : > { %4013 = vmatprep.mubr.msk.f32.mxu0 %vm525_vm1, %v1939_v3  ;;  %v2588_v3 = vpack.c.bf16 %v5088_v2, %v5083_v1 }
 0x981   : > { %4014 = vmatmul.mubr.msk.f32.gmra.mrb[32].mxu0 %vm525_vm1, %v1940_v5 }
 0x982   : > { %4016 = vmatprep.mubr.msk.f32.mxu0 %vm525_vm1, %v1941_v6  ;;  %v5095_v6 = vld [vmem:[%s5453_s11 + $0x10] sm:$0xff] }
 0x985   : > { %4017 = vmatmul.mubr.msk.f32.gmra.mrb[34].mxu0 %vm525_vm1, %v1942_v7  ;;  %v5100_v7 = vld [vmem:[%s5453_s11 + $0x18] sm:$0xff] }
 0x986   : > { %4019 = vmatprep.mubr.msk.f32.mxu0 %vm525_vm1, %v1943_v8  ;;  %v2589_v8 = vpack.c.bf16 %v5100_v7, %v5095_v6 }
 0x989   : > { %4020 = vmatmul.mubr.msk.f32.gmra.mrb[36].mxu0 %vm525_vm1, %v1944_v9 }
 0x98a   : > { %4022 = vmatprep.mubr.msk.f32.mxu0 %vm525_vm1, %v1945_v10 }
 0x98d   : > { %4023 = vmatmul.mubr.msk.f32.gmra.mrb[38].mxu0 %vm525_vm1, %v1946_v11 }
 0x98e   : > { %4025 = vmatprep.mubr.msk.f32.mxu0 %vm525_vm1, %v1947_v47 }
 0x991   : > { %4026 = vmatmul.mubr.msk.f32.gmra.mrb[40].mxu0 %vm525_vm1, %v1948_v12 }
 0x992   : > { %4028 = vmatprep.mubr.msk.f32.mxu0 %vm525_vm1, %v1949_v13 }
 0x995   : > { %4029 = vmatmul.mubr.msk.f32.gmra.mrb[42].mxu0 %vm525_vm1, %v1950_v16 }
 0x996   : > { %4031 = vmatprep.mubr.msk.f32.mxu0 %vm525_vm1, %v1951_v23 }
 0x999   : > { %4032 = vmatmul.mubr.msk.f32.gmra.mrb[44].mxu0 %vm525_vm1, %v1952_v24 }
 0x99a   : > { %4034 = vmatprep.mubr.msk.f32.mxu0 %vm525_vm1, %v1953_v25 }
 0x99d   : > { %4035 = vmatmul.mubr.msk.f32.gmra.mrb[46].mxu0 %vm525_vm1, %v1954_v26 }
 0x99e   : > { %4037 = vmatprep.mubr.msk.f32.mxu0 %vm525_vm1, %v1955_v27 }
 0x9a1   : > { %4038 = vmatmul.mubr.msk.f32.gmra.mrb[48].mxu0 %vm525_vm1, %v1956_v28 }
 0x9a2   : > { %4040 = vmatprep.mubr.msk.f32.mxu0 %vm525_vm1, %v1957_v29 }
 0x9a5   : > { %4041 = vmatmul.mubr.msk.f32.gmra.mrb[50].mxu0 %vm525_vm1, %v1958_v30 }
 0x9a6   : > { %4043 = vmatprep.mubr.msk.f32.mxu0 %vm525_vm1, %v1959_v57 }
 0x9a9   : > { %4044 = vmatmul.mubr.msk.f32.gmra.mrb[52].mxu0 %vm525_vm1, %v1960_v31 }
 0x9aa   : > { %4046 = vmatprep.mubr.msk.f32.mxu0 %vm525_vm1, %v1961_v32 }
 0x9ad   : > { %4047 = vmatmul.mubr.msk.f32.gmra.mrb[54].mxu0 %vm525_vm1, %v1962_v33 }
 0x9ae   : > { %4093 = vmatprep.mubr.msk.bf16.mxu0 %vm525_vm1, %v2588_v3 }
 0x9b1   : > { %4094 = vmatmul.mubr.msk.bf16.vlgmr.msra.gmra.mrb[56].mxu0 %vm525_vm1, %v2589_v8 }
 0x9db   : > { %v1668_v51 = vpop.xlane.xlu1 %1667 }
 0x9dc   : > { %v1665_v58 = vpop.xlane.xlu0 %1664 }
 0x9dd   : > { %4407 = vrcp.f32 %v1665_v58 }
 0x9de   : > { %4409 = vrcp.f32 %v1668_v51 }
 0x9e0   : > { %v1671_v49 = vpop.xlane.xlu0 %1670 }
 0x9e1   : > { %4411 = vrcp.f32 %v1671_v49 }
 0x9e4   : > { %v1674_v61 = vpop.xlane.xlu1 %1673  ;;  %v4291_v34 = vpop.permute.xlu0 %4290 }
 0x9e5   : > { %v4293_v59 = vunpack.i.h.bf16 %v4291_v34  ;;  %v4292_v36 = vunpack.i.l.bf16 %v4291_v34  ;;  %4413 = vrcp.f32 %v1674_v61 }
 0x9e7   : > { %v4408_v37 = vpop.eup %4407  ;;  %v4205_v38 = vpack.c.bf16 %v4293_v59, %v4292_v36 }
 0x9e8   : > { %v4296_v39 = vpop.permute.xlu1 %4295  ;;  %v1679_v40 = vmul.f32 %v4408_v37, %v4884_v52  ;;  %v4410_v4 = vpop.eup %4409 }
 0x9e9   : > { %v4298_v41 = vunpack.i.h.bf16 %v4296_v39  ;;  %v4297_v35 = vunpack.i.l.bf16 %v4296_v39  ;;  %4206 = vmatprep.subr.bf16.mxu1 %v4205_v38  ;;  %v1680_v56 = vmul.f32 %v4410_v4, %v4882_v55  ;;  %v4337_v55 = vld [vmem:[%s4536_s24 + $0x38] sm:$0xff]  }
 0x9ea   : > { %4208 = vmatpush3.bf16.msra.mxu1 %v4205_v38  ;;  %3973 = vmatprep.mubr.msk.f32.mxu1 %vm525_vm1, %v1679_v40 }
 0x9eb   : > { %v4209_v0 = vpack.c.bf16 %v4298_v41, %v4297_v35  ;;  %v4412_v42 = vpop.eup %4411 }
 0x9ec   : > { %v1681_v52 = vmul.f32 %v4412_v42, %v4890_v54 }
 0x9ed   : > { %4210 = vmatprep.subr.bf16.mxu1 %v4209_v0 }
 0x9ee   : > { %4212 = vmatpush3.bf16.msra.mxu1 %v4209_v0 }
 0x9ef   : > { %v4414_v53 = vpop.eup %4413  ;;  %3979 = vmatprep.subr.bf16.mxu1 %v4336_v15 }
 0x9f0   : > { %v1682_v60 = vmul.f32 %v4414_v53, %v4894_v62 }
 0x9f1   : > { %3974 = vmatmul.mubr.msk.f32.vlgmr.msra.gmra.mrb[20].mxu1 %vm525_vm1, %v1680_v56 }
 0x9f2   : > { %3976 = vmatprep.mubr.msk.f32.mxu1 %vm525_vm1, %v1681_v52  ;;  %3980 = vmatpush3.bf16.msra.mxu1 %v4336_v15  ;;  %v4311_v15 = vpop.permute.xlu0 %4310 }
 0x9f3   : > { %3981 = vmatprep.subr.bf16.mxu1 %v4337_v55  ;;  %v4312_v61 = vunpack.i.l.bf16 %v4311_v15 }
 0x9f5   : > { %3977 = vmatmul.mubr.msk.f32.gmra.mrb[22].mxu1 %vm525_vm1, %v1682_v60 }
 0x9f6   : > { %3982 = vmatpush3.bf16.msra.mxu1 %v4337_v55 }
 0x9f7   : > { %4049 = vmatprep.subr.bf16.mxu1 %v5064_v46 }
 0xa3c   : > { %v5066_v54 = vpop.f32.mrb[20].mxu0 }
 0xa3d   : > { %v5069_v62 = vpop.f32.mrb[21].mxu0 }
 0xa3e   : > { %v2327_v45 = vpack.c.bf16 %v5066_v54, %v5069_v62 }
 0xa40   : > { %v5074_v50 = vpop.f32.mrb[22].mxu0 }
 0xa41   : > { %v5076_v17 = vpop.f32.mrb[23].mxu0 }
 0xa42   : > { %v2328_v19 = vpack.c.bf16 %v5074_v50, %v5076_v17 }
 0xa44   : > { %v5105_v10 = vpop.f32.mrb[24].mxu0 }
 0xa45   : > { %v5108_v47 = vpop.f32.mrb[25].mxu0 }
 0xa46   : > { %v2329_v12 = vpack.c.bf16 %v5105_v10, %v5108_v47 }
 0xa48   : > { %v5112_v13 = vpop.f32.mrb[26].mxu0 }
 0xa49   : > { %v5114_v16 = vpop.f32.mrb[27].mxu0 }
 0xa4c   : > { %v5118_v24 = vpop.f32.mrb[28].mxu0 }
 0xa4d   : > { %v5120_v25 = vpop.f32.mrb[29].mxu0 }
 0xa50   : > { %v5124_v27 = vpop.f32.mrb[30].mxu0 }
 0xa51   : > { %v5126_v28 = vpop.f32.mrb[31].mxu0 }
 0xa54   : > { %v5130_v30 = vpop.f32.mrb[32].mxu0 }
 0xa55   : > { %v5132_v57 = vpop.f32.mrb[33].mxu0 }
 0xa56   : > { %v5461_v54 = vpack.c.bf16 %v5130_v30, %v5132_v57 }
 0xa58   : > { %v5136_v32 = vpop.f32.mrb[34].mxu0 }
 0xa59   : > { %v5138_v33 = vpop.f32.mrb[35].mxu0 }
 0xa5a   : > { %v5462_v62 = vpack.c.bf16 %v5136_v32, %v5138_v33 }
 0xa5c   : > { %v5142_v51 = vpop.f32.mrb[36].mxu0 }
 0xa5d   : > { %v5144_v49 = vpop.f32.mrb[37].mxu0 }
 0xa60   : > { %v5148_v34 = vpop.f32.mrb[38].mxu0 }
 0xa61   : > { %v5150_v59 = vpop.f32.mrb[39].mxu0 }
 0xa62   : > { %v5464_v50 = vpack.c.bf16 %v5148_v34, %v5150_v59 }
 0xa64   : > { %v5154_v37 = vpop.f32.mrb[40].mxu0 }
 0xa65   : > { %v5156_v38 = vpop.f32.mrb[41].mxu0 }
 0xa66   : > { %v5465_v17 = vpack.c.bf16 %v5154_v37, %v5156_v38 }
 0xa68   : > { %v5160_v40 = vpop.f32.mrb[42].mxu0 }
 0xa69   : > { %v5162_v41 = vpop.f32.mrb[43].mxu0 }
 0xa6c   : > { %v5166_v0 = vpop.f32.mrb[44].mxu0 }
 0xa6d   : > { %v5168_v4 = vpop.f32.mrb[45].mxu0 }
 0xa6e   : > { %v5467_v10 = vpack.c.bf16 %v5166_v0, %v5168_v4 }
 0xa70   : > { %v5172_v56 = vpop.f32.mrb[46].mxu0 }
 0xa71   : > { %v5174_v53 = vpop.f32.mrb[47].mxu0 }
 0xa72   : > { %v5468_v47 = vpack.c.bf16 %v5172_v56, %v5174_v53 }
 0xa74   : > { %v5178_v60 = vpop.f32.mrb[48].mxu0 }
 0xa75   : > { %v5180_v63 = vpop.f32.mrb[49].mxu0 }
 0xa78   : > { %v5184_v55 = vpop.f32.mrb[50].mxu0 }
 0xac4   : > { %v3975_v48 = vpop.f32.mrb[20].mxu1 }
 0xac5   : > { %v1773_v44 = vpop.f32.mrb[21].mxu1 }
 0xac6   : > { %v4319_v14 = vpack.i.bf16 %v3975_v48, %v1773_v44  ;;  %v5186_v48 = vpop.f32.mrb[51].mxu0 }
 0xac7   : > { %v2342_v43 = vpack.c.bf16 %v5184_v55, %v5186_v48  ;;  %v5190_v44 = vpop.f32.mrb[52].mxu0  ;;  %v4313_v48 = vunpack.i.h.bf16 %v4311_v15 }
 0xac8   : > { %4320 = vrot.lane.b32.xlu0 %v4319_v14, %s4456_s13  ;;  %v3978_v5 = vpop.f32.mrb[22].mxu1  ;;  %v2297_v14 = vpop.f32.mrb[53].mxu0 }
 0xac9   : > { %v1783_v9 = vpop.f32.mrb[23].mxu1  ;;  %v2343_v3 = vpack.c.bf16 %v5190_v44, %v2297_v14 }
 0xaca   : > { %v4324_v11 = vpack.i.bf16 %v3978_v5, %v1783_v9  ;;  %v4048_v5 = vpop.f32.mrb[54].mxu0 }
 0xacb   : > { %v2307_v8 = vpop.f32.mrb[55].mxu0 }
 0xacc   : > { %4325 = vrot.lane.b32.xlu1 %v4324_v11, %s4456_s13  ;;  %v2344_v9 = vpack.c.bf16 %v4048_v5, %v2307_v8  ;;  %v4301_v11 = vpop.permute.xlu1 %4300 }
 0xacd   : > { %v4303_v42 = vunpack.i.h.bf16 %v4301_v11  ;;  %v4302_v35 = vunpack.i.l.bf16 %v4301_v11 }
 0xacf   : > { %v1841_v39 = vsel %vm727_vm2, %v4754_v18, %v4303_v42  ;;  %v1840_v36 = vsel %vm727_vm2, %v4756_v20, %v4302_v35 }
 0xad0   : > { %v4306_v52 = vpop.permute.xlu1 %4305  ;;  %v1845_v11 = vsel %vm1844_vm4, %v1840_v36, %v4312_v61  ;;  %v1846_v18 = vsel %vm1844_vm4, %v1841_v39, %v4313_v48 }
 0xad1   : > { %v4308_v14 = vunpack.i.h.bf16 %v4306_v52  ;;  %v4307_v58 = vunpack.i.l.bf16 %v4306_v52 }
 0xad3   : > { %v1843_v15 = vsel %vm727_vm2, %v4758_v21, %v4308_v14  ;;  %v1842_v52 = vsel %vm727_vm2, %v4760_v22, %v4307_v58  ;;  %v5458_v21 = vpack.c.bf16 %v5112_v13, %v5114_v16  ;;  %v5459_v22 = vpack.c.bf16 %v5118_v24, %v5120_v25  ;;  %v4095_v13 = vpop.f32.mrb[56].mxu0  ;;  %v4341_v25 = vld [vmem:[%s4536_s24 + $0x70] sm:$0xff]  }
 0xad4   : > { %v4316_v55 = vpop.permute.xlu1 %4315  ;;  %v2646_v16 = vpop.f32.mrb[57].mxu0 }
 0xad5   : > { %v4318_v31 = vunpack.i.h.bf16 %v4316_v55  ;;  %v4317_v29 = vunpack.i.l.bf16 %v4316_v55 }
 0xad7   : > { %v1847_v55 = vsel %vm1844_vm4, %v1842_v52, %v4317_v29  ;;  %v1848_v61 = vsel %vm1844_vm4, %v1843_v15, %v4318_v31  ;;  %v3565_v29 = vld [vmem:[%s4556_s20 + $0x3] ss:$0 sm:$0xff]  ;;  %v3634_v31 = vld [vmem:[%s4556_s20 + $0x4] ss:$0 sm:$0xff] }
 0xad8   : > { %v5294_v59 = vadd.f32 %v4095_v13, %v3634_v31  ;;  %v5298_v38 = vadd.f32 %v3634_v31, %v2646_v16 }
 0xb3a   : > { %v4321_v44 = vpop.permute.xlu0 %4320 }
 0xb3b   : > { %v4323_v5 = vunpack.i.h.bf16 %v4321_v44  ;;  %v4322_v8 = vunpack.i.l.bf16 %v4321_v44 }
 0xb3d   : > { %v1851_v42 = vsel %vm1849_vm5, %v1846_v18, %v4323_v5  ;;  %v1850_v20 = vsel %vm1849_vm5, %v1845_v11, %v4322_v8  ;;  %v4340_v5 = vld [vmem:[%s4536_s24 + $0x48] sm:$0xff]  }
 0xb3e   : > { %v1854_v35 = vpack.c.bf16 %v1851_v42, %v1850_v20  ;;  %v4326_v26 = vpop.permute.xlu1 %4325 }
 0xb3f   : > { %v4328_v44 = vunpack.i.h.bf16 %v4326_v26  ;;  %v4327_v23 = vunpack.i.l.bf16 %v4326_v26  ;;  %v4342_v26 = vld [vmem:[%s4536_s24 + $0x78] sm:$0xff]  }
 0xb40   : > { %3983 = vmatprep.mubr.msk.bf16.mxu1 %vm525_vm1, %v1854_v35 }
 0xb41   : > { %v1853_v36 = vsel %vm1849_vm5, %v1848_v61, %v4328_v44  ;;  %v1852_v39 = vsel %vm1849_vm5, %v1847_v55, %v4327_v23  ;;  %v4096_v23 = vpop.f32.mrb[58].mxu0 }
 0xb42   : > { %v1855_v48 = vpack.c.bf16 %v1853_v36, %v1852_v39  ;;  %v2649_v24 = vpop.f32.mrb[59].mxu0 }
 0xb43   : > { %v5302_v0 = vadd.f32 %v3634_v31, %v2649_v24 }
 0xb44   : > { %3984 = vmatmul.mubr.msk.bf16.vlgmr.msra.gmra.mrb[24].mxu1 %vm525_vm1, %v1855_v48 }
 0xb45   : > { %4050 = vmatpush3.bf16.msra.mxu1 %v5064_v46  ;;  %4053 = vmatprep.mubr.msk.bf16.mxu1 %vm525_vm1, %v2327_v45  ;;  %v5460_v46 = vpack.c.bf16 %v5124_v27, %v5126_v28  ;;  %v5463_v45 = vpack.c.bf16 %v5142_v51, %v5144_v49  ;;  %v5279_v27 = vld [vmem:[%s4536_s24 + $0x60] sm:$0xff]  }
 0xb46   : > { %4051 = vmatprep.subr.bf16.mxu1 %v4340_v5 }
 0xb49   : > { %4052 = vmatpush3.bf16.msra.mxu1 %v4340_v5 }
 0xb4a   : > { %4097 = vmatprep.subr.bf16.mxu1 %v4341_v25 }
 0xb4c   : > { %4054 = vmatmul.mubr.msk.bf16.vlgmr.msra.gmra.mrb[28].mxu1 %vm525_vm1, %v2328_v19  ;;  %v5466_v19 = vpack.c.bf16 %v5160_v40, %v5162_v41  ;;  %v5300_v40 = vadd.f32 %v4096_v23, %v3634_v31 }
 0xb4d   : > { %4057 = vmatprep.mubr.msk.bf16.mxu1 %vm525_vm1, %v2329_v12  ;;  %v5469_v12 = vpack.c.bf16 %v5178_v60, %v5180_v63  ;;  %4098 = vmatpush3.bf16.msra.mxu1 %v4341_v25 }
 0xb4e   : > { %4099 = vmatprep.subr.bf16.mxu1 %v4342_v26 }
 0xb51   : > { %4100 = vmatpush3.bf16.msra.mxu1 %v4342_v26 }
 0xb52   : > { %4105 = vmatprep.subr.bf16.mxu1 %v5279_v27 }
 0xb54   : > { %4058 = vmatmul.mubr.msk.bf16.gmra.mrb[32].mxu1 %vm525_vm1, %v5458_v21 }
 0xb55   : > { %4061 = vmatprep.mubr.msk.bf16.mxu1 %vm525_vm1, %v5459_v22 }
 0xb5c   : > { %4062 = vmatmul.mubr.msk.bf16.gmra.mrb[36].mxu1 %vm525_vm1, %v5460_v46 }
 0xb5d   : > { %4065 = vmatprep.mubr.msk.bf16.mxu1 %vm525_vm1, %v5461_v54 }
 0xb64   : > { %4066 = vmatmul.mubr.msk.bf16.gmra.mrb[40].mxu1 %vm525_vm1, %v5462_v62 }
 0xb65   : > { %4069 = vmatprep.mubr.msk.bf16.mxu1 %vm525_vm1, %v5463_v45 }
 0xb6c   : > { %4070 = vmatmul.mubr.msk.bf16.gmra.mrb[44].mxu1 %vm525_vm1, %v5464_v50 }
 0xb6d   : > { %4073 = vmatprep.mubr.msk.bf16.mxu1 %vm525_vm1, %v5465_v17 }
 0xb74   : > { %4074 = vmatmul.mubr.msk.bf16.gmra.mrb[48].mxu1 %vm525_vm1, %v5466_v19 }
 0xb75   : > { %4077 = vmatprep.mubr.msk.bf16.mxu1 %vm525_vm1, %v5467_v10 }
 0xb7c   : > { %4078 = vmatmul.mubr.msk.bf16.gmra.mrb[52].mxu1 %vm525_vm1, %v5468_v47 }
 0xb7d   : > { %4081 = vmatprep.mubr.msk.bf16.mxu1 %vm525_vm1, %v5469_v12 }
 0xb84   : > { %4082 = vmatmul.mubr.msk.bf16.gmra.mrb[56].mxu1 %vm525_vm1, %v2342_v43 }
 0xb85   : > { %4085 = vmatprep.mubr.msk.bf16.mxu1 %vm525_vm1, %v2343_v3 }
 0xb8c   : > { %4086 = vmatmul.mubr.msk.bf16.gmra.mrb[60].mxu1 %vm525_vm1, %v2344_v9 }
 0xc17   : > { %v3985_v28 = vpop.f32.mrb[24].mxu1 }
 0xc18   : > { %v1912_v30 = vpop.f32.mrb[25].mxu1  ;;  %v5284_v32 = vadd.f32 %v3985_v28, %v3565_v29 }
 0xc19   : > { %v3986_v57 = vpop.f32.mrb[26].mxu1  ;;  %v5288_v51 = vadd.f32 %v3565_v29, %v1912_v30 }
 0xc1a   : > { %v5286_v33 = vadd.f32 %v3986_v57, %v3565_v29  ;;  %v1915_v58 = vpop.f32.mrb[27].mxu1 }
 0xc1b   : > { %v5290_v49 = vadd.f32 %v3565_v29, %v1915_v58 }
 0xc1c   : > { %v2843_v34 = vpack.c.bf16 %v5286_v33, %v5284_v32 }
 0xc1d   : > { %v2842_v37 = vpack.c.bf16 %v5290_v49, %v5288_v51 }
 0xc1f   : > { %v4055_v41 = vpop.f32.mrb[28].mxu1 }
 0xc20   : > { %v2663_v4 = vadd.f32 %v4055_v41, %v5294_v59  ;;  %v2445_v56 = vpop.f32.mrb[29].mxu1 }
 0xc21   : > { %v2661_v53 = vadd.f32 %v5298_v38, %v2445_v56  ;;  %v4056_v60 = vpop.f32.mrb[30].mxu1 }
 0xc22   : > { %v2664_v63 = vadd.f32 %v4056_v60, %v5300_v40  ;;  %v2448_v43 = vpop.f32.mrb[31].mxu1  ;;  %v2671_v9 = vmul.f32 0.2, %v2663_v4  ;;  %vm2667_vm6 = vcmp.ge.f32.partialorder %v2663_v4, 0.0 }
 0xc23   : > { %v2662_v3 = vadd.f32 %v5302_v0, %v2448_v43  ;;  %v2669_v14 = vmul.f32 0.2, %v2661_v53  ;;  %vm2665_vm7 = vcmp.ge.f32.partialorder %v2661_v53, 0.0 }
 0xc24   : > { %v2675_v42 = vsel %vm2667_vm6, %v2663_v4, %v2671_v9  ;;  %vm2668_vm8 = vcmp.ge.f32.partialorder %v2664_v63, 0.0  ;;  %v2672_v20 = vmul.f32 0.2, %v2664_v63 }
 0xc25   : > { %v2673_v52 = vsel %vm2665_vm7, %v2661_v53, %v2669_v14  ;;  %v2670_v36 = vmul.f32 0.2, %v2662_v3  ;;  %vm2666_vm11 = vcmp.ge.f32.partialorder %v2662_v3, 0.0 }
 0xc26   : > { %v2676_v62 = vsel %vm2668_vm8, %v2664_v63, %v2672_v20 }
 0xc27   : > { %v4059_v8 = vpop.f32.mrb[32].mxu1  ;;  %v2674_v17 = vsel %vm2666_vm11, %v2662_v3, %v2670_v36 }
 0xc28   : > { %v2679_v11 = vadd.f32 %v4059_v8, %v5294_v59  ;;  %v2461_v18 = vpop.f32.mrb[33].mxu1 }
 0xc29   : > { %v2677_v35 = vadd.f32 %v5298_v38, %v2461_v18  ;;  %v4060_v15 = vpop.f32.mrb[34].mxu1 }
 0xc2a   : > { %vm2683_vm9 = vcmp.ge.f32.partialorder %v2679_v11, 0.0  ;;  %v2687_v44 = vmul.f32 0.2, %v2679_v11  ;;  %v2680_v55 = vadd.f32 %v4060_v15, %v5300_v40  ;;  %v2464_v61 = vpop.f32.mrb[35].mxu1 }
 0xc2b   : > { %vm2681_vm10 = vcmp.ge.f32.partialorder %v2677_v35, 0.0  ;;  %v2685_v39 = vmul.f32 0.2, %v2677_v35  ;;  %v2678_v48 = vadd.f32 %v5302_v0, %v2464_v61 }
 0xc2c   : > { %v2691_v5 = vsel %vm2683_vm9, %v2679_v11, %v2687_v44  ;;  %vm2684_vm12 = vcmp.ge.f32.partialorder %v2680_v55, 0.0  ;;  %v2688_v21 = vmul.f32 0.2, %v2680_v55 }
 0xc2d   : > { %v2695_v22 = vmax.f32 %v2675_v42, %v2691_v5  ;;  %v2689_v46 = vsel %vm2681_vm10, %v2677_v35, %v2685_v39  ;;  %vm2682_vm13 = vcmp.ge.f32.partialorder %v2678_v48, 0.0  ;;  %v2686_v54 = vmul.f32 0.2, %v2678_v48 }
 0xc2e   : > { %v2693_v45 = vmax.f32 %v2673_v52, %v2689_v46  ;;  %v2692_v50 = vsel %vm2684_vm12, %v2680_v55, %v2688_v21 }
 0xc2f   : > { %v2696_v19 = vmax.f32 %v2676_v62, %v2692_v50  ;;  %v2690_v10 = vsel %vm2682_vm13, %v2678_v48, %v2686_v54  ;;  %v4063_v47 = vpop.f32.mrb[36].mxu1 }
 0xc30   : > { %v2694_v12 = vmax.f32 %v2674_v17, %v2690_v10  ;;  %v2699_v13 = vadd.f32 %v4063_v47, %v5294_v59  ;;  %v2477_v16 = vpop.f32.mrb[37].mxu1 }
 0xc31   : > { %v2697_v23 = vadd.f32 %v5298_v38, %v2477_v16  ;;  %v4064_v24 = vpop.f32.mrb[38].mxu1 }
 0xc32   : > { %vm2703_vm14 = vcmp.ge.f32.partialorder %v2699_v13, 0.0  ;;  %v2707_v25 = vmul.f32 0.2, %v2699_v13  ;;  %v2700_v26 = vadd.f32 %v4064_v24, %v5300_v40  ;;  %v2480_v28 = vpop.f32.mrb[39].mxu1 }
 0xc33   : > { %vm2701_vm15 = vcmp.ge.f32.partialorder %v2697_v23, 0.0  ;;  %v2705_v29 = vmul.f32 0.2, %v2697_v23  ;;  %v2698_v30 = vadd.f32 %v5302_v0, %v2480_v28 }
 0xc34   : > { %v2711_v57 = vsel %vm2703_vm14, %v2699_v13, %v2707_v25  ;;  %vm2704_vm0 = vcmp.ge.f32.partialorder %v2700_v26, 0.0  ;;  %v2708_v31 = vmul.f32 0.2, %v2700_v26 }
 0xc35   : > { %v2715_v58 = vmax.f32 %v2695_v22, %v2711_v57  ;;  %v2709_v41 = vsel %vm2701_vm15, %v2697_v23, %v2705_v29  ;;  %vm2702_vm2 = vcmp.ge.f32.partialorder %v2698_v30, 0.0  ;;  %v2706_v4 = vmul.f32 0.2, %v2698_v30 }
 0xc36   : > { %v2713_v56 = vmax.f32 %v2693_v45, %v2709_v41  ;;  %v2712_v53 = vsel %vm2704_vm0, %v2700_v26, %v2708_v31 }
 0xc37   : > { %v2716_v60 = vmax.f32 %v2696_v19, %v2712_v53  ;;  %v2710_v63 = vsel %vm2702_vm2, %v2698_v30, %v2706_v4  ;;  %v4067_v43 = vpop.f32.mrb[40].mxu1 }
 0xc38   : > { %v2714_v3 = vmax.f32 %v2694_v12, %v2710_v63  ;;  %v2719_v9 = vadd.f32 %v4067_v43, %v5294_v59  ;;  %v2493_v14 = vpop.f32.mrb[41].mxu1 }
 0xc39   : > { %v2717_v8 = vadd.f32 %v5298_v38, %v2493_v14  ;;  %v4068_v11 = vpop.f32.mrb[42].mxu1 }
 0xc3a   : > { %vm2723_vm3 = vcmp.ge.f32.partialorder %v2719_v9, 0.0  ;;  %v2727_v18 = vmul.f32 0.2, %v2719_v9  ;;  %v2720_v42 = vadd.f32 %v4068_v11, %v5300_v40  ;;  %v2496_v20 = vpop.f32.mrb[43].mxu1 }
 0xc3b   : > { %vm2721_vm4 = vcmp.ge.f32.partialorder %v2717_v8, 0.0  ;;  %v2725_v35 = vmul.f32 0.2, %v2717_v8  ;;  %v2718_v15 = vadd.f32 %v5302_v0, %v2496_v20 }
 0xc3c   : > { %v2731_v52 = vsel %vm2723_vm3, %v2719_v9, %v2727_v18  ;;  %vm2724_vm5 = vcmp.ge.f32.partialorder %v2720_v42, 0.0  ;;  %v2728_v44 = vmul.f32 0.2, %v2720_v42 }
 0xc3d   : > { %v2735_v55 = vmax.f32 %v2715_v58, %v2731_v52  ;;  %v2729_v61 = vsel %vm2721_vm4, %v2717_v8, %v2725_v35  ;;  %vm2722_vm6 = vcmp.ge.f32.partialorder %v2718_v15, 0.0  ;;  %v2726_v36 = vmul.f32 0.2, %v2718_v15 }
 0xc3e   : > { %v2733_v39 = vmax.f32 %v2713_v56, %v2729_v61  ;;  %v2732_v48 = vsel %vm2724_vm5, %v2720_v42, %v2728_v44 }
 0xc3f   : > { %v2736_v5 = vmax.f32 %v2716_v60, %v2732_v48  ;;  %v2730_v21 = vsel %vm2722_vm6, %v2718_v15, %v2726_v36  ;;  %v4071_v22 = vpop.f32.mrb[44].mxu1 }
 0xc40   : > { %v2734_v46 = vmax.f32 %v2714_v3, %v2730_v21  ;;  %v2739_v54 = vadd.f32 %v4071_v22, %v5294_v59  ;;  %v2509_v62 = vpop.f32.mrb[45].mxu1 }
 0xc41   : > { %v2737_v45 = vadd.f32 %v5298_v38, %v2509_v62  ;;  %v4072_v50 = vpop.f32.mrb[46].mxu1 }
 0xc42   : > { %vm2743_vm7 = vcmp.ge.f32.partialorder %v2739_v54, 0.0  ;;  %v2747_v17 = vmul.f32 0.2, %v2739_v54  ;;  %v2740_v19 = vadd.f32 %v4072_v50, %v5300_v40  ;;  %v2512_v10 = vpop.f32.mrb[47].mxu1 }
 0xc43   : > { %vm2741_vm8 = vcmp.ge.f32.partialorder %v2737_v45, 0.0  ;;  %v2745_v47 = vmul.f32 0.2, %v2737_v45  ;;  %v2738_v12 = vadd.f32 %v5302_v0, %v2512_v10 }
 0xc44   : > { %v2751_v13 = vsel %vm2743_vm7, %v2739_v54, %v2747_v17  ;;  %vm2744_vm9 = vcmp.ge.f32.partialorder %v2740_v19, 0.0  ;;  %v2748_v16 = vmul.f32 0.2, %v2740_v19 }
 0xc45   : > { %v2755_v23 = vmax.f32 %v2735_v55, %v2751_v13  ;;  %v2749_v24 = vsel %vm2741_vm8, %v2737_v45, %v2745_v47  ;;  %vm2742_vm10 = vcmp.ge.f32.partialorder %v2738_v12, 0.0  ;;  %v2746_v25 = vmul.f32 0.2, %v2738_v12 }
 0xc46   : > { %v2753_v26 = vmax.f32 %v2733_v39, %v2749_v24  ;;  %v2752_v28 = vsel %vm2744_vm9, %v2740_v19, %v2748_v16 }
 0xc47   : > { %v2756_v29 = vmax.f32 %v2736_v5, %v2752_v28  ;;  %v2750_v30 = vsel %vm2742_vm10, %v2738_v12, %v2746_v25  ;;  %v4075_v57 = vpop.f32.mrb[48].mxu1 }
 0xc48   : > { %v2754_v31 = vmax.f32 %v2734_v46, %v2750_v30  ;;  %v2759_v58 = vadd.f32 %v4075_v57, %v5294_v59  ;;  %v2525_v41 = vpop.f32.mrb[49].mxu1 }
 0xc49   : > { %v2757_v4 = vadd.f32 %v5298_v38, %v2525_v41  ;;  %v4076_v56 = vpop.f32.mrb[50].mxu1 }
 0xc4a   : > { %vm2763_vm11 = vcmp.ge.f32.partialorder %v2759_v58, 0.0  ;;  %v2767_v53 = vmul.f32 0.2, %v2759_v58  ;;  %v2760_v60 = vadd.f32 %v4076_v56, %v5300_v40  ;;  %v2528_v63 = vpop.f32.mrb[51].mxu1 }
 0xc4b   : > { %vm2761_vm12 = vcmp.ge.f32.partialorder %v2757_v4, 0.0  ;;  %v2765_v43 = vmul.f32 0.2, %v2757_v4  ;;  %v2758_v3 = vadd.f32 %v5302_v0, %v2528_v63 }
 0xc4c   : > { %v2771_v9 = vsel %vm2763_vm11, %v2759_v58, %v2767_v53  ;;  %vm2764_vm13 = vcmp.ge.f32.partialorder %v2760_v60, 0.0  ;;  %v2768_v14 = vmul.f32 0.2, %v2760_v60 }
 0xc4d   : > { %v2775_v8 = vmax.f32 %v2755_v23, %v2771_v9  ;;  %v2769_v11 = vsel %vm2761_vm12, %v2757_v4, %v2765_v43  ;;  %vm2762_vm14 = vcmp.ge.f32.partialorder %v2758_v3, 0.0  ;;  %v2766_v18 = vmul.f32 0.2, %v2758_v3 }
 0xc4e   : > { %v2773_v42 = vmax.f32 %v2753_v26, %v2769_v11  ;;  %v2772_v20 = vsel %vm2764_vm13, %v2760_v60, %v2768_v14  ;;  %vm3192_vm12 = vcmask 523264  }
 0xc4f   : > { %v2776_v35 = vmax.f32 %v2756_v29, %v2772_v20  ;;  %v2770_v15 = vsel %vm2762_vm14, %v2758_v3, %v2766_v18  ;;  %v4079_v52 = vpop.f32.mrb[52].mxu1 }
 0xc50   : > { %v2774_v44 = vmax.f32 %v2754_v31, %v2770_v15  ;;  %v2779_v55 = vadd.f32 %v4079_v52, %v5294_v59  ;;  %v2541_v61 = vpop.f32.mrb[53].mxu1 }
 0xc51   : > { %v2777_v36 = vadd.f32 %v5298_v38, %v2541_v61  ;;  %v4080_v39 = vpop.f32.mrb[54].mxu1 }
 0xc52   : > { %vm2783_vm15 = vcmp.ge.f32.partialorder %v2779_v55, 0.0  ;;  %v2787_v48 = vmul.f32 0.2, %v2779_v55  ;;  %v2780_v5 = vadd.f32 %v4080_v39, %v5300_v40  ;;  %v2544_v21 = vpop.f32.mrb[55].mxu1 }
 0xc53   : > { %vm2781_vm0 = vcmp.ge.f32.partialorder %v2777_v36, 0.0  ;;  %v2785_v22 = vmul.f32 0.2, %v2777_v36  ;;  %v2778_v46 = vadd.f32 %v5302_v0, %v2544_v21 }
 0xc54   : > { %v2791_v54 = vsel %vm2783_vm15, %v2779_v55, %v2787_v48  ;;  %vm2784_vm2 = vcmp.ge.f32.partialorder %v2780_v5, 0.0  ;;  %v2788_v62 = vmul.f32 0.2, %v2780_v5 }
 0xc55   : > { %v2795_v45 = vmax.f32 %v2775_v8, %v2791_v54  ;;  %v2789_v50 = vsel %vm2781_vm0, %v2777_v36, %v2785_v22  ;;  %vm2782_vm3 = vcmp.ge.f32.partialorder %v2778_v46, 0.0  ;;  %v2786_v17 = vmul.f32 0.2, %v2778_v46  ;;  %v4344_v54 = vld [vmem:[%s4536_s24 + $0x68] sm:$0xff]  }
 0xc56   : > { %v2793_v19 = vmax.f32 %v2773_v42, %v2789_v50  ;;  %v2792_v10 = vsel %vm2784_vm2, %v2780_v5, %v2788_v62 }
 0xc57   : > { %v2796_v47 = vmax.f32 %v2776_v35, %v2792_v10  ;;  %v2790_v12 = vsel %vm2782_vm3, %v2778_v46, %v2786_v17  ;;  %v4083_v13 = vpop.f32.mrb[56].mxu1 }
 0xc58   : > { %v2794_v16 = vmax.f32 %v2774_v44, %v2790_v12  ;;  %v2799_v23 = vadd.f32 %v4083_v13, %v5294_v59  ;;  %v2557_v24 = vpop.f32.mrb[57].mxu1 }
 0xc59   : > { %v2797_v25 = vadd.f32 %v5298_v38, %v2557_v24  ;;  %v4084_v26 = vpop.f32.mrb[58].mxu1 }
 0xc5a   : > { %vm2803_vm4 = vcmp.ge.f32.partialorder %v2799_v23, 0.0  ;;  %v2807_v28 = vmul.f32 0.2, %v2799_v23  ;;  %v2800_v29 = vadd.f32 %v4084_v26, %v5300_v40  ;;  %v2560_v30 = vpop.f32.mrb[59].mxu1 }
 0xc5b   : > { %vm2801_vm5 = vcmp.ge.f32.partialorder %v2797_v25, 0.0  ;;  %v2805_v57 = vmul.f32 0.2, %v2797_v25  ;;  %v2798_v31 = vadd.f32 %v5302_v0, %v2560_v30 }
 0xc5c   : > { %v2811_v58 = vsel %vm2803_vm4, %v2799_v23, %v2807_v28  ;;  %vm2804_vm6 = vcmp.ge.f32.partialorder %v2800_v29, 0.0  ;;  %v2808_v41 = vmul.f32 0.2, %v2800_v29 }
 0xc5d   : > { %v2815_v4 = vmax.f32 %v2795_v45, %v2811_v58  ;;  %v2809_v56 = vsel %vm2801_vm5, %v2797_v25, %v2805_v57  ;;  %vm2802_vm7 = vcmp.ge.f32.partialorder %v2798_v31, 0.0  ;;  %v2806_v53 = vmul.f32 0.2, %v2798_v31 }
 0xc5e   : > { %v2813_v60 = vmax.f32 %v2793_v19, %v2809_v56  ;;  %v2812_v63 = vsel %vm2804_vm6, %v2800_v29, %v2808_v41 }
 0xc5f   : > { %v2816_v43 = vmax.f32 %v2796_v47, %v2812_v63  ;;  %v2810_v3 = vsel %vm2802_vm7, %v2798_v31, %v2806_v53  ;;  %v4087_v9 = vpop.f32.mrb[60].mxu1  ;;  %v4345_v63 = vld [vmem:[%s4541_s27] sm:$0xff]  }
 0xc60   : > { %v2814_v14 = vmax.f32 %v2794_v16, %v2810_v3  ;;  %v2819_v8 = vadd.f32 %v4087_v9, %v5294_v59  ;;  %v2573_v11 = vpop.f32.mrb[61].mxu1  ;;  %4113 = vmatprep.subr.bf16.mxu0 %v4345_v63  ;;  %v4347_v3 = vld [vmem:[%s4551_s15] sm:$0xff]  }
 0xc61   : > { %v2817_v18 = vadd.f32 %v5298_v38, %v2573_v11  ;;  %v4088_v42 = vpop.f32.mrb[62].mxu1  ;;  %4114 = vmatpush3.bf16.msra.mxu0 %v4345_v63 }
 0xc62   : > { %vm2823_vm8 = vcmp.ge.f32.partialorder %v2819_v8, 0.0  ;;  %v2827_v20 = vmul.f32 0.2, %v2819_v8  ;;  %v2820_v35 = vadd.f32 %v4088_v42, %v5300_v40  ;;  %v2576_v15 = vpop.f32.mrb[63].mxu1 }
 0xc63   : > { %vm2821_vm9 = vcmp.ge.f32.partialorder %v2817_v18, 0.0  ;;  %v2825_v52 = vmul.f32 0.2, %v2817_v18  ;;  %v2818_v44 = vadd.f32 %v5302_v0, %v2576_v15  ;;  %v3655_v0 = vld [vmem:[%s4556_s20 + $0x5] ss:$0 sm:$0xff] }
 0xc64   : > { %v2831_v55 = vsel %vm2823_vm8, %v2819_v8, %v2827_v20  ;;  %vm2824_vm10 = vcmp.ge.f32.partialorder %v2820_v35, 0.0  ;;  %v2828_v61 = vmul.f32 0.2, %v2820_v35 }
 0xc65   : > { %v2835_v36 = vmax.f32 %v2815_v4, %v2831_v55  ;;  %v2829_v39 = vsel %vm2821_vm9, %v2817_v18, %v2825_v52  ;;  %vm2822_vm11 = vcmp.ge.f32.partialorder %v2818_v44, 0.0  ;;  %v2826_v59 = vmul.f32 0.2, %v2818_v44 }
 0xc66   : > { %v2833_v38 = vmax.f32 %v2813_v60, %v2829_v39  ;;  %v2832_v48 = vsel %vm2824_vm10, %v2820_v35, %v2828_v61 }
 0xc67   : > { %v2836_v5 = vmax.f32 %v2816_v43, %v2832_v48  ;;  %v2830_v21 = vsel %vm2822_vm11, %v2818_v44, %v2826_v59  ;;  %v4346_v43 = vld [vmem:[%s4541_s27 + $0x8] sm:$0xff]  }
 0xc68   : > { %v2834_v22 = vmax.f32 %v2814_v14, %v2830_v21  ;;  %4115 = vmatprep.subr.bf16.mxu0 %v4346_v43  ;;  %v3657_v21 = vld [vmem:[%s4556_s20 + $0x8] ss:$0 sm:$0xff] }
 0xc69   : > { %v2850_v40 = vpack.c.bf16 %v2836_v5, %v2835_v36  ;;  %4116 = vmatpush3.bf16.msra.mxu0 %v4346_v43  ;;  %v3656_v36 = vld [vmem:[%s4556_s20 + $0x7] ss:$0 sm:$0xff] }
 0xc6a   : > { %v2849_v46 = vpack.c.bf16 %v2834_v22, %v2833_v38  ;;  %4121 = vmatprep.subr.bf16.mxu0 %v4347_v3 }
 0xc6c   : > { %4101 = vmatprep.mubr.msk.bf16.mxu1 %vm525_vm1, %v2849_v46 }
 0xc6d   : > { %4102 = vmatmul.mubr.msk.bf16.vlgmr.msra.gmra.mrb[64].mxu1 %vm525_vm1, %v2850_v40 }
 0xc6e   : > { %4106 = vmatpush3.bf16.msra.mxu1 %v5279_v27  ;;  %4109 = vmatprep.mubr.msk.bf16.mxu1 %vm525_vm1, %v2842_v37 }
 0xc6f   : > { %4107 = vmatprep.subr.bf16.mxu1 %v4344_v54 }
 0xc72   : > { %4108 = vmatpush3.bf16.msra.mxu1 %v4344_v54 }
 0xc79   : > { %4110 = vmatmul.mubr.msk.bf16.vlgmr.msra.gmra.mrb[64].mxu1 %vm525_vm1, %v2843_v34 }
 0xd4c   : > { %v4111_v62 = vpop.f32.mrb[64].mxu1 }
 0xd4d   : > { %v2970_v45 = vpop.f32.mrb[65].mxu1  ;;  %v2992_v50 = vadd.f32 %v4111_v62, %v3655_v0 }
 0xd4e   : > { %v2990_v17 = vadd.f32 %v3655_v0, %v2970_v45  ;;  %v4112_v19 = vpop.f32.mrb[66].mxu1 }
 0xd4f   : > { %v2973_v10 = vpop.f32.mrb[67].mxu1  ;;  %v2993_v51 = vadd.f32 %v4112_v19, %v3655_v0  ;;  %v2996_v12 = vadd.f32 %v5095_v6, %v2992_v50 }
 0xd50   : > { %v2991_v27 = vadd.f32 %v3655_v0, %v2973_v10  ;;  %v2994_v47 = vadd.f32 %v5083_v1, %v2990_v17 }
 0xd51   : > { %v3006_v33 = vsel %vm525_vm1, %v2996_v12, 0.0  ;;  %v2997_v34 = vadd.f32 %v5100_v7, %v2993_v51  ;;  %v4349_v51 = vld [vmem:[%s4551_s15 + $0x10] sm:$0xff]  }
 0xd52   : > { %v3000_v49 = vsel %vm525_vm1, %v2994_v47, 0.0  ;;  %v2995_v37 = vadd.f32 %v5088_v2, %v2991_v27 }
 0xd53   : > { %3001 = vadd.xlane.f32.xlu0 %v3000_v49  ;;  %v3009_v13 = vsel %vm525_vm1, %v2997_v34, 0.0  ;;  %v4350_v49 = vld [vmem:[%s4551_s15 + $0x18] sm:$0xff]  }
 0xd54   : > { %v3003_v32 = vsel %vm525_vm1, %v2995_v37, 0.0 }
 0xd55   : > { %3004 = vadd.xlane.f32.xlu1 %v3003_v32 }
 0xd57   : > { %3007 = vadd.xlane.f32.xlu0 %v3006_v33 }
 0xd5b   : > { %3010 = vadd.xlane.f32.xlu0 %v3009_v13 }
 0xde0   : > { %v3002_v1 = vpop.xlane.xlu0 %3001 }
 0xde1   : > { %v3013_v16 = vmul.f32 0.03125, %v3002_v1 }
 0xde2   : > { %v3005_v23 = vpop.xlane.xlu1 %3004 }
 0xde3   : > { %v3017_v24 = vsub.f32 %v2994_v47, %v3013_v16  ;;  %v3014_v25 = vmul.f32 0.03125, %v3005_v23  ;;  %v4348_v47 = vld [vmem:[%s4551_s15 + $0x8] sm:$0xff]  }
 0xde4   : > { %v3008_v2 = vpop.xlane.xlu0 %3007 }
 0xde5   : > { %v3018_v26 = vsub.f32 %v2995_v37, %v3014_v25  ;;  %v3015_v6 = vmul.f32 0.03125, %v3008_v2  ;;  %v3021_v28 = vmul.f32 %v3017_v24, %v3017_v24  ;;  %v3658_v37 = vld [vmem:[%s440_s12] ss:$0 sm:$0xff] }
 0xde7   : > { %v3019_v29 = vsub.f32 %v2996_v12, %v3015_v6  ;;  %v3025_v30 = vsel %vm525_vm1, %v3021_v28, 0.0  ;;  %v3022_v57 = vmul.f32 %v3018_v26, %v3018_v26 }
 0xde8   : > { %3026 = vadd.xlane.f32.xlu0 %v3025_v30  ;;  %v3011_v7 = vpop.xlane.xlu0 %3010 }
 0xde9   : > { %v3016_v31 = vmul.f32 0.03125, %v3011_v7  ;;  %v3028_v58 = vsel %vm525_vm1, %v3022_v57, 0.0  ;;  %v3023_v41 = vmul.f32 %v3019_v29, %v3019_v29 }
 0xdea   : > { %3029 = vadd.xlane.f32.xlu1 %v3028_v58 }
 0xdeb   : > { %v3020_v4 = vsub.f32 %v2997_v34, %v3016_v31  ;;  %v3031_v56 = vsel %vm525_vm1, %v3023_v41, 0.0 }
 0xdec   : > { %3032 = vadd.xlane.f32.xlu0 %v3031_v56 }
 0xded   : > { %v3024_v53 = vmul.f32 %v3020_v4, %v3020_v4 }
 0xdef   : > { %v3034_v60 = vsel %vm525_vm1, %v3024_v53, 0.0 }
 0xdf0   : > { %3035 = vadd.xlane.f32.xlu1 %v3034_v60 }
 0xe75   : > { %v3027_v9 = vpop.xlane.xlu0 %3026 }
 0xe76   : > { %v3037_v14 = vmul.f32 0.03125, %v3027_v9 }
 0xe77   : > { %v3030_v8 = vpop.xlane.xlu1 %3029 }
 0xe78   : > { %v3041_v11 = vadd.f32 1e-05, %v3037_v14  ;;  %v3038_v18 = vmul.f32 0.03125, %v3030_v8 }
 0xe79   : > { %v3033_v42 = vpop.xlane.xlu0 %3032 }
 0xe7a   : > { %4415 = vrsqrt.f32 %v3041_v11  ;;  %v3042_v20 = vadd.f32 1e-05, %v3038_v18  ;;  %v3039_v35 = vmul.f32 0.03125, %v3033_v42 }
 0xe7c   : > { %4417 = vrsqrt.f32 %v3042_v20  ;;  %v3043_v15 = vadd.f32 1e-05, %v3039_v35 }
 0xe7d   : > { %v3036_v52 = vpop.xlane.xlu1 %3035 }
 0xe7e   : > { %4419 = vrsqrt.f32 %v3043_v15  ;;  %v3040_v44 = vmul.f32 0.03125, %v3036_v52 }
 0xe80   : > { %v3044_v55 = vadd.f32 1e-05, %v3040_v44 }
 0xe82   : > { %4421 = vrsqrt.f32 %v3044_v55 }
 0xe84   : > { %v4416_v61 = vpop.eup %4415 }
 0xe85   : > { %v3049_v39 = vmul.f32 %v4416_v61, %v3017_v24 }
 0xe86   : > { %v4418_v59 = vpop.eup %4417 }
 0xe87   : > { %v3050_v38 = vmul.f32 %v4418_v59, %v3018_v26  ;;  %v3057_v48 = vmul.f32 %v3656_v36, %v3049_v39 }
 0xe88   : > { %v4420_v5 = vpop.eup %4419 }
 0xe89   : > { %v3051_v22 = vmul.f32 %v4420_v5, %v3019_v29  ;;  %v3058_v40 = vmul.f32 %v3656_v36, %v3050_v38  ;;  %v3065_v46 = vadd.f32 %v3657_v21, %v3057_v48  ;;  %v3663_v29 = vld [vmem:[%s4556_s20 + $0x6] ss:$0 sm:$0xff] }
 0xe8b   : > { %v3066_v54 = vadd.f32 %v3657_v21, %v3058_v40  ;;  %v3059_v62 = vmul.f32 %v3656_v36, %v3051_v22 }
 0xe8c   : > { %v4422_v0 = vpop.eup %4421 }
 0xe8d   : > { %v3052_v45 = vmul.f32 %v4422_v0, %v3020_v4  ;;  %v3073_v50 = vpack.c.bf16 %v3066_v54, %v3065_v46  ;;  %v3067_v19 = vadd.f32 %v3657_v21, %v3059_v62 }
 0xe8f   : > { %v3060_v17 = vmul.f32 %v3656_v36, %v3052_v45  ;;  %4117 = vmatprep.mubr.msk.bf16.mxu0 %vm525_vm1, %v3073_v50 }
 0xe91   : > { %v3068_v10 = vadd.f32 %v3657_v21, %v3060_v17 }
 0xe93   : > { %v3074_v27 = vpack.c.bf16 %v3068_v10, %v3067_v19 }
 0xe95   : > { %4118 = vmatmul.mubr.msk.bf16.vlgmr.msra.gmra.mrb[60].mxu0 %vm525_vm1, %v3074_v27 }
 0xe96   : > { %4122 = vmatpush3.bf16.msra.mxu0 %v4347_v3 }
 0xe97   : > { %4123 = vmatprep.subr.bf16.mxu0 %v4348_v47 }
 0xe9a   : > { %4124 = vmatpush3.bf16.msra.mxu0 %v4348_v47 }
 0xe9b   : > { %4125 = vmatprep.subr.bf16.mxu0 %v4349_v51 }
 0xe9e   : > { %4126 = vmatpush3.bf16.msra.mxu0 %v4349_v51 }
 0xe9f   : > { %4127 = vmatprep.subr.bf16.mxu0 %v4350_v49 }
 0xea2   : > { %4128 = vmatpush3.bf16.msra.mxu0 %v4350_v49 }
 0xf68   : > { %v4119_v12 = vpop.f32.mrb[60].mxu0 }
 0xf69   : > { %v3143_v32 = vadd.f32 %v4119_v12, %v3658_v37  ;;  %v3134_v33 = vpop.f32.mrb[61].mxu0  ;;  %v3670_v12 = vld [vmem:[%s4556_s20 + $0x9] ss:$0 sm:$0xff] }
 0xf6a   : > { %v3135_v34 = vadd.f32 %v3658_v37, %v3134_v33  ;;  %v4120_v13 = vpop.f32.mrb[62].mxu0 }
 0xf6b   : > { %v3146_v1 = vadd.f32 %v4120_v13, %v3658_v37  ;;  %v3137_v16 = vpop.f32.mrb[63].mxu0  ;;  %v3151_v24 = vmax.f32 %v3143_v32, 0.0 }
 0xf6c   : > { %v3138_v23 = vadd.f32 %v3658_v37, %v3137_v16  ;;  %v3149_v2 = vmax.f32 %v3135_v34, 0.0  ;;  %v3671_v34 = vld [vmem:[%s4556_s20 + $0xa] ss:$0 sm:$0xff] }
 0xf6d   : > { %v3152_v25 = vmax.f32 %v3146_v1, 0.0 }
 0xf6e   : > { %v3150_v26 = vmax.f32 %v3138_v23, 0.0 }
 0xf6f   : > { %v3162_v6 = vpack.c.bf16 %v3152_v25, %v3151_v24 }
 0xf70   : > { %v3161_v28 = vpack.c.bf16 %v3150_v26, %v3149_v2 }
 0xf72   : > { %4129 = vmatprep.mubr.msk.bf16.mxu0 %vm3192_vm12, %v3161_v28 }
 0xf73   : > { %4130 = vmatmul.mubr.msk.bf16.vlgmr.msra.gmra.mrb[64].mxu0 %vm3192_vm12, %v3162_v6 }
0x1046   : > { %v4131_v30 = vpop.f32.mrb[64].mxu0 }
0x1047   : > { %v3233_v57 = vpop.f32.mrb[65].mxu0  ;;  %v3242_v7 = vadd.f32 %v4131_v30, %v3663_v29 }
0x1048   : > { %v3234_v31 = vadd.f32 %v3663_v29, %v3233_v57  ;;  %v4132_v58 = vpop.f32.mrb[66].mxu0 }
0x1049   : > { %v3236_v41 = vpop.f32.mrb[67].mxu0  ;;  %v3245_v4 = vadd.f32 %v4132_v58, %v3663_v29  ;;  %v3250_v43 = vadd.f32 %v3242_v7, %v3067_v19 }
0x104a   : > { %v3237_v56 = vadd.f32 %v3663_v29, %v3236_v41  ;;  %v3248_v53 = vadd.f32 %v3234_v31, %v3065_v46 }
0x104b   : > { %v3251_v9 = vadd.f32 %v3245_v4, %v3068_v10  ;;  %v3260_v14 = vsel %vm525_vm1, %v3250_v43, 0.0 }
0x104c   : > { %v3254_v60 = vsel %vm525_vm1, %v3248_v53, 0.0  ;;  %v3249_v63 = vadd.f32 %v3237_v56, %v3066_v54 }
0x104d   : > { %3255 = vadd.xlane.f32.xlu0 %v3254_v60  ;;  %v3263_v8 = vsel %vm525_vm1, %v3251_v9, 0.0 }
0x104e   : > { %v3257_v3 = vsel %vm525_vm1, %v3249_v63, 0.0 }
0x104f   : > { %3258 = vadd.xlane.f32.xlu1 %v3257_v3 }
0x1051   : > { %3261 = vadd.xlane.f32.xlu0 %v3260_v14 }
0x1053   : > { %3264 = vadd.xlane.f32.xlu1 %v3263_v8 }
0x10da   : > { %v3256_v11 = vpop.xlane.xlu0 %3255 }
0x10db   : > { %v3266_v18 = vmul.f32 0.03125, %v3256_v11 }
0x10dc   : > { %v3259_v42 = vpop.xlane.xlu1 %3258 }
0x10dd   : > { %v3270_v20 = vsub.f32 %v3248_v53, %v3266_v18  ;;  %v3267_v35 = vmul.f32 0.03125, %v3259_v42 }
0x10de   : > { %v3262_v15 = vpop.xlane.xlu0 %3261 }
0x10df   : > { %v3271_v52 = vsub.f32 %v3249_v63, %v3267_v35  ;;  %v3268_v44 = vmul.f32 0.03125, %v3262_v15  ;;  %v3274_v55 = vmul.f32 %v3270_v20, %v3270_v20 }
0x10e0   : > { %v3265_v61 = vpop.xlane.xlu1 %3264 }
0x10e1   : > { %v3272_v36 = vsub.f32 %v3250_v43, %v3268_v44  ;;  %v3269_v39 = vmul.f32 0.03125, %v3265_v61  ;;  %v3278_v59 = vsel %vm525_vm1, %v3274_v55, 0.0  ;;  %v3275_v38 = vmul.f32 %v3271_v52, %v3271_v52 }
0x10e2   : > { %3279 = vadd.xlane.f32.xlu0 %v3278_v59 }
0x10e3   : > { %v3273_v48 = vsub.f32 %v3251_v9, %v3269_v39  ;;  %v3281_v5 = vsel %vm525_vm1, %v3275_v38, 0.0  ;;  %v3276_v21 = vmul.f32 %v3272_v36, %v3272_v36 }
0x10e4   : > { %3282 = vadd.xlane.f32.xlu1 %v3281_v5 }
0x10e5   : > { %v3284_v22 = vsel %vm525_vm1, %v3276_v21, 0.0  ;;  %v3277_v40 = vmul.f32 %v3273_v48, %v3273_v48 }
0x10e6   : > { %3285 = vadd.xlane.f32.xlu0 %v3284_v22 }
0x10e7   : > { %v3287_v46 = vsel %vm525_vm1, %v3277_v40, 0.0 }
0x10e8   : > { %3288 = vadd.xlane.f32.xlu1 %v3287_v46 }
0x116f   : > { %v3280_v54 = vpop.xlane.xlu0 %3279 }
0x1170   : > { %v3290_v0 = vmul.f32 0.03125, %v3280_v54 }
0x1171   : > { %v3283_v62 = vpop.xlane.xlu1 %3282 }
0x1172   : > { %v3294_v45 = vadd.f32 1e-05, %v3290_v0  ;;  %v3291_v50 = vmul.f32 0.03125, %v3283_v62 }
0x1173   : > { %v3286_v17 = vpop.xlane.xlu0 %3285 }
0x1174   : > { %4423 = vrsqrt.f32 %v3294_v45  ;;  %v3295_v19 = vadd.f32 1e-05, %v3291_v50  ;;  %v3292_v10 = vmul.f32 0.03125, %v3286_v17  ;;  %v3673_v45 = vld [vmem:[%s5452_s10] ss:$0 sm:$0xff] (!%p3672_p5) }
0x1175   : > { %v3289_v27 = vpop.xlane.xlu1 %3288  ;;  %v3674_v17 = vld [vmem:[%s5452_s10 + $0x1] ss:$0 sm:$0xff] (!%p3672_p5) }
0x1176   : > { %4425 = vrsqrt.f32 %v3295_v19  ;;  %v3296_v47 = vadd.f32 1e-05, %v3292_v10  ;;  %v3293_v51 = vmul.f32 0.03125, %v3289_v27 }
0x1178   : > { %4427 = vrsqrt.f32 %v3296_v47  ;;  %v3297_v49 = vadd.f32 1e-05, %v3293_v51 }
0x117a   : > { %4429 = vrsqrt.f32 %v3297_v49 }
0x117e   : > { %v4424_v37 = vpop.eup %4423 }
0x117f   : > { %v3302_v32 = vmul.f32 %v4424_v37, %v3270_v20 }
0x1180   : > { %v4426_v33 = vpop.eup %4425 }
0x1181   : > { %v3310_v13 = vmul.f32 %v3670_v12, %v3302_v32  ;;  %v3303_v1 = vmul.f32 %v4426_v33, %v3271_v52 }
0x1182   : > { %v4428_v16 = vpop.eup %4427 }
0x1183   : > { %v3318_v23 = vadd.f32 %v3671_v34, %v3310_v13  ;;  %v3311_v24 = vmul.f32 %v3670_v12, %v3303_v1  ;;  %v3304_v25 = vmul.f32 %v4428_v16, %v3272_v36 }
0x1184   : > { %v4430_v2 = vpop.eup %4429 }
0x1185   : > { %3322 = vst.msk [vmem:[%s5453_s11] sm:$0xff] %vm525_vm1, %v3318_v23  ;;  %v3319_v26 = vadd.f32 %v3671_v34, %v3311_v24  ;;  %v3312_v6 = vmul.f32 %v3670_v12, %v3304_v25  ;;  %v3305_v28 = vmul.f32 %v4430_v2, %v3273_v48  ;;  %3329 = sbr.rel (%p3672_p5) target bundleno = 4807 (0x12c7), region = 72  ;;  %v3332_v7 = vsel (!%p3672_p5), %vm525_vm1, %v3318_v23, 0.0 }
0x1186   : > { %3333 = vadd.xlane.f32.xlu0 (!%p3672_p5), %v3332_v7 }
0x1187   : > { %3323 = vst.msk [vmem:[%s5453_s11 + $0x8] sm:$0xff] %vm525_vm1, %v3319_v26  ;;  %v3320_v29 = vadd.f32 %v3671_v34, %v3312_v6  ;;  %v3313_v30 = vmul.f32 %v3670_v12, %v3305_v28  ;;  %v3335_v58 = vsel (!%p3672_p5), %vm525_vm1, %v3319_v26, 0.0 }
0x1189   : > { %3324 = vst.msk [vmem:[%s5453_s11 + $0x10] sm:$0xff] %vm525_vm1, %v3320_v29  ;;  %v3321_v57 = vadd.f32 %v3671_v34, %v3313_v30  ;;  %v3338_v31 = vsel (!%p3672_p5), %vm525_vm1, %v3320_v29, 0.0 }
0x118a   : > { %3339 = vadd.xlane.f32.xlu1 (!%p3672_p5), %v3338_v31  ;;  %3336 = vadd.xlane.f32.xlu0 (!%p3672_p5), %v3335_v58 }
0x118b   : > { %3325 = vst.msk [vmem:[%s5453_s11 + $0x18] sm:$0xff] %vm525_vm1, %v3321_v57  ;;  %v3341_v41 = vsel (!%p3672_p5), %vm525_vm1, %v3321_v57, 0.0 }
0x118e   : > { %3342 = vadd.xlane.f32.xlu1 %v3341_v41 }
0x1213   : > { %v3334_v4 = vpop.xlane.xlu0 %3333 }
0x1214   : > { %v3344_v53 = vmul.f32 0.03125, %v3334_v4 }
0x1216   : > { %v3348_v63 = vsub.f32 %v3318_v23, %v3344_v53 }
0x1217   : > { %v3340_v56 = vpop.xlane.xlu1 %3339  ;;  %v3337_v3 = vpop.xlane.xlu0 %3336 }
0x1218   : > { %v3346_v60 = vmul.f32 0.03125, %v3340_v56  ;;  %v3345_v14 = vmul.f32 0.03125, %v3337_v3  ;;  %v3352_v11 = vmul.f32 %v3348_v63, %v3348_v63 }
0x121a   : > { %v3350_v43 = vsub.f32 %v3320_v29, %v3346_v60  ;;  %v3349_v42 = vsub.f32 %v3319_v26, %v3345_v14  ;;  %v3356_v35 = vsel %vm525_vm1, %v3352_v11, 0.0 }
0x121b   : > { %v3343_v9 = vpop.xlane.xlu1 %3342  ;;  %3357 = vadd.xlane.f32.xlu0 %v3356_v35 }
0x121c   : > { %v3347_v8 = vmul.f32 0.03125, %v3343_v9  ;;  %v3354_v18 = vmul.f32 %v3350_v43, %v3350_v43  ;;  %v3353_v52 = vmul.f32 %v3349_v42, %v3349_v42 }
0x121e   : > { %v3351_v20 = vsub.f32 %v3321_v57, %v3347_v8  ;;  %v3362_v15 = vsel %vm525_vm1, %v3354_v18, 0.0  ;;  %v3359_v55 = vsel %vm525_vm1, %v3353_v52, 0.0 }
0x121f   : > { %3363 = vadd.xlane.f32.xlu0 %v3362_v15  ;;  %3360 = vadd.xlane.f32.xlu1 %v3359_v55 }
0x1220   : > { %v3355_v44 = vmul.f32 %v3351_v20, %v3351_v20 }
0x1222   : > { %v3365_v61 = vsel %vm525_vm1, %v3355_v44, 0.0 }
0x1223   : > { %3366 = vadd.xlane.f32.xlu1 %v3365_v61 }
0x12a8   : > { %v3358_v36 = vpop.xlane.xlu0 %3357 }
0x12a9   : > { %v3368_v39 = vmul.f32 0.03125, %v3358_v36 }
0x12ab   : > { %v3372_v59 = vadd.f32 1e-05, %v3368_v39 }
0x12ac   : > { %v3361_v38 = vpop.xlane.xlu1 %3360  ;;  %v3364_v48 = vpop.xlane.xlu0 %3363 }
0x12ad   : > { %4435 = vrsqrt.f32 %v3372_v59  ;;  %v3369_v5 = vmul.f32 0.03125, %v3361_v38  ;;  %v3370_v21 = vmul.f32 0.03125, %v3364_v48 }
0x12af   : > { %v3373_v22 = vadd.f32 1e-05, %v3369_v5  ;;  %v3374_v40 = vadd.f32 1e-05, %v3370_v21 }
0x12b0   : > { %v3367_v46 = vpop.xlane.xlu1 %3366 }
0x12b1   : > { %4437 = vrsqrt.f32 %v3373_v22  ;;  %v3371_v54 = vmul.f32 0.03125, %v3367_v46 }
0x12b2   : > { %4439 = vrsqrt.f32 %v3374_v40 }
0x12b3   : > { %v3375_v0 = vadd.f32 1e-05, %v3371_v54 }
0x12b5   : > { %4441 = vrsqrt.f32 %v3375_v0 }
0x12b7   : > { %v4436_v62 = vpop.eup %4435 }
0x12b8   : > { %v3380_v50 = vmul.f32 %v4436_v62, %v3348_v63 }
0x12ba   : > { %v3388_v19 = vmul.f32 %v3673_v45, %v3380_v50 }
0x12bb   : > { %v4438_v10 = vpop.eup %4437 }
0x12bc   : > { %v4440_v27 = vpop.eup %4439  ;;  %v3396_v47 = vadd.f32 %v3674_v17, %v3388_v19  ;;  %v3381_v51 = vmul.f32 %v4438_v10, %v3349_v42 }
0x12bd   : > { %v3382_v49 = vmul.f32 %v4440_v27, %v3350_v43 }
0x12be   : > { %3400 = vst.msk [vmem:[%s5453_s11] sm:$0xff] %vm525_vm1, %v3396_v47  ;;  %v3389_v37 = vmul.f32 %v3673_v45, %v3381_v51 }
0x12bf   : > { %v4442_v12 = vpop.eup %4441  ;;  %v3390_v32 = vmul.f32 %v3673_v45, %v3382_v49 }
0x12c0   : > { %v3397_v33 = vadd.f32 %v3674_v17, %v3389_v37  ;;  %v3383_v34 = vmul.f32 %v4442_v12, %v3351_v20 }
0x12c1   : > { %v3398_v13 = vadd.f32 %v3674_v17, %v3390_v32 }
0x12c2   : > { %3401 = vst.msk [vmem:[%s5453_s11 + $0x8] sm:$0xff] %vm525_vm1, %v3397_v33  ;;  %v3391_v1 = vmul.f32 %v3673_v45, %v3383_v34 }
0x12c3   : > { %3402 = vst.msk [vmem:[%s5453_s11 + $0x10] sm:$0xff] %vm525_vm1, %v3398_v13 }
0x12c4   : > { %v3399_v16 = vadd.f32 %v3674_v17, %v3391_v1 }
0x12c6   : > { %3403 = vst.msk [vmem:[%s5453_s11 + $0x18] sm:$0xff] %vm525_vm1, %v3399_v16 }
0x12c7 PF: > { %s5470_s12 = sld [smem:[#allocation2_spill]] }
0x12cd   : > { %s21_s17 = sadd.s32 1, %s5470_s12  }
0x12ce   : > { %p18_p6 = scmp.ge.s32.totalorder %s21_s17, 4  }
0x12d0   :  { %20 = sbr.rel (!%p18_p6) target bundleno = 1 (0x1), region = 117 }

// kernel: tf_forward.3
= control target key start
LH: loop header
LB: loop body
LE: loop exit
PB: predicated region body
PF: predicated region fallthrough
CT: control target
= control target key end

     0   :  { %s7849_s17 = smov 0   ;;  %s9556_s0 = inlined_call_operand.vmem [shape: f32[32,32], index: 0, kind: input, shape index: {}]   ;;  %s9557_s1 = inlined_call_operand.vmem [shape: f32[32,32], index: 1, kind: input, shape index: {}]   ;;  %s9558_s2 = inlined_call_operand.vmem [shape: f32[32,32], index: 2, kind: input, shape index: {}]   ;;  %s9559_s3 = inlined_call_operand.vmem [shape: f32[288,32], index: 3, kind: input, shape index: {}]   ;;  %s9560_s4 = inlined_call_operand.vmem [shape: f32[32,32], index: 4, kind: input, shape index: {}]   ;;  %s9561_s5 = inlined_call_operand.vmem [shape: bf16[2,16,32,32], index: 5, kind: input, shape index: {}]   ;;  %s9562_s6 = inlined_call_operand.vmem [shape: bf16[2,32,64], index: 6, kind: input, shape index: {}]   ;;  %s9563_s7 = inlined_call_operand.vmem [shape: bf16[2,64,32], index: 7, kind: input, shape index: {}]   ;;  %s9564_s8 = inlined_call_operand.vmem [shape: f32[2,1,64], index: 8, kind: input, shape index: {}]   ;;  %s9565_s9 = inlined_call_operand.vmem [shape: f32[2,19,32], index: 9, kind: input, shape index: {}]   ;;  %s9566_s10 = inlined_call_operand.vmem [shape: f32[2,32], index: 10, kind: input, shape index: {}]   ;;  %s9567_s11 = inlined_call_operand.vmem [shape: f32[32,32], index: 11, kind: output, shape index: {}]  }
   0x1 LB: > { %9579 = sst [smem:[#allocation2_spill]] %s7781_s17  ;;  %s7855_s18 = sadd.s32 4294967295, %s7781_s17   ;;  %s7781_s17 = sphi %s7849_s17, %s21_s17  }
   0x2   : > { %p5905_p0 = scmp.ge.s32.totalorder %s7781_s17, 1  ;;  %p370_p1 = scmp.lt.s32.totalorder %s7781_s17, 3 }
   0x4   : > { %p371_p2 = pnand %p5905_p0, %p370_p1 }
   0x6   : > { %374 = sbr.rel (%p371_p2) target bundleno = 8502 (0x2136), region = 64 }
   0xd   : > { %p423_p3 = scmp.lt.s32.totalorder %s7855_s18, 1  ;;  %p5913_p4 = scmp.ne.s32.totalorder %s7855_s18, 0 }
   0xe   : > { %v451_v0 = vld [vmem:[%s9556_s0] sm:$0xff] (!%p5913_p4)  ;;  %vm455_vm0 = vcmask (!%p5913_p4), 261120   ;;  %v452_v1 = vld [vmem:[%s9556_s0 + $0x8] sm:$0xff] (!%p5913_p4)  ;;  %v453_v2 = vld [vmem:[%s9556_s0 + $0x10] sm:$0xff] (!%p5913_p4) }
   0xf   : > { %s7861_s19 = scalar_select %p423_p3, %s7855_s18, 1 }
  0x10   : > { %450 = sbr.rel (%p5913_p4) target bundleno = 23 (0x17), region = 68  ;;  %456 = vst.msk [vmem:[%s9567_s11] sm:$0xff] (!%p5913_p4), %vm455_vm0, %v451_v0  ;;  %457 = vst.msk [vmem:[%s9567_s11 + $0x8] sm:$0xff] (!%p5913_p4), %vm455_vm0, %v452_v1  ;;  %v454_v3 = vld [vmem:[%s9556_s0 + $0x18] sm:$0xff] (!%p5913_p4) }
  0x11   : > { %s6273_s20 = sshll.u32 %s7861_s19, 8  ;;  %s6274_s21 = sshll.u32 %s7861_s19, 4  ;;  %458 = vst.msk [vmem:[%s9567_s11 + $0x10] sm:$0xff] (!%p5913_p4), %vm455_vm0, %v453_v2  ;;  %459 = vst.msk [vmem:[%s9567_s11 + $0x18] sm:$0xff] (!%p5913_p4), %vm455_vm0, %v454_v3 }
  0x12   : > { %s7868_s24 = scalar_lea.vmem %s9561_s5, %s6273_s20  ;;  %s7873_s27 = scalar_lea.vmem %s9562_s6, %s6274_s21 }
  0x13   : > { %s6275_s28 = sshll.u32 %s7861_s19, 5  ;;  %s7334_s16 = smul.u32 24, %s7861_s19 }
  0x14   : > { %s7883_s15 = scalar_lea.vmem %s9563_s7, %s6275_s28 }
  0x15   : > { %s7889_s20 = scalar_lea.vmem %s9565_s9, %s7334_s16 }
  0x17 PF: > { %v7529_v4 = vld [vmem:[%s7868_s24 + $0x10] sm:$0xff]   ;;  %v7530_v5 = vld [vmem:[%s7868_s24 + $0x18] sm:$0xff]   ;;  %v460_v6 = vld [vmem:[%s9567_s11] sm:$0xff]  ;;  %vm557_vm1 = vcmask 261120   ;;  %vm751_vm2 = vcmask 64512   ;;  %s7783_s28 = smov 120  }
  0x18   : > { %6598 = vmatprep.subr.bf16.mxu1 %v7529_v4  ;;  %v461_v7 = vld [vmem:[%s9567_s11 + $0x8] sm:$0xff]  ;;  %v468_v8 = vld [vmem:[%s9558_s2] sm:$0xff]  ;;  %v462_v12 = vld [vmem:[%s9567_s11 + $0x10] sm:$0xff]  ;;  %s7784_s29 = smov 112   ;;  %s7785_s30 = smov 104   ;;  %vm1868_vm4 = vcmask 130048  }
  0x19   : > { %6599 = vmatpush3.bf16.msra.mxu1 %v7529_v4  ;;  %v469_v9 = vld [vmem:[%s9558_s2 + $0x8] sm:$0xff]  ;;  %v512_v10 = vadd.f32 %v468_v8, %v460_v6  ;;  %v463_v13 = vld [vmem:[%s9567_s11 + $0x18] sm:$0xff]  ;;  %v470_v14 = vld [vmem:[%s9558_s2 + $0x10] sm:$0xff]  ;;  %v7986_v47 = vpack.c.bf16 %v461_v7, %v460_v6  ;;  %s7786_s17 = smov 8   ;;  %s7787_s13 = smov 16   ;;  %vm1873_vm5 = vcmask 195584  }
  0x1a   : > { %6600 = vmatprep.subr.bf16.mxu1 %v7530_v5  ;;  %v513_v11 = vadd.f32 %v469_v9, %v461_v7  ;;  %v471_v15 = vld [vmem:[%s9558_s2 + $0x18] sm:$0xff]  ;;  %v514_v16 = vadd.f32 %v470_v14, %v462_v12  ;;  %v7531_v19 = vld [vmem:[%s7868_s24] sm:$0xff]   ;;  %v7532_v20 = vld [vmem:[%s7868_s24 + $0x8] sm:$0xff]   ;;  %v7990_v48 = vpack.c.bf16 %v463_v13, %v462_v12  ;;  %s9569_s14 = smov 24   ;;  %p6268_p5 = scmp.ne.s32.totalorder %s7855_s18, 1 }
  0x1b   : > { %v515_v18 = vadd.f32 %v471_v15, %v463_v13  ;;  %6590 = vmatprep.subr.bf16.mxu0 %v7531_v19  ;;  %v5931_v23 = vld [vmem:[%s7889_s20 + $0x1] ss:$0 sm:$0xff]  ;;  %vm7951_vm3 = vmpackc.low %vm751_vm2, %vm751_vm2  ;;  %v5926_v33 = vld [vmem:[%s7889_s20] ss:$0 sm:$0xff] }
  0x1c   : > { %v539_v17 = vpack.c.bf16 %v513_v11, %v512_v10  ;;  %6591 = vmatpush3.bf16.msra.mxu0 %v7531_v19  ;;  %v7533_v45 = vld [vmem:[%s7868_s24 + $0x20] sm:$0xff]   ;;  %v7534_v46 = vld [vmem:[%s7868_s24 + $0x28] sm:$0xff]   ;;  %v8008_v54 = vld [vmem:[%s9560_s4 + $0x10] sm:$0xff] }
  0x1d   : > { %6601 = vmatpush3.bf16.msra.mxu1 %v7530_v5  ;;  %v540_v21 = vpack.c.bf16 %v515_v18, %v514_v16  ;;  %6592 = vmatprep.subr.bf16.mxu0 %v7532_v20  ;;  %v7997_v49 = vld [vmem:[%s9560_s4] sm:$0xff]  ;;  %v8002_v51 = vld [vmem:[%s9560_s4 + $0x8] sm:$0xff]  ;;  %v8015_v58 = vld [vmem:[%s9560_s4 + $0x18] sm:$0xff] }
  0x1e   : > { %6602 = vmatprep.mubr.msk.bf16.mxu1 %vm557_vm1, %v539_v17  ;;  %6594 = vmatprep.mubr.msk.bf16.mxu0 %vm557_vm1, %v539_v17  ;;  %v5936_v1 = vld [vmem:[%s7889_s20 + $0x2] ss:$0 sm:$0xff] }
  0x20   : > { %6603 = vmatmul.mubr.msk.bf16.vlgmr.msra.gmra.mrb[0].mxu1 %vm557_vm1, %v540_v21  ;;  %6593 = vmatpush3.bf16.msra.mxu0 %v7532_v20 }
  0x21   : > { %6606 = vmatprep.subr.bf16.mxu0 %v7533_v45 }
  0x23   : > { %6595 = vmatmul.mubr.msk.bf16.vlgmr.msra.gmra.mrb[0].mxu0 %vm557_vm1, %v540_v21 }
  0x24   : > { %6610 = vmatprep.mubr.msk.bf16.mxu0 %vm557_vm1, %v7986_v47  ;;  %6607 = vmatpush3.bf16.msra.mxu0 %v7533_v45 }
  0x25   : > { %6608 = vmatprep.subr.bf16.mxu0 %v7534_v46 }
  0x28   : > { %6609 = vmatpush3.bf16.msra.mxu0 %v7534_v46 }
  0x2b   : > { %6611 = vmatmul.mubr.msk.bf16.vlgmr.msra.gmra.mrb[4].mxu0 %vm557_vm1, %v7990_v48 }
  0xf3   : > { %v6604_v22 = vpop.f32.mrb[0].mxu1 }
  0xf4   : > { %v663_v24 = vpop.f32.mrb[1].mxu1  ;;  %v672_v26 = vadd.f32 %v6604_v22, %v5931_v23 }
  0xf5   : > { %v6605_v25 = vpop.f32.mrb[2].mxu1  ;;  %v664_v29 = vadd.f32 %v5931_v23, %v663_v24 }
  0xf6   : > { %v675_v27 = vadd.f32 %v6605_v25, %v5931_v23  ;;  %v666_v28 = vpop.f32.mrb[3].mxu1  ;;  %v6596_v36 = vpop.f32.mrb[0].mxu0 }
  0xf7   : > { %v667_v30 = vadd.f32 %v5931_v23, %v666_v28  ;;  %v598_v38 = vpop.f32.mrb[1].mxu0  ;;  %v7974_v43 = vadd.f32 %v6596_v36, %v5926_v33 }
  0xf8   : > { %v7156_v32 = vpack.c.bf16 %v675_v27, %v672_v26  ;;  %v7956_v34 = vpack.i.bf16 %v675_v27, %v672_v26  ;;  %v7962_v39 = vadd.f32 %v5926_v33, %v598_v38  ;;  %v6597_v40 = vpop.f32.mrb[2].mxu0 }
  0xf9   : > { %v7150_v35 = vpack.c.bf16 %v667_v30, %v664_v29  ;;  %v7958_v37 = vpack.i.bf16 %v667_v30, %v664_v29  ;;  %v601_v41 = vpop.f32.mrb[3].mxu0  ;;  %v7980_v44 = vadd.f32 %v6597_v40, %v5926_v33 }
  0xfa   : > { %6622 = vmatprep.mubr.msk.f32.mxu1 %vm751_vm2, %v7962_v39  ;;  %v7972_v42 = vadd.f32 %v5926_v33, %v601_v41 }
  0xfb   : > { %7152 = vmatprep.subr.msk.bf16.mxu1 %vm7951_vm3, %v7150_v35 }
  0xfc   : > { %7155 = vmatpush3.bf16.xpose.msk.msra.mxu1 %vm7951_vm3, %v7150_v35 }
  0xfd   : > { %7158 = vmatprep.subr.msk.bf16.mxu1 %vm7951_vm3, %v7156_v32 }
  0xfe   : > { %v6612_v2 = vpop.f32.mrb[4].mxu0 }
  0xff   : > { %v736_v3 = vpop.f32.mrb[5].mxu0  ;;  %v8023_v4 = vadd.f32 %v6612_v2, %v5936_v1 }
 0x100   : > { %v8025_v5 = vadd.f32 %v5936_v1, %v736_v3  ;;  %v6613_v6 = vpop.f32.mrb[6].mxu0 }
 0x101   : > { %v8027_v7 = vadd.f32 %v6613_v6, %v5936_v1  ;;  %v739_v8 = vpop.f32.mrb[7].mxu0 }
 0x102   : > { %v8029_v9 = vadd.f32 %v5936_v1, %v739_v8 }
 0x103   : > { %v7166_v11 = vpack.c.bf16 %v8027_v7, %v8023_v4 }
 0x104   : > { %7161 = vmatpush3.bf16.xpose.msk.msra.mxu1 %vm7951_vm3, %v7156_v32  ;;  %v7162_v10 = vpack.c.bf16 %v8029_v9, %v8025_v5 }
 0x106   : > { %7163 = vmatprep.subr.bf16.mxu0 %v7162_v10 }
 0x107   : > { %7165 = vmatpush3.bf16.msra.mxu0 %v7162_v10 }
 0x108   : > { %7167 = vmatprep.subr.bf16.mxu0 %v7166_v11 }
 0x10b   : > { %6623 = vmatmul.mubr.msk.f32.vlgmr.msra.gmra.mrb[4].mxu1 %vm751_vm2, %v7972_v42  ;;  %7169 = vmatpush3.bf16.msra.mxu0 %v7166_v11 }
 0x10c   : > { %6625 = vmatprep.mubr.msk.f32.mxu1 %vm751_vm2, %v7974_v43 }
 0x10f   : > { %6626 = vmatmul.mubr.msk.f32.gmra.mrb[6].mxu1 %vm751_vm2, %v7980_v44 }
 0x1de   : > { %v6624_v50 = vpop.f32.mrb[4].mxu1 }
 0x1df   : > { %v842_v52 = vpop.f32.mrb[5].mxu1  ;;  %v848_v55 = vadd.f32 %v6624_v50, %v8002_v51 }
 0x1e0   : > { %v843_v53 = vadd.f32 %v842_v52, %v7997_v49 }
 0x1e1   : > { %v864_v63 = vsel %vm557_vm1, %v848_v55, -inf }
 0x1e2   : > { %v6627_v56 = vpop.f32.mrb[6].mxu1  ;;  %v861_v57 = vsel %vm557_vm1, %v843_v53, -inf }
 0x1e3   : > { %v852_v59 = vpop.f32.mrb[7].mxu1  ;;  %862 = vmax.xlane.f32.xlu0 %v861_v57  ;;  %v858_v61 = vadd.f32 %v6627_v56, %v8015_v58 }
 0x1e4   : > { %v853_v60 = vadd.f32 %v852_v59, %v8008_v54 }
 0x1e5   : > { %v870_v0 = vsel %vm557_vm1, %v858_v61, -inf }
 0x1e6   : > { %v867_v62 = vsel %vm557_vm1, %v853_v60, -inf }
 0x1e7   : > { %868 = vmax.xlane.f32.xlu1 %v867_v62  ;;  %865 = vmax.xlane.f32.xlu0 %v864_v63 }
 0x1eb   : > { %871 = vmax.xlane.f32.xlu1 %v870_v0 }
 0x270   : > { %v863_v12 = vpop.xlane.xlu0 %862 }
 0x271   : > { %v873_v13 = vsub.f32 %v843_v53, %v863_v12 }
 0x273   : > { %v877_v14 = vmul.f32 1.442695, %v873_v13 }
 0x274   : > { %v869_v15 = vpop.xlane.xlu1 %868  ;;  %v866_v16 = vpop.xlane.xlu0 %865 }
 0x275   : > { %7567 = vpow2.f32 %v877_v14  ;;  %v875_v17 = vsub.f32 %v853_v60, %v869_v15  ;;  %v874_v18 = vsub.f32 %v848_v55, %v866_v16 }
 0x277   : > { %v881_v19 = vmul.f32 1.442695, %v875_v17  ;;  %v879_v20 = vmul.f32 1.442695, %v874_v18 }
 0x278   : > { %v872_v21 = vpop.xlane.xlu1 %871 }
 0x279   : > { %7569 = vpow2.f32 %v881_v19  ;;  %v876_v22 = vsub.f32 %v858_v61, %v872_v21 }
 0x27a   : > { %7571 = vpow2.f32 %v879_v20 }
 0x27b   : > { %v883_v23 = vmul.f32 1.442695, %v876_v22 }
 0x27d   : > { %7573 = vpow2.f32 %v883_v23 }
 0x27f   : > { %v7568_v24 = vpop.eup %7567 }
 0x280   : > { %v885_v25 = vsel %vm557_vm1, %v7568_v24, 0.0 }
 0x281   : > { %886 = vadd.xlane.f32.xlu0 %v885_v25 }
 0x283   : > { %v7570_v26 = vpop.eup %7569 }
 0x284   : > { %v7572_v27 = vpop.eup %7571  ;;  %v891_v28 = vsel %vm557_vm1, %v7570_v26, 0.0 }
 0x285   : > { %892 = vadd.xlane.f32.xlu0 %v891_v28  ;;  %v888_v29 = vsel %vm557_vm1, %v7572_v27, 0.0 }
 0x286   : > { %889 = vadd.xlane.f32.xlu1 %v888_v29 }
 0x287   : > { %v7574_v30 = vpop.eup %7573 }
 0x288   : > { %v894_v32 = vsel %vm557_vm1, %v7574_v30, 0.0 }
 0x28a   : > { %895 = vadd.xlane.f32.xlu1 %v894_v32 }
 0x29b   : > { %7355 = vrot.lane.b32.xlu1 %v7956_v34, %s7783_s28  ;;  %7350 = vrot.lane.b32.xlu0 %v7958_v37, %s7783_s28 }
 0x29f   : > { %1002 = vrot.lane.b32.xlu1 %v7962_v39, %s7783_s28  ;;  %1006 = vrot.lane.b32.xlu0 %v7974_v43, %s7783_s28 }
 0x2a3   : > { %1004 = vrot.lane.b32.xlu1 %v7972_v42, %s7783_s28 }
 0x2a7   : > { %1008 = vrot.lane.b32.xlu1 %v7980_v44, %s7783_s28 }
 0x30e   : > { %v887_v33 = vpop.xlane.xlu0 %886 }
 0x30f   : > { %7575 = vrcp.f32 %v887_v33 }
 0x312   : > { %v893_v35 = vpop.xlane.xlu0 %892 }
 0x313   : > { %v890_v36 = vpop.xlane.xlu1 %889  ;;  %7577 = vrcp.f32 %v893_v35 }
 0x314   : > { %7579 = vrcp.f32 %v890_v36 }
 0x316   : > { %v7351_v38 = vpop.permute.xlu0 %7350 }
 0x317   : > { %v896_v40 = vpop.xlane.xlu1 %895  ;;  %v7353_v41 = vunpack.i.h.bf16 %v7351_v38  ;;  %v7352_v45 = vunpack.i.l.bf16 %v7351_v38  ;;  %v8087_v38 = vpack.i.bf16 %v8027_v7, %v8023_v4 }
 0x318   : > { %7581 = vrcp.f32 %v896_v40  ;;  %v8095_v40 = vpack.i.bf16 %v8029_v9, %v8025_v5 }
 0x319   : > { %v7576_v46 = vpop.eup %7575  ;;  %v7170_v50 = vpack.c.bf16 %v7353_v41, %v7352_v45 }
 0x31a   : > { %v901_v52 = vmul.f32 %v7576_v46, %v7568_v24  ;;  %v1007_v3 = vpop.permute.xlu0 %1006 }
 0x31b   : > { %v7356_v53 = vpop.permute.xlu1 %7355  ;;  %7172 = vmatprep.subr.msk.bf16.mxu0 %vm7951_vm3, %v7170_v50 }
 0x31c   : > { %6636 = vmatprep.mubr.msk.f32.mxu0 %vm557_vm1, %v901_v52  ;;  %v7358_v56 = vunpack.i.h.bf16 %v7356_v53  ;;  %v7357_v57 = vunpack.i.l.bf16 %v7356_v53 }
 0x31d   : > { %v7578_v55 = vpop.eup %7577 }
 0x31e   : > { %v7580_v59 = vpop.eup %7579  ;;  %v903_v60 = vmul.f32 %v7578_v55, %v7570_v26  ;;  %v7176_v62 = vpack.c.bf16 %v7358_v56, %v7357_v57 }
 0x31f   : > { %v902_v61 = vmul.f32 %v7580_v59, %v7572_v27  ;;  %v1003_v1 = vpop.permute.xlu1 %1002 }
 0x321   : > { %6637 = vmatmul.mubr.msk.f32.vlgmr.msra.gmra.mrb[8].mxu0 %vm557_vm1, %v902_v61 }
 0x322   : > { %v7582_v63 = vpop.eup %7581  ;;  %7175 = vmatpush3.bf16.xpose.msk.msra.mxu0 %vm7951_vm3, %v7170_v50  ;;  %6639 = vmatprep.mubr.msk.f32.mxu0 %vm557_vm1, %v903_v60 }
 0x323   : > { %7178 = vmatprep.subr.msk.bf16.mxu0 %vm7951_vm3, %v7176_v62  ;;  %v904_v0 = vmul.f32 %v7582_v63, %v7574_v30  ;;  %v1005_v2 = vpop.permute.xlu1 %1004 }
 0x325   : > { %6640 = vmatmul.mubr.msk.f32.gmra.mrb[10].mxu0 %vm557_vm1, %v904_v0 }
 0x326   : > { %6650 = vmatprep.mubr.msk.f32.mxu0 %vm751_vm2, %v1003_v1 }
 0x327   : > { %v1009_v6 = vpop.permute.xlu1 %1008 }
 0x32a   : > { %7181 = vmatpush3.bf16.xpose.msk.msra.mxu0 %vm7951_vm3, %v7176_v62 }
 0x331   : > { %6651 = vmatmul.mubr.msk.f32.vlgmr.msra.gmra.mrb[12].mxu0 %vm751_vm2, %v1005_v2 }
 0x332   : > { %6653 = vmatprep.mubr.msk.f32.mxu0 %vm751_vm2, %v1007_v3 }
 0x335   : > { %6654 = vmatmul.mubr.msk.f32.gmra.mrb[14].mxu0 %vm751_vm2, %v1009_v6 }
 0x3f4   : > { %v8067_v8 = vpop.f32.mrb[8].mxu0 }
 0x3f5   : > { %v8069_v10 = vpop.f32.mrb[9].mxu0 }
 0x3f8   : > { %v8071_v11 = vpop.f32.mrb[10].mxu0 }
 0x3f9   : > { %v8073_v12 = vpop.f32.mrb[11].mxu0 }
 0x404   : > { %v6652_v13 = vpop.f32.mrb[12].mxu0 }
 0x405   : > { %v1106_v14 = vadd.f32 %v6652_v13, %v8002_v51  ;;  %v1100_v15 = vpop.f32.mrb[13].mxu0 }
 0x406   : > { %v1101_v16 = vadd.f32 %v1100_v15, %v7997_v49 }
 0x407   : > { %v1122_v17 = vsel %vm557_vm1, %v1106_v14, -inf }
 0x408   : > { %1123 = vmax.xlane.f32.xlu1 %v1122_v17  ;;  %v6655_v18 = vpop.f32.mrb[14].mxu0  ;;  %v1119_v19 = vsel %vm557_vm1, %v1101_v16, -inf }
 0x409   : > { %v1110_v20 = vpop.f32.mrb[15].mxu0  ;;  %1120 = vmax.xlane.f32.xlu0 %v1119_v19  ;;  %v1116_v22 = vadd.f32 %v6655_v18, %v8015_v58 }
 0x40a   : > { %v1111_v21 = vadd.f32 %v1110_v20, %v8008_v54 }
 0x40b   : > { %v1128_v24 = vsel %vm557_vm1, %v1116_v22, -inf }
 0x40c   : > { %v1125_v23 = vsel %vm557_vm1, %v1111_v21, -inf }
 0x40d   : > { %1126 = vmax.xlane.f32.xlu0 %v1125_v23 }
 0x411   : > { %1129 = vmax.xlane.f32.xlu0 %v1128_v24 }
 0x495   : > { %v1124_v25 = vpop.xlane.xlu1 %1123 }
 0x496   : > { %v1132_v26 = vsub.f32 %v1106_v14, %v1124_v25  ;;  %v1121_v27 = vpop.xlane.xlu0 %1120 }
 0x497   : > { %v1131_v28 = vsub.f32 %v1101_v16, %v1121_v27 }
 0x498   : > { %v1137_v29 = vmul.f32 1.442695, %v1132_v26 }
 0x499   : > { %v1135_v30 = vmul.f32 1.442695, %v1131_v28 }
 0x49a   : > { %7583 = vpow2.f32 %v1137_v29  ;;  %v1127_v41 = vpop.xlane.xlu0 %1126 }
 0x49b   : > { %7585 = vpow2.f32 %v1135_v30  ;;  %v1133_v4 = vsub.f32 %v1111_v21, %v1127_v41 }
 0x49d   : > { %v1139_v7 = vmul.f32 1.442695, %v1133_v4 }
 0x49e   : > { %v1130_v45 = vpop.xlane.xlu0 %1129 }
 0x49f   : > { %v1134_v46 = vsub.f32 %v1116_v22, %v1130_v45  ;;  %7587 = vpow2.f32 %v1139_v7 }
 0x4a1   : > { %v1141_v50 = vmul.f32 1.442695, %v1134_v46 }
 0x4a3   : > { %7589 = vpow2.f32 %v1141_v50 }
 0x4a4   : > { %v7584_v32 = vpop.eup %7583 }
 0x4a5   : > { %v7586_v33 = vpop.eup %7585  ;;  %v1146_v35 = vsel %vm557_vm1, %v7584_v32, 0.0 }
 0x4a6   : > { %1147 = vadd.xlane.f32.xlu1 %v1146_v35  ;;  %v1143_v36 = vsel %vm557_vm1, %v7586_v33, 0.0 }
 0x4a7   : > { %1144 = vadd.xlane.f32.xlu0 %v1143_v36 }
 0x4a9   : > { %v7588_v52 = vpop.eup %7587 }
 0x4aa   : > { %v1149_v53 = vsel %vm557_vm1, %v7588_v52, 0.0 }
 0x4ad   : > { %v7590_v5 = vpop.eup %7589 }
 0x4ae   : > { %v1152_v9 = vsel %vm557_vm1, %v7590_v5, 0.0 }
 0x4b7   : > { %7365 = vrot.lane.b32.xlu1 %v8087_v38, %s7783_s28 }
 0x4bb   : > { %7370 = vrot.lane.b32.xlu1 %v7958_v37, %s7784_s29 }
 0x4bd   : > { %7360 = vrot.lane.b32.xlu0 %v8095_v40, %s7783_s28 }
 0x4bf   : > { %7375 = vrot.lane.b32.xlu1 %v7956_v34, %s7784_s29 }
 0x4dc   : > { %1150 = vadd.xlane.f32.xlu0 %v1149_v53 }
 0x4e3   : > { %1153 = vadd.xlane.f32.xlu1 %v1152_v9 }
 0x4f2   : > { %1276 = vrot.lane.b32.xlu0 %v7962_v39, %s7784_s29 }
 0x4f4   : > { %1278 = vrot.lane.b32.xlu1 %v7972_v42, %s7784_s29 }
 0x4f6   : > { %1280 = vrot.lane.b32.xlu0 %v7974_v43, %s7784_s29 }
 0x4f8   : > { %1282 = vrot.lane.b32.xlu1 %v7980_v44, %s7784_s29 }
 0x533   : > { %v1148_v55 = vpop.xlane.xlu1 %1147 }
 0x534   : > { %v1145_v56 = vpop.xlane.xlu0 %1144 }
 0x535   : > { %7591 = vrcp.f32 %v1145_v56 }
 0x536   : > { %7593 = vrcp.f32 %v1148_v55 }
 0x537   : > { %v7366_v57 = vpop.permute.xlu1 %7365 }
 0x538   : > { %v7361_v59 = vpop.permute.xlu0 %7360  ;;  %v7368_v60 = vunpack.i.h.bf16 %v7366_v57  ;;  %v7367_v61 = vunpack.i.l.bf16 %v7366_v57 }
 0x539   : > { %v7363_v62 = vunpack.i.h.bf16 %v7361_v59  ;;  %v7362_v63 = vunpack.i.l.bf16 %v7361_v59 }
 0x53a   : > { %v7186_v6 = vpack.c.bf16 %v7368_v60, %v7367_v61 }
 0x53b   : > { %v7371_v0 = vpop.permute.xlu1 %7370  ;;  %v7182_v1 = vpack.c.bf16 %v7363_v62, %v7362_v63 }
 0x53c   : > { %v7373_v2 = vunpack.i.h.bf16 %v7371_v0  ;;  %v7372_v3 = vunpack.i.l.bf16 %v7371_v0 }
 0x53d   : > { %7183 = vmatprep.subr.bf16.mxu1 %v7182_v1 }
 0x53e   : > { %7185 = vmatpush3.bf16.msra.mxu1 %v7182_v1  ;;  %v7190_v16 = vpack.c.bf16 %v7373_v2, %v7372_v3 }
 0x53f   : > { %v7592_v13 = vpop.eup %7591  ;;  %7187 = vmatprep.subr.bf16.mxu1 %v7186_v6  ;;  %v7376_v18 = vpop.permute.xlu1 %7375 }
 0x540   : > { %v7594_v14 = vpop.eup %7593  ;;  %v1159_v15 = vmul.f32 %v7592_v13, %v7586_v33  ;;  %v7378_v19 = vunpack.i.h.bf16 %v7376_v18  ;;  %v7377_v20 = vunpack.i.l.bf16 %v7376_v18 }
 0x541   : > { %v1160_v17 = vmul.f32 %v7594_v14, %v7584_v32 }
 0x542   : > { %7189 = vmatpush3.bf16.msra.mxu1 %v7186_v6  ;;  %6664 = vmatprep.mubr.msk.f32.mxu1 %vm557_vm1, %v1159_v15  ;;  %v7196_v21 = vpack.c.bf16 %v7378_v19, %v7377_v20 }
 0x543   : > { %7192 = vmatprep.subr.msk.bf16.mxu1 %vm7951_vm3, %v7190_v16 }
 0x545   : > { %6665 = vmatmul.mubr.msk.f32.vlgmr.msra.gmra.mrb[8].mxu1 %vm557_vm1, %v1160_v17 }
 0x54b   : > { %7195 = vmatpush3.bf16.xpose.msk.msra.mxu1 %vm7951_vm3, %v7190_v16 }
 0x54c   : > { %7198 = vmatprep.subr.msk.bf16.mxu1 %vm7951_vm3, %v7196_v21 }
 0x553   : > { %7201 = vmatpush3.bf16.xpose.msk.msra.mxu1 %vm7951_vm3, %v7196_v21 }
 0x569   : > { %v1151_v22 = vpop.xlane.xlu0 %1150 }
 0x56a   : > { %7595 = vrcp.f32 %v1151_v22 }
 0x56d   : > { %v1277_v27 = vpop.permute.xlu0 %1276 }
 0x570   : > { %v1154_v23 = vpop.xlane.xlu1 %1153 }
 0x571   : > { %7597 = vrcp.f32 %v1154_v23  ;;  %v1281_v30 = vpop.permute.xlu0 %1280 }
 0x574   : > { %v7596_v24 = vpop.eup %7595  ;;  %v1279_v29 = vpop.permute.xlu1 %1278 }
 0x575   : > { %v1161_v25 = vmul.f32 %v7596_v24, %v7588_v52 }
 0x577   : > { %6667 = vmatprep.mubr.msk.f32.mxu1 %vm557_vm1, %v1161_v25 }
 0x578   : > { %v1283_v32 = vpop.permute.xlu1 %1282 }
 0x57b   : > { %v7598_v26 = vpop.eup %7597 }
 0x57c   : > { %v1162_v28 = vmul.f32 %v7598_v26, %v7590_v5 }
 0x57e   : > { %6668 = vmatmul.mubr.msk.f32.gmra.mrb[10].mxu1 %vm557_vm1, %v1162_v28 }
 0x57f   : > { %6678 = vmatprep.mubr.msk.f32.mxu1 %vm751_vm2, %v1277_v27 }
 0x582   : > { %6679 = vmatmul.mubr.msk.f32.vlgmr.msra.gmra.mrb[12].mxu1 %vm751_vm2, %v1279_v29 }
 0x583   : > { %6681 = vmatprep.mubr.msk.f32.mxu1 %vm751_vm2, %v1281_v30 }
 0x586   : > { %6682 = vmatmul.mubr.msk.f32.gmra.mrb[14].mxu1 %vm751_vm2, %v1283_v32 }
 0x618   : > { %v8127_v33 = vpop.f32.mrb[8].mxu1 }
 0x619   : > { %v8129_v35 = vpop.f32.mrb[9].mxu1 }
 0x61a   : > { %v7409_v36 = vpack.i.bf16 %v8127_v33, %v8129_v35  ;;  %v478_v33 = vld [vmem:[%s9559_s3 + $0x10] sm:$0xff]  ;;  %v479_v35 = vld [vmem:[%s9559_s3 + $0x18] sm:$0xff] }
 0x651   : > { %v8133_v41 = vpop.f32.mrb[10].mxu1 }
 0x652   : > { %v8135_v4 = vpop.f32.mrb[11].mxu1 }
 0x653   : > { %v7414_v7 = vpack.i.bf16 %v8133_v41, %v8135_v4  ;;  %v481_v41 = vld [vmem:[%s9559_s3 + $0x28] sm:$0xff]  ;;  %v482_v4 = vld [vmem:[%s9559_s3 + $0x30] sm:$0xff] }
 0x655   : > { %v6680_v45 = vpop.f32.mrb[12].mxu1 }
 0x656   : > { %v1380_v46 = vadd.f32 %v6680_v45, %v8002_v51  ;;  %v1374_v50 = vpop.f32.mrb[13].mxu1 }
 0x657   : > { %v1375_v52 = vadd.f32 %v1374_v50, %v7997_v49 }
 0x658   : > { %v1396_v53 = vsel %vm557_vm1, %v1380_v46, -inf }
 0x659   : > { %1397 = vmax.xlane.f32.xlu1 %v1396_v53  ;;  %v6683_v5 = vpop.f32.mrb[14].mxu1  ;;  %v1393_v9 = vsel %vm557_vm1, %v1375_v52, -inf }
 0x65a   : > { %v1384_v55 = vpop.f32.mrb[15].mxu1  ;;  %1394 = vmax.xlane.f32.xlu0 %v1393_v9  ;;  %v1390_v57 = vadd.f32 %v6683_v5, %v8015_v58 }
 0x65b   : > { %v1385_v56 = vadd.f32 %v1384_v55, %v8008_v54 }
 0x65c   : > { %v1402_v60 = vsel %vm557_vm1, %v1390_v57, -inf }
 0x65d   : > { %v1399_v59 = vsel %vm557_vm1, %v1385_v56, -inf }
 0x65e   : > { %1400 = vmax.xlane.f32.xlu0 %v1399_v59 }
 0x662   : > { %1403 = vmax.xlane.f32.xlu0 %v1402_v60 }
 0x6e6   : > { %v1398_v61 = vpop.xlane.xlu1 %1397 }
 0x6e7   : > { %v1406_v62 = vsub.f32 %v1380_v46, %v1398_v61  ;;  %v1395_v63 = vpop.xlane.xlu0 %1394 }
 0x6e8   : > { %v1405_v0 = vsub.f32 %v1375_v52, %v1395_v63 }
 0x6e9   : > { %v1411_v1 = vmul.f32 1.442695, %v1406_v62 }
 0x6ea   : > { %v1409_v2 = vmul.f32 1.442695, %v1405_v0 }
 0x6eb   : > { %7599 = vpow2.f32 %v1411_v1  ;;  %v1401_v15 = vpop.xlane.xlu0 %1400 }
 0x6ec   : > { %7601 = vpow2.f32 %v1409_v2  ;;  %v1407_v16 = vsub.f32 %v1385_v56, %v1401_v15 }
 0x6ee   : > { %v1413_v17 = vmul.f32 1.442695, %v1407_v16 }
 0x6ef   : > { %v1404_v18 = vpop.xlane.xlu0 %1403 }
 0x6f0   : > { %v1408_v19 = vsub.f32 %v1390_v57, %v1404_v18  ;;  %7603 = vpow2.f32 %v1413_v17 }
 0x6f2   : > { %v1415_v20 = vmul.f32 1.442695, %v1408_v19 }
 0x6f4   : > { %7605 = vpow2.f32 %v1415_v20 }
 0x6f5   : > { %v7600_v3 = vpop.eup %7599 }
 0x6f6   : > { %v7602_v6 = vpop.eup %7601  ;;  %v1420_v13 = vsel %vm557_vm1, %v7600_v3, 0.0 }
 0x6f7   : > { %1421 = vadd.xlane.f32.xlu1 %v1420_v13  ;;  %v1417_v14 = vsel %vm557_vm1, %v7602_v6, 0.0 }
 0x6f8   : > { %1418 = vadd.xlane.f32.xlu0 %v1417_v14 }
 0x6fa   : > { %v7604_v21 = vpop.eup %7603 }
 0x6fb   : > { %v1423_v22 = vsel %vm557_vm1, %v7604_v21, 0.0 }
 0x6fe   : > { %v7606_v23 = vpop.eup %7605 }
 0x708   : > { %7385 = vrot.lane.b32.xlu1 %v8087_v38, %s7784_s29 }
 0x70c   : > { %7390 = vrot.lane.b32.xlu1 %v7958_v37, %s7785_s30  ;;  %v1426_v37 = vsel %vm557_vm1, %v7606_v23, 0.0 }
 0x70e   : > { %7380 = vrot.lane.b32.xlu0 %v8095_v40, %s7784_s29 }
 0x710   : > { %7395 = vrot.lane.b32.xlu1 %v7956_v34, %s7785_s30 }
 0x72d   : > { %1424 = vadd.xlane.f32.xlu0 %v1423_v22 }
 0x734   : > { %1427 = vadd.xlane.f32.xlu1 %v1426_v37 }
 0x743   : > { %1546 = vrot.lane.b32.xlu0 %v7962_v39, %s7785_s30 }
 0x745   : > { %1548 = vrot.lane.b32.xlu1 %v7972_v42, %s7785_s30 }
 0x747   : > { %1550 = vrot.lane.b32.xlu0 %v7974_v43, %s7785_s30 }
 0x749   : > { %1552 = vrot.lane.b32.xlu1 %v7980_v44, %s7785_s30 }
 0x784   : > { %v1422_v34 = vpop.xlane.xlu1 %1421 }
 0x785   : > { %v1419_v24 = vpop.xlane.xlu0 %1418 }
 0x786   : > { %7607 = vrcp.f32 %v1419_v24 }
 0x787   : > { %7609 = vrcp.f32 %v1422_v34 }
 0x788   : > { %v7386_v25 = vpop.permute.xlu1 %7385 }
 0x789   : > { %v7381_v26 = vpop.permute.xlu0 %7380  ;;  %v7388_v27 = vunpack.i.h.bf16 %v7386_v25  ;;  %v7387_v28 = vunpack.i.l.bf16 %v7386_v25 }
 0x78a   : > { %v7383_v29 = vunpack.i.h.bf16 %v7381_v26  ;;  %v7382_v30 = vunpack.i.l.bf16 %v7381_v26 }
 0x78b   : > { %v7206_v46 = vpack.c.bf16 %v7388_v27, %v7387_v28 }
 0x78c   : > { %v7391_v39 = vpop.permute.xlu1 %7390  ;;  %v7202_v32 = vpack.c.bf16 %v7383_v29, %v7382_v30 }
 0x78d   : > { %v7393_v45 = vunpack.i.h.bf16 %v7391_v39  ;;  %v7392_v42 = vunpack.i.l.bf16 %v7391_v39 }
 0x78e   : > { %7203 = vmatprep.subr.bf16.mxu0 %v7202_v32 }
 0x78f   : > { %7205 = vmatpush3.bf16.msra.mxu0 %v7202_v32  ;;  %v7210_v52 = vpack.c.bf16 %v7393_v45, %v7392_v42 }
 0x790   : > { %v7608_v43 = vpop.eup %7607  ;;  %7207 = vmatprep.subr.bf16.mxu0 %v7206_v46  ;;  %v7396_v5 = vpop.permute.xlu1 %7395 }
 0x791   : > { %v7610_v44 = vpop.eup %7609  ;;  %v1433_v50 = vmul.f32 %v7608_v43, %v7602_v6  ;;  %v7398_v9 = vunpack.i.h.bf16 %v7396_v5  ;;  %v7397_v55 = vunpack.i.l.bf16 %v7396_v5 }
 0x792   : > { %v1434_v53 = vmul.f32 %v7610_v44, %v7600_v3 }
 0x793   : > { %7209 = vmatpush3.bf16.msra.mxu0 %v7206_v46  ;;  %6692 = vmatprep.mubr.msk.f32.mxu0 %vm557_vm1, %v1433_v50  ;;  %v7216_v56 = vpack.c.bf16 %v7398_v9, %v7397_v55 }
 0x794   : > { %7212 = vmatprep.subr.msk.bf16.mxu0 %vm7951_vm3, %v7210_v52 }
 0x796   : > { %6693 = vmatmul.mubr.msk.f32.vlgmr.msra.gmra.mrb[16].mxu0 %vm557_vm1, %v1434_v53 }
 0x79c   : > { %7215 = vmatpush3.bf16.xpose.msk.msra.mxu0 %vm7951_vm3, %v7210_v52 }
 0x79d   : > { %7218 = vmatprep.subr.msk.bf16.mxu0 %vm7951_vm3, %v7216_v56 }
 0x7a4   : > { %7221 = vmatpush3.bf16.xpose.msk.msra.mxu0 %vm7951_vm3, %v7216_v56  ;;  %v484_v56 = vld [vmem:[%s9559_s3 + $0x40] sm:$0xff] }
 0x7a5   : > { %7231 = vmatprep.subr.bf16.mxu0 %v7986_v47 }
 0x7ba   : > { %v1425_v57 = vpop.xlane.xlu0 %1424 }
 0x7bb   : > { %7611 = vrcp.f32 %v1425_v57  ;;  %v485_v57 = vld [vmem:[%s9559_s3 + $0x48] sm:$0xff] }
 0x7be   : > { %v1547_v63 = vpop.permute.xlu0 %1546 }
 0x7c1   : > { %v1428_v59 = vpop.xlane.xlu1 %1427 }
 0x7c2   : > { %7613 = vrcp.f32 %v1428_v59  ;;  %v1551_v2 = vpop.permute.xlu0 %1550  ;;  %v486_v59 = vld [vmem:[%s9559_s3 + $0x50] sm:$0xff] }
 0x7c5   : > { %v7612_v60 = vpop.eup %7611  ;;  %v1549_v1 = vpop.permute.xlu1 %1548 }
 0x7c6   : > { %v1435_v61 = vmul.f32 %v7612_v60, %v7604_v21  ;;  %v487_v60 = vld [vmem:[%s9559_s3 + $0x58] sm:$0xff] }
 0x7c8   : > { %6695 = vmatprep.mubr.msk.f32.mxu0 %vm557_vm1, %v1435_v61  ;;  %v488_v61 = vld [vmem:[%s9559_s3 + $0x60] sm:$0xff] }
 0x7c9   : > { %v1553_v3 = vpop.permute.xlu1 %1552 }
 0x7cc   : > { %v7614_v62 = vpop.eup %7613 }
 0x7cd   : > { %v1436_v0 = vmul.f32 %v7614_v62, %v7606_v23  ;;  %v489_v62 = vld [vmem:[%s9559_s3 + $0x68] sm:$0xff] }
 0x7cf   : > { %6696 = vmatmul.mubr.msk.f32.gmra.mrb[18].mxu0 %vm557_vm1, %v1436_v0  ;;  %v491_v0 = vld [vmem:[%s9559_s3 + $0x78] sm:$0xff] }
 0x7d0   : > { %6706 = vmatprep.mubr.msk.f32.mxu0 %vm751_vm2, %v1547_v63  ;;  %v490_v63 = vld [vmem:[%s9559_s3 + $0x70] sm:$0xff] }
 0x7d3   : > { %6707 = vmatmul.mubr.msk.f32.vlgmr.msra.gmra.mrb[20].mxu0 %vm751_vm2, %v1549_v1  ;;  %v492_v1 = vld [vmem:[%s9559_s3 + $0x80] sm:$0xff] }
 0x7d4   : > { %6709 = vmatprep.mubr.msk.f32.mxu0 %vm751_vm2, %v1551_v2  ;;  %7233 = vmatpush3.bf16.msra.mxu0 %v7986_v47  ;;  %v493_v2 = vld [vmem:[%s9559_s3 + $0x88] sm:$0xff] }
 0x7d5   : > { %7235 = vmatprep.subr.bf16.mxu0 %v7990_v48 }
 0x7d7   : > { %6710 = vmatmul.mubr.msk.f32.gmra.mrb[22].mxu0 %vm751_vm2, %v1553_v3  ;;  %v494_v3 = vld [vmem:[%s9559_s3 + $0x90] sm:$0xff] }
 0x7d8   : > { %7237 = vmatpush3.bf16.msra.mxu0 %v7990_v48 }
 0x869   : > { %v6694_v6 = vpop.f32.mrb[16].mxu0 }
 0x86a   : > { %v1527_v13 = vpop.f32.mrb[17].mxu0 }
 0x86b   : > { %v7419_v14 = vpack.i.bf16 %v6694_v6, %v1527_v13  ;;  %v495_v6 = vld [vmem:[%s9559_s3 + $0x98] sm:$0xff]  ;;  %v496_v13 = vld [vmem:[%s9559_s3 + $0xa0] sm:$0xff] }
 0x8a2   : > { %v6697_v15 = vpop.f32.mrb[18].mxu0 }
 0x8a3   : > { %v1537_v16 = vpop.f32.mrb[19].mxu0 }
 0x8a4   : > { %v7424_v17 = vpack.i.bf16 %v6697_v15, %v1537_v16  ;;  %v498_v15 = vld [vmem:[%s9559_s3 + $0xb0] sm:$0xff]  ;;  %v499_v16 = vld [vmem:[%s9559_s3 + $0xb8] sm:$0xff] }
 0x8a6   : > { %v6708_v18 = vpop.f32.mrb[20].mxu0 }
 0x8a7   : > { %v1650_v19 = vadd.f32 %v6708_v18, %v8002_v51  ;;  %v1644_v20 = vpop.f32.mrb[21].mxu0  ;;  %v501_v18 = vld [vmem:[%s9559_s3 + $0xc8] sm:$0xff] }
 0x8a8   : > { %v1645_v21 = vadd.f32 %v1644_v20, %v7997_v49  ;;  %v503_v20 = vld [vmem:[%s9559_s3 + $0xd8] sm:$0xff] }
 0x8a9   : > { %v1666_v22 = vsel %vm557_vm1, %v1650_v19, -inf }
 0x8aa   : > { %1667 = vmax.xlane.f32.xlu1 %v1666_v22  ;;  %v6711_v23 = vpop.f32.mrb[22].mxu0  ;;  %v1663_v37 = vsel %vm557_vm1, %v1645_v21, -inf  ;;  %v505_v22 = vld [vmem:[%s9559_s3 + $0xe8] sm:$0xff] }
 0x8ab   : > { %v1654_v34 = vpop.f32.mrb[23].mxu0  ;;  %1664 = vmax.xlane.f32.xlu0 %v1663_v37  ;;  %v1660_v25 = vadd.f32 %v6711_v23, %v8015_v58  ;;  %v506_v23 = vld [vmem:[%s9559_s3 + $0xf0] sm:$0xff]  ;;  %v507_v37 = vld [vmem:[%s9559_s3 + $0xf8] sm:$0xff] }
 0x8ac   : > { %v1655_v24 = vadd.f32 %v1654_v34, %v8008_v54  ;;  %v508_v34 = vld [vmem:[%s9559_s3 + $0x100] sm:$0xff] }
 0x8ad   : > { %v1672_v51 = vsel %vm557_vm1, %v1660_v25, -inf }
 0x8ae   : > { %v1669_v26 = vsel %vm557_vm1, %v1655_v24, -inf }
 0x8af   : > { %1670 = vmax.xlane.f32.xlu0 %v1669_v26  ;;  %v511_v26 = vld [vmem:[%s9559_s3 + $0x118] sm:$0xff] }
 0x8b3   : > { %1673 = vmax.xlane.f32.xlu0 %v1672_v51 }
 0x937   : > { %v1668_v27 = vpop.xlane.xlu1 %1667 }
 0x938   : > { %v1676_v49 = vsub.f32 %v1650_v19, %v1668_v27  ;;  %v1665_v28 = vpop.xlane.xlu0 %1664  ;;  %v502_v19 = vld [vmem:[%s9559_s3 + $0xd0] sm:$0xff] }
 0x939   : > { %v1675_v29 = vsub.f32 %v1645_v21, %v1665_v28  ;;  %v504_v21 = vld [vmem:[%s9559_s3 + $0xe0] sm:$0xff] }
 0x93a   : > { %v1681_v30 = vmul.f32 1.442695, %v1676_v49 }
 0x93b   : > { %v1679_v39 = vmul.f32 1.442695, %v1675_v29 }
 0x93c   : > { %7615 = vpow2.f32 %v1681_v30  ;;  %v1671_v32 = vpop.xlane.xlu0 %1670 }
 0x93d   : > { %7617 = vpow2.f32 %v1679_v39  ;;  %v1677_v45 = vsub.f32 %v1655_v24, %v1671_v32  ;;  %v509_v24 = vld [vmem:[%s9559_s3 + $0x108] sm:$0xff] }
 0x93f   : > { %v1683_v42 = vmul.f32 1.442695, %v1677_v45 }
 0x940   : > { %v1674_v54 = vpop.xlane.xlu0 %1673 }
 0x941   : > { %7619 = vpow2.f32 %v1683_v42  ;;  %v1678_v58 = vsub.f32 %v1660_v25, %v1674_v54  ;;  %v510_v25 = vld [vmem:[%s9559_s3 + $0x110] sm:$0xff] }
 0x943   : > { %v1685_v46 = vmul.f32 1.442695, %v1678_v58 }
 0x945   : > { %7621 = vpow2.f32 %v1685_v46 }
 0x946   : > { %v8195_v43 = vpop.eup %7615 }
 0x947   : > { %v8197_v44 = vpop.eup %7617  ;;  %v1690_v50 = vsel %vm557_vm1, %v8195_v43, 0.0 }
 0x948   : > { %1691 = vadd.xlane.f32.xlu1 %v1690_v50  ;;  %v1687_v52 = vsel %vm557_vm1, %v8197_v44, 0.0 }
 0x949   : > { %1688 = vadd.xlane.f32.xlu0 %v1687_v52 }
 0x94b   : > { %v8203_v53 = vpop.eup %7619 }
 0x94c   : > { %v1693_v5 = vsel %vm557_vm1, %v8203_v53, 0.0 }
 0x94d   : > { %1694 = vadd.xlane.f32.xlu0 %v1693_v5 }
 0x94f   : > { %v8207_v9 = vpop.eup %7621 }
 0x950   : > { %v1696_v55 = vsel %vm557_vm1, %v8207_v9, 0.0 }
 0x951   : > { %1697 = vadd.xlane.f32.xlu1 %v1696_v55 }
 0x962   : > { %7405 = vrot.lane.b32.xlu1 %v8087_v38, %s7785_s30  ;;  %v476_v38 = vld [vmem:[%s9559_s3] sm:$0xff] }
 0x963   : > { %7400 = vrot.lane.b32.xlu0 %v8095_v40, %s7785_s30  ;;  %v477_v40 = vld [vmem:[%s9559_s3 + $0x8] sm:$0xff]  ;;  %6742 = vmatprep.mubr.msk.f32.mxu0 %vm557_vm1, %v476_v38 }
 0x964   : > { %6743 = vmatmul.mubr.msk.f32.vlgmr.msra.gmra.mrb[24].mxu0 %vm557_vm1, %v477_v40  ;;  %v7535_v40 = vld [vmem:[%s7868_s24 + $0x90] sm:$0xff]  }
 0x965   : > { %6745 = vmatprep.mubr.msk.f32.mxu0 %vm557_vm1, %v478_v33  ;;  %6836 = vmatprep.subr.bf16.mxu0 %v7535_v40  ;;  %v7536_v33 = vld [vmem:[%s7868_s24 + $0x30] sm:$0xff]  }
 0x966   : > { %7410 = vrot.lane.b32.xlu1 %v7409_v36, %s7786_s17  ;;  %v480_v36 = vld [vmem:[%s9559_s3 + $0x20] sm:$0xff]  ;;  %6837 = vmatpush3.bf16.msra.mxu0 %v7535_v40 }
 0x967   : > { %7420 = vrot.lane.b32.xlu0 %v7419_v14, %s7787_s13  ;;  %v497_v14 = vld [vmem:[%s9559_s3 + $0xa8] sm:$0xff] }
 0x968   : > { %6746 = vmatmul.mubr.msk.f32.gmra.mrb[26].mxu0 %vm557_vm1, %v479_v35 }
 0x969   : > { %6748 = vmatprep.mubr.msk.f32.mxu0 %vm557_vm1, %v480_v36 }
 0x96a   : > { %7415 = vrot.lane.b32.xlu1 %v7414_v7, %s7786_s17  ;;  %v483_v7 = vld [vmem:[%s9559_s3 + $0x38] sm:$0xff] }
 0x96c   : > { %6749 = vmatmul.mubr.msk.f32.gmra.mrb[28].mxu0 %vm557_vm1, %v481_v41 }
 0x96d   : > { %6751 = vmatprep.mubr.msk.f32.mxu0 %vm557_vm1, %v482_v4 }
 0x96e   : > { %7425 = vrot.lane.b32.xlu1 %v7424_v17, %s7787_s13  ;;  %v500_v17 = vld [vmem:[%s9559_s3 + $0xc0] sm:$0xff] }
 0x970   : > { %6752 = vmatmul.mubr.msk.f32.gmra.mrb[30].mxu0 %vm557_vm1, %v483_v7 }
 0x971   : > { %6754 = vmatprep.mubr.msk.f32.mxu0 %vm557_vm1, %v484_v56 }
 0x974   : > { %6755 = vmatmul.mubr.msk.f32.gmra.mrb[32].mxu0 %vm557_vm1, %v485_v57 }
 0x975   : > { %6757 = vmatprep.mubr.msk.f32.mxu0 %vm557_vm1, %v486_v59 }
 0x978   : > { %6758 = vmatmul.mubr.msk.f32.gmra.mrb[34].mxu0 %vm557_vm1, %v487_v60 }
 0x979   : > { %6760 = vmatprep.mubr.msk.f32.mxu0 %vm557_vm1, %v488_v61 }
 0x97c   : > { %6761 = vmatmul.mubr.msk.f32.gmra.mrb[36].mxu0 %vm557_vm1, %v489_v62 }
 0x97d   : > { %6763 = vmatprep.mubr.msk.f32.mxu0 %vm557_vm1, %v490_v63 }
 0x980   : > { %6764 = vmatmul.mubr.msk.f32.gmra.mrb[38].mxu0 %vm557_vm1, %v491_v0 }
 0x981   : > { %6766 = vmatprep.mubr.msk.f32.mxu0 %vm557_vm1, %v492_v1 }
 0x984   : > { %6767 = vmatmul.mubr.msk.f32.gmra.mrb[40].mxu0 %vm557_vm1, %v493_v2 }
 0x985   : > { %6769 = vmatprep.mubr.msk.f32.mxu0 %vm557_vm1, %v494_v3 }
 0x988   : > { %6770 = vmatmul.mubr.msk.f32.gmra.mrb[42].mxu0 %vm557_vm1, %v495_v6 }
 0x989   : > { %6772 = vmatprep.mubr.msk.f32.mxu0 %vm557_vm1, %v496_v13 }
 0x98c   : > { %6773 = vmatmul.mubr.msk.f32.gmra.mrb[44].mxu0 %vm557_vm1, %v497_v14 }
 0x98d   : > { %6775 = vmatprep.mubr.msk.f32.mxu0 %vm557_vm1, %v498_v15 }
 0x990   : > { %6776 = vmatmul.mubr.msk.f32.gmra.mrb[46].mxu0 %vm557_vm1, %v499_v16 }
 0x991   : > { %6778 = vmatprep.mubr.msk.f32.mxu0 %vm557_vm1, %v500_v17 }
 0x994   : > { %6779 = vmatmul.mubr.msk.f32.gmra.mrb[48].mxu0 %vm557_vm1, %v501_v18 }
 0x995   : > { %6781 = vmatprep.mubr.msk.f32.mxu0 %vm557_vm1, %v502_v19 }
 0x998   : > { %6782 = vmatmul.mubr.msk.f32.gmra.mrb[50].mxu0 %vm557_vm1, %v503_v20 }
 0x999   : > { %6784 = vmatprep.mubr.msk.f32.mxu0 %vm557_vm1, %v504_v21 }
 0x99c   : > { %6785 = vmatmul.mubr.msk.f32.gmra.mrb[52].mxu0 %vm557_vm1, %v505_v22 }
 0x99d   : > { %6787 = vmatprep.mubr.msk.f32.mxu0 %vm557_vm1, %v506_v23 }
 0x9a0   : > { %6788 = vmatmul.mubr.msk.f32.gmra.mrb[54].mxu0 %vm557_vm1, %v507_v37 }
 0x9a1   : > { %6790 = vmatprep.mubr.msk.f32.mxu0 %vm557_vm1, %v508_v34 }
 0x9a4   : > { %6791 = vmatmul.mubr.msk.f32.gmra.mrb[56].mxu0 %vm557_vm1, %v509_v24 }
 0x9a5   : > { %6793 = vmatprep.mubr.msk.f32.mxu0 %vm557_vm1, %v510_v25 }
 0x9a8   : > { %6794 = vmatmul.mubr.msk.f32.gmra.mrb[58].mxu0 %vm557_vm1, %v511_v26 }
 0x9a9   : > { %6840 = vmatprep.mubr.msk.bf16.mxu0 %vm557_vm1, %v7986_v47 }
 0x9d5   : > { %v1692_v27 = vpop.xlane.xlu1 %1691 }
 0x9d6   : > { %v1689_v51 = vpop.xlane.xlu0 %1688 }
 0x9d7   : > { %7623 = vrcp.f32 %v1689_v51 }
 0x9d8   : > { %7625 = vrcp.f32 %v1692_v27 }
 0x9da   : > { %v1695_v49 = vpop.xlane.xlu0 %1694 }
 0x9db   : > { %7627 = vrcp.f32 %v1695_v49 }
 0x9de   : > { %v1698_v28 = vpop.xlane.xlu1 %1697  ;;  %v7401_v29 = vpop.permute.xlu0 %7400 }
 0x9df   : > { %v7403_v30 = vunpack.i.h.bf16 %v7401_v29  ;;  %v7402_v39 = vunpack.i.l.bf16 %v7401_v29  ;;  %7629 = vrcp.f32 %v1698_v28 }
 0x9e1   : > { %v7624_v32 = vpop.eup %7623  ;;  %v7222_v45 = vpack.c.bf16 %v7403_v30, %v7402_v39 }
 0x9e2   : > { %v7406_v42 = vpop.permute.xlu1 %7405  ;;  %v1703_v54 = vmul.f32 %v7624_v32, %v8197_v44  ;;  %v7626_v50 = vpop.eup %7625 }
 0x9e3   : > { %v7408_v58 = vunpack.i.h.bf16 %v7406_v42  ;;  %v7407_v46 = vunpack.i.l.bf16 %v7406_v42  ;;  %7223 = vmatprep.subr.bf16.mxu1 %v7222_v45  ;;  %v1704_v5 = vmul.f32 %v7626_v50, %v8195_v43  ;;  %v7537_v43 = vld [vmem:[%s7868_s24 + $0x38] sm:$0xff]  }
 0x9e4   : > { %7225 = vmatpush3.bf16.msra.mxu1 %v7222_v45  ;;  %6720 = vmatprep.mubr.msk.f32.mxu1 %vm557_vm1, %v1703_v54 }
 0x9e5   : > { %v7226_v47 = vpack.c.bf16 %v7408_v58, %v7407_v46  ;;  %v7628_v52 = vpop.eup %7627 }
 0x9e6   : > { %v1705_v44 = vmul.f32 %v7628_v52, %v8203_v53  ;;  %v8385_v53 = vld [vmem:[%s7868_s24 + $0x80] sm:$0xff]  }
 0x9e7   : > { %7227 = vmatprep.subr.bf16.mxu1 %v7226_v47 }
 0x9e8   : > { %7229 = vmatpush3.bf16.msra.mxu1 %v7226_v47 }
 0x9e9   : > { %v7630_v55 = vpop.eup %7629  ;;  %6726 = vmatprep.subr.bf16.mxu1 %v7536_v33 }
 0x9ea   : > { %v1706_v38 = vmul.f32 %v7630_v55, %v8207_v9  ;;  %v7539_v9 = vld [vmem:[%s7868_s24 + $0x98] sm:$0xff]  }
 0x9eb   : > { %6721 = vmatmul.mubr.msk.f32.vlgmr.msra.gmra.mrb[16].mxu1 %vm557_vm1, %v1704_v5  ;;  %6838 = vmatprep.subr.bf16.mxu0 %v7539_v9  ;;  %v7421_v5 = vpop.permute.xlu0 %7420 }
 0x9ec   : > { %6723 = vmatprep.mubr.msk.f32.mxu1 %vm557_vm1, %v1705_v44  ;;  %6727 = vmatpush3.bf16.msra.mxu1 %v7536_v33  ;;  %v7422_v32 = vunpack.i.l.bf16 %v7421_v5 }
 0x9ed   : > { %6728 = vmatprep.subr.bf16.mxu1 %v7537_v43  ;;  %6839 = vmatpush3.bf16.msra.mxu0 %v7539_v9 }
 0x9ef   : > { %6724 = vmatmul.mubr.msk.f32.gmra.mrb[18].mxu1 %vm557_vm1, %v1706_v38 }
 0x9f0   : > { %6729 = vmatpush3.bf16.msra.mxu1 %v7537_v43  ;;  %6841 = vmatmul.mubr.msk.bf16.vlgmr.msra.gmra.mrb[60].mxu0 %vm557_vm1, %v7990_v48 }
 0x9f1   : > { %6796 = vmatprep.subr.bf16.mxu1 %v8385_v53 }
 0xa37   : > { %v8382_v35 = vpop.f32.mrb[24].mxu0 }
 0xa38   : > { %v8387_v41 = vpop.f32.mrb[25].mxu0 }
 0xa39   : > { %v2315_v7 = vpack.c.bf16 %v8382_v35, %v8387_v41 }
 0xa3b   : > { %v8393_v56 = vpop.f32.mrb[26].mxu0 }
 0xa3c   : > { %v8395_v59 = vpop.f32.mrb[27].mxu0 }
 0xa3d   : > { %v2316_v60 = vpack.c.bf16 %v8393_v56, %v8395_v59 }
 0xa3f   : > { %v8400_v63 = vpop.f32.mrb[28].mxu0 }
 0xa40   : > { %v8404_v1 = vpop.f32.mrb[29].mxu0 }
 0xa41   : > { %v2317_v2 = vpack.c.bf16 %v8400_v63, %v8404_v1 }
 0xa43   : > { %v8409_v3 = vpop.f32.mrb[30].mxu0 }
 0xa44   : > { %v8411_v6 = vpop.f32.mrb[31].mxu0 }
 0xa45   : > { %v2318_v13 = vpack.c.bf16 %v8409_v3, %v8411_v6  ;;  %v7541_v6 = vld [vmem:[%s7868_s24 + $0xd0] sm:$0xff]  }
 0xa47   : > { %v8415_v14 = vpop.f32.mrb[32].mxu0 }
 0xa48   : > { %v8417_v15 = vpop.f32.mrb[33].mxu0 }
 0xa49   : > { %v2319_v48 = vpack.c.bf16 %v8415_v14, %v8417_v15  ;;  %v8576_v14 = vld [vmem:[%s7868_s24 + $0xc0] sm:$0xff]  }
 0xa4b   : > { %v8421_v16 = vpop.f32.mrb[34].mxu0 }
 0xa4c   : > { %v8423_v17 = vpop.f32.mrb[35].mxu0 }
 0xa4d   : > { %v2320_v18 = vpack.c.bf16 %v8421_v16, %v8423_v17 }
 0xa4f   : > { %v8427_v19 = vpop.f32.mrb[36].mxu0 }
 0xa50   : > { %v8429_v20 = vpop.f32.mrb[37].mxu0 }
 0xa53   : > { %v8433_v22 = vpop.f32.mrb[38].mxu0 }
 0xa54   : > { %v8435_v23 = vpop.f32.mrb[39].mxu0 }
 0xa57   : > { %v8439_v34 = vpop.f32.mrb[40].mxu0 }
 0xa58   : > { %v8441_v24 = vpop.f32.mrb[41].mxu0 }
 0xa59   : > { %v9584_v35 = vpack.c.bf16 %v8439_v34, %v8441_v24 }
 0xa5b   : > { %v8445_v26 = vpop.f32.mrb[42].mxu0 }
 0xa5c   : > { %v8447_v51 = vpop.f32.mrb[43].mxu0 }
 0xa5f   : > { %v8451_v49 = vpop.f32.mrb[44].mxu0 }
 0xa60   : > { %v8453_v28 = vpop.f32.mrb[45].mxu0 }
 0xa61   : > { %v9586_v41 = vpack.c.bf16 %v8451_v49, %v8453_v28 }
 0xa63   : > { %v8457_v30 = vpop.f32.mrb[46].mxu0 }
 0xa64   : > { %v8459_v39 = vpop.f32.mrb[47].mxu0 }
 0xa67   : > { %v8463_v45 = vpop.f32.mrb[48].mxu0 }
 0xa68   : > { %v8465_v42 = vpop.f32.mrb[49].mxu0 }
 0xa69   : > { %v9588_v56 = vpack.c.bf16 %v8463_v45, %v8465_v42 }
 0xa6b   : > { %v8469_v58 = vpop.f32.mrb[50].mxu0 }
 0xa6c   : > { %v8471_v46 = vpop.f32.mrb[51].mxu0 }
 0xa6d   : > { %v9589_v59 = vpack.c.bf16 %v8469_v58, %v8471_v46 }
 0xa6f   : > { %v8475_v50 = vpop.f32.mrb[52].mxu0 }
 0xa70   : > { %v8477_v52 = vpop.f32.mrb[53].mxu0 }
 0xa73   : > { %v8481_v55 = vpop.f32.mrb[54].mxu0 }
 0xa74   : > { %v8483_v44 = vpop.f32.mrb[55].mxu0 }
 0xa75   : > { %v2330_v38 = vpack.c.bf16 %v8481_v55, %v8483_v44  ;;  %v7423_v44 = vunpack.i.h.bf16 %v7421_v5 }
 0xa77   : > { %v8487_v40 = vpop.f32.mrb[56].mxu0 }
 0xa78   : > { %v2285_v33 = vpop.f32.mrb[57].mxu0 }
 0xa79   : > { %v2331_v43 = vpack.c.bf16 %v8487_v40, %v2285_v33 }
 0xabe   : > { %v6722_v36 = vpop.f32.mrb[16].mxu1 }
 0xabf   : > { %v1797_v4 = vpop.f32.mrb[17].mxu1 }
 0xac0   : > { %v7429_v57 = vpack.i.bf16 %v6722_v36, %v1797_v4  ;;  %v6795_v36 = vpop.f32.mrb[58].mxu0 }
 0xac1   : > { %v2295_v9 = vpop.f32.mrb[59].mxu0 }
 0xac2   : > { %7430 = vrot.lane.b32.xlu0 %v7429_v57, %s9569_s14  ;;  %v6725_v61 = vpop.f32.mrb[18].mxu1  ;;  %v2332_v4 = vpack.c.bf16 %v6795_v36, %v2295_v9  ;;  %v7411_v57 = vpop.permute.xlu1 %7410 }
 0xac3   : > { %v1807_v62 = vpop.f32.mrb[19].mxu1  ;;  %v6842_v63 = vpop.f32.mrb[60].mxu0 }
 0xac4   : > { %v7434_v0 = vpack.i.bf16 %v6725_v61, %v1807_v62  ;;  %v7413_v62 = vunpack.i.h.bf16 %v7411_v57  ;;  %v2626_v1 = vpop.f32.mrb[61].mxu0 }
 0xac6   : > { %7435 = vrot.lane.b32.xlu1 %v7434_v0, %s9569_s14  ;;  %v7416_v61 = vpop.permute.xlu1 %7415  ;;  %v7412_v0 = vunpack.i.l.bf16 %v7411_v57  ;;  %v1865_v47 = vsel %vm751_vm2, %v8067_v8, %v7413_v62 }
 0xac7   : > { %v7418_v33 = vunpack.i.h.bf16 %v7416_v61  ;;  %v7417_v29 = vunpack.i.l.bf16 %v7416_v61  ;;  %v1870_v8 = vsel %vm1868_vm4, %v1865_v47, %v7423_v44 }
 0xac8   : > { %v1864_v54 = vsel %vm751_vm2, %v8069_v10, %v7412_v0 }
 0xac9   : > { %v1869_v57 = vsel %vm1868_vm4, %v1864_v54, %v7422_v32  ;;  %v1867_v5 = vsel %vm751_vm2, %v8071_v11, %v7418_v33  ;;  %v1866_v61 = vsel %vm751_vm2, %v8073_v12, %v7417_v29  ;;  %v9582_v11 = vpack.c.bf16 %v8427_v19, %v8429_v20 }
 0xaca   : > { %v7426_v55 = vpop.permute.xlu1 %7425  ;;  %v9583_v12 = vpack.c.bf16 %v8433_v22, %v8435_v23 }
 0xacb   : > { %v7428_v27 = vunpack.i.h.bf16 %v7426_v55  ;;  %v7427_v25 = vunpack.i.l.bf16 %v7426_v55 }
 0xacd   : > { %v1871_v55 = vsel %vm1868_vm4, %v1866_v61, %v7427_v25  ;;  %v1872_v32 = vsel %vm1868_vm4, %v1867_v5, %v7428_v27 }
 0xb34   : > { %v7431_v40 = vpop.permute.xlu0 %7430 }
 0xb35   : > { %v7433_v36 = vunpack.i.h.bf16 %v7431_v40  ;;  %v7432_v9 = vunpack.i.l.bf16 %v7431_v40 }
 0xb37   : > { %v1875_v62 = vsel %vm1873_vm5, %v1870_v8, %v7433_v36  ;;  %v1874_v10 = vsel %vm1873_vm5, %v1869_v57, %v7432_v9  ;;  %v7540_v36 = vld [vmem:[%s7868_s24 + $0x88] sm:$0xff]  }
 0xb38   : > { %v1878_v0 = vpack.c.bf16 %v1875_v62, %v1874_v10  ;;  %v7436_v37 = vpop.permute.xlu1 %7435 }
 0xb39   : > { %v7438_v40 = vunpack.i.h.bf16 %v7436_v37  ;;  %v7437_v21 = vunpack.i.l.bf16 %v7436_v37 }
 0xb3a   : > { %6730 = vmatprep.mubr.msk.bf16.mxu1 %vm557_vm1, %v1878_v0 }
 0xb3b   : > { %v1877_v54 = vsel %vm1873_vm5, %v1872_v32, %v7438_v40  ;;  %v1876_v47 = vsel %vm1873_vm5, %v1871_v55, %v7437_v21 }
 0xb3c   : > { %v1879_v44 = vpack.c.bf16 %v1877_v54, %v1876_v47 }
 0xb3e   : > { %6731 = vmatmul.mubr.msk.bf16.vlgmr.msra.gmra.mrb[20].mxu1 %vm557_vm1, %v1879_v44 }
 0xb3f   : > { %6797 = vmatpush3.bf16.msra.mxu1 %v8385_v53  ;;  %6800 = vmatprep.mubr.msk.bf16.mxu1 %vm557_vm1, %v2315_v7  ;;  %v9585_v53 = vpack.c.bf16 %v8445_v26, %v8447_v51  ;;  %v9587_v7 = vpack.c.bf16 %v8457_v30, %v8459_v39 }
 0xb40   : > { %6798 = vmatprep.subr.bf16.mxu1 %v7540_v36 }
 0xb43   : > { %6799 = vmatpush3.bf16.msra.mxu1 %v7540_v36 }
 0xb44   : > { %6844 = vmatprep.subr.bf16.mxu1 %v7541_v6 }
 0xb46   : > { %6801 = vmatmul.mubr.msk.bf16.vlgmr.msra.gmra.mrb[24].mxu1 %vm557_vm1, %v2316_v60  ;;  %v9590_v60 = vpack.c.bf16 %v8475_v50, %v8477_v52 }
 0xb47   : > { %6804 = vmatprep.mubr.msk.bf16.mxu1 %vm557_vm1, %v2317_v2  ;;  %v6843_v2 = vpop.f32.mrb[62].mxu0  ;;  %6845 = vmatpush3.bf16.msra.mxu1 %v7541_v6 }
 0xb48   : > { %v2629_v3 = vpop.f32.mrb[63].mxu0 }
 0xb4e   : > { %6805 = vmatmul.mubr.msk.bf16.gmra.mrb[28].mxu1 %vm557_vm1, %v2318_v13  ;;  %v7542_v13 = vld [vmem:[%s7868_s24 + $0xd8] sm:$0xff]  }
 0xb4f   : > { %6808 = vmatprep.mubr.msk.bf16.mxu1 %vm557_vm1, %v2319_v48  ;;  %6846 = vmatprep.subr.bf16.mxu1 %v7542_v13  ;;  %v5989_v48 = vld [vmem:[%s7889_s20 + $0x3] ss:$0 sm:$0xff] }
 0xb50   : > { %6847 = vmatpush3.bf16.msra.mxu1 %v7542_v13 }
 0xb51   : > { %6852 = vmatprep.subr.bf16.mxu1 %v8576_v14 }
 0xb56   : > { %6809 = vmatmul.mubr.msk.bf16.gmra.mrb[32].mxu1 %vm557_vm1, %v2320_v18  ;;  %v6058_v18 = vld [vmem:[%s7889_s20 + $0x4] ss:$0 sm:$0xff] }
 0xb57   : > { %6812 = vmatprep.mubr.msk.bf16.mxu1 %vm557_vm1, %v9582_v11  ;;  %v8591_v34 = vadd.f32 %v6842_v63, %v6058_v18  ;;  %v8595_v25 = vadd.f32 %v6058_v18, %v2626_v1  ;;  %v8597_v26 = vadd.f32 %v6843_v2, %v6058_v18  ;;  %v8599_v27 = vadd.f32 %v6058_v18, %v2629_v3 }
 0xb5e   : > { %6813 = vmatmul.mubr.msk.bf16.gmra.mrb[36].mxu1 %vm557_vm1, %v9583_v12 }
 0xb5f   : > { %6816 = vmatprep.mubr.msk.bf16.mxu1 %vm557_vm1, %v9584_v35 }
 0xb66   : > { %6817 = vmatmul.mubr.msk.bf16.gmra.mrb[40].mxu1 %vm557_vm1, %v9585_v53 }
 0xb67   : > { %6820 = vmatprep.mubr.msk.bf16.mxu1 %vm557_vm1, %v9586_v41 }
 0xb6e   : > { %6821 = vmatmul.mubr.msk.bf16.gmra.mrb[44].mxu1 %vm557_vm1, %v9587_v7 }
 0xb6f   : > { %6824 = vmatprep.mubr.msk.bf16.mxu1 %vm557_vm1, %v9588_v56 }
 0xb76   : > { %6825 = vmatmul.mubr.msk.bf16.gmra.mrb[48].mxu1 %vm557_vm1, %v9589_v59 }
 0xb77   : > { %6828 = vmatprep.mubr.msk.bf16.mxu1 %vm557_vm1, %v9590_v60 }
 0xb7e   : > { %6829 = vmatmul.mubr.msk.bf16.gmra.mrb[52].mxu1 %vm557_vm1, %v2330_v38 }
 0xb7f   : > { %6832 = vmatprep.mubr.msk.bf16.mxu1 %vm557_vm1, %v2331_v43 }
 0xb86   : > { %6833 = vmatmul.mubr.msk.bf16.gmra.mrb[56].mxu1 %vm557_vm1, %v2332_v4 }
 0xc11   : > { %v6732_v15 = vpop.f32.mrb[20].mxu1 }
 0xc12   : > { %v1936_v16 = vpop.f32.mrb[21].mxu1  ;;  %v8581_v19 = vadd.f32 %v6732_v15, %v5989_v48 }
 0xc13   : > { %v6733_v17 = vpop.f32.mrb[22].mxu1  ;;  %v8585_v22 = vadd.f32 %v5989_v48, %v1936_v16 }
 0xc14   : > { %v8583_v20 = vadd.f32 %v6733_v17, %v5989_v48  ;;  %v1939_v21 = vpop.f32.mrb[23].mxu1 }
 0xc15   : > { %v8587_v23 = vadd.f32 %v5989_v48, %v1939_v21 }
 0xc16   : > { %v2823_v37 = vpack.c.bf16 %v8583_v20, %v8581_v19  ;;  %v7720_v19 = vld [vmem:[%s9567_s11 + $0x8] sm:$0xff] }
 0xc17   : > { %v2822_v24 = vpack.c.bf16 %v8587_v23, %v8585_v22  ;;  %v7719_v22 = vld [vmem:[%s9567_s11] sm:$0xff] }
 0xc19   : > { %v6802_v51 = vpop.f32.mrb[24].mxu1 }
 0xc1a   : > { %v2643_v49 = vadd.f32 %v6802_v51, %v8591_v34  ;;  %v2433_v28 = vpop.f32.mrb[25].mxu1 }
 0xc1b   : > { %v2641_v29 = vadd.f32 %v8595_v25, %v2433_v28  ;;  %v6803_v30 = vpop.f32.mrb[26].mxu1 }
 0xc1c   : > { %v2644_v39 = vadd.f32 %v6803_v30, %v8597_v26  ;;  %v2436_v45 = vpop.f32.mrb[27].mxu1  ;;  %v2651_v58 = vmul.f32 0.2, %v2643_v49  ;;  %vm2647_vm6 = vcmp.ge.f32.partialorder %v2643_v49, 0.0 }
 0xc1d   : > { %v2642_v42 = vadd.f32 %v8599_v27, %v2436_v45  ;;  %v2649_v46 = vmul.f32 0.2, %v2641_v29  ;;  %vm2645_vm7 = vcmp.ge.f32.partialorder %v2641_v29, 0.0 }
 0xc1e   : > { %v2655_v43 = vsel %vm2647_vm6, %v2643_v49, %v2651_v58  ;;  %vm2648_vm8 = vcmp.ge.f32.partialorder %v2644_v39, 0.0  ;;  %v2652_v4 = vmul.f32 0.2, %v2644_v39 }
 0xc1f   : > { %v2653_v57 = vsel %vm2645_vm7, %v2641_v29, %v2649_v46  ;;  %v2650_v0 = vmul.f32 0.2, %v2642_v42  ;;  %vm2646_vm11 = vcmp.ge.f32.partialorder %v2642_v42, 0.0 }
 0xc20   : > { %v2656_v44 = vsel %vm2648_vm8, %v2644_v39, %v2652_v4 }
 0xc21   : > { %v6806_v50 = vpop.f32.mrb[28].mxu1  ;;  %v2654_v12 = vsel %vm2646_vm11, %v2642_v42, %v2650_v0 }
 0xc22   : > { %v2659_v52 = vadd.f32 %v6806_v50, %v8591_v34  ;;  %v2449_v38 = vpop.f32.mrb[29].mxu1 }
 0xc23   : > { %v2657_v33 = vadd.f32 %v8595_v25, %v2449_v38  ;;  %v6807_v9 = vpop.f32.mrb[30].mxu1 }
 0xc24   : > { %vm2663_vm9 = vcmp.ge.f32.partialorder %v2659_v52, 0.0  ;;  %v2667_v8 = vmul.f32 0.2, %v2659_v52  ;;  %v2660_v62 = vadd.f32 %v6807_v9, %v8597_v26  ;;  %v2452_v10 = vpop.f32.mrb[31].mxu1 }
 0xc25   : > { %vm2661_vm10 = vcmp.ge.f32.partialorder %v2657_v33, 0.0  ;;  %v2665_v5 = vmul.f32 0.2, %v2657_v33  ;;  %v2658_v61 = vadd.f32 %v8599_v27, %v2452_v10 }
 0xc26   : > { %v2671_v40 = vsel %vm2663_vm9, %v2659_v52, %v2667_v8  ;;  %vm2664_vm12 = vcmp.ge.f32.partialorder %v2660_v62, 0.0  ;;  %v2668_v55 = vmul.f32 0.2, %v2660_v62 }
 0xc27   : > { %v2675_v32 = vmax.f32 %v2655_v43, %v2671_v40  ;;  %v2669_v54 = vsel %vm2661_vm10, %v2657_v33, %v2665_v5  ;;  %vm2662_vm13 = vcmp.ge.f32.partialorder %v2658_v61, 0.0  ;;  %v2666_v47 = vmul.f32 0.2, %v2658_v61 }
 0xc28   : > { %v2673_v36 = vmax.f32 %v2653_v57, %v2669_v54  ;;  %v2672_v11 = vsel %vm2664_vm12, %v2660_v62, %v2668_v55 }
 0xc29   : > { %v2676_v35 = vmax.f32 %v2656_v44, %v2672_v11  ;;  %v2670_v53 = vsel %vm2662_vm13, %v2658_v61, %v2666_v47  ;;  %v6810_v41 = vpop.f32.mrb[32].mxu1 }
 0xc2a   : > { %v2674_v7 = vmax.f32 %v2654_v12, %v2670_v53  ;;  %v2679_v56 = vadd.f32 %v6810_v41, %v8591_v34  ;;  %v2465_v59 = vpop.f32.mrb[33].mxu1 }
 0xc2b   : > { %v2677_v60 = vadd.f32 %v8595_v25, %v2465_v59  ;;  %v6811_v63 = vpop.f32.mrb[34].mxu1 }
 0xc2c   : > { %vm2683_vm14 = vcmp.ge.f32.partialorder %v2679_v56, 0.0  ;;  %v2687_v1 = vmul.f32 0.2, %v2679_v56  ;;  %v2680_v2 = vadd.f32 %v6811_v63, %v8597_v26  ;;  %v2468_v3 = vpop.f32.mrb[35].mxu1 }
 0xc2d   : > { %vm2681_vm15 = vcmp.ge.f32.partialorder %v2677_v60, 0.0  ;;  %v2685_v6 = vmul.f32 0.2, %v2677_v60  ;;  %v2678_v13 = vadd.f32 %v8599_v27, %v2468_v3 }
 0xc2e   : > { %v2691_v15 = vsel %vm2683_vm14, %v2679_v56, %v2687_v1  ;;  %vm2684_vm0 = vcmp.ge.f32.partialorder %v2680_v2, 0.0  ;;  %v2688_v48 = vmul.f32 0.2, %v2680_v2 }
 0xc2f   : > { %v2695_v16 = vmax.f32 %v2675_v32, %v2691_v15  ;;  %v2689_v17 = vsel %vm2681_vm15, %v2677_v60, %v2685_v6  ;;  %vm2682_vm6 = vcmp.ge.f32.partialorder %v2678_v13, 0.0  ;;  %v2686_v18 = vmul.f32 0.2, %v2678_v13 }
 0xc30   : > { %v2693_v21 = vmax.f32 %v2673_v36, %v2689_v17  ;;  %v2692_v51 = vsel %vm2684_vm0, %v2680_v2, %v2688_v48 }
 0xc31   : > { %v2696_v49 = vmax.f32 %v2676_v35, %v2692_v51  ;;  %v2690_v28 = vsel %vm2682_vm6, %v2678_v13, %v2686_v18  ;;  %v6814_v29 = vpop.f32.mrb[36].mxu1 }
 0xc32   : > { %v2694_v30 = vmax.f32 %v2674_v7, %v2690_v28  ;;  %v2699_v39 = vadd.f32 %v6814_v29, %v8591_v34  ;;  %v2481_v45 = vpop.f32.mrb[37].mxu1 }
 0xc33   : > { %v2697_v42 = vadd.f32 %v8595_v25, %v2481_v45  ;;  %v6815_v58 = vpop.f32.mrb[38].mxu1 }
 0xc34   : > { %vm2703_vm7 = vcmp.ge.f32.partialorder %v2699_v39, 0.0  ;;  %v2707_v46 = vmul.f32 0.2, %v2699_v39  ;;  %v2700_v50 = vadd.f32 %v6815_v58, %v8597_v26  ;;  %v2484_v52 = vpop.f32.mrb[39].mxu1 }
 0xc35   : > { %vm2701_vm8 = vcmp.ge.f32.partialorder %v2697_v42, 0.0  ;;  %v2705_v38 = vmul.f32 0.2, %v2697_v42  ;;  %v2698_v43 = vadd.f32 %v8599_v27, %v2484_v52 }
 0xc36   : > { %v2711_v4 = vsel %vm2703_vm7, %v2699_v39, %v2707_v46  ;;  %vm2704_vm9 = vcmp.ge.f32.partialorder %v2700_v50, 0.0  ;;  %v2708_v33 = vmul.f32 0.2, %v2700_v50 }
 0xc37   : > { %v2715_v9 = vmax.f32 %v2695_v16, %v2711_v4  ;;  %v2709_v57 = vsel %vm2701_vm8, %v2697_v42, %v2705_v38  ;;  %vm2702_vm10 = vcmp.ge.f32.partialorder %v2698_v43, 0.0  ;;  %v2706_v8 = vmul.f32 0.2, %v2698_v43 }
 0xc38   : > { %v2713_v62 = vmax.f32 %v2693_v21, %v2709_v57  ;;  %v2712_v10 = vsel %vm2704_vm9, %v2700_v50, %v2708_v33 }
 0xc39   : > { %v2716_v0 = vmax.f32 %v2696_v49, %v2712_v10  ;;  %v2710_v5 = vsel %vm2702_vm10, %v2698_v43, %v2706_v8  ;;  %v6818_v61 = vpop.f32.mrb[40].mxu1 }
 0xc3a   : > { %v2714_v40 = vmax.f32 %v2694_v30, %v2710_v5  ;;  %v2719_v55 = vadd.f32 %v6818_v61, %v8591_v34  ;;  %v2497_v32 = vpop.f32.mrb[41].mxu1 }
 0xc3b   : > { %v2717_v54 = vadd.f32 %v8595_v25, %v2497_v32  ;;  %v6819_v47 = vpop.f32.mrb[42].mxu1 }
 0xc3c   : > { %vm2723_vm11 = vcmp.ge.f32.partialorder %v2719_v55, 0.0  ;;  %v2727_v44 = vmul.f32 0.2, %v2719_v55  ;;  %v2720_v36 = vadd.f32 %v6819_v47, %v8597_v26  ;;  %v2500_v11 = vpop.f32.mrb[43].mxu1 }
 0xc3d   : > { %vm2721_vm12 = vcmp.ge.f32.partialorder %v2717_v54, 0.0  ;;  %v2725_v12 = vmul.f32 0.2, %v2717_v54  ;;  %v2718_v35 = vadd.f32 %v8599_v27, %v2500_v11 }
 0xc3e   : > { %v2731_v53 = vsel %vm2723_vm11, %v2719_v55, %v2727_v44  ;;  %vm2724_vm13 = vcmp.ge.f32.partialorder %v2720_v36, 0.0  ;;  %v2728_v41 = vmul.f32 0.2, %v2720_v36 }
 0xc3f   : > { %v2735_v7 = vmax.f32 %v2715_v9, %v2731_v53  ;;  %v2729_v56 = vsel %vm2721_vm12, %v2717_v54, %v2725_v12  ;;  %vm2722_vm14 = vcmp.ge.f32.partialorder %v2718_v35, 0.0  ;;  %v2726_v59 = vmul.f32 0.2, %v2718_v35 }
 0xc40   : > { %v2733_v60 = vmax.f32 %v2713_v62, %v2729_v56  ;;  %v2732_v63 = vsel %vm2724_vm13, %v2720_v36, %v2728_v41 }
 0xc41   : > { %v2736_v1 = vmax.f32 %v2716_v0, %v2732_v63  ;;  %v2730_v2 = vsel %vm2722_vm14, %v2718_v35, %v2726_v59  ;;  %v6822_v3 = vpop.f32.mrb[44].mxu1 }
 0xc42   : > { %v2734_v6 = vmax.f32 %v2714_v40, %v2730_v2  ;;  %v2739_v13 = vadd.f32 %v6822_v3, %v8591_v34  ;;  %v2513_v15 = vpop.f32.mrb[45].mxu1 }
 0xc43   : > { %v2737_v48 = vadd.f32 %v8595_v25, %v2513_v15  ;;  %v6823_v16 = vpop.f32.mrb[46].mxu1 }
 0xc44   : > { %vm2743_vm15 = vcmp.ge.f32.partialorder %v2739_v13, 0.0  ;;  %v2747_v17 = vmul.f32 0.2, %v2739_v13  ;;  %v2740_v18 = vadd.f32 %v6823_v16, %v8597_v26  ;;  %v2516_v21 = vpop.f32.mrb[47].mxu1 }
 0xc45   : > { %vm2741_vm0 = vcmp.ge.f32.partialorder %v2737_v48, 0.0  ;;  %v2745_v51 = vmul.f32 0.2, %v2737_v48  ;;  %v2738_v49 = vadd.f32 %v8599_v27, %v2516_v21 }
 0xc46   : > { %v2751_v28 = vsel %vm2743_vm15, %v2739_v13, %v2747_v17  ;;  %vm2744_vm6 = vcmp.ge.f32.partialorder %v2740_v18, 0.0  ;;  %v2748_v29 = vmul.f32 0.2, %v2740_v18 }
 0xc47   : > { %v2755_v30 = vmax.f32 %v2735_v7, %v2751_v28  ;;  %v2749_v39 = vsel %vm2741_vm0, %v2737_v48, %v2745_v51  ;;  %vm2742_vm7 = vcmp.ge.f32.partialorder %v2738_v49, 0.0  ;;  %v2746_v45 = vmul.f32 0.2, %v2738_v49 }
 0xc48   : > { %v2753_v42 = vmax.f32 %v2733_v60, %v2749_v39  ;;  %v2752_v58 = vsel %vm2744_vm6, %v2740_v18, %v2748_v29 }
 0xc49   : > { %v2756_v46 = vmax.f32 %v2736_v1, %v2752_v58  ;;  %v2750_v50 = vsel %vm2742_vm7, %v2738_v49, %v2746_v45  ;;  %v6826_v52 = vpop.f32.mrb[48].mxu1 }
 0xc4a   : > { %v2754_v38 = vmax.f32 %v2734_v6, %v2750_v50  ;;  %v2759_v43 = vadd.f32 %v6826_v52, %v8591_v34  ;;  %v2529_v4 = vpop.f32.mrb[49].mxu1 }
 0xc4b   : > { %v2757_v33 = vadd.f32 %v8595_v25, %v2529_v4  ;;  %v6827_v9 = vpop.f32.mrb[50].mxu1 }
 0xc4c   : > { %vm2763_vm8 = vcmp.ge.f32.partialorder %v2759_v43, 0.0  ;;  %v2767_v57 = vmul.f32 0.2, %v2759_v43  ;;  %v2760_v8 = vadd.f32 %v6827_v9, %v8597_v26  ;;  %v2532_v62 = vpop.f32.mrb[51].mxu1 }
 0xc4d   : > { %vm2761_vm9 = vcmp.ge.f32.partialorder %v2757_v33, 0.0  ;;  %v2765_v10 = vmul.f32 0.2, %v2757_v33  ;;  %v2758_v0 = vadd.f32 %v8599_v27, %v2532_v62  ;;  %v7544_v62 = vld [vmem:[%s7868_s24 + $0xc8] sm:$0xff]  }
 0xc4e   : > { %v2771_v5 = vsel %vm2763_vm8, %v2759_v43, %v2767_v57  ;;  %vm2764_vm10 = vcmp.ge.f32.partialorder %v2760_v8, 0.0  ;;  %v2768_v61 = vmul.f32 0.2, %v2760_v8 }
 0xc4f   : > { %v2775_v40 = vmax.f32 %v2755_v30, %v2771_v5  ;;  %v2769_v55 = vsel %vm2761_vm9, %v2757_v33, %v2765_v10  ;;  %vm2762_vm11 = vcmp.ge.f32.partialorder %v2758_v0, 0.0  ;;  %v2766_v32 = vmul.f32 0.2, %v2758_v0 }
 0xc50   : > { %v2773_v54 = vmax.f32 %v2753_v42, %v2769_v55  ;;  %v2772_v47 = vsel %vm2764_vm10, %v2760_v8, %v2768_v61 }
 0xc51   : > { %v2776_v44 = vmax.f32 %v2756_v46, %v2772_v47  ;;  %v2770_v36 = vsel %vm2762_vm11, %v2758_v0, %v2766_v32  ;;  %v6830_v11 = vpop.f32.mrb[52].mxu1 }
 0xc52   : > { %v2774_v12 = vmax.f32 %v2754_v38, %v2770_v36  ;;  %v2779_v35 = vadd.f32 %v6830_v11, %v8591_v34  ;;  %v2545_v53 = vpop.f32.mrb[53].mxu1  ;;  %v7722_v36 = vld [vmem:[%s9567_s11 + $0x18] sm:$0xff] }
 0xc53   : > { %v2777_v41 = vadd.f32 %v8595_v25, %v2545_v53  ;;  %v6831_v7 = vpop.f32.mrb[54].mxu1 }
 0xc54   : > { %vm2783_vm12 = vcmp.ge.f32.partialorder %v2779_v35, 0.0  ;;  %v2787_v56 = vmul.f32 0.2, %v2779_v35  ;;  %v2780_v59 = vadd.f32 %v6831_v7, %v8597_v26  ;;  %v2548_v60 = vpop.f32.mrb[55].mxu1 }
 0xc55   : > { %vm2781_vm13 = vcmp.ge.f32.partialorder %v2777_v41, 0.0  ;;  %v2785_v63 = vmul.f32 0.2, %v2777_v41  ;;  %v2778_v1 = vadd.f32 %v8599_v27, %v2548_v60 }
 0xc56   : > { %v2791_v2 = vsel %vm2783_vm12, %v2779_v35, %v2787_v56  ;;  %vm2784_vm14 = vcmp.ge.f32.partialorder %v2780_v59, 0.0  ;;  %v2788_v3 = vmul.f32 0.2, %v2780_v59 }
 0xc57   : > { %v2795_v6 = vmax.f32 %v2775_v40, %v2791_v2  ;;  %v2789_v13 = vsel %vm2781_vm13, %v2777_v41, %v2785_v63  ;;  %vm2782_vm15 = vcmp.ge.f32.partialorder %v2778_v1, 0.0  ;;  %v2786_v15 = vmul.f32 0.2, %v2778_v1 }
 0xc58   : > { %v2793_v48 = vmax.f32 %v2773_v54, %v2789_v13  ;;  %v2792_v16 = vsel %vm2784_vm14, %v2780_v59, %v2788_v3 }
 0xc59   : > { %v2796_v17 = vmax.f32 %v2776_v44, %v2792_v16  ;;  %v2790_v18 = vsel %vm2782_vm15, %v2778_v1, %v2786_v15  ;;  %v6834_v21 = vpop.f32.mrb[56].mxu1 }
 0xc5a   : > { %v2794_v51 = vmax.f32 %v2774_v12, %v2790_v18  ;;  %v2799_v49 = vadd.f32 %v6834_v21, %v8591_v34  ;;  %v2561_v28 = vpop.f32.mrb[57].mxu1 }
 0xc5b   : > { %v2797_v29 = vadd.f32 %v8595_v25, %v2561_v28  ;;  %v6835_v30 = vpop.f32.mrb[58].mxu1  ;;  %v7546_v28 = vld [vmem:[%s7868_s24 + $0x48] sm:$0xff]  }
 0xc5c   : > { %vm2803_vm0 = vcmp.ge.f32.partialorder %v2799_v49, 0.0  ;;  %v2807_v39 = vmul.f32 0.2, %v2799_v49  ;;  %v2800_v45 = vadd.f32 %v6835_v30, %v8597_v26  ;;  %v2564_v42 = vpop.f32.mrb[59].mxu1 }
 0xc5d   : > { %vm2801_vm6 = vcmp.ge.f32.partialorder %v2797_v29, 0.0  ;;  %v2805_v58 = vmul.f32 0.2, %v2797_v29  ;;  %v2798_v46 = vadd.f32 %v8599_v27, %v2564_v42  ;;  %v6079_v27 = vld [vmem:[%s7889_s20 + $0x5] ss:$0 sm:$0xff] }
 0xc5e   : > { %v2811_v50 = vsel %vm2803_vm0, %v2799_v49, %v2807_v39  ;;  %vm2804_vm7 = vcmp.ge.f32.partialorder %v2800_v45, 0.0  ;;  %v2808_v52 = vmul.f32 0.2, %v2800_v45  ;;  %v7545_v49 = vld [vmem:[%s7868_s24 + $0x40] sm:$0xff]  }
 0xc5f   : > { %v2815_v38 = vmax.f32 %v2795_v6, %v2811_v50  ;;  %v2809_v43 = vsel %vm2801_vm6, %v2797_v29, %v2805_v58  ;;  %vm2802_vm8 = vcmp.ge.f32.partialorder %v2798_v46, 0.0  ;;  %v2806_v34 = vmul.f32 0.2, %v2798_v46  ;;  %6860 = vmatprep.subr.bf16.mxu0 %v7545_v49  ;;  %v7547_v29 = vld [vmem:[%s7868_s24 + $0x50] sm:$0xff]  }
 0xc60   : > { %v2813_v25 = vmax.f32 %v2793_v48, %v2809_v43  ;;  %v2812_v4 = vsel %vm2804_vm7, %v2800_v45, %v2808_v52  ;;  %6861 = vmatpush3.bf16.msra.mxu0 %v7545_v49 }
 0xc61   : > { %v2816_v33 = vmax.f32 %v2796_v17, %v2812_v4  ;;  %v2810_v9 = vsel %vm2802_vm8, %v2798_v46, %v2806_v34  ;;  %6862 = vmatprep.subr.bf16.mxu0 %v7546_v28 }
 0xc62   : > { %v2814_v57 = vmax.f32 %v2794_v51, %v2810_v9 }
 0xc63   : > { %v2830_v26 = vpack.c.bf16 %v2816_v33, %v2815_v38  ;;  %v6080_v33 = vld [vmem:[%s7889_s20 + $0xd] ss:$0 sm:$0xff] }
 0xc64   : > { %v2829_v8 = vpack.c.bf16 %v2814_v57, %v2813_v25  ;;  %6863 = vmatpush3.bf16.msra.mxu0 %v7546_v28 }
 0xc65   : > { %6868 = vmatprep.subr.bf16.mxu0 %v7547_v29 }
 0xc66   : > { %6848 = vmatprep.mubr.msk.bf16.mxu1 %vm557_vm1, %v2829_v8 }
 0xc67   : > { %6849 = vmatmul.mubr.msk.bf16.vlgmr.msra.gmra.mrb[60].mxu1 %vm557_vm1, %v2830_v26  ;;  %v6081_v26 = vld [vmem:[%s7889_s20 + $0xe] ss:$0 sm:$0xff] }
 0xc68   : > { %6853 = vmatpush3.bf16.msra.mxu1 %v8576_v14  ;;  %6856 = vmatprep.mubr.msk.bf16.mxu1 %vm557_vm1, %v2822_v24 }
 0xc69   : > { %6854 = vmatprep.subr.bf16.mxu1 %v7544_v62 }
 0xc6c   : > { %6855 = vmatpush3.bf16.msra.mxu1 %v7544_v62 }
 0xc73   : > { %6857 = vmatmul.mubr.msk.bf16.vlgmr.msra.gmra.mrb[60].mxu1 %vm557_vm1, %v2823_v37  ;;  %v7721_v37 = vld [vmem:[%s9567_s11 + $0x10] sm:$0xff] }
 0xd46   : > { %v6858_v10 = vpop.f32.mrb[60].mxu1 }
 0xd47   : > { %v2950_v0 = vpop.f32.mrb[61].mxu1  ;;  %v2972_v5 = vadd.f32 %v6858_v10, %v6079_v27 }
 0xd48   : > { %v2970_v61 = vadd.f32 %v6079_v27, %v2950_v0  ;;  %v6859_v40 = vpop.f32.mrb[62].mxu1 }
 0xd49   : > { %v2953_v55 = vpop.f32.mrb[63].mxu1  ;;  %v2973_v24 = vadd.f32 %v6859_v40, %v6079_v27  ;;  %v2976_v54 = vadd.f32 %v7721_v37, %v2972_v5 }
 0xd4a   : > { %v2971_v14 = vadd.f32 %v6079_v27, %v2953_v55  ;;  %v2974_v23 = vadd.f32 %v7719_v22, %v2970_v61  ;;  %v8688_v22 = vld [vmem:[%s9557_s1 + $0x8] sm:$0xff] }
 0xd4b   : > { %v2986_v44 = vsel %vm557_vm1, %v2976_v54, 0.0  ;;  %v2977_v11 = vadd.f32 %v7722_v36, %v2973_v24  ;;  %v7723_v24 = vld [vmem:[%s9558_s2] sm:$0xff] }
 0xd4c   : > { %v2980_v32 = vsel %vm557_vm1, %v2974_v23, 0.0  ;;  %v2975_v20 = vadd.f32 %v7720_v19, %v2971_v14  ;;  %v8683_v14 = vld [vmem:[%s9557_s1] sm:$0xff]  ;;  %v7724_v19 = vld [vmem:[%s9558_s2 + $0x8] sm:$0xff] }
 0xd4d   : > { %2981 = vadd.xlane.f32.xlu0 %v2980_v32  ;;  %v2989_v12 = vsel %vm557_vm1, %v2977_v11, 0.0  ;;  %v3054_v36 = vadd.f32 %v7724_v19, %v8688_v22 }
 0xd4e   : > { %v2983_v47 = vsel %vm557_vm1, %v2975_v20, 0.0 }
 0xd4f   : > { %2984 = vadd.xlane.f32.xlu1 %v2983_v47 }
 0xd51   : > { %2987 = vadd.xlane.f32.xlu0 %v2986_v44  ;;  %v3053_v44 = vadd.f32 %v7723_v24, %v8683_v14 }
 0xd55   : > { %2990 = vadd.xlane.f32.xlu0 %v2989_v12  ;;  %v7725_v12 = vld [vmem:[%s9558_s2 + $0x10] sm:$0xff] }
 0xdda   : > { %v2982_v35 = vpop.xlane.xlu0 %2981 }
 0xddb   : > { %v2993_v53 = vmul.f32 0.03125, %v2982_v35 }
 0xddc   : > { %v2985_v41 = vpop.xlane.xlu1 %2984 }
 0xddd   : > { %v2997_v7 = vsub.f32 %v2974_v23, %v2993_v53  ;;  %v2994_v56 = vmul.f32 0.03125, %v2985_v41  ;;  %v7726_v53 = vld [vmem:[%s9558_s2 + $0x18] sm:$0xff] }
 0xdde   : > { %v2988_v59 = vpop.xlane.xlu0 %2987 }
 0xddf   : > { %v2998_v60 = vsub.f32 %v2975_v20, %v2994_v56  ;;  %v2995_v63 = vmul.f32 0.03125, %v2988_v59  ;;  %v3001_v1 = vmul.f32 %v2997_v7, %v2997_v7  ;;  %v466_v56 = vld [vmem:[%s9557_s1 + $0x10] sm:$0xff]  ;;  %v467_v59 = vld [vmem:[%s9557_s1 + $0x18] sm:$0xff] }
 0xde1   : > { %v2999_v2 = vsub.f32 %v2976_v54, %v2995_v63  ;;  %v3005_v3 = vsel %vm557_vm1, %v3001_v1, 0.0  ;;  %v3002_v6 = vmul.f32 %v2998_v60, %v2998_v60  ;;  %v7548_v63 = vld [vmem:[%s7868_s24 + $0x58] sm:$0xff]   ;;  %v3055_v1 = vadd.f32 %v7725_v12, %v466_v56 }
 0xde2   : > { %3006 = vadd.xlane.f32.xlu0 %v3005_v3  ;;  %v2991_v13 = vpop.xlane.xlu0 %2990 }
 0xde3   : > { %v2996_v15 = vmul.f32 0.03125, %v2991_v13  ;;  %v3008_v48 = vsel %vm557_vm1, %v3002_v6, 0.0  ;;  %v3003_v16 = vmul.f32 %v2999_v2, %v2999_v2  ;;  %v6098_v6 = vld [vmem:[%s7889_s20 + $0x6] ss:$0 sm:$0xff] }
 0xde4   : > { %3009 = vadd.xlane.f32.xlu1 %v3008_v48 }
 0xde5   : > { %v3000_v17 = vsub.f32 %v2977_v11, %v2996_v15  ;;  %v3011_v18 = vsel %vm557_vm1, %v3003_v16, 0.0 }
 0xde6   : > { %3012 = vadd.xlane.f32.xlu0 %v3011_v18 }
 0xde7   : > { %v3004_v21 = vmul.f32 %v3000_v17, %v3000_v17 }
 0xde9   : > { %v3014_v51 = vsel %vm557_vm1, %v3004_v21, 0.0  ;;  %v6103_v21 = vld [vmem:[%s7889_s20 + $0x7] ss:$0 sm:$0xff] }
 0xdea   : > { %3015 = vadd.xlane.f32.xlu1 %v3014_v51 }
 0xe6f   : > { %v3007_v30 = vpop.xlane.xlu0 %3006 }
 0xe70   : > { %v3017_v39 = vmul.f32 0.03125, %v3007_v30 }
 0xe71   : > { %v3010_v45 = vpop.xlane.xlu1 %3009 }
 0xe72   : > { %v3021_v42 = vadd.f32 1e-05, %v3017_v39  ;;  %v3018_v58 = vmul.f32 0.03125, %v3010_v45 }
 0xe73   : > { %v3013_v46 = vpop.xlane.xlu0 %3012 }
 0xe74   : > { %7631 = vrsqrt.f32 %v3021_v42  ;;  %v3022_v50 = vadd.f32 1e-05, %v3018_v58  ;;  %v3019_v52 = vmul.f32 0.03125, %v3013_v46 }
 0xe76   : > { %7633 = vrsqrt.f32 %v3022_v50  ;;  %v3023_v38 = vadd.f32 1e-05, %v3019_v52 }
 0xe77   : > { %v3016_v43 = vpop.xlane.xlu1 %3015 }
 0xe78   : > { %7635 = vrsqrt.f32 %v3023_v38  ;;  %v3020_v34 = vmul.f32 0.03125, %v3016_v43 }
 0xe7a   : > { %v3024_v25 = vadd.f32 1e-05, %v3020_v34  ;;  %v7549_v34 = vld [vmem:[%s7868_s24 + $0x60] sm:$0xff]  }
 0xe7b   : > { %6876 = vmatprep.subr.bf16.mxu1 %v7549_v34 }
 0xe7c   : > { %7637 = vrsqrt.f32 %v3024_v25  ;;  %v7550_v25 = vld [vmem:[%s7868_s24 + $0x68] sm:$0xff]   ;;  %6877 = vmatpush3.bf16.msra.mxu1 %v7549_v34 }
 0xe7d   : > { %6878 = vmatprep.subr.bf16.mxu1 %v7550_v25 }
 0xe7e   : > { %v7632_v4 = vpop.eup %7631 }
 0xe7f   : > { %v3029_v9 = vmul.f32 %v7632_v4, %v2997_v7  ;;  %v3154_v7 = vpack.c.bf16 %v3054_v36, %v3053_v44  ;;  %v8757_v4 = vpack.c.bf16 %v8688_v22, %v8683_v14 }
 0xe80   : > { %v7634_v57 = vpop.eup %7633  ;;  %6879 = vmatpush3.bf16.msra.mxu1 %v7550_v25 }
 0xe81   : > { %v3037_v8 = vmul.f32 %v6080_v33, %v3029_v9  ;;  %v3030_v62 = vmul.f32 %v7634_v57, %v2998_v60  ;;  %6880 = vmatprep.mubr.msk.bf16.mxu1 %vm557_vm1, %v8757_v4  ;;  %v8768_v57 = vld [vmem:[%s9560_s4 + $0x8] sm:$0xff] }
 0xe82   : > { %v7636_v27 = vpop.eup %7635 }
 0xe83   : > { %v3038_v10 = vmul.f32 %v6080_v33, %v3030_v62  ;;  %v3031_v0 = vmul.f32 %v7636_v27, %v2999_v2  ;;  %v8676_v5 = vadd.f32 %v6081_v26, %v3037_v8  ;;  %v3056_v2 = vadd.f32 %v7726_v53, %v467_v59  ;;  %v8774_v62 = vld [vmem:[%s9560_s4] sm:$0xff] }
 0xe85   : > { %9591 = vst [vmem:[#allocation3_spill] sm:$0xff] %v8676_v5  ;;  %v3039_v61 = vmul.f32 %v6080_v33, %v3031_v0  ;;  %v8678_v40 = vadd.f32 %v6081_v26, %v3038_v10  ;;  %v3049_v32 = vadd.f32 %v7723_v24, %v8676_v5  ;;  %v3155_v3 = vpack.c.bf16 %v3056_v2, %v3055_v1 }
 0xe86   : > { %v7638_v55 = vpop.eup %7637 }
 0xe87   : > { %9592 = vst [vmem:[#allocation4_spill] sm:$0xff] %v8678_v40  ;;  %v3032_v23 = vmul.f32 %v7638_v55, %v3000_v17  ;;  %v3050_v20 = vadd.f32 %v7724_v19, %v8678_v40  ;;  %v8698_v37 = vadd.f32 %v6081_v26, %v3039_v61  ;;  %v8782_v55 = vld [vmem:[%s9560_s4 + $0x18] sm:$0xff] }
 0xe89   : > { %9593 = vst [vmem:[#allocation5_spill] sm:$0xff] %v8698_v37  ;;  %v3040_v54 = vmul.f32 %v6080_v33, %v3032_v23  ;;  %v3081_v47 = vpack.c.bf16 %v3050_v20, %v3049_v32  ;;  %v3051_v35 = vadd.f32 %v7725_v12, %v8698_v37  ;;  %v8761_v33 = vpack.c.bf16 %v467_v59, %v466_v56  ;;  %v8788_v23 = vld [vmem:[%s9560_s4 + $0x10] sm:$0xff]  ;;  %v6108_v20 = vld [vmem:[%s7889_s20 + $0x8] ss:$0 sm:$0xff] }
 0xe8b   : > { %v8702_v11 = vadd.f32 %v6081_v26, %v3040_v54  ;;  %6864 = vmatprep.mubr.msk.bf16.mxu0 %vm557_vm1, %v3081_v47  ;;  %6881 = vmatmul.mubr.msk.bf16.vlgmr.msra.gmra.mrb[64].mxu1 %vm557_vm1, %v8761_v33 }
 0xe8d   : > { %9594 = vst [vmem:[#allocation6_spill] sm:$0xff] %v8702_v11  ;;  %v3052_v41 = vadd.f32 %v7726_v53, %v8702_v11 }
 0xe8f   : > { %v3082_v60 = vpack.c.bf16 %v3052_v41, %v3051_v35 }
 0xe91   : > { %6865 = vmatmul.mubr.msk.bf16.vlgmr.msra.gmra.mrb[64].mxu0 %vm557_vm1, %v3082_v60 }
 0xe92   : > { %6869 = vmatpush3.bf16.msra.mxu0 %v7547_v29  ;;  %6872 = vmatprep.mubr.msk.bf16.mxu0 %vm557_vm1, %v3154_v7 }
 0xe93   : > { %6870 = vmatprep.subr.bf16.mxu0 %v7548_v63 }
 0xe96   : > { %6871 = vmatpush3.bf16.msra.mxu0 %v7548_v63 }
 0xe99   : > { %6873 = vmatmul.mubr.msk.bf16.vlgmr.msra.gmra.mrb[68].mxu0 %vm557_vm1, %v3155_v3 }
 0xf5e   : > { %v6882_v54 = vpop.f32.mrb[64].mxu1 }
 0xf5f   : > { %v3285_v47 = vpop.f32.mrb[65].mxu1  ;;  %v8794_v44 = vadd.f32 %v6882_v54, %v6108_v20 }
 0xf60   : > { %v8796_v36 = vadd.f32 %v6108_v20, %v3285_v47  ;;  %v6883_v12 = vpop.f32.mrb[66].mxu1 }
 0xf61   : > { %v8798_v35 = vadd.f32 %v6883_v12, %v6108_v20  ;;  %v3288_v53 = vpop.f32.mrb[67].mxu1 }
 0xf62   : > { %v8800_v41 = vadd.f32 %v6108_v20, %v3288_v53 }
 0xf63   : > { %v7254_v56 = vpack.c.bf16 %v8798_v35, %v8794_v44 }
 0xf64   : > { %v6866_v13 = vpop.f32.mrb[64].mxu0  ;;  %v7250_v7 = vpack.c.bf16 %v8800_v41, %v8796_v36 }
 0xf65   : > { %v3139_v15 = vpop.f32.mrb[65].mxu0  ;;  %v8743_v38 = vadd.f32 %v6866_v13, %v6098_v6 }
 0xf66   : > { %v8724_v48 = vadd.f32 %v6098_v6, %v3139_v15  ;;  %v6867_v16 = vpop.f32.mrb[66].mxu0  ;;  %7251 = vmatprep.subr.bf16.mxu1 %v7250_v7 }
 0xf67   : > { %v3142_v17 = vpop.f32.mrb[67].mxu0  ;;  %v8749_v43 = vadd.f32 %v6867_v16, %v6098_v6  ;;  %7253 = vmatpush3.bf16.msra.mxu1 %v7250_v7 }
 0xf68   : > { %6892 = vmatprep.mubr.msk.f32.mxu0 %vm751_vm2, %v8724_v48  ;;  %v8741_v52 = vadd.f32 %v6098_v6, %v3142_v17  ;;  %7255 = vmatprep.subr.bf16.mxu1 %v7254_v56 }
 0xf6b   : > { %7257 = vmatpush3.bf16.msra.mxu1 %v7254_v56 }
 0xf6c   : > { %v6874_v18 = vpop.f32.mrb[68].mxu0 }
 0xf6d   : > { %v3212_v51 = vpop.f32.mrb[69].mxu0  ;;  %v3221_v28 = vadd.f32 %v6874_v18, %v6103_v21 }
 0xf6e   : > { %v6875_v49 = vpop.f32.mrb[70].mxu0  ;;  %v3213_v39 = vadd.f32 %v6103_v21, %v3212_v51 }
 0xf6f   : > { %v3224_v29 = vadd.f32 %v6875_v49, %v6103_v21  ;;  %v3215_v30 = vpop.f32.mrb[71].mxu0 }
 0xf70   : > { %v3216_v45 = vadd.f32 %v6103_v21, %v3215_v30 }
 0xf71   : > { %v7244_v42 = vpack.c.bf16 %v3224_v29, %v3221_v28  ;;  %v8729_v58 = vpack.i.bf16 %v3224_v29, %v3221_v28 }
 0xf72   : > { %v7238_v46 = vpack.c.bf16 %v3216_v45, %v3213_v39  ;;  %v8731_v50 = vpack.i.bf16 %v3216_v45, %v3213_v39 }
 0xf74   : > { %7240 = vmatprep.subr.msk.bf16.mxu0 %vm7951_vm3, %v7238_v46 }
 0xf75   : > { %7243 = vmatpush3.bf16.xpose.msk.msra.mxu0 %vm7951_vm3, %v7238_v46 }
 0xf76   : > { %7246 = vmatprep.subr.msk.bf16.mxu0 %vm7951_vm3, %v7244_v42 }
 0xf7d   : > { %7249 = vmatpush3.bf16.xpose.msk.msra.mxu0 %vm7951_vm3, %v7244_v42 }
 0xf84   : > { %6893 = vmatmul.mubr.msk.f32.vlgmr.msra.gmra.mrb[72].mxu0 %vm751_vm2, %v8741_v52 }
 0xf85   : > { %6895 = vmatprep.mubr.msk.f32.mxu0 %vm751_vm2, %v8743_v38 }
 0xf88   : > { %6896 = vmatmul.mubr.msk.f32.gmra.mrb[74].mxu0 %vm751_vm2, %v8749_v43 }
0x1057   : > { %v6894_v9 = vpop.f32.mrb[72].mxu0 }
0x1058   : > { %v3396_v26 = vadd.f32 %v8768_v57, %v6894_v9  ;;  %v3390_v8 = vpop.f32.mrb[73].mxu0 }
0x1059   : > { %v3391_v27 = vadd.f32 %v8774_v62, %v3390_v8 }
0x105a   : > { %v3412_v10 = vsel %vm557_vm1, %v3396_v26, -inf }
0x105b   : > { %3413 = vmax.xlane.f32.xlu1 %v3412_v10  ;;  %v6897_v0 = vpop.f32.mrb[74].mxu0  ;;  %v3409_v61 = vsel %vm557_vm1, %v3391_v27, -inf }
0x105c   : > { %v3406_v14 = vadd.f32 %v8782_v55, %v6897_v0  ;;  %v3400_v22 = vpop.f32.mrb[75].mxu0  ;;  %3410 = vmax.xlane.f32.xlu0 %v3409_v61 }
0x105d   : > { %v3401_v24 = vadd.f32 %v8788_v23, %v3400_v22 }
0x105e   : > { %v3418_v32 = vsel %vm557_vm1, %v3406_v14, -inf }
0x105f   : > { %3419 = vmax.xlane.f32.xlu1 %v3418_v32  ;;  %v3415_v19 = vsel %vm557_vm1, %v3401_v24, -inf }
0x1060   : > { %3416 = vmax.xlane.f32.xlu0 %v3415_v19 }
0x10e8   : > { %v3414_v59 = vpop.xlane.xlu1 %3413 }
0x10e9   : > { %v3422_v60 = vsub.f32 %v3396_v26, %v3414_v59  ;;  %v3411_v63 = vpop.xlane.xlu0 %3410 }
0x10ea   : > { %v3421_v1 = vsub.f32 %v3391_v27, %v3411_v63 }
0x10eb   : > { %v3427_v2 = vmul.f32 1.442695, %v3422_v60 }
0x10ec   : > { %v3425_v3 = vmul.f32 1.442695, %v3421_v1  ;;  %v3420_v6 = vpop.xlane.xlu1 %3419 }
0x10ed   : > { %7639 = vpow2.f32 %v3427_v2  ;;  %v3424_v13 = vsub.f32 %v3406_v14, %v3420_v6  ;;  %v3417_v15 = vpop.xlane.xlu0 %3416 }
0x10ee   : > { %7641 = vpow2.f32 %v3425_v3  ;;  %v3423_v16 = vsub.f32 %v3401_v24, %v3417_v15 }
0x10ef   : > { %v3431_v17 = vmul.f32 1.442695, %v3424_v13 }
0x10f0   : > { %v3429_v18 = vmul.f32 1.442695, %v3423_v16 }
0x10f1   : > { %7643 = vpow2.f32 %v3431_v17 }
0x10f2   : > { %7645 = vpow2.f32 %v3429_v18 }
0x10f7   : > { %v7640_v21 = vpop.eup %7639 }
0x10f8   : > { %v7642_v51 = vpop.eup %7641  ;;  %v3436_v49 = vsel %vm557_vm1, %v7640_v21, 0.0 }
0x10f9   : > { %3437 = vadd.xlane.f32.xlu1 %v3436_v49  ;;  %v3433_v28 = vsel %vm557_vm1, %v7642_v51, 0.0 }
0x10fa   : > { %3434 = vadd.xlane.f32.xlu0 %v3433_v28 }
0x10fb   : > { %v7644_v29 = vpop.eup %7643 }
0x10fc   : > { %v7646_v30 = vpop.eup %7645  ;;  %v3442_v39 = vsel %vm557_vm1, %v7644_v29, 0.0 }
0x10fd   : > { %3443 = vadd.xlane.f32.xlu1 %v3442_v39  ;;  %v3439_v45 = vsel %vm557_vm1, %v7646_v30, 0.0 }
0x10fe   : > { %3440 = vadd.xlane.f32.xlu0 %v3439_v45 }
0x110e   : > { %7445 = vrot.lane.b32.xlu1 %v8729_v58, %s7783_s28 }
0x1112   : > { %3550 = vrot.lane.b32.xlu1 %v8724_v48, %s7783_s28 }
0x1114   : > { %7440 = vrot.lane.b32.xlu0 %v8731_v50, %s7783_s28 }
0x1116   : > { %3552 = vrot.lane.b32.xlu1 %v8741_v52, %s7783_s28 }
0x1118   : > { %3554 = vrot.lane.b32.xlu0 %v8743_v38, %s7783_s28 }
0x111a   : > { %3556 = vrot.lane.b32.xlu1 %v8749_v43, %s7783_s28 }
0x1186   : > { %v3438_v42 = vpop.xlane.xlu1 %3437 }
0x1187   : > { %7647 = vrcp.f32 %v3438_v42  ;;  %v3435_v46 = vpop.xlane.xlu0 %3434 }
0x1188   : > { %7649 = vrcp.f32 %v3435_v46 }
0x118a   : > { %v3444_v34 = vpop.xlane.xlu1 %3443 }
0x118b   : > { %7651 = vrcp.f32 %v3444_v34  ;;  %v3441_v25 = vpop.xlane.xlu0 %3440 }
0x118c   : > { %7653 = vrcp.f32 %v3441_v25 }
0x118e   : > { %v7446_v9 = vpop.permute.xlu1 %7445 }
0x118f   : > { %v7441_v26 = vpop.permute.xlu0 %7440  ;;  %v7448_v61 = vunpack.i.h.bf16 %v7446_v9  ;;  %v7447_v14 = vunpack.i.l.bf16 %v7446_v9 }
0x1190   : > { %v7443_v8 = vunpack.i.h.bf16 %v7441_v26  ;;  %v7442_v27 = vunpack.i.l.bf16 %v7441_v26 }
0x1191   : > { %v7648_v10 = vpop.eup %7647  ;;  %v7264_v54 = vpack.c.bf16 %v7448_v61, %v7447_v14 }
0x1192   : > { %v7650_v0 = vpop.eup %7649  ;;  %v7258_v22 = vpack.c.bf16 %v7443_v8, %v7442_v27  ;;  %v3450_v32 = vmul.f32 %v7648_v10, %v7640_v21  ;;  %v3551_v53 = vpop.permute.xlu1 %3550  ;;  %v8858_v27 = vpack.i.bf16 %v8798_v35, %v8794_v44  ;;  %v8866_v10 = vpack.i.bf16 %v8800_v41, %v8796_v36 }
0x1193   : > { %v3449_v24 = vmul.f32 %v7650_v0, %v7642_v51  ;;  %v3555_v56 = vpop.permute.xlu0 %3554 }
0x1194   : > { %7260 = vmatprep.subr.msk.bf16.mxu1 %vm7951_vm3, %v7258_v22 }
0x1195   : > { %v7652_v19 = vpop.eup %7651  ;;  %6906 = vmatprep.mubr.msk.f32.mxu1 %vm557_vm1, %v3449_v24 }
0x1196   : > { %v7654_v20 = vpop.eup %7653  ;;  %6907 = vmatmul.mubr.msk.f32.vlgmr.msra.gmra.mrb[68].mxu1 %vm557_vm1, %v3450_v32  ;;  %v3452_v12 = vmul.f32 %v7652_v19, %v7644_v29  ;;  %v3553_v7 = vpop.permute.xlu1 %3552 }
0x1197   : > { %7263 = vmatpush3.bf16.xpose.msk.msra.mxu1 %vm7951_vm3, %v7258_v22  ;;  %v3451_v47 = vmul.f32 %v7654_v20, %v7646_v30 }
0x1198   : > { %7266 = vmatprep.subr.msk.bf16.mxu1 %vm7951_vm3, %v7264_v54 }
0x1199   : > { %6909 = vmatprep.mubr.msk.f32.mxu1 %vm557_vm1, %v3451_v47 }
0x119a   : > { %6910 = vmatmul.mubr.msk.f32.gmra.mrb[70].mxu1 %vm557_vm1, %v3452_v12  ;;  %v3557_v59 = vpop.permute.xlu1 %3556 }
0x119b   : > { %6920 = vmatprep.mubr.msk.f32.mxu1 %vm751_vm2, %v3551_v53 }
0x119f   : > { %7269 = vmatpush3.bf16.xpose.msk.msra.mxu1 %vm7951_vm3, %v7264_v54 }
0x11a6   : > { %6921 = vmatmul.mubr.msk.f32.vlgmr.msra.gmra.mrb[72].mxu1 %vm751_vm2, %v3553_v7 }
0x11a7   : > { %6923 = vmatprep.mubr.msk.f32.mxu1 %vm751_vm2, %v3555_v56 }
0x11aa   : > { %6924 = vmatmul.mubr.msk.f32.gmra.mrb[74].mxu1 %vm751_vm2, %v3557_v59 }
0x1269   : > { %v8838_v60 = vpop.f32.mrb[68].mxu1 }
0x126a   : > { %v8840_v63 = vpop.f32.mrb[69].mxu1 }
0x126d   : > { %v8842_v1 = vpop.f32.mrb[70].mxu1 }
0x126e   : > { %v8844_v2 = vpop.f32.mrb[71].mxu1 }
0x1279   : > { %v6922_v3 = vpop.f32.mrb[72].mxu1 }
0x127a   : > { %v3654_v6 = vadd.f32 %v8768_v57, %v6922_v3  ;;  %v3648_v13 = vpop.f32.mrb[73].mxu1 }
0x127b   : > { %v3649_v15 = vadd.f32 %v8774_v62, %v3648_v13 }
0x127c   : > { %v3670_v16 = vsel %vm557_vm1, %v3654_v6, -inf }
0x127d   : > { %3671 = vmax.xlane.f32.xlu1 %v3670_v16  ;;  %v6925_v17 = vpop.f32.mrb[74].mxu1  ;;  %v3667_v18 = vsel %vm557_vm1, %v3649_v15, -inf }
0x127e   : > { %v3658_v21 = vpop.f32.mrb[75].mxu1  ;;  %3668 = vmax.xlane.f32.xlu0 %v3667_v18  ;;  %v3664_v49 = vadd.f32 %v8782_v55, %v6925_v17 }
0x127f   : > { %v3659_v51 = vadd.f32 %v8788_v23, %v3658_v21 }
0x1280   : > { %v3676_v29 = vsel %vm557_vm1, %v3664_v49, -inf }
0x1281   : > { %v3673_v28 = vsel %vm557_vm1, %v3659_v51, -inf }
0x1282   : > { %3674 = vmax.xlane.f32.xlu0 %v3673_v28 }
0x1286   : > { %3677 = vmax.xlane.f32.xlu0 %v3676_v29 }
0x130a   : > { %v3672_v30 = vpop.xlane.xlu1 %3671 }
0x130b   : > { %v3680_v39 = vsub.f32 %v3654_v6, %v3672_v30  ;;  %v3669_v45 = vpop.xlane.xlu0 %3668 }
0x130c   : > { %v3679_v42 = vsub.f32 %v3649_v15, %v3669_v45 }
0x130d   : > { %v3685_v46 = vmul.f32 1.442695, %v3680_v39 }
0x130e   : > { %v3683_v34 = vmul.f32 1.442695, %v3679_v42 }
0x130f   : > { %7655 = vpow2.f32 %v3685_v46  ;;  %v3675_v0 = vpop.xlane.xlu0 %3674 }
0x1310   : > { %7657 = vpow2.f32 %v3683_v34  ;;  %v3681_v61 = vsub.f32 %v3659_v51, %v3675_v0 }
0x1312   : > { %v3687_v44 = vmul.f32 1.442695, %v3681_v61 }
0x1313   : > { %v3678_v35 = vpop.xlane.xlu0 %3677 }
0x1314   : > { %v3682_v14 = vsub.f32 %v3664_v49, %v3678_v35  ;;  %7659 = vpow2.f32 %v3687_v44 }
0x1316   : > { %v3689_v22 = vmul.f32 1.442695, %v3682_v14 }
0x1318   : > { %7661 = vpow2.f32 %v3689_v22 }
0x1319   : > { %v7656_v25 = vpop.eup %7655 }
0x131a   : > { %v7658_v9 = vpop.eup %7657  ;;  %v3694_v26 = vsel %vm557_vm1, %v7656_v25, 0.0 }
0x131b   : > { %3695 = vadd.xlane.f32.xlu1 %v3694_v26  ;;  %v3691_v8 = vsel %vm557_vm1, %v7658_v9, 0.0 }
0x131c   : > { %3692 = vadd.xlane.f32.xlu0 %v3691_v8 }
0x131e   : > { %v7660_v24 = vpop.eup %7659 }
0x131f   : > { %v3697_v32 = vsel %vm557_vm1, %v7660_v24, 0.0 }
0x1322   : > { %v7662_v36 = vpop.eup %7661 }
0x1323   : > { %v3700_v41 = vsel %vm557_vm1, %v7662_v36, 0.0 }
0x132c   : > { %7455 = vrot.lane.b32.xlu1 %v8858_v27, %s7783_s28 }
0x1330   : > { %7460 = vrot.lane.b32.xlu1 %v8731_v50, %s7784_s29 }
0x1332   : > { %7450 = vrot.lane.b32.xlu0 %v8866_v10, %s7783_s28 }
0x1334   : > { %7465 = vrot.lane.b32.xlu1 %v8729_v58, %s7784_s29 }
0x1351   : > { %3698 = vadd.xlane.f32.xlu0 %v3697_v32 }
0x1358   : > { %3701 = vadd.xlane.f32.xlu1 %v3700_v41 }
0x1367   : > { %3824 = vrot.lane.b32.xlu0 %v8724_v48, %s7784_s29 }
0x1369   : > { %3826 = vrot.lane.b32.xlu1 %v8741_v52, %s7784_s29 }
0x136b   : > { %3828 = vrot.lane.b32.xlu0 %v8743_v38, %s7784_s29 }
0x136d   : > { %3830 = vrot.lane.b32.xlu1 %v8749_v43, %s7784_s29 }
0x13a8   : > { %v3696_v19 = vpop.xlane.xlu1 %3695 }
0x13a9   : > { %v3693_v20 = vpop.xlane.xlu0 %3692 }
0x13aa   : > { %7663 = vrcp.f32 %v3693_v20 }
0x13ab   : > { %7665 = vrcp.f32 %v3696_v19 }
0x13ac   : > { %v7456_v54 = vpop.permute.xlu1 %7455 }
0x13ad   : > { %v7451_v47 = vpop.permute.xlu0 %7450  ;;  %v7458_v12 = vunpack.i.h.bf16 %v7456_v54  ;;  %v7457_v53 = vunpack.i.l.bf16 %v7456_v54 }
0x13ae   : > { %v7453_v7 = vunpack.i.h.bf16 %v7451_v47  ;;  %v7452_v56 = vunpack.i.l.bf16 %v7451_v47 }
0x13af   : > { %v7274_v6 = vpack.c.bf16 %v7458_v12, %v7457_v53 }
0x13b0   : > { %v7270_v59 = vpack.c.bf16 %v7453_v7, %v7452_v56  ;;  %v7461_v3 = vpop.permute.xlu1 %7460 }
0x13b1   : > { %v7463_v13 = vunpack.i.h.bf16 %v7461_v3  ;;  %v7462_v15 = vunpack.i.l.bf16 %v7461_v3 }
0x13b2   : > { %7271 = vmatprep.subr.bf16.mxu0 %v7270_v59 }
0x13b3   : > { %7273 = vmatpush3.bf16.msra.mxu0 %v7270_v59  ;;  %v7278_v21 = vpack.c.bf16 %v7463_v13, %v7462_v15 }
0x13b4   : > { %v7664_v16 = vpop.eup %7663  ;;  %7275 = vmatprep.subr.bf16.mxu0 %v7274_v6  ;;  %v7466_v49 = vpop.permute.xlu1 %7465 }
0x13b5   : > { %v7666_v17 = vpop.eup %7665  ;;  %v3707_v18 = vmul.f32 %v7664_v16, %v7658_v9  ;;  %v7468_v28 = vunpack.i.h.bf16 %v7466_v49  ;;  %v7467_v29 = vunpack.i.l.bf16 %v7466_v49 }
0x13b6   : > { %v3708_v51 = vmul.f32 %v7666_v17, %v7656_v25 }
0x13b7   : > { %7277 = vmatpush3.bf16.msra.mxu0 %v7274_v6  ;;  %6934 = vmatprep.mubr.msk.f32.mxu0 %vm557_vm1, %v3707_v18  ;;  %v7284_v30 = vpack.c.bf16 %v7468_v28, %v7467_v29 }
0x13b8   : > { %7280 = vmatprep.subr.msk.bf16.mxu0 %vm7951_vm3, %v7278_v21 }
0x13ba   : > { %6935 = vmatmul.mubr.msk.f32.vlgmr.msra.gmra.mrb[76].mxu0 %vm557_vm1, %v3708_v51 }
0x13c0   : > { %7283 = vmatpush3.bf16.xpose.msk.msra.mxu0 %vm7951_vm3, %v7278_v21 }
0x13c1   : > { %7286 = vmatprep.subr.msk.bf16.mxu0 %vm7951_vm3, %v7284_v30 }
0x13c8   : > { %7289 = vmatpush3.bf16.xpose.msk.msra.mxu0 %vm7951_vm3, %v7284_v30 }
0x13de   : > { %v3699_v39 = vpop.xlane.xlu0 %3698 }
0x13df   : > { %7667 = vrcp.f32 %v3699_v39 }
0x13e2   : > { %v3825_v25 = vpop.permute.xlu0 %3824 }
0x13e5   : > { %v3702_v45 = vpop.xlane.xlu1 %3701 }
0x13e6   : > { %7669 = vrcp.f32 %v3702_v45  ;;  %v3829_v8 = vpop.permute.xlu0 %3828 }
0x13e9   : > { %v7668_v42 = vpop.eup %7667  ;;  %v3827_v26 = vpop.permute.xlu1 %3826 }
0x13ea   : > { %v3709_v46 = vmul.f32 %v7668_v42, %v7660_v24 }
0x13ec   : > { %6937 = vmatprep.mubr.msk.f32.mxu0 %vm557_vm1, %v3709_v46 }
0x13ed   : > { %v3831_v0 = vpop.permute.xlu1 %3830 }
0x13f0   : > { %v7670_v34 = vpop.eup %7669 }
0x13f1   : > { %v3710_v9 = vmul.f32 %v7670_v34, %v7662_v36 }
0x13f3   : > { %6938 = vmatmul.mubr.msk.f32.gmra.mrb[78].mxu0 %vm557_vm1, %v3710_v9 }
0x13f4   : > { %6948 = vmatprep.mubr.msk.f32.mxu0 %vm751_vm2, %v3825_v25 }
0x13f7   : > { %6949 = vmatmul.mubr.msk.f32.vlgmr.msra.gmra.mrb[80].mxu0 %vm751_vm2, %v3827_v26 }
0x13f8   : > { %6951 = vmatprep.mubr.msk.f32.mxu0 %vm751_vm2, %v3829_v8 }
0x13fb   : > { %6952 = vmatmul.mubr.msk.f32.gmra.mrb[82].mxu0 %vm751_vm2, %v3831_v0 }
0x148d   : > { %v8898_v61 = vpop.f32.mrb[76].mxu0 }
0x148e   : > { %v8900_v44 = vpop.f32.mrb[77].mxu0 }
0x14c6   : > { %v8904_v14 = vpop.f32.mrb[78].mxu0 }
0x14c7   : > { %v8906_v22 = vpop.f32.mrb[79].mxu0 }
0x14ca   : > { %v6950_v32 = vpop.f32.mrb[80].mxu0 }
0x14cb   : > { %v3928_v36 = vadd.f32 %v8768_v57, %v6950_v32  ;;  %v3922_v41 = vpop.f32.mrb[81].mxu0 }
0x14cc   : > { %v3923_v19 = vadd.f32 %v8774_v62, %v3922_v41 }
0x14cd   : > { %v3944_v20 = vsel %vm557_vm1, %v3928_v36, -inf }
0x14ce   : > { %3945 = vmax.xlane.f32.xlu1 %v3944_v20  ;;  %v6953_v54 = vpop.f32.mrb[82].mxu0  ;;  %v3941_v47 = vsel %vm557_vm1, %v3923_v19, -inf }
0x14cf   : > { %v3932_v12 = vpop.f32.mrb[83].mxu0  ;;  %3942 = vmax.xlane.f32.xlu0 %v3941_v47  ;;  %v3938_v7 = vadd.f32 %v8782_v55, %v6953_v54 }
0x14d0   : > { %v3933_v53 = vadd.f32 %v8788_v23, %v3932_v12 }
0x14d1   : > { %v3950_v59 = vsel %vm557_vm1, %v3938_v7, -inf }
0x14d2   : > { %v3947_v56 = vsel %vm557_vm1, %v3933_v53, -inf }
0x14d3   : > { %3948 = vmax.xlane.f32.xlu0 %v3947_v56 }
0x14d7   : > { %3951 = vmax.xlane.f32.xlu0 %v3950_v59 }
0x155b   : > { %v3946_v3 = vpop.xlane.xlu1 %3945 }
0x155c   : > { %v3954_v6 = vsub.f32 %v3928_v36, %v3946_v3  ;;  %v3943_v13 = vpop.xlane.xlu0 %3942 }
0x155d   : > { %v3953_v15 = vsub.f32 %v3923_v19, %v3943_v13 }
0x155e   : > { %v3959_v16 = vmul.f32 1.442695, %v3954_v6 }
0x155f   : > { %v3957_v17 = vmul.f32 1.442695, %v3953_v15 }
0x1560   : > { %7671 = vpow2.f32 %v3959_v16  ;;  %v3949_v28 = vpop.xlane.xlu0 %3948 }
0x1561   : > { %7673 = vpow2.f32 %v3957_v17  ;;  %v3955_v29 = vsub.f32 %v3933_v53, %v3949_v28 }
0x1563   : > { %v3961_v30 = vmul.f32 1.442695, %v3955_v29  ;;  %v7731_v29 = vld [vmem:[%s9559_s3] sm:$0xff] }
0x1564   : > { %v3952_v39 = vpop.xlane.xlu0 %3951 }
0x1565   : > { %v3956_v45 = vsub.f32 %v3938_v7, %v3952_v39  ;;  %7675 = vpow2.f32 %v3961_v30  ;;  %v7552_v30 = vld [vmem:[%s7868_s24 + $0xb8] sm:$0xff]   ;;  %v7733_v39 = vld [vmem:[%s9559_s3 + $0x10] sm:$0xff] }
0x1567   : > { %v3963_v42 = vmul.f32 1.442695, %v3956_v45  ;;  %v7735_v45 = vld [vmem:[%s9559_s3 + $0x20] sm:$0xff] }
0x1569   : > { %7677 = vpow2.f32 %v3963_v42  ;;  %v7736_v42 = vld [vmem:[%s9559_s3 + $0x28] sm:$0xff] }
0x156a   : > { %v7672_v18 = vpop.eup %7671 }
0x156b   : > { %v7674_v21 = vpop.eup %7673  ;;  %v3968_v51 = vsel %vm557_vm1, %v7672_v18, 0.0 }
0x156c   : > { %3969 = vadd.xlane.f32.xlu1 %v3968_v51  ;;  %v3965_v49 = vsel %vm557_vm1, %v7674_v21, 0.0 }
0x156d   : > { %3966 = vadd.xlane.f32.xlu0 %v3965_v49  ;;  %v7551_v49 = vld [vmem:[%s7868_s24 + $0xb0] sm:$0xff]  }
0x156f   : > { %v7676_v46 = vpop.eup %7675 }
0x1570   : > { %v3971_v34 = vsel %vm557_vm1, %v7676_v46, 0.0 }
0x1573   : > { %v7678_v25 = vpop.eup %7677 }
0x157d   : > { %7475 = vrot.lane.b32.xlu1 %v8858_v27, %s7784_s29 }
0x1581   : > { %7480 = vrot.lane.b32.xlu1 %v8731_v50, %s7785_s30  ;;  %v3974_v50 = vsel %vm557_vm1, %v7678_v25, 0.0 }
0x1583   : > { %7470 = vrot.lane.b32.xlu0 %v8866_v10, %s7784_s29 }
0x1585   : > { %7485 = vrot.lane.b32.xlu1 %v8729_v58, %s7785_s30 }
0x15a2   : > { %3972 = vadd.xlane.f32.xlu0 %v3971_v34  ;;  %v7738_v34 = vld [vmem:[%s9559_s3 + $0x38] sm:$0xff] }
0x15a9   : > { %3975 = vadd.xlane.f32.xlu1 %v3974_v50  ;;  %v7740_v50 = vld [vmem:[%s9559_s3 + $0x48] sm:$0xff] }
0x15b8   : > { %4094 = vrot.lane.b32.xlu0 %v8724_v48, %s7785_s30 }
0x15ba   : > { %4096 = vrot.lane.b32.xlu1 %v8741_v52, %s7785_s30 }
0x15bc   : > { %4098 = vrot.lane.b32.xlu0 %v8743_v38, %s7785_s30 }
0x15be   : > { %4100 = vrot.lane.b32.xlu1 %v8749_v43, %s7785_s30 }
0x15f9   : > { %v3970_v58 = vpop.xlane.xlu1 %3969 }
0x15fa   : > { %v3967_v9 = vpop.xlane.xlu0 %3966 }
0x15fb   : > { %7679 = vrcp.f32 %v3967_v9  ;;  %v7742_v9 = vld [vmem:[%s9559_s3 + $0x58] sm:$0xff] }
0x15fc   : > { %7681 = vrcp.f32 %v3970_v58  ;;  %v7741_v58 = vld [vmem:[%s9559_s3 + $0x50] sm:$0xff] }
0x15fd   : > { %v7476_v26 = vpop.permute.xlu1 %7475 }
0x15fe   : > { %v7471_v8 = vpop.permute.xlu0 %7470  ;;  %v7478_v0 = vunpack.i.h.bf16 %v7476_v26  ;;  %v7477_v32 = vunpack.i.l.bf16 %v7476_v26  ;;  %v7743_v26 = vld [vmem:[%s9559_s3 + $0x60] sm:$0xff] }
0x15ff   : > { %v7473_v36 = vunpack.i.h.bf16 %v7471_v8  ;;  %v7472_v41 = vunpack.i.l.bf16 %v7471_v8  ;;  %v7744_v8 = vld [vmem:[%s9559_s3 + $0x68] sm:$0xff] }
0x1600   : > { %v7294_v20 = vpack.c.bf16 %v7478_v0, %v7477_v32  ;;  %v7745_v0 = vld [vmem:[%s9559_s3 + $0x70] sm:$0xff]  ;;  %v7746_v32 = vld [vmem:[%s9559_s3 + $0x78] sm:$0xff] }
0x1601   : > { %v7290_v48 = vpack.c.bf16 %v7473_v36, %v7472_v41  ;;  %v7481_v19 = vpop.permute.xlu1 %7480  ;;  %v7747_v36 = vld [vmem:[%s9559_s3 + $0x80] sm:$0xff]  ;;  %v7748_v41 = vld [vmem:[%s9559_s3 + $0x88] sm:$0xff] }
0x1602   : > { %v7483_v52 = vunpack.i.h.bf16 %v7481_v19  ;;  %v7482_v54 = vunpack.i.l.bf16 %v7481_v19  ;;  %v7750_v19 = vld [vmem:[%s9559_s3 + $0x98] sm:$0xff] }
0x1603   : > { %7291 = vmatprep.subr.bf16.mxu1 %v7290_v48 }
0x1604   : > { %7293 = vmatpush3.bf16.msra.mxu1 %v7290_v48  ;;  %v7298_v12 = vpack.c.bf16 %v7483_v52, %v7482_v54  ;;  %v7749_v48 = vld [vmem:[%s9559_s3 + $0x90] sm:$0xff]  ;;  %v7752_v52 = vld [vmem:[%s9559_s3 + $0xa8] sm:$0xff] }
0x1605   : > { %v7680_v38 = vpop.eup %7679  ;;  %7295 = vmatprep.subr.bf16.mxu1 %v7294_v20  ;;  %v7486_v7 = vpop.permute.xlu1 %7485  ;;  %v7753_v54 = vld [vmem:[%s9559_s3 + $0xb0] sm:$0xff] }
0x1606   : > { %v7682_v43 = vpop.eup %7681  ;;  %v3981_v47 = vmul.f32 %v7680_v38, %v7674_v21  ;;  %v7488_v56 = vunpack.i.h.bf16 %v7486_v7  ;;  %v7487_v59 = vunpack.i.l.bf16 %v7486_v7  ;;  %v7754_v38 = vld [vmem:[%s9559_s3 + $0xb8] sm:$0xff]  ;;  %v7759_v7 = vld [vmem:[%s9559_s3 + $0xe0] sm:$0xff] }
0x1607   : > { %v3982_v53 = vmul.f32 %v7682_v43, %v7672_v18  ;;  %v7755_v43 = vld [vmem:[%s9559_s3 + $0xc0] sm:$0xff] }
0x1608   : > { %7297 = vmatpush3.bf16.msra.mxu1 %v7294_v20  ;;  %6962 = vmatprep.mubr.msk.f32.mxu1 %vm557_vm1, %v3981_v47  ;;  %v7304_v3 = vpack.c.bf16 %v7488_v56, %v7487_v59  ;;  %v7751_v20 = vld [vmem:[%s9559_s3 + $0xa0] sm:$0xff]  ;;  %v7756_v47 = vld [vmem:[%s9559_s3 + $0xc8] sm:$0xff]  ;;  %v7761_v59 = vld [vmem:[%s9559_s3 + $0xf0] sm:$0xff] }
0x1609   : > { %7300 = vmatprep.subr.msk.bf16.mxu1 %vm7951_vm3, %v7298_v12  ;;  %v7760_v56 = vld [vmem:[%s9559_s3 + $0xe8] sm:$0xff] }
0x160b   : > { %6963 = vmatmul.mubr.msk.f32.vlgmr.msra.gmra.mrb[76].mxu1 %vm557_vm1, %v3982_v53  ;;  %v7758_v53 = vld [vmem:[%s9559_s3 + $0xd8] sm:$0xff] }
0x1611   : > { %7303 = vmatpush3.bf16.xpose.msk.msra.mxu1 %vm7951_vm3, %v7298_v12  ;;  %v7757_v12 = vld [vmem:[%s9559_s3 + $0xd0] sm:$0xff] }
0x1612   : > { %7306 = vmatprep.subr.msk.bf16.mxu1 %vm7951_vm3, %v7304_v3 }
0x1619   : > { %7309 = vmatpush3.bf16.xpose.msk.msra.mxu1 %vm7951_vm3, %v7304_v3  ;;  %v7762_v3 = vld [vmem:[%s9559_s3 + $0xf8] sm:$0xff] }
0x161a   : > { %7319 = vmatprep.subr.bf16.mxu1 %v8757_v4 }
0x162f   : > { %v3973_v6 = vpop.xlane.xlu0 %3972 }
0x1630   : > { %7683 = vrcp.f32 %v3973_v6  ;;  %v7763_v6 = vld [vmem:[%s9559_s3 + $0x100] sm:$0xff] }
0x1633   : > { %v4095_v18 = vpop.permute.xlu0 %4094 }
0x1636   : > { %v3976_v13 = vpop.xlane.xlu1 %3975 }
0x1637   : > { %7685 = vrcp.f32 %v3976_v13  ;;  %v4099_v31 = vpop.permute.xlu0 %4098  ;;  %v7764_v13 = vld [vmem:[%s9559_s3 + $0x108] sm:$0xff] }
0x163a   : > { %v7684_v15 = vpop.eup %7683  ;;  %v4097_v51 = vpop.permute.xlu1 %4096 }
0x163b   : > { %v3983_v16 = vmul.f32 %v7684_v15, %v7676_v46  ;;  %v7737_v46 = vld [vmem:[%s9559_s3 + $0x30] sm:$0xff] }
0x163c   : > { %v7765_v15 = vld [vmem:[%s9559_s3 + $0x110] sm:$0xff] }
0x163d   : > { %6965 = vmatprep.mubr.msk.f32.mxu1 %vm557_vm1, %v3983_v16  ;;  %v5014_v16 = vpack.c.bf16 %v8678_v40, %v8676_v5 }
0x163e   : > { %v4101_v28 = vpop.permute.xlu1 %4100 }
0x1641   : > { %v7686_v17 = vpop.eup %7685 }
0x1642   : > { %v3984_v21 = vmul.f32 %v7686_v17, %v7678_v25  ;;  %v7739_v25 = vld [vmem:[%s9559_s3 + $0x40] sm:$0xff]  ;;  %v7766_v17 = vld [vmem:[%s9559_s3 + $0x118] sm:$0xff] }
0x1644   : > { %6966 = vmatmul.mubr.msk.f32.gmra.mrb[78].mxu1 %vm557_vm1, %v3984_v21 }
0x1645   : > { %6976 = vmatprep.mubr.msk.f32.mxu1 %vm751_vm2, %v4095_v18  ;;  %v5015_v18 = vpack.c.bf16 %v8702_v11, %v8698_v37 }
0x1648   : > { %6977 = vmatmul.mubr.msk.f32.vlgmr.msra.gmra.mrb[80].mxu1 %vm751_vm2, %v4097_v51 }
0x1649   : > { %6979 = vmatprep.mubr.msk.f32.mxu1 %vm751_vm2, %v4099_v31  ;;  %7321 = vmatpush3.bf16.msra.mxu1 %v8757_v4  ;;  %v7732_v4 = vld [vmem:[%s9559_s3 + $0x8] sm:$0xff] }
0x164a   : > { %7323 = vmatprep.subr.bf16.mxu1 %v8761_v33 }
0x164c   : > { %6980 = vmatmul.mubr.msk.f32.gmra.mrb[82].mxu1 %vm751_vm2, %v4101_v28 }
0x164d   : > { %7325 = vmatpush3.bf16.msra.mxu1 %v8761_v33  ;;  %7012 = vmatprep.mubr.msk.f32.mxu1 %vm557_vm1, %v7731_v29  ;;  %v7734_v33 = vld [vmem:[%s9559_s3 + $0x18] sm:$0xff] }
0x164e   : > { %7106 = vmatprep.subr.bf16.mxu1 %v7551_v49 }
0x1650   : > { %7013 = vmatmul.mubr.msk.f32.vlgmr.msra.gmra.mrb[84].mxu1 %vm557_vm1, %v7732_v4 }
0x1651   : > { %7015 = vmatprep.mubr.msk.f32.mxu1 %vm557_vm1, %v7733_v39  ;;  %7107 = vmatpush3.bf16.msra.mxu1 %v7551_v49 }
0x1652   : > { %7108 = vmatprep.subr.bf16.mxu1 %v7552_v30 }
0x1654   : > { %7016 = vmatmul.mubr.msk.f32.gmra.mrb[86].mxu1 %vm557_vm1, %v7734_v33 }
0x1655   : > { %7018 = vmatprep.mubr.msk.f32.mxu1 %vm557_vm1, %v7735_v45  ;;  %7109 = vmatpush3.bf16.msra.mxu1 %v7552_v30 }
0x1658   : > { %7019 = vmatmul.mubr.msk.f32.gmra.mrb[88].mxu1 %vm557_vm1, %v7736_v42 }
0x1659   : > { %7021 = vmatprep.mubr.msk.f32.mxu1 %vm557_vm1, %v7737_v46 }
0x165c   : > { %7022 = vmatmul.mubr.msk.f32.gmra.mrb[90].mxu1 %vm557_vm1, %v7738_v34 }
0x165d   : > { %7024 = vmatprep.mubr.msk.f32.mxu1 %vm557_vm1, %v7739_v25 }
0x1660   : > { %7025 = vmatmul.mubr.msk.f32.gmra.mrb[92].mxu1 %vm557_vm1, %v7740_v50 }
0x1661   : > { %7027 = vmatprep.mubr.msk.f32.mxu1 %vm557_vm1, %v7741_v58 }
0x1664   : > { %7028 = vmatmul.mubr.msk.f32.gmra.mrb[94].mxu1 %vm557_vm1, %v7742_v9 }
0x1665   : > { %7030 = vmatprep.mubr.msk.f32.mxu1 %vm557_vm1, %v7743_v26 }
0x1668   : > { %7031 = vmatmul.mubr.msk.f32.gmra.mrb[96].mxu1 %vm557_vm1, %v7744_v8 }
0x1669   : > { %7033 = vmatprep.mubr.msk.f32.mxu1 %vm557_vm1, %v7745_v0 }
0x166c   : > { %7034 = vmatmul.mubr.msk.f32.gmra.mrb[98].mxu1 %vm557_vm1, %v7746_v32 }
0x166d   : > { %7036 = vmatprep.mubr.msk.f32.mxu1 %vm557_vm1, %v7747_v36 }
0x1670   : > { %7037 = vmatmul.mubr.msk.f32.gmra.mrb[100].mxu1 %vm557_vm1, %v7748_v41 }
0x1671   : > { %7039 = vmatprep.mubr.msk.f32.mxu1 %vm557_vm1, %v7749_v48 }
0x1674   : > { %7040 = vmatmul.mubr.msk.f32.gmra.mrb[102].mxu1 %vm557_vm1, %v7750_v19 }
0x1675   : > { %7042 = vmatprep.mubr.msk.f32.mxu1 %vm557_vm1, %v7751_v20 }
0x1678   : > { %7043 = vmatmul.mubr.msk.f32.gmra.mrb[104].mxu1 %vm557_vm1, %v7752_v52 }
0x1679   : > { %7045 = vmatprep.mubr.msk.f32.mxu1 %vm557_vm1, %v7753_v54 }
0x167c   : > { %7046 = vmatmul.mubr.msk.f32.gmra.mrb[106].mxu1 %vm557_vm1, %v7754_v38 }
0x167d   : > { %7048 = vmatprep.mubr.msk.f32.mxu1 %vm557_vm1, %v7755_v43 }
0x1680   : > { %7049 = vmatmul.mubr.msk.f32.gmra.mrb[108].mxu1 %vm557_vm1, %v7756_v47 }
0x1681   : > { %7051 = vmatprep.mubr.msk.f32.mxu1 %vm557_vm1, %v7757_v12 }
0x1684   : > { %7052 = vmatmul.mubr.msk.f32.gmra.mrb[110].mxu1 %vm557_vm1, %v7758_v53 }
0x1685   : > { %7054 = vmatprep.mubr.msk.f32.mxu1 %vm557_vm1, %v7759_v7 }
0x1688   : > { %7055 = vmatmul.mubr.msk.f32.gmra.mrb[112].mxu1 %vm557_vm1, %v7760_v56 }
0x1689   : > { %7057 = vmatprep.mubr.msk.f32.mxu1 %vm557_vm1, %v7761_v59 }
0x168c   : > { %7058 = vmatmul.mubr.msk.f32.gmra.mrb[114].mxu1 %vm557_vm1, %v7762_v3 }
0x168d   : > { %7060 = vmatprep.mubr.msk.f32.mxu1 %vm557_vm1, %v7763_v6 }
0x1690   : > { %7061 = vmatmul.mubr.msk.f32.gmra.mrb[116].mxu1 %vm557_vm1, %v7764_v13 }
0x1691   : > { %7063 = vmatprep.mubr.msk.f32.mxu1 %vm557_vm1, %v7765_v15 }
0x1694   : > { %7064 = vmatmul.mubr.msk.f32.gmra.mrb[118].mxu1 %vm557_vm1, %v7766_v17 }
0x1695   : > { %7110 = vmatprep.mubr.msk.bf16.mxu1 %vm557_vm1, %v5014_v16 }
0x1698   : > { %7111 = vmatmul.mubr.msk.bf16.vlgmr.msra.gmra.mrb[120].mxu1 %vm557_vm1, %v5015_v18 }
0x16de   : > { %v9110_v21 = vpop.f32.mrb[76].mxu1 }
0x16df   : > { %v9112_v51 = vpop.f32.mrb[77].mxu1 }
0x1717   : > { %v9116_v49 = vpop.f32.mrb[78].mxu1 }
0x1718   : > { %v9118_v28 = vpop.f32.mrb[79].mxu1 }
0x171b   : > { %v6978_v30 = vpop.f32.mrb[80].mxu1 }
0x171c   : > { %v9123_v4 = vadd.f32 %v8768_v57, %v6978_v30  ;;  %v4192_v39 = vpop.f32.mrb[81].mxu1 }
0x171d   : > { %v9126_v33 = vadd.f32 %v8774_v62, %v4192_v39 }
0x171e   : > { %v4214_v45 = vsel %vm557_vm1, %v9123_v4, -inf }
0x171f   : > { %4215 = vmax.xlane.f32.xlu1 %v4214_v45  ;;  %v6981_v42 = vpop.f32.mrb[82].mxu1  ;;  %v4211_v46 = vsel %vm557_vm1, %v9126_v33, -inf }
0x1720   : > { %v4202_v34 = vpop.f32.mrb[83].mxu1  ;;  %4212 = vmax.xlane.f32.xlu0 %v4211_v46  ;;  %v9136_v57 = vadd.f32 %v8782_v55, %v6981_v42 }
0x1721   : > { %v9133_v25 = vadd.f32 %v8788_v23, %v4202_v34 }
0x1722   : > { %v4220_v26 = vsel %vm557_vm1, %v9136_v57, -inf }
0x1723   : > { %v4217_v62 = vsel %vm557_vm1, %v9133_v25, -inf  ;;  %v9140_v50 = vpop.f32.mrb[84].mxu1 }
0x1724   : > { %4218 = vmax.xlane.f32.xlu0 %v4217_v62  ;;  %v9142_v58 = vpop.f32.mrb[85].mxu1 }
0x1727   : > { %v9148_v8 = vpop.f32.mrb[86].mxu1 }
0x1728   : > { %4221 = vmax.xlane.f32.xlu0 %v4220_v26  ;;  %v9150_v23 = vpop.f32.mrb[87].mxu1 }
0x172b   : > { %v9154_v0 = vpop.f32.mrb[88].mxu1 }
0x172c   : > { %v9156_v32 = vpop.f32.mrb[89].mxu1 }
0x172f   : > { %v9160_v41 = vpop.f32.mrb[90].mxu1 }
0x1730   : > { %v9162_v48 = vpop.f32.mrb[91].mxu1 }
0x1733   : > { %v9166_v20 = vpop.f32.mrb[92].mxu1 }
0x1734   : > { %v9168_v52 = vpop.f32.mrb[93].mxu1 }
0x1737   : > { %v9172_v38 = vpop.f32.mrb[94].mxu1 }
0x1738   : > { %v9174_v43 = vpop.f32.mrb[95].mxu1 }
0x173b   : > { %v9178_v12 = vpop.f32.mrb[96].mxu1 }
0x173c   : > { %v9180_v53 = vpop.f32.mrb[97].mxu1 }
0x173f   : > { %v9184_v56 = vpop.f32.mrb[98].mxu1 }
0x1740   : > { %v9186_v59 = vpop.f32.mrb[99].mxu1 }
0x1743   : > { %v9190_v6 = vpop.f32.mrb[100].mxu1 }
0x1744   : > { %v9192_v13 = vpop.f32.mrb[101].mxu1 }
0x1747   : > { %v9196_v16 = vpop.f32.mrb[102].mxu1 }
0x1748   : > { %v9198_v17 = vpop.f32.mrb[103].mxu1 }
0x174b   : > { %v9202_v30 = vpop.f32.mrb[104].mxu1 }
0x174c   : > { %v9204_v39 = vpop.f32.mrb[105].mxu1 }
0x174f   : > { %v9208_v42 = vpop.f32.mrb[106].mxu1 }
0x1750   : > { %v9210_v46 = vpop.f32.mrb[107].mxu1 }
0x1753   : > { %v9214_v62 = vpop.f32.mrb[108].mxu1 }
0x1754   : > { %v9216_v26 = vpop.f32.mrb[109].mxu1 }
0x1757   : > { %v9220_v15 = vpop.f32.mrb[110].mxu1 }
0x1758   : > { %v9222_v3 = vpop.f32.mrb[111].mxu1 }
0x175b   : > { %v9226_v7 = vpop.f32.mrb[112].mxu1 }
0x175c   : > { %v9228_v47 = vpop.f32.mrb[113].mxu1 }
0x175f   : > { %v9232_v54 = vpop.f32.mrb[114].mxu1 }
0x1760   : > { %v9234_v19 = vpop.f32.mrb[115].mxu1 }
0x1763   : > { %v9238_v36 = vpop.f32.mrb[116].mxu1 }
0x1764   : > { %9595 = vst [vmem:[#allocation7_spill] sm:$0xff] %v9238_v36  ;;  %v9240_v55 = vpop.f32.mrb[117].mxu1 }
0x1765   : > { %9596 = vst [vmem:[#allocation8_spill] sm:$0xff] %v9240_v55 }
0x1767   : > { %v9244_v9 = vpop.f32.mrb[118].mxu1 }
0x1768   : > { %9597 = vst [vmem:[#allocation9_spill] sm:$0xff] %v9244_v9  ;;  %v9246_v29 = vpop.f32.mrb[119].mxu1 }
0x1769   : > { %9598 = vst [vmem:[#allocation10_spill] sm:$0xff] %v9246_v29 }
0x176b   : > { %v9250_v24 = vpop.f32.mrb[120].mxu1 }
0x176c   : > { %9599 = vst [vmem:[#allocation11_spill] sm:$0xff] %v9250_v24  ;;  %v9252_v31 = vpop.f32.mrb[121].mxu1 }
0x176d   : > { %9600 = vst [vmem:[#allocation12_spill] sm:$0xff] %v9252_v31  ;;  %v9254_v35 = vpop.f32.mrb[122].mxu1 }
0x176e   : > { %9601 = vst [vmem:[#allocation13_spill] sm:$0xff] %v9254_v35  ;;  %v9256_v18 = vpop.f32.mrb[123].mxu1 }
0x176f   : > { %9602 = vst [vmem:[#allocation14_spill] sm:$0xff] %v9256_v18 }
0x17ac   : > { %v4216_v11 = vpop.xlane.xlu1 %4215 }
0x17ad   : > { %v4224_v40 = vsub.f32 %v9123_v4, %v4216_v11  ;;  %v4213_v37 = vpop.xlane.xlu0 %4212 }
0x17ae   : > { %v4223_v45 = vsub.f32 %v9126_v33, %v4213_v37 }
0x17af   : > { %v4229_v5 = vmul.f32 1.442695, %v4224_v40 }
0x17b0   : > { %v4227_v55 = vmul.f32 1.442695, %v4223_v45 }
0x17b1   : > { %7687 = vpow2.f32 %v4229_v5  ;;  %v4219_v36 = vpop.xlane.xlu0 %4218 }
0x17b2   : > { %7689 = vpow2.f32 %v4227_v55  ;;  %v4225_v34 = vsub.f32 %v9133_v25, %v4219_v36 }
0x17b4   : > { %v4231_v24 = vmul.f32 1.442695, %v4225_v34 }
0x17b5   : > { %v4222_v29 = vpop.xlane.xlu0 %4221 }
0x17b6   : > { %7691 = vpow2.f32 %v4231_v24  ;;  %v4226_v35 = vsub.f32 %v9136_v57, %v4222_v29  ;;  %v9604_v24 = vpack.i.bf16 %v9110_v21, %v9112_v51 }
0x17b8   : > { %v4233_v31 = vmul.f32 1.442695, %v4226_v35  ;;  %v9603_v35 = vpack.i.bf16 %v8898_v61, %v8900_v44 }
0x17ba   : > { %7693 = vpow2.f32 %v4233_v31  ;;  %v9605_v31 = vpack.i.bf16 %v8904_v14, %v8906_v22 }
0x17bb   : > { %v7688_v18 = vpop.eup %7687 }
0x17bc   : > { %v7690_v9 = vpop.eup %7689  ;;  %v4238_v11 = vsel %vm557_vm1, %v7688_v18, 0.0 }
0x17bd   : > { %4239 = vadd.xlane.f32.xlu1 %v4238_v11  ;;  %v4235_v40 = vsel %vm557_vm1, %v7690_v9, 0.0 }
0x17be   : > { %4236 = vadd.xlane.f32.xlu0 %v4235_v40 }
0x17c0   : > { %v7692_v5 = vpop.eup %7691 }
0x17c1   : > { %v4241_v37 = vsel %vm557_vm1, %v7692_v5, 0.0 }
0x17c2   : > { %4242 = vadd.xlane.f32.xlu0 %v4241_v37 }
0x17c4   : > { %v7694_v4 = vpop.eup %7693 }
0x17c5   : > { %v4244_v33 = vsel %vm557_vm1, %v7694_v4, 0.0 }
0x17c6   : > { %4245 = vadd.xlane.f32.xlu1 %v4244_v33  ;;  %v7553_v33 = vld [vmem:[%s7868_s24 + $0x70] sm:$0xff]  }
0x17d7   : > { %7495 = vrot.lane.b32.xlu1 %v8858_v27, %s7785_s30  ;;  %v9606_v27 = vpack.i.bf16 %v9116_v49, %v9118_v28 }
0x17d8   : > { %7490 = vrot.lane.b32.xlu0 %v8866_v10, %s7785_s30  ;;  %s9607_s30 = smov 24  }
0x17db   : > { %7500 = vrot.lane.b32.xlu1 %v9603_v35, %s7786_s17  ;;  %v7554_v35 = vld [vmem:[%s7868_s24 + $0x78] sm:$0xff]  }
0x17dc   : > { %7510 = vrot.lane.b32.xlu0 %v9604_v24, %s7787_s13  ;;  %v7555_v24 = vld [vmem:[%s7868_s24 + $0xa0] sm:$0xff]  }
0x17df   : > { %7505 = vrot.lane.b32.xlu1 %v9605_v31, %s7786_s17  ;;  %s9638_s17 = scalar_lea.vmem %s9564_s8, %s7861_s19 }
0x17e3   : > { %7515 = vrot.lane.b32.xlu1 %v9606_v27, %s7787_s13 }
0x184a   : > { %v4240_v29 = vpop.xlane.xlu1 %4239 }
0x184b   : > { %v4237_v10 = vpop.xlane.xlu0 %4236 }
0x184c   : > { %7695 = vrcp.f32 %v4237_v10 }
0x184d   : > { %7697 = vrcp.f32 %v4240_v29 }
0x184f   : > { %v4243_v61 = vpop.xlane.xlu0 %4242 }
0x1850   : > { %7699 = vrcp.f32 %v4243_v61 }
0x1853   : > { %v4246_v44 = vpop.xlane.xlu1 %4245  ;;  %v7491_v25 = vpop.permute.xlu0 %7490 }
0x1854   : > { %v7493_v21 = vunpack.i.h.bf16 %v7491_v25  ;;  %v7492_v51 = vunpack.i.l.bf16 %v7491_v25  ;;  %7701 = vrcp.f32 %v4246_v44 }
0x1856   : > { %v7696_v57 = vpop.eup %7695  ;;  %v7310_v55 = vpack.c.bf16 %v7493_v21, %v7492_v51 }
0x1857   : > { %v7496_v14 = vpop.permute.xlu1 %7495  ;;  %v4251_v22 = vmul.f32 %v7696_v57, %v7690_v9  ;;  %v7698_v28 = vpop.eup %7697 }
0x1858   : > { %v7498_v36 = vunpack.i.h.bf16 %v7496_v14  ;;  %v7497_v45 = vunpack.i.l.bf16 %v7496_v14  ;;  %7311 = vmatprep.subr.bf16.mxu0 %v7310_v55  ;;  %v4252_v11 = vmul.f32 %v7698_v28, %v7688_v18  ;;  %v7511_v21 = vpop.permute.xlu0 %7510 }
0x1859   : > { %7313 = vmatpush3.bf16.msra.mxu0 %v7310_v55  ;;  %6990 = vmatprep.mubr.msk.f32.mxu0 %vm557_vm1, %v4251_v22  ;;  %v7513_v14 = vunpack.i.h.bf16 %v7511_v21  ;;  %v7512_v22 = vunpack.i.l.bf16 %v7511_v21  ;;  %v9610_v21 = vpack.c.bf16 %v9154_v0, %v9156_v32  ;;  %v9616_v0 = vpack.c.bf16 %v9190_v6, %v9192_v13  ;;  %v9628_v6 = vld [vmem:[#allocation10_spill] sm:$0xff]  ;;  %v7557_v13 = vld [vmem:[%s7868_s24 + $0xf0] sm:$0xff]  }
0x185a   : > { %v7314_v49 = vpack.c.bf16 %v7498_v36, %v7497_v45  ;;  %v7700_v34 = vpop.eup %7699  ;;  %v9617_v32 = vpack.c.bf16 %v9196_v16, %v9198_v17 }
0x185b   : > { %v4253_v37 = vmul.f32 %v7700_v34, %v7692_v5 }
0x185c   : > { %7315 = vmatprep.subr.bf16.mxu0 %v7314_v49 }
0x185d   : > { %7317 = vmatpush3.bf16.msra.mxu0 %v7314_v49 }
0x185e   : > { %v7702_v40 = vpop.eup %7701  ;;  %6996 = vmatprep.subr.bf16.mxu0 %v7553_v33 }
0x185f   : > { %v4254_v9 = vmul.f32 %v7702_v40, %v7694_v4  ;;  %v7501_v4 = vpop.permute.xlu1 %7500 }
0x1860   : > { %6991 = vmatmul.mubr.msk.f32.vlgmr.msra.gmra.mrb[84].mxu0 %vm557_vm1, %v4252_v11  ;;  %v7503_v44 = vunpack.i.h.bf16 %v7501_v4  ;;  %v7502_v25 = vunpack.i.l.bf16 %v7501_v4 }
0x1861   : > { %6993 = vmatprep.mubr.msk.f32.mxu0 %vm557_vm1, %v4253_v37  ;;  %6997 = vmatpush3.bf16.msra.mxu0 %v7553_v33 }
0x1862   : > { %6998 = vmatprep.subr.bf16.mxu0 %v7554_v35  ;;  %v4413_v51 = vsel %vm751_vm2, %v8838_v60, %v7503_v44  ;;  %v4412_v57 = vsel %vm751_vm2, %v8840_v63, %v7502_v25  ;;  %v7556_v25 = vld [vmem:[%s7868_s24 + $0xa8] sm:$0xff]  }
0x1863   : > { %v7506_v61 = vpop.permute.xlu1 %7505  ;;  %v4416_v37 = vsel %vm1868_vm4, %v4412_v57, %v7512_v22  ;;  %v9630_v57 = vld [vmem:[#allocation11_spill] sm:$0xff] }
0x1864   : > { %6994 = vmatmul.mubr.msk.f32.gmra.mrb[86].mxu0 %vm557_vm1, %v4254_v9  ;;  %v7508_v45 = vunpack.i.h.bf16 %v7506_v61  ;;  %v7507_v49 = vunpack.i.l.bf16 %v7506_v61  ;;  %v4417_v9 = vsel %vm1868_vm4, %v4413_v51, %v7513_v14  ;;  %v9631_v14 = vld [vmem:[#allocation12_spill] sm:$0xff] }
0x1865   : > { %6999 = vmatpush3.bf16.msra.mxu0 %v7554_v35 }
0x1866   : > { %7066 = vmatprep.subr.bf16.mxu0 %v7555_v24 }
0x1867   : > { %v7516_v55 = vpop.permute.xlu1 %7515 }
0x1868   : > { %v7518_v11 = vunpack.i.h.bf16 %v7516_v55  ;;  %v7517_v40 = vunpack.i.l.bf16 %v7516_v55 }
0x1933   : > { %v6992_v31 = vpop.f32.mrb[84].mxu0 }
0x1934   : > { %v4345_v27 = vpop.f32.mrb[85].mxu0 }
0x1935   : > { %v7519_v18 = vpack.i.bf16 %v6992_v31, %v4345_v27  ;;  %v4415_v31 = vsel %vm751_vm2, %v8842_v1, %v7508_v45  ;;  %v4414_v27 = vsel %vm751_vm2, %v8844_v2, %v7507_v49  ;;  %v9608_v1 = vpack.c.bf16 %v9140_v50, %v9142_v58  ;;  %v9632_v45 = vld [vmem:[#allocation13_spill] sm:$0xff] }
0x1936   : > { %v9609_v2 = vpack.c.bf16 %v9148_v8, %v9150_v23  ;;  %v9612_v50 = vpack.c.bf16 %v9166_v20, %v9168_v52  ;;  %v9613_v58 = vpack.c.bf16 %v9172_v38, %v9174_v43  ;;  %v9614_v8 = vpack.c.bf16 %v9178_v12, %v9180_v53  ;;  %v9624_v12 = vld [vmem:[#allocation7_spill] sm:$0xff]  ;;  %v9625_v53 = vld [vmem:[#allocation8_spill] sm:$0xff] }
0x1937   : > { %7520 = vrot.lane.b32.xlu0 %v7519_v18, %s9607_s30  ;;  %v6995_v5 = vpop.f32.mrb[86].mxu0  ;;  %v9615_v23 = vpack.c.bf16 %v9184_v56, %v9186_v59  ;;  %v9620_v20 = vpack.c.bf16 %v9214_v62, %v9216_v26  ;;  %v9621_v52 = vpack.c.bf16 %v9220_v15, %v9222_v3  ;;  %v9622_v38 = vpack.c.bf16 %v9226_v7, %v9228_v47  ;;  %v9627_v59 = vld [vmem:[#allocation9_spill] sm:$0xff]  ;;  %v7558_v47 = vld [vmem:[%s7868_s24 + $0xf8] sm:$0xff]   ;;  %v6161_v7 = vld [vmem:[%s7889_s20 + $0x9] ss:$0 sm:$0xff] }
0x1938   : > { %v4355_v10 = vpop.f32.mrb[87].mxu0  ;;  %v9623_v43 = vpack.c.bf16 %v9232_v54, %v9234_v19  ;;  %v9626_v56 = vpack.c.bf16 %v9624_v12, %v9625_v53  ;;  %v9629_v3 = vpack.c.bf16 %v9627_v59, %v9628_v6  ;;  %v9389_v19 = vld [vmem:[%s7868_s24 + $0xe0] sm:$0xff]  }
0x1939   : > { %v7524_v29 = vpack.i.bf16 %v6995_v5, %v4355_v10  ;;  %v4418_v10 = vsel %vm1868_vm4, %v4414_v27, %v7517_v40 }
0x193b   : > { %7525 = vrot.lane.b32.xlu1 %v7524_v29, %s9607_s30  ;;  %v4419_v29 = vsel %vm1868_vm4, %v4415_v31, %v7518_v11  ;;  %v9633_v11 = vld [vmem:[#allocation14_spill] sm:$0xff] }
0x19a9   : > { %v7521_v36 = vpop.permute.xlu0 %7520 }
0x19aa   : > { %v7523_v28 = vunpack.i.h.bf16 %v7521_v36  ;;  %v7522_v34 = vunpack.i.l.bf16 %v7521_v36 }
0x19ac   : > { %v4421_v60 = vsel %vm1873_vm5, %v4417_v9, %v7523_v28  ;;  %v4420_v33 = vsel %vm1873_vm5, %v4416_v37, %v7522_v34 }
0x19ad   : > { %v4424_v63 = vpack.c.bf16 %v4421_v60, %v4420_v33  ;;  %v7526_v35 = vpop.permute.xlu1 %7525 }
0x19ae   : > { %v7528_v18 = vunpack.i.h.bf16 %v7526_v35  ;;  %v7527_v5 = vunpack.i.l.bf16 %v7526_v35 }
0x19af   : > { %7000 = vmatprep.mubr.msk.bf16.mxu0 %vm557_vm1, %v4424_v63 }
0x19b0   : > { %v4423_v4 = vsel %vm1873_vm5, %v4419_v29, %v7528_v18  ;;  %v4422_v61 = vsel %vm1873_vm5, %v4418_v10, %v7527_v5 }
0x19b1   : > { %v4425_v44 = vpack.c.bf16 %v4423_v4, %v4422_v61 }
0x19b3   : > { %7001 = vmatmul.mubr.msk.bf16.vlgmr.msra.gmra.mrb[88].mxu0 %vm557_vm1, %v4425_v44 }
0x19b4   : > { %7067 = vmatpush3.bf16.msra.mxu0 %v7555_v24  ;;  %7070 = vmatprep.mubr.msk.bf16.mxu0 %vm557_vm1, %v9608_v1  ;;  %v9611_v24 = vpack.c.bf16 %v9160_v41, %v9162_v48  ;;  %v9618_v41 = vpack.c.bf16 %v9202_v30, %v9204_v39  ;;  %v9619_v48 = vpack.c.bf16 %v9208_v42, %v9210_v46  ;;  %v6230_v42 = vld [vmem:[%s7889_s20 + $0xa] ss:$0 sm:$0xff] }
0x19b5   : > { %7068 = vmatprep.subr.bf16.mxu0 %v7556_v25  ;;  %v9407_v55 = vadd.f32 %v9630_v57, %v6230_v42  ;;  %v9410_v22 = vadd.f32 %v6230_v42, %v9631_v14  ;;  %v9413_v49 = vadd.f32 %v9632_v45, %v6230_v42  ;;  %v9417_v40 = vadd.f32 %v6230_v42, %v9633_v11 }
0x19b8   : > { %7069 = vmatpush3.bf16.msra.mxu0 %v7556_v25 }
0x19b9   : > { %7114 = vmatprep.subr.bf16.mxu0 %v7557_v13 }
0x19bb   : > { %7071 = vmatmul.mubr.msk.bf16.vlgmr.msra.gmra.mrb[92].mxu0 %vm557_vm1, %v9609_v2 }
0x19bc   : > { %7074 = vmatprep.mubr.msk.bf16.mxu0 %vm557_vm1, %v9610_v21  ;;  %7115 = vmatpush3.bf16.msra.mxu0 %v7557_v13 }
0x19bd   : > { %7116 = vmatprep.subr.bf16.mxu0 %v7558_v47 }
0x19c0   : > { %7117 = vmatpush3.bf16.msra.mxu0 %v7558_v47 }
0x19c1   : > { %7122 = vmatprep.subr.bf16.mxu0 %v9389_v19 }
0x19c3   : > { %7075 = vmatmul.mubr.msk.bf16.gmra.mrb[96].mxu0 %vm557_vm1, %v9611_v24 }
0x19c4   : > { %7078 = vmatprep.mubr.msk.bf16.mxu0 %vm557_vm1, %v9612_v50 }
0x19cb   : > { %7079 = vmatmul.mubr.msk.bf16.gmra.mrb[100].mxu0 %vm557_vm1, %v9613_v58 }
0x19cc   : > { %7082 = vmatprep.mubr.msk.bf16.mxu0 %vm557_vm1, %v9614_v8 }
0x19d3   : > { %7083 = vmatmul.mubr.msk.bf16.gmra.mrb[104].mxu0 %vm557_vm1, %v9615_v23 }
0x19d4   : > { %7086 = vmatprep.mubr.msk.bf16.mxu0 %vm557_vm1, %v9616_v0 }
0x19db   : > { %7087 = vmatmul.mubr.msk.bf16.gmra.mrb[108].mxu0 %vm557_vm1, %v9617_v32 }
0x19dc   : > { %7090 = vmatprep.mubr.msk.bf16.mxu0 %vm557_vm1, %v9618_v41 }
0x19e3   : > { %7091 = vmatmul.mubr.msk.bf16.gmra.mrb[112].mxu0 %vm557_vm1, %v9619_v48 }
0x19e4   : > { %7094 = vmatprep.mubr.msk.bf16.mxu0 %vm557_vm1, %v9620_v20 }
0x19eb   : > { %7095 = vmatmul.mubr.msk.bf16.gmra.mrb[116].mxu0 %vm557_vm1, %v9621_v52 }
0x19ec   : > { %7098 = vmatprep.mubr.msk.bf16.mxu0 %vm557_vm1, %v9622_v38 }
0x19f3   : > { %7099 = vmatmul.mubr.msk.bf16.gmra.mrb[120].mxu0 %vm557_vm1, %v9623_v43 }
0x19f4   : > { %7102 = vmatprep.mubr.msk.bf16.mxu0 %vm557_vm1, %v9626_v56 }
0x19fb   : > { %7103 = vmatmul.mubr.msk.bf16.gmra.mrb[124].mxu0 %vm557_vm1, %v9629_v3 }
0x1a86   : > { %v7002_v54 = vpop.f32.mrb[88].mxu0 }
0x1a87   : > { %v4482_v15 = vpop.f32.mrb[89].mxu0  ;;  %v9393_v17 = vadd.f32 %v7002_v54, %v6161_v7 }
0x1a88   : > { %v7003_v16 = vpop.f32.mrb[90].mxu0  ;;  %v9398_v46 = vadd.f32 %v6161_v7, %v4482_v15 }
0x1a89   : > { %v9395_v30 = vadd.f32 %v7003_v16, %v6161_v7  ;;  %v4485_v39 = vpop.f32.mrb[91].mxu0 }
0x1a8a   : > { %v9400_v62 = vadd.f32 %v6161_v7, %v4485_v39 }
0x1a8b   : > { %v5269_v26 = vpack.c.bf16 %v9395_v30, %v9393_v17  ;;  %v9637_v30 = vld [vmem:[#allocation6_spill] sm:$0xff] }
0x1a8c   : > { %v5268_v51 = vpack.c.bf16 %v9400_v62, %v9398_v46  ;;  %v9635_v46 = vld [vmem:[#allocation5_spill] sm:$0xff] }
0x1a8e   : > { %v7072_v36 = vpop.f32.mrb[92].mxu0 }
0x1a8f   : > { %v5089_v28 = vadd.f32 %v7072_v36, %v9407_v55  ;;  %v4871_v34 = vpop.f32.mrb[93].mxu0 }
0x1a90   : > { %v5087_v37 = vadd.f32 %v9410_v22, %v4871_v34  ;;  %v7073_v9 = vpop.f32.mrb[94].mxu0 }
0x1a91   : > { %v5090_v60 = vadd.f32 %v7073_v9, %v9413_v49  ;;  %v4874_v33 = vpop.f32.mrb[95].mxu0  ;;  %v5097_v35 = vmul.f32 0.2, %v5089_v28  ;;  %vm5093_vm2 = vcmp.ge.f32.partialorder %v5089_v28, 0.0 }
0x1a92   : > { %v5088_v63 = vadd.f32 %v9417_v40, %v4874_v33  ;;  %v5095_v31 = vmul.f32 0.2, %v5087_v37  ;;  %vm5091_vm3 = vcmp.ge.f32.partialorder %v5087_v37, 0.0 }
0x1a93   : > { %v5101_v10 = vsel %vm5093_vm2, %v5089_v28, %v5097_v35  ;;  %vm5094_vm4 = vcmp.ge.f32.partialorder %v5090_v60, 0.0  ;;  %v5098_v29 = vmul.f32 0.2, %v5090_v60 }
0x1a94   : > { %v5099_v44 = vsel %vm5091_vm3, %v5087_v37, %v5095_v31  ;;  %v5096_v21 = vmul.f32 0.2, %v5088_v63  ;;  %vm5092_vm10 = vcmp.ge.f32.partialorder %v5088_v63, 0.0 }
0x1a95   : > { %v5102_v41 = vsel %vm5094_vm4, %v5090_v60, %v5098_v29 }
0x1a96   : > { %v7076_v27 = vpop.f32.mrb[96].mxu0  ;;  %v5100_v52 = vsel %vm5092_vm10, %v5088_v63, %v5096_v21 }
0x1a97   : > { %v5105_v18 = vadd.f32 %v7076_v27, %v9407_v55  ;;  %v4887_v5 = vpop.f32.mrb[97].mxu0 }
0x1a98   : > { %v5103_v4 = vadd.f32 %v9410_v22, %v4887_v5  ;;  %v7077_v61 = vpop.f32.mrb[98].mxu0 }
0x1a99   : > { %vm5109_vm5 = vcmp.ge.f32.partialorder %v5105_v18, 0.0  ;;  %v5113_v25 = vmul.f32 0.2, %v5105_v18  ;;  %v5106_v1 = vadd.f32 %v7077_v61, %v9413_v49  ;;  %v4890_v2 = vpop.f32.mrb[99].mxu0 }
0x1a9a   : > { %vm5107_vm9 = vcmp.ge.f32.partialorder %v5103_v4, 0.0  ;;  %v5111_v24 = vmul.f32 0.2, %v5103_v4  ;;  %v5104_v50 = vadd.f32 %v9417_v40, %v4890_v2 }
0x1a9b   : > { %v5117_v58 = vsel %vm5109_vm5, %v5105_v18, %v5113_v25  ;;  %vm5110_vm11 = vcmp.ge.f32.partialorder %v5106_v1, 0.0  ;;  %v5114_v8 = vmul.f32 0.2, %v5106_v1 }
0x1a9c   : > { %v5121_v23 = vmax.f32 %v5101_v10, %v5117_v58  ;;  %v5115_v0 = vsel %vm5107_vm9, %v5103_v4, %v5111_v24  ;;  %vm5108_vm12 = vcmp.ge.f32.partialorder %v5104_v50, 0.0  ;;  %v5112_v32 = vmul.f32 0.2, %v5104_v50 }
0x1a9d   : > { %v5119_v48 = vmax.f32 %v5099_v44, %v5115_v0  ;;  %v5118_v20 = vsel %vm5110_vm11, %v5106_v1, %v5114_v8 }
0x1a9e   : > { %v5122_v38 = vmax.f32 %v5102_v41, %v5118_v20  ;;  %v5116_v43 = vsel %vm5108_vm12, %v5104_v50, %v5112_v32  ;;  %v7080_v12 = vpop.f32.mrb[100].mxu0 }
0x1a9f   : > { %v5120_v53 = vmax.f32 %v5100_v52, %v5116_v43  ;;  %v5125_v56 = vadd.f32 %v7080_v12, %v9407_v55  ;;  %v4903_v59 = vpop.f32.mrb[101].mxu0 }
0x1aa0   : > { %v5123_v6 = vadd.f32 %v9410_v22, %v4903_v59  ;;  %v7081_v3 = vpop.f32.mrb[102].mxu0 }
0x1aa1   : > { %vm5129_vm13 = vcmp.ge.f32.partialorder %v5125_v56, 0.0  ;;  %v5133_v13 = vmul.f32 0.2, %v5125_v56  ;;  %v5126_v47 = vadd.f32 %v7081_v3, %v9413_v49  ;;  %v4906_v54 = vpop.f32.mrb[103].mxu0 }
0x1aa2   : > { %vm5127_vm14 = vcmp.ge.f32.partialorder %v5123_v6, 0.0  ;;  %v5131_v7 = vmul.f32 0.2, %v5123_v6  ;;  %v5124_v15 = vadd.f32 %v9417_v40, %v4906_v54 }
0x1aa3   : > { %v5137_v16 = vsel %vm5129_vm13, %v5125_v56, %v5133_v13  ;;  %vm5130_vm15 = vcmp.ge.f32.partialorder %v5126_v47, 0.0  ;;  %v5134_v39 = vmul.f32 0.2, %v5126_v47 }
0x1aa4   : > { %v5141_v42 = vmax.f32 %v5121_v23, %v5137_v16  ;;  %v5135_v57 = vsel %vm5127_vm14, %v5123_v6, %v5131_v7  ;;  %vm5128_vm0 = vcmp.ge.f32.partialorder %v5124_v15, 0.0  ;;  %v5132_v14 = vmul.f32 0.2, %v5124_v15 }
0x1aa5   : > { %v5139_v36 = vmax.f32 %v5119_v48, %v5135_v57  ;;  %v5138_v45 = vsel %vm5130_vm15, %v5126_v47, %v5134_v39 }
0x1aa6   : > { %v5142_v28 = vmax.f32 %v5122_v38, %v5138_v45  ;;  %v5136_v34 = vsel %vm5128_vm0, %v5124_v15, %v5132_v14  ;;  %v7084_v11 = vpop.f32.mrb[104].mxu0 }
0x1aa7   : > { %v5140_v37 = vmax.f32 %v5120_v53, %v5136_v34  ;;  %v5145_v9 = vadd.f32 %v7084_v11, %v9407_v55  ;;  %v4919_v60 = vpop.f32.mrb[105].mxu0 }
0x1aa8   : > { %v5143_v33 = vadd.f32 %v9410_v22, %v4919_v60  ;;  %v7085_v63 = vpop.f32.mrb[106].mxu0 }
0x1aa9   : > { %vm5149_vm6 = vcmp.ge.f32.partialorder %v5145_v9, 0.0  ;;  %v5153_v35 = vmul.f32 0.2, %v5145_v9  ;;  %v5146_v31 = vadd.f32 %v7085_v63, %v9413_v49  ;;  %v4922_v27 = vpop.f32.mrb[107].mxu0 }
0x1aaa   : > { %vm5147_vm7 = vcmp.ge.f32.partialorder %v5143_v33, 0.0  ;;  %v5151_v18 = vmul.f32 0.2, %v5143_v33  ;;  %v5144_v5 = vadd.f32 %v9417_v40, %v4922_v27 }
0x1aab   : > { %v5157_v10 = vsel %vm5149_vm6, %v5145_v9, %v5153_v35  ;;  %vm5150_vm8 = vcmp.ge.f32.partialorder %v5146_v31, 0.0  ;;  %v5154_v29 = vmul.f32 0.2, %v5146_v31 }
0x1aac   : > { %v5161_v4 = vmax.f32 %v5141_v42, %v5157_v10  ;;  %v5155_v61 = vsel %vm5147_vm7, %v5143_v33, %v5151_v18  ;;  %vm5148_vm2 = vcmp.ge.f32.partialorder %v5144_v5, 0.0  ;;  %v5152_v44 = vmul.f32 0.2, %v5144_v5 }
0x1aad   : > { %v5159_v25 = vmax.f32 %v5139_v36, %v5155_v61  ;;  %v5158_v1 = vsel %vm5150_vm8, %v5146_v31, %v5154_v29 }
0x1aae   : > { %v5162_v2 = vmax.f32 %v5142_v28, %v5158_v1  ;;  %v5156_v21 = vsel %vm5148_vm2, %v5144_v5, %v5152_v44  ;;  %v7088_v24 = vpop.f32.mrb[108].mxu0 }
0x1aaf   : > { %v5160_v50 = vmax.f32 %v5140_v37, %v5156_v21  ;;  %v5165_v58 = vadd.f32 %v7088_v24, %v9407_v55  ;;  %v4935_v8 = vpop.f32.mrb[109].mxu0 }
0x1ab0   : > { %v5163_v23 = vadd.f32 %v9410_v22, %v4935_v8  ;;  %v7089_v0 = vpop.f32.mrb[110].mxu0 }
0x1ab1   : > { %vm5169_vm3 = vcmp.ge.f32.partialorder %v5165_v58, 0.0  ;;  %v5173_v32 = vmul.f32 0.2, %v5165_v58  ;;  %v5166_v41 = vadd.f32 %v7089_v0, %v9413_v49  ;;  %v4938_v48 = vpop.f32.mrb[111].mxu0 }
0x1ab2   : > { %vm5167_vm4 = vcmp.ge.f32.partialorder %v5163_v23, 0.0  ;;  %v5171_v20 = vmul.f32 0.2, %v5163_v23  ;;  %v5164_v52 = vadd.f32 %v9417_v40, %v4938_v48 }
0x1ab3   : > { %v5177_v38 = vsel %vm5169_vm3, %v5165_v58, %v5173_v32  ;;  %vm5170_vm5 = vcmp.ge.f32.partialorder %v5166_v41, 0.0  ;;  %v5174_v43 = vmul.f32 0.2, %v5166_v41 }
0x1ab4   : > { %v5181_v12 = vmax.f32 %v5161_v4, %v5177_v38  ;;  %v5175_v53 = vsel %vm5167_vm4, %v5163_v23, %v5171_v20  ;;  %vm5168_vm9 = vcmp.ge.f32.partialorder %v5164_v52, 0.0  ;;  %v5172_v56 = vmul.f32 0.2, %v5164_v52 }
0x1ab5   : > { %v5179_v59 = vmax.f32 %v5159_v25, %v5175_v53  ;;  %v5178_v6 = vsel %vm5170_vm5, %v5166_v41, %v5174_v43 }
0x1ab6   : > { %v5182_v3 = vmax.f32 %v5162_v2, %v5178_v6  ;;  %v5176_v13 = vsel %vm5168_vm9, %v5164_v52, %v5172_v56  ;;  %v7092_v47 = vpop.f32.mrb[112].mxu0 }
0x1ab7   : > { %v5180_v54 = vmax.f32 %v5160_v50, %v5176_v13  ;;  %v5185_v7 = vadd.f32 %v7092_v47, %v9407_v55  ;;  %v4951_v15 = vpop.f32.mrb[113].mxu0 }
0x1ab8   : > { %v5183_v16 = vadd.f32 %v9410_v22, %v4951_v15  ;;  %v7093_v39 = vpop.f32.mrb[114].mxu0 }
0x1ab9   : > { %vm5189_vm10 = vcmp.ge.f32.partialorder %v5185_v7, 0.0  ;;  %v5193_v42 = vmul.f32 0.2, %v5185_v7  ;;  %v5186_v57 = vadd.f32 %v7093_v39, %v9413_v49  ;;  %v4954_v14 = vpop.f32.mrb[115].mxu0 }
0x1aba   : > { %vm5187_vm11 = vcmp.ge.f32.partialorder %v5183_v16, 0.0  ;;  %v5191_v36 = vmul.f32 0.2, %v5183_v16  ;;  %v5184_v45 = vadd.f32 %v9417_v40, %v4954_v14 }
0x1abb   : > { %v5197_v28 = vsel %vm5189_vm10, %v5185_v7, %v5193_v42  ;;  %vm5190_vm12 = vcmp.ge.f32.partialorder %v5186_v57, 0.0  ;;  %v5194_v34 = vmul.f32 0.2, %v5186_v57 }
0x1abc   : > { %v5201_v11 = vmax.f32 %v5181_v12, %v5197_v28  ;;  %v5195_v37 = vsel %vm5187_vm11, %v5183_v16, %v5191_v36  ;;  %vm5188_vm13 = vcmp.ge.f32.partialorder %v5184_v45, 0.0  ;;  %v5192_v9 = vmul.f32 0.2, %v5184_v45 }
0x1abd   : > { %v5199_v60 = vmax.f32 %v5179_v59, %v5195_v37  ;;  %v5198_v33 = vsel %vm5190_vm12, %v5186_v57, %v5194_v34  ;;  %vm5617_vm11 = vcmask 523264  }
0x1abe   : > { %v5202_v63 = vmax.f32 %v5182_v3, %v5198_v33  ;;  %v5196_v35 = vsel %vm5188_vm13, %v5184_v45, %v5192_v9  ;;  %v7096_v31 = vpop.f32.mrb[116].mxu0 }
0x1abf   : > { %v5200_v27 = vmax.f32 %v5180_v54, %v5196_v35  ;;  %v5205_v18 = vadd.f32 %v7096_v31, %v9407_v55  ;;  %v4967_v5 = vpop.f32.mrb[117].mxu0 }
0x1ac0   : > { %v5203_v10 = vadd.f32 %v9410_v22, %v4967_v5  ;;  %v7097_v29 = vpop.f32.mrb[118].mxu0 }
0x1ac1   : > { %vm5209_vm14 = vcmp.ge.f32.partialorder %v5205_v18, 0.0  ;;  %v5213_v4 = vmul.f32 0.2, %v5205_v18  ;;  %v5206_v61 = vadd.f32 %v7097_v29, %v9413_v49  ;;  %v4970_v44 = vpop.f32.mrb[119].mxu0 }
0x1ac2   : > { %vm5207_vm15 = vcmp.ge.f32.partialorder %v5203_v10, 0.0  ;;  %v5211_v25 = vmul.f32 0.2, %v5203_v10  ;;  %v5204_v1 = vadd.f32 %v9417_v40, %v4970_v44 }
0x1ac3   : > { %v5217_v2 = vsel %vm5209_vm14, %v5205_v18, %v5213_v4  ;;  %vm5210_vm0 = vcmp.ge.f32.partialorder %v5206_v61, 0.0  ;;  %v5214_v21 = vmul.f32 0.2, %v5206_v61 }
0x1ac4   : > { %v5221_v24 = vmax.f32 %v5201_v11, %v5217_v2  ;;  %v5215_v50 = vsel %vm5207_vm15, %v5203_v10, %v5211_v25  ;;  %vm5208_vm6 = vcmp.ge.f32.partialorder %v5204_v1, 0.0  ;;  %v5212_v58 = vmul.f32 0.2, %v5204_v1 }
0x1ac5   : > { %v5219_v8 = vmax.f32 %v5199_v60, %v5215_v50  ;;  %v5218_v23 = vsel %vm5210_vm0, %v5206_v61, %v5214_v21  ;;  %v7560_v61 = vld [vmem:[%s7868_s24 + $0xe8] sm:$0xff]  }
0x1ac6   : > { %v5222_v0 = vmax.f32 %v5202_v63, %v5218_v23  ;;  %v5216_v32 = vsel %vm5208_vm6, %v5204_v1, %v5212_v58  ;;  %v7100_v41 = vpop.f32.mrb[120].mxu0 }
0x1ac7   : > { %v5220_v48 = vmax.f32 %v5200_v27, %v5216_v32  ;;  %v5225_v20 = vadd.f32 %v7100_v41, %v9407_v55  ;;  %v4983_v52 = vpop.f32.mrb[121].mxu0 }
0x1ac8   : > { %v5223_v38 = vadd.f32 %v9410_v22, %v4983_v52  ;;  %v7101_v43 = vpop.f32.mrb[122].mxu0 }
0x1ac9   : > { %vm5229_vm7 = vcmp.ge.f32.partialorder %v5225_v20, 0.0  ;;  %v5233_v12 = vmul.f32 0.2, %v5225_v20  ;;  %v5226_v53 = vadd.f32 %v7101_v43, %v9413_v49  ;;  %v4986_v56 = vpop.f32.mrb[123].mxu0 }
0x1aca   : > { %vm5227_vm8 = vcmp.ge.f32.partialorder %v5223_v38, 0.0  ;;  %v5231_v59 = vmul.f32 0.2, %v5223_v38  ;;  %v5224_v6 = vadd.f32 %v9417_v40, %v4986_v56 }
0x1acb   : > { %v5237_v3 = vsel %vm5229_vm7, %v5225_v20, %v5233_v12  ;;  %vm5230_vm2 = vcmp.ge.f32.partialorder %v5226_v53, 0.0  ;;  %v5234_v13 = vmul.f32 0.2, %v5226_v53 }
0x1acc   : > { %v5241_v47 = vmax.f32 %v5221_v24, %v5237_v3  ;;  %v5235_v54 = vsel %vm5227_vm8, %v5223_v38, %v5231_v59  ;;  %vm5228_vm3 = vcmp.ge.f32.partialorder %v5224_v6, 0.0  ;;  %v5232_v7 = vmul.f32 0.2, %v5224_v6 }
0x1acd   : > { %v5239_v15 = vmax.f32 %v5219_v8, %v5235_v54  ;;  %v5238_v16 = vsel %vm5230_vm2, %v5226_v53, %v5234_v13  ;;  %v9636_v8 = vld [vmem:[#allocation4_spill] sm:$0xff] }
0x1ace   : > { %v5242_v39 = vmax.f32 %v5222_v0, %v5238_v16  ;;  %v5236_v42 = vsel %vm5228_vm3, %v5224_v6, %v5232_v7  ;;  %v7104_v57 = vpop.f32.mrb[124].mxu0 }
0x1acf   : > { %v5240_v14 = vmax.f32 %v5220_v48, %v5236_v42  ;;  %v5245_v36 = vadd.f32 %v7104_v57, %v9407_v55  ;;  %v4999_v45 = vpop.f32.mrb[125].mxu0 }
0x1ad0   : > { %v5243_v28 = vadd.f32 %v9410_v22, %v4999_v45  ;;  %v7105_v34 = vpop.f32.mrb[126].mxu0  ;;  %v7563_v45 = vld [vmem:[%s7883_s15] sm:$0xff]  }
0x1ad1   : > { %vm5249_vm4 = vcmp.ge.f32.partialorder %v5245_v36, 0.0  ;;  %v5253_v11 = vmul.f32 0.2, %v5245_v36  ;;  %v5246_v37 = vadd.f32 %v7105_v34, %v9413_v49  ;;  %v5002_v9 = vpop.f32.mrb[127].mxu0 }
0x1ad2   : > { %vm5247_vm5 = vcmp.ge.f32.partialorder %v5243_v28, 0.0  ;;  %v5251_v60 = vmul.f32 0.2, %v5243_v28  ;;  %v5244_v33 = vadd.f32 %v9417_v40, %v5002_v9  ;;  %v6251_v40 = vld [vmem:[%s7889_s20 + $0xb] ss:$0 sm:$0xff] }
0x1ad3   : > { %v5257_v63 = vsel %vm5249_vm4, %v5245_v36, %v5253_v11  ;;  %vm5250_vm9 = vcmp.ge.f32.partialorder %v5246_v37, 0.0  ;;  %v5254_v35 = vmul.f32 0.2, %v5246_v37  ;;  %v7562_v36 = vld [vmem:[%s7873_s27 + $0x8] sm:$0xff]  }
0x1ad4   : > { %v5261_v31 = vmax.f32 %v5241_v47, %v5257_v63  ;;  %v5255_v27 = vsel %vm5247_vm5, %v5243_v28, %v5251_v60  ;;  %vm5248_vm10 = vcmp.ge.f32.partialorder %v5244_v33, 0.0  ;;  %v5252_v55 = vmul.f32 0.2, %v5244_v33 }
0x1ad5   : > { %v5259_v22 = vmax.f32 %v5239_v15, %v5255_v27  ;;  %v5258_v18 = vsel %vm5250_vm9, %v5246_v37, %v5254_v35 }
0x1ad6   : > { %v5262_v5 = vmax.f32 %v5242_v39, %v5258_v18  ;;  %v5256_v10 = vsel %vm5248_vm10, %v5244_v33, %v5252_v55  ;;  %v6252_v18 = vld [vmem:[%s7889_s20 + $0xf] ss:$0 sm:$0xff] }
0x1ad7   : > { %v5260_v29 = vmax.f32 %v5240_v14, %v5256_v10  ;;  %v7561_v14 = vld [vmem:[%s7873_s27] sm:$0xff]  }
0x1ad8   : > { %v5276_v49 = vpack.c.bf16 %v5262_v5, %v5261_v31  ;;  %7130 = vmatprep.subr.bf16.mxu1 %v7561_v14 }
0x1ad9   : > { %v5275_v4 = vpack.c.bf16 %v5260_v29, %v5259_v22  ;;  %7131 = vmatpush3.bf16.msra.mxu1 %v7561_v14 }
0x1ada   : > { %7132 = vmatprep.subr.bf16.mxu1 %v7562_v36 }
0x1adb   : > { %7118 = vmatprep.mubr.msk.bf16.mxu0 %vm557_vm1, %v5275_v4 }
0x1adc   : > { %7119 = vmatmul.mubr.msk.bf16.vlgmr.msra.gmra.mrb[128].mxu0 %vm557_vm1, %v5276_v49 }
0x1add   : > { %7123 = vmatpush3.bf16.msra.mxu0 %v9389_v19  ;;  %7126 = vmatprep.mubr.msk.bf16.mxu0 %vm557_vm1, %v5268_v51  ;;  %v9634_v19 = vld [vmem:[#allocation3_spill] sm:$0xff] }
0x1ade   : > { %7124 = vmatprep.subr.bf16.mxu0 %v7560_v61  ;;  %7133 = vmatpush3.bf16.msra.mxu1 %v7562_v36 }
0x1adf   : > { %7138 = vmatprep.subr.bf16.mxu1 %v7563_v45 }
0x1ae1   : > { %7125 = vmatpush3.bf16.msra.mxu0 %v7560_v61  ;;  %v6253_v61 = vld [vmem:[%s7889_s20 + $0x10] ss:$0 sm:$0xff] }
0x1ae8   : > { %7127 = vmatmul.mubr.msk.bf16.vlgmr.msra.gmra.mrb[128].mxu0 %vm557_vm1, %v5269_v26 }
0x1bbb   : > { %v7128_v44 = vpop.f32.mrb[128].mxu0 }
0x1bbc   : > { %v5396_v25 = vpop.f32.mrb[129].mxu0  ;;  %v5418_v1 = vadd.f32 %v7128_v44, %v6251_v40 }
0x1bbd   : > { %v5416_v2 = vadd.f32 %v6251_v40, %v5396_v25  ;;  %v7129_v21 = vpop.f32.mrb[130].mxu0 }
0x1bbe   : > { %v5399_v24 = vpop.f32.mrb[131].mxu0  ;;  %v5422_v62 = vadd.f32 %v5418_v1, %v9635_v46  ;;  %v5419_v51 = vadd.f32 %v7129_v21, %v6251_v40 }
0x1bbf   : > { %v5420_v50 = vadd.f32 %v5416_v2, %v9634_v19  ;;  %v5417_v58 = vadd.f32 %v6251_v40, %v5399_v24 }
0x1bc0   : > { %v5423_v26 = vadd.f32 %v5419_v51, %v9637_v30  ;;  %v5432_v32 = vsel %vm557_vm1, %v5422_v62, 0.0  ;;  %v7564_v51 = vld [vmem:[%s7883_s15 + $0x8] sm:$0xff]  }
0x1bc1   : > { %v5421_v23 = vadd.f32 %v5417_v58, %v9636_v8  ;;  %v5426_v0 = vsel %vm557_vm1, %v5420_v50, 0.0  ;;  %v7565_v8 = vld [vmem:[%s7883_s15 + $0x10] sm:$0xff]  }
0x1bc2   : > { %5427 = vadd.xlane.f32.xlu0 %v5426_v0  ;;  %v5435_v41 = vsel %vm557_vm1, %v5423_v26, 0.0  ;;  %v6254_v0 = vld [vmem:[%s9638_s17] ss:$0 sm:$0xff] }
0x1bc3   : > { %v5429_v17 = vsel %vm557_vm1, %v5421_v23, 0.0 }
0x1bc4   : > { %5430 = vadd.xlane.f32.xlu1 %v5429_v17 }
0x1bc6   : > { %5433 = vadd.xlane.f32.xlu0 %v5432_v32 }
0x1bca   : > { %5436 = vadd.xlane.f32.xlu0 %v5435_v41 }
0x1c4f   : > { %v5428_v48 = vpop.xlane.xlu0 %5427 }
0x1c50   : > { %v5438_v20 = vmul.f32 0.03125, %v5428_v48 }
0x1c51   : > { %v5431_v52 = vpop.xlane.xlu1 %5430 }
0x1c52   : > { %v5442_v38 = vsub.f32 %v5420_v50, %v5438_v20  ;;  %v5439_v43 = vmul.f32 0.03125, %v5431_v52 }
0x1c53   : > { %v5434_v12 = vpop.xlane.xlu0 %5433 }
0x1c54   : > { %v5443_v53 = vsub.f32 %v5421_v23, %v5439_v43  ;;  %v5440_v56 = vmul.f32 0.03125, %v5434_v12  ;;  %v5446_v59 = vmul.f32 %v5442_v38, %v5442_v38  ;;  %v7566_v23 = vld [vmem:[%s7883_s15 + $0x18] sm:$0xff]  }
0x1c56   : > { %v5444_v6 = vsub.f32 %v5422_v62, %v5440_v56  ;;  %v5450_v3 = vsel %vm557_vm1, %v5446_v59, 0.0  ;;  %v5447_v13 = vmul.f32 %v5443_v53, %v5443_v53 }
0x1c57   : > { %5451 = vadd.xlane.f32.xlu0 %v5450_v3  ;;  %v5437_v47 = vpop.xlane.xlu0 %5436 }
0x1c58   : > { %v5441_v54 = vmul.f32 0.03125, %v5437_v47  ;;  %v5453_v7 = vsel %vm557_vm1, %v5447_v13, 0.0  ;;  %v5448_v15 = vmul.f32 %v5444_v6, %v5444_v6 }
0x1c59   : > { %5454 = vadd.xlane.f32.xlu1 %v5453_v7 }
0x1c5a   : > { %v5445_v16 = vsub.f32 %v5423_v26, %v5441_v54  ;;  %v5456_v39 = vsel %vm557_vm1, %v5448_v15, 0.0 }
0x1c5b   : > { %5457 = vadd.xlane.f32.xlu0 %v5456_v39 }
0x1c5c   : > { %v5449_v42 = vmul.f32 %v5445_v16, %v5445_v16 }
0x1c5e   : > { %v5459_v57 = vsel %vm557_vm1, %v5449_v42, 0.0 }
0x1c5f   : > { %5460 = vadd.xlane.f32.xlu1 %v5459_v57 }
0x1ce4   : > { %v5452_v28 = vpop.xlane.xlu0 %5451 }
0x1ce5   : > { %v5462_v34 = vmul.f32 0.03125, %v5452_v28 }
0x1ce6   : > { %v5455_v11 = vpop.xlane.xlu1 %5454 }
0x1ce7   : > { %v5466_v37 = vadd.f32 1e-05, %v5462_v34  ;;  %v5463_v9 = vmul.f32 0.03125, %v5455_v11 }
0x1ce8   : > { %v5458_v60 = vpop.xlane.xlu0 %5457 }
0x1ce9   : > { %7703 = vrsqrt.f32 %v5466_v37  ;;  %v5467_v33 = vadd.f32 1e-05, %v5463_v9  ;;  %v5464_v63 = vmul.f32 0.03125, %v5458_v60 }
0x1ceb   : > { %7705 = vrsqrt.f32 %v5467_v33  ;;  %v5468_v35 = vadd.f32 1e-05, %v5464_v63 }
0x1cec   : > { %v5461_v31 = vpop.xlane.xlu1 %5460 }
0x1ced   : > { %7707 = vrsqrt.f32 %v5468_v35  ;;  %v5465_v27 = vmul.f32 0.03125, %v5461_v31 }
0x1cef   : > { %v5469_v55 = vadd.f32 1e-05, %v5465_v27 }
0x1cf1   : > { %7709 = vrsqrt.f32 %v5469_v55 }
0x1cf3   : > { %v7704_v22 = vpop.eup %7703 }
0x1cf4   : > { %v5474_v5 = vmul.f32 %v7704_v22, %v5442_v38 }
0x1cf5   : > { %v7706_v10 = vpop.eup %7705 }
0x1cf6   : > { %v5475_v29 = vmul.f32 %v7706_v10, %v5443_v53  ;;  %v5482_v49 = vmul.f32 %v6252_v18, %v5474_v5 }
0x1cf7   : > { %v7708_v4 = vpop.eup %7707 }
0x1cf8   : > { %v5476_v40 = vmul.f32 %v7708_v4, %v5444_v6  ;;  %v5483_v44 = vmul.f32 %v6252_v18, %v5475_v29  ;;  %v5490_v25 = vadd.f32 %v6253_v61, %v5482_v49  ;;  %v6259_v6 = vld [vmem:[%s7889_s20 + $0xc] ss:$0 sm:$0xff] }
0x1cfa   : > { %v5491_v1 = vadd.f32 %v6253_v61, %v5483_v44  ;;  %v5484_v21 = vmul.f32 %v6252_v18, %v5476_v40 }
0x1cfb   : > { %v7710_v2 = vpop.eup %7709 }
0x1cfc   : > { %v5477_v24 = vmul.f32 %v7710_v2, %v5445_v16  ;;  %v5498_v19 = vpack.c.bf16 %v5491_v1, %v5490_v25  ;;  %v5492_v58 = vadd.f32 %v6253_v61, %v5484_v21 }
0x1cfe   : > { %v5485_v50 = vmul.f32 %v6252_v18, %v5477_v24  ;;  %7134 = vmatprep.mubr.msk.bf16.mxu1 %vm557_vm1, %v5498_v19 }
0x1d00   : > { %v5493_v46 = vadd.f32 %v6253_v61, %v5485_v50 }
0x1d02   : > { %v5499_v62 = vpack.c.bf16 %v5493_v46, %v5492_v58 }
0x1d04   : > { %7135 = vmatmul.mubr.msk.bf16.vlgmr.msra.gmra.mrb[124].mxu1 %vm557_vm1, %v5499_v62 }
0x1d05   : > { %7139 = vmatpush3.bf16.msra.mxu1 %v7563_v45 }
0x1d06   : > { %7140 = vmatprep.subr.bf16.mxu1 %v7564_v51 }
0x1d09   : > { %7141 = vmatpush3.bf16.msra.mxu1 %v7564_v51 }
0x1d0a   : > { %7142 = vmatprep.subr.bf16.mxu1 %v7565_v8 }
0x1d0d   : > { %7143 = vmatpush3.bf16.msra.mxu1 %v7565_v8 }
0x1d0e   : > { %7144 = vmatprep.subr.bf16.mxu1 %v7566_v23 }
0x1d11   : > { %7145 = vmatpush3.bf16.msra.mxu1 %v7566_v23 }
0x1dd7   : > { %v7136_v17 = vpop.f32.mrb[124].mxu1 }
0x1dd8   : > { %v5568_v30 = vadd.f32 %v7136_v17, %v6254_v0  ;;  %v5559_v26 = vpop.f32.mrb[125].mxu1  ;;  %v6266_v17 = vld [vmem:[%s7889_s20 + $0x11] ss:$0 sm:$0xff] }
0x1dd9   : > { %v5560_v32 = vadd.f32 %v6254_v0, %v5559_v26  ;;  %v7137_v41 = vpop.f32.mrb[126].mxu1 }
0x1dda   : > { %v5571_v48 = vadd.f32 %v7137_v41, %v6254_v0  ;;  %v5562_v20 = vpop.f32.mrb[127].mxu1  ;;  %v5576_v38 = vmax.f32 %v5568_v30, 0.0 }
0x1ddb   : > { %v5563_v52 = vadd.f32 %v6254_v0, %v5562_v20  ;;  %v5574_v12 = vmax.f32 %v5560_v32, 0.0  ;;  %v6267_v32 = vld [vmem:[%s7889_s20 + $0x12] ss:$0 sm:$0xff] }
0x1ddc   : > { %v5577_v43 = vmax.f32 %v5571_v48, 0.0 }
0x1ddd   : > { %v5575_v53 = vmax.f32 %v5563_v52, 0.0 }
0x1dde   : > { %v5587_v56 = vpack.c.bf16 %v5577_v43, %v5576_v38 }
0x1ddf   : > { %v5586_v59 = vpack.c.bf16 %v5575_v53, %v5574_v12 }
0x1de1   : > { %7146 = vmatprep.mubr.msk.bf16.mxu1 %vm5617_vm11, %v5586_v59 }
0x1de2   : > { %7147 = vmatmul.mubr.msk.bf16.vlgmr.msra.gmra.mrb[128].mxu1 %vm5617_vm11, %v5587_v56 }
0x1eb5   : > { %v7148_v3 = vpop.f32.mrb[128].mxu1 }
0x1eb6   : > { %v5658_v13 = vpop.f32.mrb[129].mxu1  ;;  %v5667_v47 = vadd.f32 %v7148_v3, %v6259_v6 }
0x1eb7   : > { %v5659_v54 = vadd.f32 %v6259_v6, %v5658_v13  ;;  %v7149_v7 = vpop.f32.mrb[130].mxu1 }
0x1eb8   : > { %v5661_v15 = vpop.f32.mrb[131].mxu1  ;;  %v5670_v39 = vadd.f32 %v7149_v7, %v6259_v6  ;;  %v5675_v57 = vadd.f32 %v5667_v47, %v5492_v58 }
0x1eb9   : > { %v5673_v16 = vadd.f32 %v5659_v54, %v5490_v25  ;;  %v5662_v42 = vadd.f32 %v6259_v6, %v5661_v15 }
0x1eba   : > { %v5676_v45 = vadd.f32 %v5670_v39, %v5493_v46  ;;  %v5685_v34 = vsel %vm557_vm1, %v5675_v57, 0.0 }
0x1ebb   : > { %v5674_v14 = vadd.f32 %v5662_v42, %v5491_v1  ;;  %v5679_v36 = vsel %vm557_vm1, %v5673_v16, 0.0 }
0x1ebc   : > { %5680 = vadd.xlane.f32.xlu0 %v5679_v36  ;;  %v5688_v11 = vsel %vm557_vm1, %v5676_v45, 0.0 }
0x1ebd   : > { %v5682_v28 = vsel %vm557_vm1, %v5674_v14, 0.0 }
0x1ebe   : > { %5683 = vadd.xlane.f32.xlu1 %v5682_v28 }
0x1ec0   : > { %5686 = vadd.xlane.f32.xlu0 %v5685_v34 }
0x1ec2   : > { %5689 = vadd.xlane.f32.xlu1 %v5688_v11 }
0x1f49   : > { %v5681_v37 = vpop.xlane.xlu0 %5680 }
0x1f4a   : > { %v5691_v9 = vmul.f32 0.03125, %v5681_v37 }
0x1f4b   : > { %v5684_v60 = vpop.xlane.xlu1 %5683 }
0x1f4c   : > { %v5695_v33 = vsub.f32 %v5673_v16, %v5691_v9  ;;  %v5692_v63 = vmul.f32 0.03125, %v5684_v60 }
0x1f4d   : > { %v5687_v35 = vpop.xlane.xlu0 %5686 }
0x1f4e   : > { %v5696_v31 = vsub.f32 %v5674_v14, %v5692_v63  ;;  %v5693_v27 = vmul.f32 0.03125, %v5687_v35  ;;  %v5699_v55 = vmul.f32 %v5695_v33, %v5695_v33 }
0x1f4f   : > { %v5690_v22 = vpop.xlane.xlu1 %5689 }
0x1f50   : > { %v5697_v18 = vsub.f32 %v5675_v57, %v5693_v27  ;;  %v5694_v5 = vmul.f32 0.03125, %v5690_v22  ;;  %v5703_v10 = vsel %vm557_vm1, %v5699_v55, 0.0  ;;  %v5700_v29 = vmul.f32 %v5696_v31, %v5696_v31 }
0x1f51   : > { %5704 = vadd.xlane.f32.xlu0 %v5703_v10 }
0x1f52   : > { %v5698_v49 = vsub.f32 %v5676_v45, %v5694_v5  ;;  %v5706_v4 = vsel %vm557_vm1, %v5700_v29, 0.0  ;;  %v5701_v61 = vmul.f32 %v5697_v18, %v5697_v18 }
0x1f53   : > { %5707 = vadd.xlane.f32.xlu1 %v5706_v4 }
0x1f54   : > { %v5709_v40 = vsel %vm557_vm1, %v5701_v61, 0.0  ;;  %v5702_v44 = vmul.f32 %v5698_v49, %v5698_v49 }
0x1f55   : > { %5710 = vadd.xlane.f32.xlu0 %v5709_v40 }
0x1f56   : > { %v5712_v25 = vsel %vm557_vm1, %v5702_v44, 0.0 }
0x1f57   : > { %5713 = vadd.xlane.f32.xlu1 %v5712_v25 }
0x1fde   : > { %v5705_v1 = vpop.xlane.xlu0 %5704 }
0x1fdf   : > { %v5715_v2 = vmul.f32 0.03125, %v5705_v1 }
0x1fe0   : > { %v5708_v21 = vpop.xlane.xlu1 %5707 }
0x1fe1   : > { %v5719_v24 = vadd.f32 1e-05, %v5715_v2  ;;  %v5716_v19 = vmul.f32 0.03125, %v5708_v21 }
0x1fe2   : > { %v5711_v50 = vpop.xlane.xlu0 %5710 }
0x1fe3   : > { %7711 = vrsqrt.f32 %v5719_v24  ;;  %v5720_v58 = vadd.f32 1e-05, %v5716_v19  ;;  %v5717_v46 = vmul.f32 0.03125, %v5711_v50  ;;  %v6269_v24 = vld [vmem:[%s9566_s10] ss:$0 sm:$0xff] (!%p6268_p5) }
0x1fe4   : > { %v5714_v62 = vpop.xlane.xlu1 %5713  ;;  %v6270_v50 = vld [vmem:[%s9566_s10 + $0x1] ss:$0 sm:$0xff] (!%p6268_p5) }
0x1fe5   : > { %7713 = vrsqrt.f32 %v5720_v58  ;;  %v5721_v51 = vadd.f32 1e-05, %v5717_v46  ;;  %v5718_v8 = vmul.f32 0.03125, %v5714_v62 }
0x1fe7   : > { %7715 = vrsqrt.f32 %v5721_v51  ;;  %v5722_v23 = vadd.f32 1e-05, %v5718_v8 }
0x1fe9   : > { %7717 = vrsqrt.f32 %v5722_v23 }
0x1fed   : > { %v7712_v0 = vpop.eup %7711 }
0x1fee   : > { %v5727_v30 = vmul.f32 %v7712_v0, %v5695_v33 }
0x1fef   : > { %v7714_v26 = vpop.eup %7713 }
0x1ff0   : > { %v5735_v41 = vmul.f32 %v6266_v17, %v5727_v30  ;;  %v5728_v48 = vmul.f32 %v7714_v26, %v5696_v31 }
0x1ff1   : > { %v7716_v20 = vpop.eup %7715 }
0x1ff2   : > { %v5743_v52 = vadd.f32 %v6267_v32, %v5735_v41  ;;  %v5736_v38 = vmul.f32 %v6266_v17, %v5728_v48  ;;  %v5729_v43 = vmul.f32 %v7716_v20, %v5697_v18 }
0x1ff3   : > { %v7718_v12 = vpop.eup %7717 }
0x1ff4   : > { %5747 = vst.msk [vmem:[%s9567_s11] sm:$0xff] %vm557_vm1, %v5743_v52  ;;  %v5744_v53 = vadd.f32 %v6267_v32, %v5736_v38  ;;  %v5737_v56 = vmul.f32 %v6266_v17, %v5729_v43  ;;  %v5730_v59 = vmul.f32 %v7718_v12, %v5698_v49  ;;  %5754 = sbr.rel (%p6268_p5) target bundleno = 8502 (0x2136), region = 72  ;;  %v5757_v47 = vsel (!%p6268_p5), %vm557_vm1, %v5743_v52, 0.0 }
0x1ff5   : > { %5758 = vadd.xlane.f32.xlu0 (!%p6268_p5), %v5757_v47 }
0x1ff6   : > { %5748 = vst.msk [vmem:[%s9567_s11 + $0x8] sm:$0xff] %vm557_vm1, %v5744_v53  ;;  %v5745_v6 = vadd.f32 %v6267_v32, %v5737_v56  ;;  %v5738_v3 = vmul.f32 %v6266_v17, %v5730_v59  ;;  %v5760_v7 = vsel (!%p6268_p5), %vm557_vm1, %v5744_v53, 0.0 }
0x1ff8   : > { %5749 = vst.msk [vmem:[%s9567_s11 + $0x10] sm:$0xff] %vm557_vm1, %v5745_v6  ;;  %v5746_v13 = vadd.f32 %v6267_v32, %v5738_v3  ;;  %v5763_v54 = vsel (!%p6268_p5), %vm557_vm1, %v5745_v6, 0.0 }
0x1ff9   : > { %5764 = vadd.xlane.f32.xlu1 (!%p6268_p5), %v5763_v54  ;;  %5761 = vadd.xlane.f32.xlu0 (!%p6268_p5), %v5760_v7 }
0x1ffa   : > { %5750 = vst.msk [vmem:[%s9567_s11 + $0x18] sm:$0xff] %vm557_vm1, %v5746_v13  ;;  %v5766_v15 = vsel (!%p6268_p5), %vm557_vm1, %v5746_v13, 0.0 }
0x1ffd   : > { %5767 = vadd.xlane.f32.xlu1 %v5766_v15 }
0x2082   : > { %v5759_v16 = vpop.xlane.xlu0 %5758 }
0x2083   : > { %v5769_v42 = vmul.f32 0.03125, %v5759_v16 }
0x2085   : > { %v5773_v14 = vsub.f32 %v5743_v52, %v5769_v42 }
0x2086   : > { %v5765_v39 = vpop.xlane.xlu1 %5764  ;;  %v5762_v45 = vpop.xlane.xlu0 %5761 }
0x2087   : > { %v5771_v57 = vmul.f32 0.03125, %v5765_v39  ;;  %v5770_v34 = vmul.f32 0.03125, %v5762_v45  ;;  %v5777_v37 = vmul.f32 %v5773_v14, %v5773_v14 }
0x2089   : > { %v5775_v36 = vsub.f32 %v5745_v6, %v5771_v57  ;;  %v5774_v60 = vsub.f32 %v5744_v53, %v5770_v34  ;;  %v5781_v63 = vsel %vm557_vm1, %v5777_v37, 0.0 }
0x208a   : > { %v5768_v28 = vpop.xlane.xlu1 %5767  ;;  %5782 = vadd.xlane.f32.xlu0 %v5781_v63 }
0x208b   : > { %v5772_v11 = vmul.f32 0.03125, %v5768_v28  ;;  %v5779_v9 = vmul.f32 %v5775_v36, %v5775_v36  ;;  %v5778_v31 = vmul.f32 %v5774_v60, %v5774_v60 }
0x208d   : > { %v5776_v33 = vsub.f32 %v5746_v13, %v5772_v11  ;;  %v5787_v35 = vsel %vm557_vm1, %v5779_v9, 0.0  ;;  %v5784_v55 = vsel %vm557_vm1, %v5778_v31, 0.0 }
0x208e   : > { %5788 = vadd.xlane.f32.xlu0 %v5787_v35  ;;  %5785 = vadd.xlane.f32.xlu1 %v5784_v55 }
0x208f   : > { %v5780_v27 = vmul.f32 %v5776_v33, %v5776_v33 }
0x2091   : > { %v5790_v22 = vsel %vm557_vm1, %v5780_v27, 0.0 }
0x2092   : > { %5791 = vadd.xlane.f32.xlu1 %v5790_v22 }
0x2117   : > { %v5783_v18 = vpop.xlane.xlu0 %5782 }
0x2118   : > { %v5793_v5 = vmul.f32 0.03125, %v5783_v18 }
0x211a   : > { %v5797_v10 = vadd.f32 1e-05, %v5793_v5 }
0x211b   : > { %v5786_v29 = vpop.xlane.xlu1 %5785  ;;  %v5789_v49 = vpop.xlane.xlu0 %5788 }
0x211c   : > { %7767 = vrsqrt.f32 %v5797_v10  ;;  %v5794_v4 = vmul.f32 0.03125, %v5786_v29  ;;  %v5795_v61 = vmul.f32 0.03125, %v5789_v49 }
0x211e   : > { %v5798_v40 = vadd.f32 1e-05, %v5794_v4  ;;  %v5799_v44 = vadd.f32 1e-05, %v5795_v61 }
0x211f   : > { %v5792_v25 = vpop.xlane.xlu1 %5791 }
0x2120   : > { %7769 = vrsqrt.f32 %v5798_v40  ;;  %v5796_v1 = vmul.f32 0.03125, %v5792_v25 }
0x2121   : > { %7771 = vrsqrt.f32 %v5799_v44 }
0x2122   : > { %v5800_v2 = vadd.f32 1e-05, %v5796_v1 }
0x2124   : > { %7773 = vrsqrt.f32 %v5800_v2 }
0x2126   : > { %v7768_v21 = vpop.eup %7767 }
0x2127   : > { %v5805_v19 = vmul.f32 %v7768_v21, %v5773_v14 }
0x2129   : > { %v5813_v58 = vmul.f32 %v6269_v24, %v5805_v19 }
0x212a   : > { %v7770_v46 = vpop.eup %7769 }
0x212b   : > { %v7772_v62 = vpop.eup %7771  ;;  %v5821_v51 = vadd.f32 %v6270_v50, %v5813_v58  ;;  %v5806_v8 = vmul.f32 %v7770_v46, %v5774_v60 }
0x212c   : > { %v5807_v23 = vmul.f32 %v7772_v62, %v5775_v36 }
0x212d   : > { %5825 = vst.msk [vmem:[%s9567_s11] sm:$0xff] %vm557_vm1, %v5821_v51  ;;  %v5814_v0 = vmul.f32 %v6269_v24, %v5806_v8 }
0x212e   : > { %v7774_v17 = vpop.eup %7773  ;;  %v5815_v30 = vmul.f32 %v6269_v24, %v5807_v23 }
0x212f   : > { %v5822_v26 = vadd.f32 %v6270_v50, %v5814_v0  ;;  %v5808_v32 = vmul.f32 %v7774_v17, %v5776_v33 }
0x2130   : > { %v5823_v41 = vadd.f32 %v6270_v50, %v5815_v30 }
0x2131   : > { %5826 = vst.msk [vmem:[%s9567_s11 + $0x8] sm:$0xff] %vm557_vm1, %v5822_v26  ;;  %v5816_v48 = vmul.f32 %v6269_v24, %v5808_v32 }
0x2132   : > { %5827 = vst.msk [vmem:[%s9567_s11 + $0x10] sm:$0xff] %vm557_vm1, %v5823_v41 }
0x2133   : > { %v5824_v20 = vadd.f32 %v6270_v50, %v5816_v48 }
0x2135   : > { %5828 = vst.msk [vmem:[%s9567_s11 + $0x18] sm:$0xff] %vm557_vm1, %v5824_v20 }
0x2136 PF: > { %s9639_s15 = sld [smem:[#allocation2_spill]] }
0x213c   : > { %s21_s17 = sadd.s32 1, %s9639_s15  }
0x213d   : > { %p18_p6 = scmp.ge.s32.totalorder %s21_s17, 4  }
0x213f   :  { %20 = sbr.rel (!%p18_p6) target bundleno = 1 (0x1), region = 125 }

</bundles_post_ra>
